<compile_context>
chip_gen: v5e
topology: v5e:2x2
jax: 0.10.0
libtpu: 0.0.40
codegen_flags: <defaults>
</compile_context>

<pallas_src>
import functools

import numpy as np
import jax
import jax.numpy as jnp
from jax.experimental import pallas as pl
from jax.experimental.pallas import tpu as pltpu

DOT_DT = jnp.bfloat16   # MXU-native matmul operand dtype; accumulation stays float32.
_PER_STAGE = 14         # refs per decoder stage in the fused kernel (skip + 13 weights)


# ----------------------------------------------------------------------------
# fused Pallas kernel: all decoder stages + head, one batch element per grid step
# ----------------------------------------------------------------------------

def _fused_decoder_kernel(*args):
    """Whole UNetDecoder forward for one batch element.

    Layout: rows = height, lanes = width*channels (interleaved).
      args = [ s5_ref,
               (skip, bhb, qq, upb, wgb, sg, wxb, sx, psib, ps, sh, mg, ma, cbs) * n_stages,
               ah, m2, bias,
               o_ref ]
      bhb : (3, Ht, H)        per-tap (transposed-conv row structure o bilinear Ah)
      qq  : (3, W*Cin, Wt*Co) per-tap (bilinear Aw o transposed-conv weights)
      sh  : (2, Ht, Ht)       3x3-conv row shifts for kh=0 and kh=2 (kh=1 is identity)
      mg/ma: (3, Wt*Co, Wt*Co) / (3, Wt*Fl, Wt*Co)  banded 3x3 W-tap weights, BN-scaled
      per-lane biases / folded-BN shifts are float32 rows of shape (1, lanes).
    """
    f32 = jnp.float32
    o_ref = args[-1]
    refs = args[:-1]
    n_stages = (len(refs) - 4) // _PER_STAGE

    x = refs[0][0].astype(f32)                 # (H, W*Cin) decoder state
    p = 1
    for _ in range(n_stages):
        (skip_ref, bhb_ref, qq_ref, upb_ref, wgb_ref, sg_ref, wxb_ref, sx_ref,
         psib_ref, ps_ref, sh_ref, mg_ref, ma_ref, cbs_ref) = refs[p:p + _PER_STAGE]
        p += _PER_STAGE

        xs = x.astype(DOT_DT)
        Ht = bhb_ref.shape[1]

        # --- ConvTranspose2d(k=3,s=2,p=1,op=1) fused with the bilinear resize to skip size ---
        g = jnp.zeros((Ht, qq_ref.shape[2]), f32)
        for kh in range(3):
            t = jnp.dot(bhb_ref[kh], xs, preferred_element_type=f32)       # (Ht, W*Cin)
            g = g + jnp.dot(t.astype(DOT_DT), qq_ref[kh], preferred_element_type=f32)
        g = g + upb_ref[...]                                               # up-conv bias

        # --- attention gate (W_g, W_x, add+ReLU, psi 1x1, sigmoid, multiply) ---
        sb = skip_ref[0]                                                   # (Ht, Wt*Fl) f32
        g16 = g.astype(DOT_DT)
        sb16 = sb.astype(DOT_DT)
        g1 = jnp.dot(g16, wgb_ref[...], preferred_element_type=f32) + sg_ref[...]
        x1 = jnp.dot(sb16, wxb_ref[...], preferred_element_type=f32) + sx_ref[...]
        a = jnp.maximum(g1 + x1, 0.0).astype(DOT_DT)
        psi = jax.nn.sigmoid(
            jnp.dot(a, psib_ref[...], preferred_element_type=f32) + ps_ref[...])
        att16 = (sb * psi).astype(DOT_DT)

        # --- 3x3 conv + BN + ReLU over [g ; att] via split banded weights (no concat) ---
        acc = jnp.zeros((Ht, cbs_ref.shape[1]), f32)
        for kh in range(3):
            if kh == 1:                        # identity row shift -> skip the shift matmuls
                gs, ats = g16, att16
            else:
                sm = sh_ref[0 if kh == 0 else 1]
                gs = jnp.dot(sm, g16, preferred_element_type=f32).astype(DOT_DT)
                ats = jnp.dot(sm, att16, preferred_element_type=f32).astype(DOT_DT)
            acc = acc + jnp.dot(gs, mg_ref[kh], preferred_element_type=f32)
            acc = acc + jnp.dot(ats, ma_ref[kh], preferred_element_type=f32)
        x = jnp.maximum(acc + cbs_ref[...], 0.0)

    # --- head: 1x1 out-conv (hoisted before resize by linearity) + 128x128 bilinear + sigmoid
    ah_ref, m2_ref, bias_ref = refs[p:p + 3]
    t = jnp.dot(ah_ref[...], x.astype(DOT_DT), preferred_element_type=f32)   # (128, Wl*Cl)
    y = jnp.dot(t.astype(DOT_DT), m2_ref[...], preferred_element_type=f32) + bias_ref[...]
    o_ref[0] = jax.nn.sigmoid(y)                                             # (128, 128*OC)


# ----------------------------------------------------------------------------
# structural (spatial) constant matrices -- built once at init with numpy
# ----------------------------------------------------------------------------

def _interp_matrix(out_size, in_size):
    # PyTorch bilinear, align_corners=False: src = (i+0.5)*in/out - 0.5, clamped at 0.
    A = np.zeros((out_size, in_size), dtype=np.float32)
    scale = in_size / out_size
    for i in range(out_size):
        src = max((i + 0.5) * scale - 0.5, 0.0)
        x0 = int(np.floor(src))
        x1 = min(x0 + 1, in_size - 1)
        lam = src - x0
        A[i, x0] += 1.0 - lam
        A[i, x1] += lam
    return A


def _updilate_matrix(k, n):
    # ConvTranspose2d(k=3, s=2, p=1, output_padding=1) as a conv over the zero-dilated,
    # (1, 2)-padded input: padded position p holds x[i] iff p == 1 + 2*i.
    U = np.zeros((2 * n, n), dtype=np.float32)
    for o in range(2 * n):
        num = o + k - 1
        if num >= 0 and num % 2 == 0:
            i = num // 2
            if 0 <= i < n:
                U[o, i] = 1.0
    return U


def _band_indicator(n):
    # Ind[w_in, w_out, kw] = 1 iff w_in == w_out + kw - 1  (3x3 conv, pad=1, along W).
    Ind = np.zeros((n, n, 3), dtype=np.float32)
    for wo in range(n):
        for kw in range(3):
            wi = wo + kw - 1
            if 0 <= wi < n:
                Ind[wi, wo, kw] = 1.0
    return Ind


def _row_shift_matrices(n):
    # S[si, h_out, h_in] = 1 iff h_in == h_out + kh - 1 for kh in (0, 2)  (kh=1 is identity).
    S = np.zeros((2, n, n), dtype=np.float32)
    for si, kh in enumerate((0, 2)):
        for ho in range(n):
            hi = ho + kh - 1
            if 0 <= hi < n:
                S[si, ho, hi] = 1.0
    return S


# ----------------------------------------------------------------------------
# parameter setup (PyTorch-style random init + eval-mode BN folding + fusion)
# ----------------------------------------------------------------------------

def _conv_weight(key, cout, cin, k):
    bound = 1.0 / np.sqrt(cin * k * k)
    kw, kb = jax.random.split(key)
    w = jax.random.uniform(kw, (cout, cin, k, k), jnp.float32, -bound, bound)
    b = jax.random.uniform(kb, (cout,), jnp.float32, -bound, bound)
    return w, b


def _convT_weight(key, cin, cout, k):
    bound = 1.0 / np.sqrt(cin * k * k)
    kw, kb = jax.random.split(key)
    w = jax.random.uniform(kw, (cin, cout, k, k), jnp.float32, -bound, bound)
    b = jax.random.uniform(kb, (cout,), jnp.float32, -bound, bound)
    return w, b


def _bn_params(key, c):
    k1, k2, k3, k4 = jax.random.split(key, 4)
    gamma = 1.0 + 0.1 * jax.random.normal(k1, (c,), jnp.float32)
    beta = 0.1 * jax.random.normal(k2, (c,), jnp.float32)
    mean = 0.1 * jax.random.normal(k3, (c,), jnp.float32)
    var = jax.random.uniform(k4, (c,), jnp.float32, 0.5, 1.5)
    return gamma, beta, mean, var


def _fold_bn(bn, bias, eps=1e-5):
    # y = s * (conv_nobias + bias - mean) + beta  =  s*conv_nobias + shift
    gamma, beta, mean, var = bn
    s = gamma / jnp.sqrt(var + eps)
    return s, s * (bias - mean) + beta


def init_params(key, layersize, skip_spatial, out_channels=1, final_size=(128, 128)):
    """skip_spatial: [(H,W) of s5, s4, s3, s2, s1] (decoder order); spatial linear ops
    (transposed conv / bilinear resize / 3x3 taps) are pre-fused into matmul weights."""
    num_stages = len(layersize) - 1
    stages = []
    current = layersize[0]
    H, W = skip_spatial[0]

    for i in range(num_stages):
        (key, k_up, k_wg, k_wx, k_psi, k_bg, k_bx, k_bp, k_cb, k_bncb) = jax.random.split(key, 10)
        out_ch = current // 2 if i < num_stages - 1 else layersize[-1]
        F_g, F_l = out_ch, layersize[i + 1]
        F_int = F_g // 2 if F_g // 2 > 0 else 1
        Ht, Wt = skip_spatial[i + 1]

        # raw module parameters
        up_w, up_b = _convT_weight(k_up, current, out_ch, 3)          # (Cin, Cout, 3, 3)
        wg_w, wg_b = _conv_weight(k_wg, F_int, F_g, 1)
        wx_w, wx_b = _conv_weight(k_wx, F_int, F_l, 1)
        psi_w, psi_b = _conv_weight(k_psi, 1, F_int, 1)
        cb_w, cb_b = _conv_weight(k_cb, out_ch, out_ch + F_l, 3)
        sg_s, sg_b = _fold_bn(_bn_params(k_bg, F_int), wg_b)
        sx_s, sx_b = _fold_bn(_bn_params(k_bx, F_int), wx_b)
        sp_s, sp_b = _fold_bn(_bn_params(k_bp, 1), psi_b)
        cb_s, cb_sh = _fold_bn(_bn_params(k_bncb, out_ch), cb_b)

        # spatial structure: bilinear resize (2H,2W)->(Ht,Wt) composed with the stride-2
        # transposed-conv tap placement.
        Ah = _interp_matrix(Ht, 2 * H)
        Aw = _interp_matrix(Wt, 2 * W)
        bhb = np.stack([Ah @ _updilate_matrix(kh, H) for kh in range(3)])   # (3, Ht, H)
        Bw = np.stack([Aw @ _updilate_matrix(kw, W) for kw in range(3)])    # (3, Wt, W)

        # fused (ConvTranspose weights o bilinear Aw), per kh tap: (W*Cin, Wt*Cout)
        wc_t = jnp.flip(up_w, axis=(2, 3)).transpose(2, 3, 0, 1)            # [kh, kw, ci, co]
        qq = jnp.stack([
            jnp.einsum('kvw,kcd->wcvd', jnp.asarray(Bw), wc_t[kh]
                       ).reshape(W * current, Wt * out_ch)
            for kh in range(3)])

        # attention-gate 1x1 convs (BN scale folded in), lifted to the interleaved lane layout
        eyeW = jnp.eye(Wt, dtype=jnp.float32)
        wg_m = wg_w[:, :, 0, 0].T * sg_s[None, :]                           # (F_g, F_int)
        wx_m = wx_w[:, :, 0, 0].T * sx_s[None, :]                           # (F_l, F_int)
        psi_v = psi_w[0, :, 0, 0] * sp_s[0]                                 # (F_int,)
        wgb = jnp.kron(eyeW, wg_m)                                          # (Wt*F_g, Wt*F_int)
        wxb = jnp.kron(eyeW, wx_m)                                          # (Wt*F_l, Wt*F_int)
        psib = jnp.kron(eyeW, psi_v[:, None] * jnp.ones((1, F_l), jnp.float32))

        # 3x3 conv block: split weights (g part / attention part) as banded W-tap matrices
        Ind = jnp.asarray(_band_indicator(Wt))                              # (Wt, Wt, 3)
        wcb = cb_w.transpose(2, 3, 1, 0) * cb_s[None, None, None, :]        # [kh, kw, c, o]
        mg = jnp.stack([
            jnp.einsum('iok,kcd->icod', Ind, wcb[kh, :, :out_ch, :]
                       ).reshape(Wt * out_ch, Wt * out_ch) for kh in range(3)])
        ma = jnp.stack([
            jnp.einsum('iok,kcd->icod', Ind, wcb[kh, :, out_ch:, :]
                       ).reshape(Wt * F_l, Wt * out_ch) for kh in range(3)])
        sh = _row_shift_matrices(Ht)                                        # (2, Ht, Ht)

        stages.append({
            "bhb": jnp.asarray(bhb, DOT_DT),
            "qq": qq.astype(DOT_DT),
            "upb": jnp.tile(up_b, Wt)[None, :],
            "wgb": wgb.astype(DOT_DT), "sg": jnp.tile(sg_b, Wt)[None, :],
            "wxb": wxb.astype(DOT_DT), "sx": jnp.tile(sx_b, Wt)[None, :],
            "psib": psib.astype(DOT_DT), "ps": jnp.tile(sp_b, Wt * F_l)[None, :],
            "sh": jnp.asarray(sh, DOT_DT),
            "mg": mg.astype(DOT_DT), "ma": ma.astype(DOT_DT),
            "cbs": jnp.tile(cb_sh, Wt)[None, :],
        })
        current = out_ch
        H, W = Ht, Wt

    # head: 1x1 out-conv commuted before the final 128x128 bilinear upsample (+ sigmoid)
    key, k_out = jax.random.split(key)
    out_w, out_b = _conv_weight(k_out, out_channels, layersize[-1], 1)
    Hl, Wl = skip_spatial[-1]
    Ah_f = _interp_matrix(final_size[0], Hl)                                # (128, Hl)
    Aw_f = _interp_matrix(final_size[1], Wl)                                # (128, Wl)
    wout = out_w[:, :, 0, 0].T                                              # (C_last, OC)
    m2 = jnp.einsum('vw,co->wcvo', jnp.asarray(Aw_f), wout
                    ).reshape(Wl * layersize[-1], final_size[1] * out_channels)
    head = {
        "ah": jnp.asarray(Ah_f, DOT_DT),
        "m2": m2.astype(DOT_DT),
        "bias": jnp.tile(out_b, final_size[1])[None, :],
    }
    return {"stages": stages, "head": head}


# ----------------------------------------------------------------------------
# forward pass: exactly ONE pallas_call, gridded over batch ("parallel")
# ----------------------------------------------------------------------------

def _bcast_spec(shape):
    nd = len(shape)
    return pl.BlockSpec(shape, lambda b: (0,) * nd)


def _batched_spec(shape):
    nd = len(shape)
    return pl.BlockSpec((1,) + tuple(shape[1:]), lambda b: (b,) + (0,) * (nd - 1))


def unet_decoder_forward(params, s1, s2, s3, s4, s5, out_channels=1):
    skips = [s5, s4, s3, s2, s1]
    B = s5.shape[0]

    arrays, in_specs = [], []

    def add_batched(a):
        arrays.append(a)
        in_specs.append(_batched_spec(a.shape))

    def add_bcast(a):
        arrays.append(a)
        in_specs.append(_bcast_spec(a.shape))

    # row-stacked (height), lane-interleaved (width*channels) layout, per batch element
    add_batched(s5.reshape(B, s5.shape[1], s5.shape[2] * s5.shape[3]))
    wkeys = ("bhb", "qq", "upb", "wgb", "sg", "wxb", "sx",
             "psib", "ps", "sh", "mg", "ma", "cbs")
    for i, st in enumerate(params["stages"]):
        sk = skips[i + 1]
        add_batched(sk.reshape(B, sk.shape[1], sk.shape[2] * sk.shape[3]))
        for k in wkeys:
            add_bcast(st[k])
    head = params["head"]
    for k in ("ah", "m2", "bias"):
        add_bcast(head[k])

    Ho = head["ah"].shape[0]
    WoOC = head["m2"].shape[1]
    out = pl.pallas_call(
        _fused_decoder_kernel,
        grid=(B,),
        out_shape=jax.ShapeDtypeStruct((B, Ho, WoOC), jnp.float32),
        in_specs=in_specs,
        out_specs=pl.BlockSpec((1, Ho, WoOC), lambda b: (b, 0, 0)),
        compiler_params=pltpu.CompilerParams(dimension_semantics=("parallel",)),
    )(*arrays)
    Wo = WoOC // out_channels
    return out.reshape(B, Ho, Wo, out_channels)


# ----------------------------------------------------------------------------
# main
# ----------------------------------------------------------------------------

if __name__ == "__main__":
    layersize = [32, 24, 16, 12, 8]                     # deepest (s5) .. shallowest (s1)
    skip_spatial = [(4, 4), (8, 8), (12, 12), (24, 24), (20, 20)]   # s5 .. s1 spatial sizes
    B = 2
    out_channels = 1

    key = jax.random.PRNGKey(0)
    kp, k1, k2, k3, k4, k5 = jax.random.split(key, 6)
    params = init_params(kp, layersize, skip_spatial, out_channels)

    # NHWC inputs (the PyTorch reference would receive the NCHW transposes of these).
    s1 = jax.random.normal(k1, (B, 20, 20, layersize[4]), jnp.float32)
    s2 = jax.random.normal(k2, (B, 24, 24, layersize[3]), jnp.float32)
    s3 = jax.random.normal(k3, (B, 12, 12, layersize[2]), jnp.float32)
    s4 = jax.random.normal(k4, (B, 8, 8, layersize[1]), jnp.float32)
    s5 = jax.random.normal(k5, (B, 4, 4, layersize[0]), jnp.float32)

    fwd = jax.jit(functools.partial(unet_decoder_forward, out_channels=out_channels))
    out = jax.block_until_ready(fwd(params, s1, s2, s3, s4, s5))
    assert out.shape == (B, 128, 128, out_channels), out.shape
    assert bool(jnp.all(jnp.isfinite(out)))
    print("KERNEL_OK")
</pallas_src>

<mosaic_0001>
module attributes {stable_mosaic.version = 11 : i64} {
  func.func @_fused_decoder_kernel(%arg0: i32, %arg1: memref<1x4x128xf32, #tpu.memory_space<vmem>>, %arg2: memref<1x8x192xf32, #tpu.memory_space<vmem>>, %arg3: memref<3x8x4xbf16, #tpu.memory_space<vmem>>, %arg4: memref<3x128x128xbf16, #tpu.memory_space<vmem>>, %arg5: memref<1x128xf32, #tpu.memory_space<vmem>>, %arg6: memref<128x64xbf16, #tpu.memory_space<vmem>>, %arg7: memref<1x64xf32, #tpu.memory_space<vmem>>, %arg8: memref<192x64xbf16, #tpu.memory_space<vmem>>, %arg9: memref<1x64xf32, #tpu.memory_space<vmem>>, %arg10: memref<64x192xbf16, #tpu.memory_space<vmem>>, %arg11: memref<1x192xf32, #tpu.memory_space<vmem>>, %arg12: memref<2x8x8xbf16, #tpu.memory_space<vmem>>, %arg13: memref<3x128x128xbf16, #tpu.memory_space<vmem>>, %arg14: memref<3x192x128xbf16, #tpu.memory_space<vmem>>, %arg15: memref<1x128xf32, #tpu.memory_space<vmem>>, %arg16: memref<1x12x192xf32, #tpu.memory_space<vmem>>, %arg17: memref<3x12x8xbf16, #tpu.memory_space<vmem>>, %arg18: memref<3x128x96xbf16, #tpu.memory_space<vmem>>, %arg19: memref<1x96xf32, #tpu.memory_space<vmem>>, %arg20: memref<96x48xbf16, #tpu.memory_space<vmem>>, %arg21: memref<1x48xf32, #tpu.memory_space<vmem>>, %arg22: memref<192x48xbf16, #tpu.memory_space<vmem>>, %arg23: memref<1x48xf32, #tpu.memory_space<vmem>>, %arg24: memref<48x192xbf16, #tpu.memory_space<vmem>>, %arg25: memref<1x192xf32, #tpu.memory_space<vmem>>, %arg26: memref<2x12x12xbf16, #tpu.memory_space<vmem>>, %arg27: memref<3x96x96xbf16, #tpu.memory_space<vmem>>, %arg28: memref<3x192x96xbf16, #tpu.memory_space<vmem>>, %arg29: memref<1x96xf32, #tpu.memory_space<vmem>>, %arg30: memref<1x24x288xf32, #tpu.memory_space<vmem>>, %arg31: memref<3x24x12xbf16, #tpu.memory_space<vmem>>, %arg32: memref<3x96x96xbf16, #tpu.memory_space<vmem>>, %arg33: memref<1x96xf32, #tpu.memory_space<vmem>>, %arg34: memref<96x48xbf16, #tpu.memory_space<vmem>>, %arg35: memref<1x48xf32, #tpu.memory_space<vmem>>, %arg36: memref<288x48xbf16, #tpu.memory_space<vmem>>, %arg37: memref<1x48xf32, #tpu.memory_space<vmem>>, %arg38: memref<48x288xbf16, #tpu.memory_space<vmem>>, %arg39: memref<1x288xf32, #tpu.memory_space<vmem>>, %arg40: memref<2x24x24xbf16, #tpu.memory_space<vmem>>, %arg41: memref<3x96x96xbf16, #tpu.memory_space<vmem>>, %arg42: memref<3x288x96xbf16, #tpu.memory_space<vmem>>, %arg43: memref<1x96xf32, #tpu.memory_space<vmem>>, %arg44: memref<1x20x160xf32, #tpu.memory_space<vmem>>, %arg45: memref<3x20x24xbf16, #tpu.memory_space<vmem>>, %arg46: memref<3x96x160xbf16, #tpu.memory_space<vmem>>, %arg47: memref<1x160xf32, #tpu.memory_space<vmem>>, %arg48: memref<160x80xbf16, #tpu.memory_space<vmem>>, %arg49: memref<1x80xf32, #tpu.memory_space<vmem>>, %arg50: memref<160x80xbf16, #tpu.memory_space<vmem>>, %arg51: memref<1x80xf32, #tpu.memory_space<vmem>>, %arg52: memref<80x160xbf16, #tpu.memory_space<vmem>>, %arg53: memref<1x160xf32, #tpu.memory_space<vmem>>, %arg54: memref<2x20x20xbf16, #tpu.memory_space<vmem>>, %arg55: memref<3x160x160xbf16, #tpu.memory_space<vmem>>, %arg56: memref<3x160x160xbf16, #tpu.memory_space<vmem>>, %arg57: memref<1x160xf32, #tpu.memory_space<vmem>>, %arg58: memref<128x20xbf16, #tpu.memory_space<vmem>>, %arg59: memref<160x128xbf16, #tpu.memory_space<vmem>>, %arg60: memref<1x128xf32, #tpu.memory_space<vmem>>, %arg61: memref<1x128x128xf32, #tpu.memory_space<vmem>>) attributes {dimension_semantics = [#tpu.dimension_semantics<parallel>], iteration_bounds = array<i64: 2>, scalar_prefetch = 0 : i64, scratch_operands = 0 : i64, tpu.core_type = #tpu.core_type<tc>, window_params = [{transform_indices = @transform_0, window_bounds = array<i64: 1, 4, 128>}, {transform_indices = @transform_1, window_bounds = array<i64: 1, 8, 192>}, {pipeline_mode = #tpu.pipeline_mode<synchronous>, transform_indices = @transform_2, window_bounds = array<i64: 3, 8, 4>}, {pipeline_mode = #tpu.pipeline_mode<synchronous>, transform_indices = @transform_3, window_bounds = array<i64: 3, 128, 128>}, {pipeline_mode = #tpu.pipeline_mode<synchronous>, transform_indices = @transform_4, window_bounds = array<i64: 1, 128>}, {pipeline_mode = #tpu.pipeline_mode<synchronous>, transform_indices = @transform_5, window_bounds = array<i64: 128, 64>}, {pipeline_mode = #tpu.pipeline_mode<synchronous>, transform_indices = @transform_6, window_bounds = array<i64: 1, 64>}, {pipeline_mode = #tpu.pipeline_mode<synchronous>, transform_indices = @transform_7, window_bounds = array<i64: 192, 64>}, {pipeline_mode = #tpu.pipeline_mode<synchronous>, transform_indices = @transform_8, window_bounds = array<i64: 1, 64>}, {pipeline_mode = #tpu.pipeline_mode<synchronous>, transform_indices = @transform_9, window_bounds = array<i64: 64, 192>}, {pipeline_mode = #tpu.pipeline_mode<synchronous>, transform_indices = @transform_10, window_bounds = array<i64: 1, 192>}, {pipeline_mode = #tpu.pipeline_mode<synchronous>, transform_indices = @transform_11, window_bounds = array<i64: 2, 8, 8>}, {pipeline_mode = #tpu.pipeline_mode<synchronous>, transform_indices = @transform_12, window_bounds = array<i64: 3, 128, 128>}, {pipeline_mode = #tpu.pipeline_mode<synchronous>, transform_indices = @transform_13, window_bounds = array<i64: 3, 192, 128>}, {pipeline_mode = #tpu.pipeline_mode<synchronous>, transform_indices = @transform_14, window_bounds = array<i64: 1, 128>}, {transform_indices = @transform_15, window_bounds = array<i64: 1, 12, 192>}, {pipeline_mode = #tpu.pipeline_mode<synchronous>, transform_indices = @transform_16, window_bounds = array<i64: 3, 12, 8>}, {pipeline_mode = #tpu.pipeline_mode<synchronous>, transform_indices = @transform_17, window_bounds = array<i64: 3, 128, 96>}, {pipeline_mode = #tpu.pipeline_mode<synchronous>, transform_indices = @transform_18, window_bounds = array<i64: 1, 96>}, {pipeline_mode = #tpu.pipeline_mode<synchronous>, transform_indices = @transform_19, window_bounds = array<i64: 96, 48>}, {pipeline_mode = #tpu.pipeline_mode<synchronous>, transform_indices = @transform_20, window_bounds = array<i64: 1, 48>}, {pipeline_mode = #tpu.pipeline_mode<synchronous>, transform_indices = @transform_21, window_bounds = array<i64: 192, 48>}, {pipeline_mode = #tpu.pipeline_mode<synchronous>, transform_indices = @transform_22, window_bounds = array<i64: 1, 48>}, {pipeline_mode = #tpu.pipeline_mode<synchronous>, transform_indices = @transform_23, window_bounds = array<i64: 48, 192>}, {pipeline_mode = #tpu.pipeline_mode<synchronous>, transform_indices = @transform_24, window_bounds = array<i64: 1, 192>}, {pipeline_mode = #tpu.pipeline_mode<synchronous>, transform_indices = @transform_25, window_bounds = array<i64: 2, 12, 12>}, {pipeline_mode = #tpu.pipeline_mode<synchronous>, transform_indices = @transform_26, window_bounds = array<i64: 3, 96, 96>}, {pipeline_mode = #tpu.pipeline_mode<synchronous>, transform_indices = @transform_27, window_bounds = array<i64: 3, 192, 96>}, {pipeline_mode = #tpu.pipeline_mode<synchronous>, transform_indices = @transform_28, window_bounds = array<i64: 1, 96>}, {transform_indices = @transform_29, window_bounds = array<i64: 1, 24, 288>}, {pipeline_mode = #tpu.pipeline_mode<synchronous>, transform_indices = @transform_30, window_bounds = array<i64: 3, 24, 12>}, {pipeline_mode = #tpu.pipeline_mode<synchronous>, transform_indices = @transform_31, window_bounds = array<i64: 3, 96, 96>}, {pipeline_mode = #tpu.pipeline_mode<synchronous>, transform_indices = @transform_32, window_bounds = array<i64: 1, 96>}, {pipeline_mode = #tpu.pipeline_mode<synchronous>, transform_indices = @transform_33, window_bounds = array<i64: 96, 48>}, {pipeline_mode = #tpu.pipeline_mode<synchronous>, transform_indices = @transform_34, window_bounds = array<i64: 1, 48>}, {pipeline_mode = #tpu.pipeline_mode<synchronous>, transform_indices = @transform_35, window_bounds = array<i64: 288, 48>}, {pipeline_mode = #tpu.pipeline_mode<synchronous>, transform_indices = @transform_36, window_bounds = array<i64: 1, 48>}, {pipeline_mode = #tpu.pipeline_mode<synchronous>, transform_indices = @transform_37, window_bounds = array<i64: 48, 288>}, {pipeline_mode = #tpu.pipeline_mode<synchronous>, transform_indices = @transform_38, window_bounds = array<i64: 1, 288>}, {pipeline_mode = #tpu.pipeline_mode<synchronous>, transform_indices = @transform_39, window_bounds = array<i64: 2, 24, 24>}, {pipeline_mode = #tpu.pipeline_mode<synchronous>, transform_indices = @transform_40, window_bounds = array<i64: 3, 96, 96>}, {pipeline_mode = #tpu.pipeline_mode<synchronous>, transform_indices = @transform_41, window_bounds = array<i64: 3, 288, 96>}, {pipeline_mode = #tpu.pipeline_mode<synchronous>, transform_indices = @transform_42, window_bounds = array<i64: 1, 96>}, {transform_indices = @transform_43, window_bounds = array<i64: 1, 20, 160>}, {pipeline_mode = #tpu.pipeline_mode<synchronous>, transform_indices = @transform_44, window_bounds = array<i64: 3, 20, 24>}, {pipeline_mode = #tpu.pipeline_mode<synchronous>, transform_indices = @transform_45, window_bounds = array<i64: 3, 96, 160>}, {pipeline_mode = #tpu.pipeline_mode<synchronous>, transform_indices = @transform_46, window_bounds = array<i64: 1, 160>}, {pipeline_mode = #tpu.pipeline_mode<synchronous>, transform_indices = @transform_47, window_bounds = array<i64: 160, 80>}, {pipeline_mode = #tpu.pipeline_mode<synchronous>, transform_indices = @transform_48, window_bounds = array<i64: 1, 80>}, {pipeline_mode = #tpu.pipeline_mode<synchronous>, transform_indices = @transform_49, window_bounds = array<i64: 160, 80>}, {pipeline_mode = #tpu.pipeline_mode<synchronous>, transform_indices = @transform_50, window_bounds = array<i64: 1, 80>}, {pipeline_mode = #tpu.pipeline_mode<synchronous>, transform_indices = @transform_51, window_bounds = array<i64: 80, 160>}, {pipeline_mode = #tpu.pipeline_mode<synchronous>, transform_indices = @transform_52, window_bounds = array<i64: 1, 160>}, {pipeline_mode = #tpu.pipeline_mode<synchronous>, transform_indices = @transform_53, window_bounds = array<i64: 2, 20, 20>}, {pipeline_mode = #tpu.pipeline_mode<synchronous>, transform_indices = @transform_54, window_bounds = array<i64: 3, 160, 160>}, {pipeline_mode = #tpu.pipeline_mode<synchronous>, transform_indices = @transform_55, window_bounds = array<i64: 3, 160, 160>}, {pipeline_mode = #tpu.pipeline_mode<synchronous>, transform_indices = @transform_56, window_bounds = array<i64: 1, 160>}, {pipeline_mode = #tpu.pipeline_mode<synchronous>, transform_indices = @transform_57, window_bounds = array<i64: 128, 20>}, {pipeline_mode = #tpu.pipeline_mode<synchronous>, transform_indices = @transform_58, window_bounds = array<i64: 160, 128>}, {pipeline_mode = #tpu.pipeline_mode<synchronous>, transform_indices = @transform_59, window_bounds = array<i64: 1, 128>}, {transform_indices = @transform_60, window_bounds = array<i64: 1, 128, 128>}]} {
    %c0 = arith.constant 0 : index
    %c0_0 = arith.constant 0 : index
    %c0_1 = arith.constant 0 : index
    %0 = vector.load %arg1[%c0, %c0_0, %c0_1] : memref<1x4x128xf32, #tpu.memory_space<vmem>>, vector<1x4x128xf32>
    %1 = vector.shape_cast %0 : vector<1x4x128xf32> to vector<4x128xf32>
    %2 = arith.truncf %1 : vector<4x128xf32> to vector<4x128xbf16>
    %cst = arith.constant 0.000000e+00 : f32
    %3 = vector.broadcast %cst : f32 to vector<8x128xf32>
    %c0_2 = arith.constant 0 : index
    %c0_3 = arith.constant 0 : index
    %c0_4 = arith.constant 0 : index
    %4 = vector.load %arg3[%c0_2, %c0_3, %c0_4] : memref<3x8x4xbf16, #tpu.memory_space<vmem>>, vector<1x8x4xbf16>
    %5 = vector.shape_cast %4 : vector<1x8x4xbf16> to vector<8x4xbf16>
    %cst_5 = arith.constant dense<0.000000e+00> : vector<8x128xf32>
    %6 = tpu.matmul %5, %2, %cst_5 {dimension_numbers = #tpu.dot_dimension_numbers<[1], [0], [0], [1], [0, 0, 1, 1], [], []>} : vector<8x4xbf16>, vector<4x128xbf16>, vector<8x128xf32> -> vector<8x128xf32>
    %7 = arith.truncf %6 : vector<8x128xf32> to vector<8x128xbf16>
    %c0_6 = arith.constant 0 : index
    %c0_7 = arith.constant 0 : index
    %c0_8 = arith.constant 0 : index
    %8 = vector.load %arg4[%c0_6, %c0_7, %c0_8] : memref<3x128x128xbf16, #tpu.memory_space<vmem>>, vector<1x128x128xbf16>
    %9 = vector.shape_cast %8 : vector<1x128x128xbf16> to vector<128x128xbf16>
    %cst_9 = arith.constant dense<0.000000e+00> : vector<8x128xf32>
    %10 = tpu.matmul %7, %9, %cst_9 {dimension_numbers = #tpu.dot_dimension_numbers<[1], [0], [0], [1], [0, 0, 1, 1], [], []>} : vector<8x128xbf16>, vector<128x128xbf16>, vector<8x128xf32> -> vector<8x128xf32>
    %11 = arith.addf %3, %10 : vector<8x128xf32>
    %c1 = arith.constant 1 : index
    %c0_10 = arith.constant 0 : index
    %c0_11 = arith.constant 0 : index
    %12 = vector.load %arg3[%c1, %c0_10, %c0_11] : memref<3x8x4xbf16, #tpu.memory_space<vmem>>, vector<1x8x4xbf16>
    %13 = vector.shape_cast %12 : vector<1x8x4xbf16> to vector<8x4xbf16>
    %cst_12 = arith.constant dense<0.000000e+00> : vector<8x128xf32>
    %14 = tpu.matmul %13, %2, %cst_12 {dimension_numbers = #tpu.dot_dimension_numbers<[1], [0], [0], [1], [0, 0, 1, 1], [], []>} : vector<8x4xbf16>, vector<4x128xbf16>, vector<8x128xf32> -> vector<8x128xf32>
    %15 = arith.truncf %14 : vector<8x128xf32> to vector<8x128xbf16>
    %c1_13 = arith.constant 1 : index
    %c0_14 = arith.constant 0 : index
    %c0_15 = arith.constant 0 : index
    %16 = vector.load %arg4[%c1_13, %c0_14, %c0_15] : memref<3x128x128xbf16, #tpu.memory_space<vmem>>, vector<1x128x128xbf16>
    %17 = vector.shape_cast %16 : vector<1x128x128xbf16> to vector<128x128xbf16>
    %cst_16 = arith.constant dense<0.000000e+00> : vector<8x128xf32>
    %18 = tpu.matmul %15, %17, %cst_16 {dimension_numbers = #tpu.dot_dimension_numbers<[1], [0], [0], [1], [0, 0, 1, 1], [], []>} : vector<8x128xbf16>, vector<128x128xbf16>, vector<8x128xf32> -> vector<8x128xf32>
    %19 = arith.addf %11, %18 : vector<8x128xf32>
    %c2 = arith.constant 2 : index
    %c0_17 = arith.constant 0 : index
    %c0_18 = arith.constant 0 : index
    %20 = vector.load %arg3[%c2, %c0_17, %c0_18] : memref<3x8x4xbf16, #tpu.memory_space<vmem>>, vector<1x8x4xbf16>
    %21 = vector.shape_cast %20 : vector<1x8x4xbf16> to vector<8x4xbf16>
    %cst_19 = arith.constant dense<0.000000e+00> : vector<8x128xf32>
    %22 = tpu.matmul %21, %2, %cst_19 {dimension_numbers = #tpu.dot_dimension_numbers<[1], [0], [0], [1], [0, 0, 1, 1], [], []>} : vector<8x4xbf16>, vector<4x128xbf16>, vector<8x128xf32> -> vector<8x128xf32>
    %23 = arith.truncf %22 : vector<8x128xf32> to vector<8x128xbf16>
    %c2_20 = arith.constant 2 : index
    %c0_21 = arith.constant 0 : index
    %c0_22 = arith.constant 0 : index
    %24 = vector.load %arg4[%c2_20, %c0_21, %c0_22] : memref<3x128x128xbf16, #tpu.memory_space<vmem>>, vector<1x128x128xbf16>
    %25 = vector.shape_cast %24 : vector<1x128x128xbf16> to vector<128x128xbf16>
    %cst_23 = arith.constant dense<0.000000e+00> : vector<8x128xf32>
    %26 = tpu.matmul %23, %25, %cst_23 {dimension_numbers = #tpu.dot_dimension_numbers<[1], [0], [0], [1], [0, 0, 1, 1], [], []>} : vector<8x128xbf16>, vector<128x128xbf16>, vector<8x128xf32> -> vector<8x128xf32>
    %27 = arith.addf %19, %26 : vector<8x128xf32>
    %c0_24 = arith.constant 0 : index
    %c0_25 = arith.constant 0 : index
    %28 = vector.load %arg5[%c0_24, %c0_25] : memref<1x128xf32, #tpu.memory_space<vmem>>, vector<1x128xf32>
    %29 = vector.broadcast %28 : vector<1x128xf32> to vector<8x128xf32>
    %30 = arith.addf %27, %29 : vector<8x128xf32>
    %c0_26 = arith.constant 0 : index
    %c0_27 = arith.constant 0 : index
    %c0_28 = arith.constant 0 : index
    %31 = vector.load %arg2[%c0_26, %c0_27, %c0_28] : memref<1x8x192xf32, #tpu.memory_space<vmem>>, vector<1x8x192xf32>
    %32 = vector.shape_cast %31 : vector<1x8x192xf32> to vector<8x192xf32>
    %33 = arith.truncf %30 : vector<8x128xf32> to vector<8x128xbf16>
    %34 = arith.truncf %32 : vector<8x192xf32> to vector<8x192xbf16>
    %c0_29 = arith.constant 0 : index
    %c0_30 = arith.constant 0 : index
    %35 = vector.load %arg6[%c0_29, %c0_30] : memref<128x64xbf16, #tpu.memory_space<vmem>>, vector<128x64xbf16>
    %cst_31 = arith.constant dense<0.000000e+00> : vector<8x64xf32>
    %36 = tpu.matmul %33, %35, %cst_31 {dimension_numbers = #tpu.dot_dimension_numbers<[1], [0], [0], [1], [0, 0, 1, 1], [], []>} : vector<8x128xbf16>, vector<128x64xbf16>, vector<8x64xf32> -> vector<8x64xf32>
    %c0_32 = arith.constant 0 : index
    %c0_33 = arith.constant 0 : index
    %37 = vector.load %arg7[%c0_32, %c0_33] : memref<1x64xf32, #tpu.memory_space<vmem>>, vector<1x64xf32>
    %38 = vector.broadcast %37 : vector<1x64xf32> to vector<8x64xf32>
    %39 = arith.addf %36, %38 : vector<8x64xf32>
    %c0_34 = arith.constant 0 : index
    %c0_35 = arith.constant 0 : index
    %40 = vector.load %arg8[%c0_34, %c0_35] : memref<192x64xbf16, #tpu.memory_space<vmem>>, vector<192x64xbf16>
    %cst_36 = arith.constant dense<0.000000e+00> : vector<8x64xf32>
    %41 = tpu.matmul %34, %40, %cst_36 {dimension_numbers = #tpu.dot_dimension_numbers<[1], [0], [0], [1], [0, 0, 1, 1], [], []>} : vector<8x192xbf16>, vector<192x64xbf16>, vector<8x64xf32> -> vector<8x64xf32>
    %c0_37 = arith.constant 0 : index
    %c0_38 = arith.constant 0 : index
    %42 = vector.load %arg9[%c0_37, %c0_38] : memref<1x64xf32, #tpu.memory_space<vmem>>, vector<1x64xf32>
    %43 = vector.broadcast %42 : vector<1x64xf32> to vector<8x64xf32>
    %44 = arith.addf %41, %43 : vector<8x64xf32>
    %45 = arith.addf %39, %44 : vector<8x64xf32>
    %cst_39 = arith.constant 0.000000e+00 : f32
    %46 = vector.broadcast %cst_39 : f32 to vector<8x64xf32>
    %47 = arith.maximumf %45, %46 : vector<8x64xf32>
    %48 = arith.truncf %47 : vector<8x64xf32> to vector<8x64xbf16>
    %c0_40 = arith.constant 0 : index
    %c0_41 = arith.constant 0 : index
    %49 = vector.load %arg10[%c0_40, %c0_41] : memref<64x192xbf16, #tpu.memory_space<vmem>>, vector<64x192xbf16>
    %cst_42 = arith.constant dense<0.000000e+00> : vector<8x192xf32>
    %50 = tpu.matmul %48, %49, %cst_42 {dimension_numbers = #tpu.dot_dimension_numbers<[1], [0], [0], [1], [0, 0, 1, 1], [], []>} : vector<8x64xbf16>, vector<64x192xbf16>, vector<8x192xf32> -> vector<8x192xf32>
    %c0_43 = arith.constant 0 : index
    %c0_44 = arith.constant 0 : index
    %51 = vector.load %arg11[%c0_43, %c0_44] : memref<1x192xf32, #tpu.memory_space<vmem>>, vector<1x192xf32>
    %52 = vector.broadcast %51 : vector<1x192xf32> to vector<8x192xf32>
    %53 = arith.addf %50, %52 : vector<8x192xf32>
    %54 = arith.negf %53 : vector<8x192xf32>
    %55 = math.exp %54 : vector<8x192xf32>
    %cst_45 = arith.constant 1.000000e+00 : f32
    %56 = vector.broadcast %cst_45 : f32 to vector<8x192xf32>
    %57 = arith.addf %56, %55 : vector<8x192xf32>
    %58 = arith.divf %56, %57 : vector<8x192xf32>
    %59 = arith.mulf %32, %58 : vector<8x192xf32>
    %60 = arith.truncf %59 : vector<8x192xf32> to vector<8x192xbf16>
    %cst_46 = arith.constant 0.000000e+00 : f32
    %61 = vector.broadcast %cst_46 : f32 to vector<8x128xf32>
    %c0_47 = arith.constant 0 : index
    %c0_48 = arith.constant 0 : index
    %c0_49 = arith.constant 0 : index
    %62 = vector.load %arg12[%c0_47, %c0_48, %c0_49] : memref<2x8x8xbf16, #tpu.memory_space<vmem>>, vector<1x8x8xbf16>
    %63 = vector.shape_cast %62 : vector<1x8x8xbf16> to vector<8x8xbf16>
    %cst_50 = arith.constant dense<0.000000e+00> : vector<8x128xf32>
    %64 = tpu.matmul %63, %33, %cst_50 {dimension_numbers = #tpu.dot_dimension_numbers<[1], [0], [0], [1], [0, 0, 1, 1], [], []>} : vector<8x8xbf16>, vector<8x128xbf16>, vector<8x128xf32> -> vector<8x128xf32>
    %65 = arith.truncf %64 : vector<8x128xf32> to vector<8x128xbf16>
    %cst_51 = arith.constant dense<0.000000e+00> : vector<8x192xf32>
    %66 = tpu.matmul %63, %60, %cst_51 {dimension_numbers = #tpu.dot_dimension_numbers<[1], [0], [0], [1], [0, 0, 1, 1], [], []>} : vector<8x8xbf16>, vector<8x192xbf16>, vector<8x192xf32> -> vector<8x192xf32>
    %67 = arith.truncf %66 : vector<8x192xf32> to vector<8x192xbf16>
    %c0_52 = arith.constant 0 : index
    %c0_53 = arith.constant 0 : index
    %c0_54 = arith.constant 0 : index
    %68 = vector.load %arg13[%c0_52, %c0_53, %c0_54] : memref<3x128x128xbf16, #tpu.memory_space<vmem>>, vector<1x128x128xbf16>
    %69 = vector.shape_cast %68 : vector<1x128x128xbf16> to vector<128x128xbf16>
    %cst_55 = arith.constant dense<0.000000e+00> : vector<8x128xf32>
    %70 = tpu.matmul %65, %69, %cst_55 {dimension_numbers = #tpu.dot_dimension_numbers<[1], [0], [0], [1], [0, 0, 1, 1], [], []>} : vector<8x128xbf16>, vector<128x128xbf16>, vector<8x128xf32> -> vector<8x128xf32>
    %71 = arith.addf %61, %70 : vector<8x128xf32>
    %c0_56 = arith.constant 0 : index
    %c0_57 = arith.constant 0 : index
    %c0_58 = arith.constant 0 : index
    %72 = vector.load %arg14[%c0_56, %c0_57, %c0_58] : memref<3x192x128xbf16, #tpu.memory_space<vmem>>, vector<1x192x128xbf16>
    %73 = vector.shape_cast %72 : vector<1x192x128xbf16> to vector<192x128xbf16>
    %cst_59 = arith.constant dense<0.000000e+00> : vector<8x128xf32>
    %74 = tpu.matmul %67, %73, %cst_59 {dimension_numbers = #tpu.dot_dimension_numbers<[1], [0], [0], [1], [0, 0, 1, 1], [], []>} : vector<8x192xbf16>, vector<192x128xbf16>, vector<8x128xf32> -> vector<8x128xf32>
    %75 = arith.addf %71, %74 : vector<8x128xf32>
    %c1_60 = arith.constant 1 : index
    %c0_61 = arith.constant 0 : index
    %c0_62 = arith.constant 0 : index
    %76 = vector.load %arg13[%c1_60, %c0_61, %c0_62] : memref<3x128x128xbf16, #tpu.memory_space<vmem>>, vector<1x128x128xbf16>
    %77 = vector.shape_cast %76 : vector<1x128x128xbf16> to vector<128x128xbf16>
    %cst_63 = arith.constant dense<0.000000e+00> : vector<8x128xf32>
    %78 = tpu.matmul %33, %77, %cst_63 {dimension_numbers = #tpu.dot_dimension_numbers<[1], [0], [0], [1], [0, 0, 1, 1], [], []>} : vector<8x128xbf16>, vector<128x128xbf16>, vector<8x128xf32> -> vector<8x128xf32>
    %79 = arith.addf %75, %78 : vector<8x128xf32>
    %c1_64 = arith.constant 1 : index
    %c0_65 = arith.constant 0 : index
    %c0_66 = arith.constant 0 : index
    %80 = vector.load %arg14[%c1_64, %c0_65, %c0_66] : memref<3x192x128xbf16, #tpu.memory_space<vmem>>, vector<1x192x128xbf16>
    %81 = vector.shape_cast %80 : vector<1x192x128xbf16> to vector<192x128xbf16>
    %cst_67 = arith.constant dense<0.000000e+00> : vector<8x128xf32>
    %82 = tpu.matmul %60, %81, %cst_67 {dimension_numbers = #tpu.dot_dimension_numbers<[1], [0], [0], [1], [0, 0, 1, 1], [], []>} : vector<8x192xbf16>, vector<192x128xbf16>, vector<8x128xf32> -> vector<8x128xf32>
    %83 = arith.addf %79, %82 : vector<8x128xf32>
    %c1_68 = arith.constant 1 : index
    %c0_69 = arith.constant 0 : index
    %c0_70 = arith.constant 0 : index
    %84 = vector.load %arg12[%c1_68, %c0_69, %c0_70] : memref<2x8x8xbf16, #tpu.memory_space<vmem>>, vector<1x8x8xbf16>
    %85 = vector.shape_cast %84 : vector<1x8x8xbf16> to vector<8x8xbf16>
    %cst_71 = arith.constant dense<0.000000e+00> : vector<8x128xf32>
    %86 = tpu.matmul %85, %33, %cst_71 {dimension_numbers = #tpu.dot_dimension_numbers<[1], [0], [0], [1], [0, 0, 1, 1], [], []>} : vector<8x8xbf16>, vector<8x128xbf16>, vector<8x128xf32> -> vector<8x128xf32>
    %87 = arith.truncf %86 : vector<8x128xf32> to vector<8x128xbf16>
    %cst_72 = arith.constant dense<0.000000e+00> : vector<8x192xf32>
    %88 = tpu.matmul %85, %60, %cst_72 {dimension_numbers = #tpu.dot_dimension_numbers<[1], [0], [0], [1], [0, 0, 1, 1], [], []>} : vector<8x8xbf16>, vector<8x192xbf16>, vector<8x192xf32> -> vector<8x192xf32>
    %89 = arith.truncf %88 : vector<8x192xf32> to vector<8x192xbf16>
    %c2_73 = arith.constant 2 : index
    %c0_74 = arith.constant 0 : index
    %c0_75 = arith.constant 0 : index
    %90 = vector.load %arg13[%c2_73, %c0_74, %c0_75] : memref<3x128x128xbf16, #tpu.memory_space<vmem>>, vector<1x128x128xbf16>
    %91 = vector.shape_cast %90 : vector<1x128x128xbf16> to vector<128x128xbf16>
    %cst_76 = arith.constant dense<0.000000e+00> : vector<8x128xf32>
    %92 = tpu.matmul %87, %91, %cst_76 {dimension_numbers = #tpu.dot_dimension_numbers<[1], [0], [0], [1], [0, 0, 1, 1], [], []>} : vector<8x128xbf16>, vector<128x128xbf16>, vector<8x128xf32> -> vector<8x128xf32>
    %93 = arith.addf %83, %92 : vector<8x128xf32>
    %c2_77 = arith.constant 2 : index
    %c0_78 = arith.constant 0 : index
    %c0_79 = arith.constant 0 : index
    %94 = vector.load %arg14[%c2_77, %c0_78, %c0_79] : memref<3x192x128xbf16, #tpu.memory_space<vmem>>, vector<1x192x128xbf16>
    %95 = vector.shape_cast %94 : vector<1x192x128xbf16> to vector<192x128xbf16>
    %cst_80 = arith.constant dense<0.000000e+00> : vector<8x128xf32>
    %96 = tpu.matmul %89, %95, %cst_80 {dimension_numbers = #tpu.dot_dimension_numbers<[1], [0], [0], [1], [0, 0, 1, 1], [], []>} : vector<8x192xbf16>, vector<192x128xbf16>, vector<8x128xf32> -> vector<8x128xf32>
    %97 = arith.addf %93, %96 : vector<8x128xf32>
    %c0_81 = arith.constant 0 : index
    %c0_82 = arith.constant 0 : index
    %98 = vector.load %arg15[%c0_81, %c0_82] : memref<1x128xf32, #tpu.memory_space<vmem>>, vector<1x128xf32>
    %99 = vector.broadcast %98 : vector<1x128xf32> to vector<8x128xf32>
    %100 = arith.addf %97, %99 : vector<8x128xf32>
    %cst_83 = arith.constant 0.000000e+00 : f32
    %101 = vector.broadcast %cst_83 : f32 to vector<8x128xf32>
    %102 = arith.maximumf %100, %101 : vector<8x128xf32>
    %103 = arith.truncf %102 : vector<8x128xf32> to vector<8x128xbf16>
    %cst_84 = arith.constant 0.000000e+00 : f32
    %104 = vector.broadcast %cst_84 : f32 to vector<12x96xf32>
    %c0_85 = arith.constant 0 : index
    %c0_86 = arith.constant 0 : index
    %c0_87 = arith.constant 0 : index
    %105 = vector.load %arg17[%c0_85, %c0_86, %c0_87] : memref<3x12x8xbf16, #tpu.memory_space<vmem>>, vector<1x12x8xbf16>
    %106 = vector.shape_cast %105 : vector<1x12x8xbf16> to vector<12x8xbf16>
    %cst_88 = arith.constant dense<0.000000e+00> : vector<12x128xf32>
    %107 = tpu.matmul %106, %103, %cst_88 {dimension_numbers = #tpu.dot_dimension_numbers<[1], [0], [0], [1], [0, 0, 1, 1], [], []>} : vector<12x8xbf16>, vector<8x128xbf16>, vector<12x128xf32> -> vector<12x128xf32>
    %108 = arith.truncf %107 : vector<12x128xf32> to vector<12x128xbf16>
    %c0_89 = arith.constant 0 : index
    %c0_90 = arith.constant 0 : index
    %c0_91 = arith.constant 0 : index
    %109 = vector.load %arg18[%c0_89, %c0_90, %c0_91] : memref<3x128x96xbf16, #tpu.memory_space<vmem>>, vector<1x128x96xbf16>
    %110 = vector.shape_cast %109 : vector<1x128x96xbf16> to vector<128x96xbf16>
    %cst_92 = arith.constant dense<0.000000e+00> : vector<12x96xf32>
    %111 = tpu.matmul %108, %110, %cst_92 {dimension_numbers = #tpu.dot_dimension_numbers<[1], [0], [0], [1], [0, 0, 1, 1], [], []>} : vector<12x128xbf16>, vector<128x96xbf16>, vector<12x96xf32> -> vector<12x96xf32>
    %112 = arith.addf %104, %111 : vector<12x96xf32>
    %c1_93 = arith.constant 1 : index
    %c0_94 = arith.constant 0 : index
    %c0_95 = arith.constant 0 : index
    %113 = vector.load %arg17[%c1_93, %c0_94, %c0_95] : memref<3x12x8xbf16, #tpu.memory_space<vmem>>, vector<1x12x8xbf16>
    %114 = vector.shape_cast %113 : vector<1x12x8xbf16> to vector<12x8xbf16>
    %cst_96 = arith.constant dense<0.000000e+00> : vector<12x128xf32>
    %115 = tpu.matmul %114, %103, %cst_96 {dimension_numbers = #tpu.dot_dimension_numbers<[1], [0], [0], [1], [0, 0, 1, 1], [], []>} : vector<12x8xbf16>, vector<8x128xbf16>, vector<12x128xf32> -> vector<12x128xf32>
    %116 = arith.truncf %115 : vector<12x128xf32> to vector<12x128xbf16>
    %c1_97 = arith.constant 1 : index
    %c0_98 = arith.constant 0 : index
    %c0_99 = arith.constant 0 : index
    %117 = vector.load %arg18[%c1_97, %c0_98, %c0_99] : memref<3x128x96xbf16, #tpu.memory_space<vmem>>, vector<1x128x96xbf16>
    %118 = vector.shape_cast %117 : vector<1x128x96xbf16> to vector<128x96xbf16>
    %cst_100 = arith.constant dense<0.000000e+00> : vector<12x96xf32>
    %119 = tpu.matmul %116, %118, %cst_100 {dimension_numbers = #tpu.dot_dimension_numbers<[1], [0], [0], [1], [0, 0, 1, 1], [], []>} : vector<12x128xbf16>, vector<128x96xbf16>, vector<12x96xf32> -> vector<12x96xf32>
    %120 = arith.addf %112, %119 : vector<12x96xf32>
    %c2_101 = arith.constant 2 : index
    %c0_102 = arith.constant 0 : index
    %c0_103 = arith.constant 0 : index
    %121 = vector.load %arg17[%c2_101, %c0_102, %c0_103] : memref<3x12x8xbf16, #tpu.memory_space<vmem>>, vector<1x12x8xbf16>
    %122 = vector.shape_cast %121 : vector<1x12x8xbf16> to vector<12x8xbf16>
    %cst_104 = arith.constant dense<0.000000e+00> : vector<12x128xf32>
    %123 = tpu.matmul %122, %103, %cst_104 {dimension_numbers = #tpu.dot_dimension_numbers<[1], [0], [0], [1], [0, 0, 1, 1], [], []>} : vector<12x8xbf16>, vector<8x128xbf16>, vector<12x128xf32> -> vector<12x128xf32>
    %124 = arith.truncf %123 : vector<12x128xf32> to vector<12x128xbf16>
    %c2_105 = arith.constant 2 : index
    %c0_106 = arith.constant 0 : index
    %c0_107 = arith.constant 0 : index
    %125 = vector.load %arg18[%c2_105, %c0_106, %c0_107] : memref<3x128x96xbf16, #tpu.memory_space<vmem>>, vector<1x128x96xbf16>
    %126 = vector.shape_cast %125 : vector<1x128x96xbf16> to vector<128x96xbf16>
    %cst_108 = arith.constant dense<0.000000e+00> : vector<12x96xf32>
    %127 = tpu.matmul %124, %126, %cst_108 {dimension_numbers = #tpu.dot_dimension_numbers<[1], [0], [0], [1], [0, 0, 1, 1], [], []>} : vector<12x128xbf16>, vector<128x96xbf16>, vector<12x96xf32> -> vector<12x96xf32>
    %128 = arith.addf %120, %127 : vector<12x96xf32>
    %c0_109 = arith.constant 0 : index
    %c0_110 = arith.constant 0 : index
    %129 = vector.load %arg19[%c0_109, %c0_110] : memref<1x96xf32, #tpu.memory_space<vmem>>, vector<1x96xf32>
    %130 = vector.broadcast %129 : vector<1x96xf32> to vector<12x96xf32>
    %131 = arith.addf %128, %130 : vector<12x96xf32>
    %c0_111 = arith.constant 0 : index
    %c0_112 = arith.constant 0 : index
    %c0_113 = arith.constant 0 : index
    %132 = vector.load %arg16[%c0_111, %c0_112, %c0_113] : memref<1x12x192xf32, #tpu.memory_space<vmem>>, vector<1x12x192xf32>
    %133 = vector.shape_cast %132 : vector<1x12x192xf32> to vector<12x192xf32>
    %134 = arith.truncf %131 : vector<12x96xf32> to vector<12x96xbf16>
    %135 = arith.truncf %133 : vector<12x192xf32> to vector<12x192xbf16>
    %c0_114 = arith.constant 0 : index
    %c0_115 = arith.constant 0 : index
    %136 = vector.load %arg20[%c0_114, %c0_115] : memref<96x48xbf16, #tpu.memory_space<vmem>>, vector<96x48xbf16>
    %cst_116 = arith.constant dense<0.000000e+00> : vector<12x48xf32>
    %137 = tpu.matmul %134, %136, %cst_116 {dimension_numbers = #tpu.dot_dimension_numbers<[1], [0], [0], [1], [0, 0, 1, 1], [], []>} : vector<12x96xbf16>, vector<96x48xbf16>, vector<12x48xf32> -> vector<12x48xf32>
    %c0_117 = arith.constant 0 : index
    %c0_118 = arith.constant 0 : index
    %138 = vector.load %arg21[%c0_117, %c0_118] : memref<1x48xf32, #tpu.memory_space<vmem>>, vector<1x48xf32>
    %139 = vector.broadcast %138 : vector<1x48xf32> to vector<12x48xf32>
    %140 = arith.addf %137, %139 : vector<12x48xf32>
    %c0_119 = arith.constant 0 : index
    %c0_120 = arith.constant 0 : index
    %141 = vector.load %arg22[%c0_119, %c0_120] : memref<192x48xbf16, #tpu.memory_space<vmem>>, vector<192x48xbf16>
    %cst_121 = arith.constant dense<0.000000e+00> : vector<12x48xf32>
    %142 = tpu.matmul %135, %141, %cst_121 {dimension_numbers = #tpu.dot_dimension_numbers<[1], [0], [0], [1], [0, 0, 1, 1], [], []>} : vector<12x192xbf16>, vector<192x48xbf16>, vector<12x48xf32> -> vector<12x48xf32>
    %c0_122 = arith.constant 0 : index
    %c0_123 = arith.constant 0 : index
    %143 = vector.load %arg23[%c0_122, %c0_123] : memref<1x48xf32, #tpu.memory_space<vmem>>, vector<1x48xf32>
    %144 = vector.broadcast %143 : vector<1x48xf32> to vector<12x48xf32>
    %145 = arith.addf %142, %144 : vector<12x48xf32>
    %146 = arith.addf %140, %145 : vector<12x48xf32>
    %cst_124 = arith.constant 0.000000e+00 : f32
    %147 = vector.broadcast %cst_124 : f32 to vector<12x48xf32>
    %148 = arith.maximumf %146, %147 : vector<12x48xf32>
    %149 = arith.truncf %148 : vector<12x48xf32> to vector<12x48xbf16>
    %c0_125 = arith.constant 0 : index
    %c0_126 = arith.constant 0 : index
    %150 = vector.load %arg24[%c0_125, %c0_126] : memref<48x192xbf16, #tpu.memory_space<vmem>>, vector<48x192xbf16>
    %cst_127 = arith.constant dense<0.000000e+00> : vector<12x192xf32>
    %151 = tpu.matmul %149, %150, %cst_127 {dimension_numbers = #tpu.dot_dimension_numbers<[1], [0], [0], [1], [0, 0, 1, 1], [], []>} : vector<12x48xbf16>, vector<48x192xbf16>, vector<12x192xf32> -> vector<12x192xf32>
    %c0_128 = arith.constant 0 : index
    %c0_129 = arith.constant 0 : index
    %152 = vector.load %arg25[%c0_128, %c0_129] : memref<1x192xf32, #tpu.memory_space<vmem>>, vector<1x192xf32>
    %153 = vector.broadcast %152 : vector<1x192xf32> to vector<12x192xf32>
    %154 = arith.addf %151, %153 : vector<12x192xf32>
    %155 = arith.negf %154 : vector<12x192xf32>
    %156 = math.exp %155 : vector<12x192xf32>
    %cst_130 = arith.constant 1.000000e+00 : f32
    %157 = vector.broadcast %cst_130 : f32 to vector<12x192xf32>
    %158 = arith.addf %157, %156 : vector<12x192xf32>
    %159 = arith.divf %157, %158 : vector<12x192xf32>
    %160 = arith.mulf %133, %159 : vector<12x192xf32>
    %161 = arith.truncf %160 : vector<12x192xf32> to vector<12x192xbf16>
    %cst_131 = arith.constant 0.000000e+00 : f32
    %162 = vector.broadcast %cst_131 : f32 to vector<12x96xf32>
    %c0_132 = arith.constant 0 : index
    %c0_133 = arith.constant 0 : index
    %c0_134 = arith.constant 0 : index
    %163 = vector.load %arg26[%c0_132, %c0_133, %c0_134] : memref<2x12x12xbf16, #tpu.memory_space<vmem>>, vector<1x12x12xbf16>
    %164 = vector.shape_cast %163 : vector<1x12x12xbf16> to vector<12x12xbf16>
    %cst_135 = arith.constant dense<0.000000e+00> : vector<12x96xf32>
    %165 = tpu.matmul %164, %134, %cst_135 {dimension_numbers = #tpu.dot_dimension_numbers<[1], [0], [0], [1], [0, 0, 1, 1], [], []>} : vector<12x12xbf16>, vector<12x96xbf16>, vector<12x96xf32> -> vector<12x96xf32>
    %166 = arith.truncf %165 : vector<12x96xf32> to vector<12x96xbf16>
    %cst_136 = arith.constant dense<0.000000e+00> : vector<12x192xf32>
    %167 = tpu.matmul %164, %161, %cst_136 {dimension_numbers = #tpu.dot_dimension_numbers<[1], [0], [0], [1], [0, 0, 1, 1], [], []>} : vector<12x12xbf16>, vector<12x192xbf16>, vector<12x192xf32> -> vector<12x192xf32>
    %168 = arith.truncf %167 : vector<12x192xf32> to vector<12x192xbf16>
    %c0_137 = arith.constant 0 : index
    %c0_138 = arith.constant 0 : index
    %c0_139 = arith.constant 0 : index
    %169 = vector.load %arg27[%c0_137, %c0_138, %c0_139] : memref<3x96x96xbf16, #tpu.memory_space<vmem>>, vector<1x96x96xbf16>
    %170 = vector.shape_cast %169 : vector<1x96x96xbf16> to vector<96x96xbf16>
    %cst_140 = arith.constant dense<0.000000e+00> : vector<12x96xf32>
    %171 = tpu.matmul %166, %170, %cst_140 {dimension_numbers = #tpu.dot_dimension_numbers<[1], [0], [0], [1], [0, 0, 1, 1], [], []>} : vector<12x96xbf16>, vector<96x96xbf16>, vector<12x96xf32> -> vector<12x96xf32>
    %172 = arith.addf %162, %171 : vector<12x96xf32>
    %c0_141 = arith.constant 0 : index
    %c0_142 = arith.constant 0 : index
    %c0_143 = arith.constant 0 : index
    %173 = vector.load %arg28[%c0_141, %c0_142, %c0_143] : memref<3x192x96xbf16, #tpu.memory_space<vmem>>, vector<1x192x96xbf16>
    %174 = vector.shape_cast %173 : vector<1x192x96xbf16> to vector<192x96xbf16>
    %cst_144 = arith.constant dense<0.000000e+00> : vector<12x96xf32>
    %175 = tpu.matmul %168, %174, %cst_144 {dimension_numbers = #tpu.dot_dimension_numbers<[1], [0], [0], [1], [0, 0, 1, 1], [], []>} : vector<12x192xbf16>, vector<192x96xbf16>, vector<12x96xf32> -> vector<12x96xf32>
    %176 = arith.addf %172, %175 : vector<12x96xf32>
    %c1_145 = arith.constant 1 : index
    %c0_146 = arith.constant 0 : index
    %c0_147 = arith.constant 0 : index
    %177 = vector.load %arg27[%c1_145, %c0_146, %c0_147] : memref<3x96x96xbf16, #tpu.memory_space<vmem>>, vector<1x96x96xbf16>
    %178 = vector.shape_cast %177 : vector<1x96x96xbf16> to vector<96x96xbf16>
    %cst_148 = arith.constant dense<0.000000e+00> : vector<12x96xf32>
    %179 = tpu.matmul %134, %178, %cst_148 {dimension_numbers = #tpu.dot_dimension_numbers<[1], [0], [0], [1], [0, 0, 1, 1], [], []>} : vector<12x96xbf16>, vector<96x96xbf16>, vector<12x96xf32> -> vector<12x96xf32>
    %180 = arith.addf %176, %179 : vector<12x96xf32>
    %c1_149 = arith.constant 1 : index
    %c0_150 = arith.constant 0 : index
    %c0_151 = arith.constant 0 : index
    %181 = vector.load %arg28[%c1_149, %c0_150, %c0_151] : memref<3x192x96xbf16, #tpu.memory_space<vmem>>, vector<1x192x96xbf16>
    %182 = vector.shape_cast %181 : vector<1x192x96xbf16> to vector<192x96xbf16>
    %cst_152 = arith.constant dense<0.000000e+00> : vector<12x96xf32>
    %183 = tpu.matmul %161, %182, %cst_152 {dimension_numbers = #tpu.dot_dimension_numbers<[1], [0], [0], [1], [0, 0, 1, 1], [], []>} : vector<12x192xbf16>, vector<192x96xbf16>, vector<12x96xf32> -> vector<12x96xf32>
    %184 = arith.addf %180, %183 : vector<12x96xf32>
    %c1_153 = arith.constant 1 : index
    %c0_154 = arith.constant 0 : index
    %c0_155 = arith.constant 0 : index
    %185 = vector.load %arg26[%c1_153, %c0_154, %c0_155] : memref<2x12x12xbf16, #tpu.memory_space<vmem>>, vector<1x12x12xbf16>
    %186 = vector.shape_cast %185 : vector<1x12x12xbf16> to vector<12x12xbf16>
    %cst_156 = arith.constant dense<0.000000e+00> : vector<12x96xf32>
    %187 = tpu.matmul %186, %134, %cst_156 {dimension_numbers = #tpu.dot_dimension_numbers<[1], [0], [0], [1], [0, 0, 1, 1], [], []>} : vector<12x12xbf16>, vector<12x96xbf16>, vector<12x96xf32> -> vector<12x96xf32>
    %188 = arith.truncf %187 : vector<12x96xf32> to vector<12x96xbf16>
    %cst_157 = arith.constant dense<0.000000e+00> : vector<12x192xf32>
    %189 = tpu.matmul %186, %161, %cst_157 {dimension_numbers = #tpu.dot_dimension_numbers<[1], [0], [0], [1], [0, 0, 1, 1], [], []>} : vector<12x12xbf16>, vector<12x192xbf16>, vector<12x192xf32> -> vector<12x192xf32>
    %190 = arith.truncf %189 : vector<12x192xf32> to vector<12x192xbf16>
    %c2_158 = arith.constant 2 : index
    %c0_159 = arith.constant 0 : index
    %c0_160 = arith.constant 0 : index
    %191 = vector.load %arg27[%c2_158, %c0_159, %c0_160] : memref<3x96x96xbf16, #tpu.memory_space<vmem>>, vector<1x96x96xbf16>
    %192 = vector.shape_cast %191 : vector<1x96x96xbf16> to vector<96x96xbf16>
    %cst_161 = arith.constant dense<0.000000e+00> : vector<12x96xf32>
    %193 = tpu.matmul %188, %192, %cst_161 {dimension_numbers = #tpu.dot_dimension_numbers<[1], [0], [0], [1], [0, 0, 1, 1], [], []>} : vector<12x96xbf16>, vector<96x96xbf16>, vector<12x96xf32> -> vector<12x96xf32>
    %194 = arith.addf %184, %193 : vector<12x96xf32>
    %c2_162 = arith.constant 2 : index
    %c0_163 = arith.constant 0 : index
    %c0_164 = arith.constant 0 : index
    %195 = vector.load %arg28[%c2_162, %c0_163, %c0_164] : memref<3x192x96xbf16, #tpu.memory_space<vmem>>, vector<1x192x96xbf16>
    %196 = vector.shape_cast %195 : vector<1x192x96xbf16> to vector<192x96xbf16>
    %cst_165 = arith.constant dense<0.000000e+00> : vector<12x96xf32>
    %197 = tpu.matmul %190, %196, %cst_165 {dimension_numbers = #tpu.dot_dimension_numbers<[1], [0], [0], [1], [0, 0, 1, 1], [], []>} : vector<12x192xbf16>, vector<192x96xbf16>, vector<12x96xf32> -> vector<12x96xf32>
    %198 = arith.addf %194, %197 : vector<12x96xf32>
    %c0_166 = arith.constant 0 : index
    %c0_167 = arith.constant 0 : index
    %199 = vector.load %arg29[%c0_166, %c0_167] : memref<1x96xf32, #tpu.memory_space<vmem>>, vector<1x96xf32>
    %200 = vector.broadcast %199 : vector<1x96xf32> to vector<12x96xf32>
    %201 = arith.addf %198, %200 : vector<12x96xf32>
    %cst_168 = arith.constant 0.000000e+00 : f32
    %202 = vector.broadcast %cst_168 : f32 to vector<12x96xf32>
    %203 = arith.maximumf %201, %202 : vector<12x96xf32>
    %204 = arith.truncf %203 : vector<12x96xf32> to vector<12x96xbf16>
    %cst_169 = arith.constant 0.000000e+00 : f32
    %205 = vector.broadcast %cst_169 : f32 to vector<24x96xf32>
    %c0_170 = arith.constant 0 : index
    %c0_171 = arith.constant 0 : index
    %c0_172 = arith.constant 0 : index
    %206 = vector.load %arg31[%c0_170, %c0_171, %c0_172] : memref<3x24x12xbf16, #tpu.memory_space<vmem>>, vector<1x24x12xbf16>
    %207 = vector.shape_cast %206 : vector<1x24x12xbf16> to vector<24x12xbf16>
    %cst_173 = arith.constant dense<0.000000e+00> : vector<24x96xf32>
    %208 = tpu.matmul %207, %204, %cst_173 {dimension_numbers = #tpu.dot_dimension_numbers<[1], [0], [0], [1], [0, 0, 1, 1], [], []>} : vector<24x12xbf16>, vector<12x96xbf16>, vector<24x96xf32> -> vector<24x96xf32>
    %209 = arith.truncf %208 : vector<24x96xf32> to vector<24x96xbf16>
    %c0_174 = arith.constant 0 : index
    %c0_175 = arith.constant 0 : index
    %c0_176 = arith.constant 0 : index
    %210 = vector.load %arg32[%c0_174, %c0_175, %c0_176] : memref<3x96x96xbf16, #tpu.memory_space<vmem>>, vector<1x96x96xbf16>
    %211 = vector.shape_cast %210 : vector<1x96x96xbf16> to vector<96x96xbf16>
    %cst_177 = arith.constant dense<0.000000e+00> : vector<24x96xf32>
    %212 = tpu.matmul %209, %211, %cst_177 {dimension_numbers = #tpu.dot_dimension_numbers<[1], [0], [0], [1], [0, 0, 1, 1], [], []>} : vector<24x96xbf16>, vector<96x96xbf16>, vector<24x96xf32> -> vector<24x96xf32>
    %213 = arith.addf %205, %212 : vector<24x96xf32>
    %c1_178 = arith.constant 1 : index
    %c0_179 = arith.constant 0 : index
    %c0_180 = arith.constant 0 : index
    %214 = vector.load %arg31[%c1_178, %c0_179, %c0_180] : memref<3x24x12xbf16, #tpu.memory_space<vmem>>, vector<1x24x12xbf16>
    %215 = vector.shape_cast %214 : vector<1x24x12xbf16> to vector<24x12xbf16>
    %cst_181 = arith.constant dense<0.000000e+00> : vector<24x96xf32>
    %216 = tpu.matmul %215, %204, %cst_181 {dimension_numbers = #tpu.dot_dimension_numbers<[1], [0], [0], [1], [0, 0, 1, 1], [], []>} : vector<24x12xbf16>, vector<12x96xbf16>, vector<24x96xf32> -> vector<24x96xf32>
    %217 = arith.truncf %216 : vector<24x96xf32> to vector<24x96xbf16>
    %c1_182 = arith.constant 1 : index
    %c0_183 = arith.constant 0 : index
    %c0_184 = arith.constant 0 : index
    %218 = vector.load %arg32[%c1_182, %c0_183, %c0_184] : memref<3x96x96xbf16, #tpu.memory_space<vmem>>, vector<1x96x96xbf16>
    %219 = vector.shape_cast %218 : vector<1x96x96xbf16> to vector<96x96xbf16>
    %cst_185 = arith.constant dense<0.000000e+00> : vector<24x96xf32>
    %220 = tpu.matmul %217, %219, %cst_185 {dimension_numbers = #tpu.dot_dimension_numbers<[1], [0], [0], [1], [0, 0, 1, 1], [], []>} : vector<24x96xbf16>, vector<96x96xbf16>, vector<24x96xf32> -> vector<24x96xf32>
    %221 = arith.addf %213, %220 : vector<24x96xf32>
    %c2_186 = arith.constant 2 : index
    %c0_187 = arith.constant 0 : index
    %c0_188 = arith.constant 0 : index
    %222 = vector.load %arg31[%c2_186, %c0_187, %c0_188] : memref<3x24x12xbf16, #tpu.memory_space<vmem>>, vector<1x24x12xbf16>
    %223 = vector.shape_cast %222 : vector<1x24x12xbf16> to vector<24x12xbf16>
    %cst_189 = arith.constant dense<0.000000e+00> : vector<24x96xf32>
    %224 = tpu.matmul %223, %204, %cst_189 {dimension_numbers = #tpu.dot_dimension_numbers<[1], [0], [0], [1], [0, 0, 1, 1], [], []>} : vector<24x12xbf16>, vector<12x96xbf16>, vector<24x96xf32> -> vector<24x96xf32>
    %225 = arith.truncf %224 : vector<24x96xf32> to vector<24x96xbf16>
    %c2_190 = arith.constant 2 : index
    %c0_191 = arith.constant 0 : index
    %c0_192 = arith.constant 0 : index
    %226 = vector.load %arg32[%c2_190, %c0_191, %c0_192] : memref<3x96x96xbf16, #tpu.memory_space<vmem>>, vector<1x96x96xbf16>
    %227 = vector.shape_cast %226 : vector<1x96x96xbf16> to vector<96x96xbf16>
    %cst_193 = arith.constant dense<0.000000e+00> : vector<24x96xf32>
    %228 = tpu.matmul %225, %227, %cst_193 {dimension_numbers = #tpu.dot_dimension_numbers<[1], [0], [0], [1], [0, 0, 1, 1], [], []>} : vector<24x96xbf16>, vector<96x96xbf16>, vector<24x96xf32> -> vector<24x96xf32>
    %229 = arith.addf %221, %228 : vector<24x96xf32>
    %c0_194 = arith.constant 0 : index
    %c0_195 = arith.constant 0 : index
    %230 = vector.load %arg33[%c0_194, %c0_195] : memref<1x96xf32, #tpu.memory_space<vmem>>, vector<1x96xf32>
    %231 = vector.broadcast %230 : vector<1x96xf32> to vector<24x96xf32>
    %232 = arith.addf %229, %231 : vector<24x96xf32>
    %c0_196 = arith.constant 0 : index
    %c0_197 = arith.constant 0 : index
    %c0_198 = arith.constant 0 : index
    %233 = vector.load %arg30[%c0_196, %c0_197, %c0_198] : memref<1x24x288xf32, #tpu.memory_space<vmem>>, vector<1x24x288xf32>
    %234 = vector.shape_cast %233 : vector<1x24x288xf32> to vector<24x288xf32>
    %235 = arith.truncf %232 : vector<24x96xf32> to vector<24x96xbf16>
    %236 = arith.truncf %234 : vector<24x288xf32> to vector<24x288xbf16>
    %c0_199 = arith.constant 0 : index
    %c0_200 = arith.constant 0 : index
    %237 = vector.load %arg34[%c0_199, %c0_200] : memref<96x48xbf16, #tpu.memory_space<vmem>>, vector<96x48xbf16>
    %cst_201 = arith.constant dense<0.000000e+00> : vector<24x48xf32>
    %238 = tpu.matmul %235, %237, %cst_201 {dimension_numbers = #tpu.dot_dimension_numbers<[1], [0], [0], [1], [0, 0, 1, 1], [], []>} : vector<24x96xbf16>, vector<96x48xbf16>, vector<24x48xf32> -> vector<24x48xf32>
    %c0_202 = arith.constant 0 : index
    %c0_203 = arith.constant 0 : index
    %239 = vector.load %arg35[%c0_202, %c0_203] : memref<1x48xf32, #tpu.memory_space<vmem>>, vector<1x48xf32>
    %240 = vector.broadcast %239 : vector<1x48xf32> to vector<24x48xf32>
    %241 = arith.addf %238, %240 : vector<24x48xf32>
    %c0_204 = arith.constant 0 : index
    %c0_205 = arith.constant 0 : index
    %242 = vector.load %arg36[%c0_204, %c0_205] : memref<288x48xbf16, #tpu.memory_space<vmem>>, vector<288x48xbf16>
    %cst_206 = arith.constant dense<0.000000e+00> : vector<24x48xf32>
    %243 = tpu.matmul %236, %242, %cst_206 {dimension_numbers = #tpu.dot_dimension_numbers<[1], [0], [0], [1], [0, 0, 1, 1], [], []>} : vector<24x288xbf16>, vector<288x48xbf16>, vector<24x48xf32> -> vector<24x48xf32>
    %c0_207 = arith.constant 0 : index
    %c0_208 = arith.constant 0 : index
    %244 = vector.load %arg37[%c0_207, %c0_208] : memref<1x48xf32, #tpu.memory_space<vmem>>, vector<1x48xf32>
    %245 = vector.broadcast %244 : vector<1x48xf32> to vector<24x48xf32>
    %246 = arith.addf %243, %245 : vector<24x48xf32>
    %247 = arith.addf %241, %246 : vector<24x48xf32>
    %cst_209 = arith.constant 0.000000e+00 : f32
    %248 = vector.broadcast %cst_209 : f32 to vector<24x48xf32>
    %249 = arith.maximumf %247, %248 : vector<24x48xf32>
    %250 = arith.truncf %249 : vector<24x48xf32> to vector<24x48xbf16>
    %c0_210 = arith.constant 0 : index
    %c0_211 = arith.constant 0 : index
    %251 = vector.load %arg38[%c0_210, %c0_211] : memref<48x288xbf16, #tpu.memory_space<vmem>>, vector<48x288xbf16>
    %cst_212 = arith.constant dense<0.000000e+00> : vector<24x288xf32>
    %252 = tpu.matmul %250, %251, %cst_212 {dimension_numbers = #tpu.dot_dimension_numbers<[1], [0], [0], [1], [0, 0, 1, 1], [], []>} : vector<24x48xbf16>, vector<48x288xbf16>, vector<24x288xf32> -> vector<24x288xf32>
    %c0_213 = arith.constant 0 : index
    %c0_214 = arith.constant 0 : index
    %253 = vector.load %arg39[%c0_213, %c0_214] : memref<1x288xf32, #tpu.memory_space<vmem>>, vector<1x288xf32>
    %254 = vector.broadcast %253 : vector<1x288xf32> to vector<24x288xf32>
    %255 = arith.addf %252, %254 : vector<24x288xf32>
    %256 = arith.negf %255 : vector<24x288xf32>
    %257 = math.exp %256 : vector<24x288xf32>
    %cst_215 = arith.constant 1.000000e+00 : f32
    %258 = vector.broadcast %cst_215 : f32 to vector<24x288xf32>
    %259 = arith.addf %258, %257 : vector<24x288xf32>
    %260 = arith.divf %258, %259 : vector<24x288xf32>
    %261 = arith.mulf %234, %260 : vector<24x288xf32>
    %262 = arith.truncf %261 : vector<24x288xf32> to vector<24x288xbf16>
    %cst_216 = arith.constant 0.000000e+00 : f32
    %263 = vector.broadcast %cst_216 : f32 to vector<24x96xf32>
    %c0_217 = arith.constant 0 : index
    %c0_218 = arith.constant 0 : index
    %c0_219 = arith.constant 0 : index
    %264 = vector.load %arg40[%c0_217, %c0_218, %c0_219] : memref<2x24x24xbf16, #tpu.memory_space<vmem>>, vector<1x24x24xbf16>
    %265 = vector.shape_cast %264 : vector<1x24x24xbf16> to vector<24x24xbf16>
    %cst_220 = arith.constant dense<0.000000e+00> : vector<24x96xf32>
    %266 = tpu.matmul %265, %235, %cst_220 {dimension_numbers = #tpu.dot_dimension_numbers<[1], [0], [0], [1], [0, 0, 1, 1], [], []>} : vector<24x24xbf16>, vector<24x96xbf16>, vector<24x96xf32> -> vector<24x96xf32>
    %267 = arith.truncf %266 : vector<24x96xf32> to vector<24x96xbf16>
    %cst_221 = arith.constant dense<0.000000e+00> : vector<24x288xf32>
    %268 = tpu.matmul %265, %262, %cst_221 {dimension_numbers = #tpu.dot_dimension_numbers<[1], [0], [0], [1], [0, 0, 1, 1], [], []>} : vector<24x24xbf16>, vector<24x288xbf16>, vector<24x288xf32> -> vector<24x288xf32>
    %269 = arith.truncf %268 : vector<24x288xf32> to vector<24x288xbf16>
    %c0_222 = arith.constant 0 : index
    %c0_223 = arith.constant 0 : index
    %c0_224 = arith.constant 0 : index
    %270 = vector.load %arg41[%c0_222, %c0_223, %c0_224] : memref<3x96x96xbf16, #tpu.memory_space<vmem>>, vector<1x96x96xbf16>
    %271 = vector.shape_cast %270 : vector<1x96x96xbf16> to vector<96x96xbf16>
    %cst_225 = arith.constant dense<0.000000e+00> : vector<24x96xf32>
    %272 = tpu.matmul %267, %271, %cst_225 {dimension_numbers = #tpu.dot_dimension_numbers<[1], [0], [0], [1], [0, 0, 1, 1], [], []>} : vector<24x96xbf16>, vector<96x96xbf16>, vector<24x96xf32> -> vector<24x96xf32>
    %273 = arith.addf %263, %272 : vector<24x96xf32>
    %c0_226 = arith.constant 0 : index
    %c0_227 = arith.constant 0 : index
    %c0_228 = arith.constant 0 : index
    %274 = vector.load %arg42[%c0_226, %c0_227, %c0_228] : memref<3x288x96xbf16, #tpu.memory_space<vmem>>, vector<1x288x96xbf16>
    %275 = vector.shape_cast %274 : vector<1x288x96xbf16> to vector<288x96xbf16>
    %cst_229 = arith.constant dense<0.000000e+00> : vector<24x96xf32>
    %276 = tpu.matmul %269, %275, %cst_229 {dimension_numbers = #tpu.dot_dimension_numbers<[1], [0], [0], [1], [0, 0, 1, 1], [], []>} : vector<24x288xbf16>, vector<288x96xbf16>, vector<24x96xf32> -> vector<24x96xf32>
    %277 = arith.addf %273, %276 : vector<24x96xf32>
    %c1_230 = arith.constant 1 : index
    %c0_231 = arith.constant 0 : index
    %c0_232 = arith.constant 0 : index
    %278 = vector.load %arg41[%c1_230, %c0_231, %c0_232] : memref<3x96x96xbf16, #tpu.memory_space<vmem>>, vector<1x96x96xbf16>
    %279 = vector.shape_cast %278 : vector<1x96x96xbf16> to vector<96x96xbf16>
    %cst_233 = arith.constant dense<0.000000e+00> : vector<24x96xf32>
    %280 = tpu.matmul %235, %279, %cst_233 {dimension_numbers = #tpu.dot_dimension_numbers<[1], [0], [0], [1], [0, 0, 1, 1], [], []>} : vector<24x96xbf16>, vector<96x96xbf16>, vector<24x96xf32> -> vector<24x96xf32>
    %281 = arith.addf %277, %280 : vector<24x96xf32>
    %c1_234 = arith.constant 1 : index
    %c0_235 = arith.constant 0 : index
    %c0_236 = arith.constant 0 : index
    %282 = vector.load %arg42[%c1_234, %c0_235, %c0_236] : memref<3x288x96xbf16, #tpu.memory_space<vmem>>, vector<1x288x96xbf16>
    %283 = vector.shape_cast %282 : vector<1x288x96xbf16> to vector<288x96xbf16>
    %cst_237 = arith.constant dense<0.000000e+00> : vector<24x96xf32>
    %284 = tpu.matmul %262, %283, %cst_237 {dimension_numbers = #tpu.dot_dimension_numbers<[1], [0], [0], [1], [0, 0, 1, 1], [], []>} : vector<24x288xbf16>, vector<288x96xbf16>, vector<24x96xf32> -> vector<24x96xf32>
    %285 = arith.addf %281, %284 : vector<24x96xf32>
    %c1_238 = arith.constant 1 : index
    %c0_239 = arith.constant 0 : index
    %c0_240 = arith.constant 0 : index
    %286 = vector.load %arg40[%c1_238, %c0_239, %c0_240] : memref<2x24x24xbf16, #tpu.memory_space<vmem>>, vector<1x24x24xbf16>
    %287 = vector.shape_cast %286 : vector<1x24x24xbf16> to vector<24x24xbf16>
    %cst_241 = arith.constant dense<0.000000e+00> : vector<24x96xf32>
    %288 = tpu.matmul %287, %235, %cst_241 {dimension_numbers = #tpu.dot_dimension_numbers<[1], [0], [0], [1], [0, 0, 1, 1], [], []>} : vector<24x24xbf16>, vector<24x96xbf16>, vector<24x96xf32> -> vector<24x96xf32>
    %289 = arith.truncf %288 : vector<24x96xf32> to vector<24x96xbf16>
    %cst_242 = arith.constant dense<0.000000e+00> : vector<24x288xf32>
    %290 = tpu.matmul %287, %262, %cst_242 {dimension_numbers = #tpu.dot_dimension_numbers<[1], [0], [0], [1], [0, 0, 1, 1], [], []>} : vector<24x24xbf16>, vector<24x288xbf16>, vector<24x288xf32> -> vector<24x288xf32>
    %291 = arith.truncf %290 : vector<24x288xf32> to vector<24x288xbf16>
    %c2_243 = arith.constant 2 : index
    %c0_244 = arith.constant 0 : index
    %c0_245 = arith.constant 0 : index
    %292 = vector.load %arg41[%c2_243, %c0_244, %c0_245] : memref<3x96x96xbf16, #tpu.memory_space<vmem>>, vector<1x96x96xbf16>
    %293 = vector.shape_cast %292 : vector<1x96x96xbf16> to vector<96x96xbf16>
    %cst_246 = arith.constant dense<0.000000e+00> : vector<24x96xf32>
    %294 = tpu.matmul %289, %293, %cst_246 {dimension_numbers = #tpu.dot_dimension_numbers<[1], [0], [0], [1], [0, 0, 1, 1], [], []>} : vector<24x96xbf16>, vector<96x96xbf16>, vector<24x96xf32> -> vector<24x96xf32>
    %295 = arith.addf %285, %294 : vector<24x96xf32>
    %c2_247 = arith.constant 2 : index
    %c0_248 = arith.constant 0 : index
    %c0_249 = arith.constant 0 : index
    %296 = vector.load %arg42[%c2_247, %c0_248, %c0_249] : memref<3x288x96xbf16, #tpu.memory_space<vmem>>, vector<1x288x96xbf16>
    %297 = vector.shape_cast %296 : vector<1x288x96xbf16> to vector<288x96xbf16>
    %cst_250 = arith.constant dense<0.000000e+00> : vector<24x96xf32>
    %298 = tpu.matmul %291, %297, %cst_250 {dimension_numbers = #tpu.dot_dimension_numbers<[1], [0], [0], [1], [0, 0, 1, 1], [], []>} : vector<24x288xbf16>, vector<288x96xbf16>, vector<24x96xf32> -> vector<24x96xf32>
    %299 = arith.addf %295, %298 : vector<24x96xf32>
    %c0_251 = arith.constant 0 : index
    %c0_252 = arith.constant 0 : index
    %300 = vector.load %arg43[%c0_251, %c0_252] : memref<1x96xf32, #tpu.memory_space<vmem>>, vector<1x96xf32>
    %301 = vector.broadcast %300 : vector<1x96xf32> to vector<24x96xf32>
    %302 = arith.addf %299, %301 : vector<24x96xf32>
    %cst_253 = arith.constant 0.000000e+00 : f32
    %303 = vector.broadcast %cst_253 : f32 to vector<24x96xf32>
    %304 = arith.maximumf %302, %303 : vector<24x96xf32>
    %305 = arith.truncf %304 : vector<24x96xf32> to vector<24x96xbf16>
    %cst_254 = arith.constant 0.000000e+00 : f32
    %306 = vector.broadcast %cst_254 : f32 to vector<20x160xf32>
    %c0_255 = arith.constant 0 : index
    %c0_256 = arith.constant 0 : index
    %c0_257 = arith.constant 0 : index
    %307 = vector.load %arg45[%c0_255, %c0_256, %c0_257] : memref<3x20x24xbf16, #tpu.memory_space<vmem>>, vector<1x20x24xbf16>
    %308 = vector.shape_cast %307 : vector<1x20x24xbf16> to vector<20x24xbf16>
    %cst_258 = arith.constant dense<0.000000e+00> : vector<20x96xf32>
    %309 = tpu.matmul %308, %305, %cst_258 {dimension_numbers = #tpu.dot_dimension_numbers<[1], [0], [0], [1], [0, 0, 1, 1], [], []>} : vector<20x24xbf16>, vector<24x96xbf16>, vector<20x96xf32> -> vector<20x96xf32>
    %310 = arith.truncf %309 : vector<20x96xf32> to vector<20x96xbf16>
    %c0_259 = arith.constant 0 : index
    %c0_260 = arith.constant 0 : index
    %c0_261 = arith.constant 0 : index
    %311 = vector.load %arg46[%c0_259, %c0_260, %c0_261] : memref<3x96x160xbf16, #tpu.memory_space<vmem>>, vector<1x96x160xbf16>
    %312 = vector.shape_cast %311 : vector<1x96x160xbf16> to vector<96x160xbf16>
    %cst_262 = arith.constant dense<0.000000e+00> : vector<20x160xf32>
    %313 = tpu.matmul %310, %312, %cst_262 {dimension_numbers = #tpu.dot_dimension_numbers<[1], [0], [0], [1], [0, 0, 1, 1], [], []>} : vector<20x96xbf16>, vector<96x160xbf16>, vector<20x160xf32> -> vector<20x160xf32>
    %314 = arith.addf %306, %313 : vector<20x160xf32>
    %c1_263 = arith.constant 1 : index
    %c0_264 = arith.constant 0 : index
    %c0_265 = arith.constant 0 : index
    %315 = vector.load %arg45[%c1_263, %c0_264, %c0_265] : memref<3x20x24xbf16, #tpu.memory_space<vmem>>, vector<1x20x24xbf16>
    %316 = vector.shape_cast %315 : vector<1x20x24xbf16> to vector<20x24xbf16>
    %cst_266 = arith.constant dense<0.000000e+00> : vector<20x96xf32>
    %317 = tpu.matmul %316, %305, %cst_266 {dimension_numbers = #tpu.dot_dimension_numbers<[1], [0], [0], [1], [0, 0, 1, 1], [], []>} : vector<20x24xbf16>, vector<24x96xbf16>, vector<20x96xf32> -> vector<20x96xf32>
    %318 = arith.truncf %317 : vector<20x96xf32> to vector<20x96xbf16>
    %c1_267 = arith.constant 1 : index
    %c0_268 = arith.constant 0 : index
    %c0_269 = arith.constant 0 : index
    %319 = vector.load %arg46[%c1_267, %c0_268, %c0_269] : memref<3x96x160xbf16, #tpu.memory_space<vmem>>, vector<1x96x160xbf16>
    %320 = vector.shape_cast %319 : vector<1x96x160xbf16> to vector<96x160xbf16>
    %cst_270 = arith.constant dense<0.000000e+00> : vector<20x160xf32>
    %321 = tpu.matmul %318, %320, %cst_270 {dimension_numbers = #tpu.dot_dimension_numbers<[1], [0], [0], [1], [0, 0, 1, 1], [], []>} : vector<20x96xbf16>, vector<96x160xbf16>, vector<20x160xf32> -> vector<20x160xf32>
    %322 = arith.addf %314, %321 : vector<20x160xf32>
    %c2_271 = arith.constant 2 : index
    %c0_272 = arith.constant 0 : index
    %c0_273 = arith.constant 0 : index
    %323 = vector.load %arg45[%c2_271, %c0_272, %c0_273] : memref<3x20x24xbf16, #tpu.memory_space<vmem>>, vector<1x20x24xbf16>
    %324 = vector.shape_cast %323 : vector<1x20x24xbf16> to vector<20x24xbf16>
    %cst_274 = arith.constant dense<0.000000e+00> : vector<20x96xf32>
    %325 = tpu.matmul %324, %305, %cst_274 {dimension_numbers = #tpu.dot_dimension_numbers<[1], [0], [0], [1], [0, 0, 1, 1], [], []>} : vector<20x24xbf16>, vector<24x96xbf16>, vector<20x96xf32> -> vector<20x96xf32>
    %326 = arith.truncf %325 : vector<20x96xf32> to vector<20x96xbf16>
    %c2_275 = arith.constant 2 : index
    %c0_276 = arith.constant 0 : index
    %c0_277 = arith.constant 0 : index
    %327 = vector.load %arg46[%c2_275, %c0_276, %c0_277] : memref<3x96x160xbf16, #tpu.memory_space<vmem>>, vector<1x96x160xbf16>
    %328 = vector.shape_cast %327 : vector<1x96x160xbf16> to vector<96x160xbf16>
    %cst_278 = arith.constant dense<0.000000e+00> : vector<20x160xf32>
    %329 = tpu.matmul %326, %328, %cst_278 {dimension_numbers = #tpu.dot_dimension_numbers<[1], [0], [0], [1], [0, 0, 1, 1], [], []>} : vector<20x96xbf16>, vector<96x160xbf16>, vector<20x160xf32> -> vector<20x160xf32>
    %330 = arith.addf %322, %329 : vector<20x160xf32>
    %c0_279 = arith.constant 0 : index
    %c0_280 = arith.constant 0 : index
    %331 = vector.load %arg47[%c0_279, %c0_280] : memref<1x160xf32, #tpu.memory_space<vmem>>, vector<1x160xf32>
    %332 = vector.broadcast %331 : vector<1x160xf32> to vector<20x160xf32>
    %333 = arith.addf %330, %332 : vector<20x160xf32>
    %c0_281 = arith.constant 0 : index
    %c0_282 = arith.constant 0 : index
    %c0_283 = arith.constant 0 : index
    %334 = vector.load %arg44[%c0_281, %c0_282, %c0_283] : memref<1x20x160xf32, #tpu.memory_space<vmem>>, vector<1x20x160xf32>
    %335 = vector.shape_cast %334 : vector<1x20x160xf32> to vector<20x160xf32>
    %336 = arith.truncf %333 : vector<20x160xf32> to vector<20x160xbf16>
    %337 = arith.truncf %335 : vector<20x160xf32> to vector<20x160xbf16>
    %c0_284 = arith.constant 0 : index
    %c0_285 = arith.constant 0 : index
    %338 = vector.load %arg48[%c0_284, %c0_285] : memref<160x80xbf16, #tpu.memory_space<vmem>>, vector<160x80xbf16>
    %cst_286 = arith.constant dense<0.000000e+00> : vector<20x80xf32>
    %339 = tpu.matmul %336, %338, %cst_286 {dimension_numbers = #tpu.dot_dimension_numbers<[1], [0], [0], [1], [0, 0, 1, 1], [], []>} : vector<20x160xbf16>, vector<160x80xbf16>, vector<20x80xf32> -> vector<20x80xf32>
    %c0_287 = arith.constant 0 : index
    %c0_288 = arith.constant 0 : index
    %340 = vector.load %arg49[%c0_287, %c0_288] : memref<1x80xf32, #tpu.memory_space<vmem>>, vector<1x80xf32>
    %341 = vector.broadcast %340 : vector<1x80xf32> to vector<20x80xf32>
    %342 = arith.addf %339, %341 : vector<20x80xf32>
    %c0_289 = arith.constant 0 : index
    %c0_290 = arith.constant 0 : index
    %343 = vector.load %arg50[%c0_289, %c0_290] : memref<160x80xbf16, #tpu.memory_space<vmem>>, vector<160x80xbf16>
    %cst_291 = arith.constant dense<0.000000e+00> : vector<20x80xf32>
    %344 = tpu.matmul %337, %343, %cst_291 {dimension_numbers = #tpu.dot_dimension_numbers<[1], [0], [0], [1], [0, 0, 1, 1], [], []>} : vector<20x160xbf16>, vector<160x80xbf16>, vector<20x80xf32> -> vector<20x80xf32>
    %c0_292 = arith.constant 0 : index
    %c0_293 = arith.constant 0 : index
    %345 = vector.load %arg51[%c0_292, %c0_293] : memref<1x80xf32, #tpu.memory_space<vmem>>, vector<1x80xf32>
    %346 = vector.broadcast %345 : vector<1x80xf32> to vector<20x80xf32>
    %347 = arith.addf %344, %346 : vector<20x80xf32>
    %348 = arith.addf %342, %347 : vector<20x80xf32>
    %cst_294 = arith.constant 0.000000e+00 : f32
    %349 = vector.broadcast %cst_294 : f32 to vector<20x80xf32>
    %350 = arith.maximumf %348, %349 : vector<20x80xf32>
    %351 = arith.truncf %350 : vector<20x80xf32> to vector<20x80xbf16>
    %c0_295 = arith.constant 0 : index
    %c0_296 = arith.constant 0 : index
    %352 = vector.load %arg52[%c0_295, %c0_296] : memref<80x160xbf16, #tpu.memory_space<vmem>>, vector<80x160xbf16>
    %cst_297 = arith.constant dense<0.000000e+00> : vector<20x160xf32>
    %353 = tpu.matmul %351, %352, %cst_297 {dimension_numbers = #tpu.dot_dimension_numbers<[1], [0], [0], [1], [0, 0, 1, 1], [], []>} : vector<20x80xbf16>, vector<80x160xbf16>, vector<20x160xf32> -> vector<20x160xf32>
    %c0_298 = arith.constant 0 : index
    %c0_299 = arith.constant 0 : index
    %354 = vector.load %arg53[%c0_298, %c0_299] : memref<1x160xf32, #tpu.memory_space<vmem>>, vector<1x160xf32>
    %355 = vector.broadcast %354 : vector<1x160xf32> to vector<20x160xf32>
    %356 = arith.addf %353, %355 : vector<20x160xf32>
    %357 = arith.negf %356 : vector<20x160xf32>
    %358 = math.exp %357 : vector<20x160xf32>
    %cst_300 = arith.constant 1.000000e+00 : f32
    %359 = vector.broadcast %cst_300 : f32 to vector<20x160xf32>
    %360 = arith.addf %359, %358 : vector<20x160xf32>
    %361 = arith.divf %359, %360 : vector<20x160xf32>
    %362 = arith.mulf %335, %361 : vector<20x160xf32>
    %363 = arith.truncf %362 : vector<20x160xf32> to vector<20x160xbf16>
    %cst_301 = arith.constant 0.000000e+00 : f32
    %364 = vector.broadcast %cst_301 : f32 to vector<20x160xf32>
    %c0_302 = arith.constant 0 : index
    %c0_303 = arith.constant 0 : index
    %c0_304 = arith.constant 0 : index
    %365 = vector.load %arg54[%c0_302, %c0_303, %c0_304] : memref<2x20x20xbf16, #tpu.memory_space<vmem>>, vector<1x20x20xbf16>
    %366 = vector.shape_cast %365 : vector<1x20x20xbf16> to vector<20x20xbf16>
    %cst_305 = arith.constant dense<0.000000e+00> : vector<20x160xf32>
    %367 = tpu.matmul %366, %336, %cst_305 {dimension_numbers = #tpu.dot_dimension_numbers<[1], [0], [0], [1], [0, 0, 1, 1], [], []>} : vector<20x20xbf16>, vector<20x160xbf16>, vector<20x160xf32> -> vector<20x160xf32>
    %368 = arith.truncf %367 : vector<20x160xf32> to vector<20x160xbf16>
    %cst_306 = arith.constant dense<0.000000e+00> : vector<20x160xf32>
    %369 = tpu.matmul %366, %363, %cst_306 {dimension_numbers = #tpu.dot_dimension_numbers<[1], [0], [0], [1], [0, 0, 1, 1], [], []>} : vector<20x20xbf16>, vector<20x160xbf16>, vector<20x160xf32> -> vector<20x160xf32>
    %370 = arith.truncf %369 : vector<20x160xf32> to vector<20x160xbf16>
    %c0_307 = arith.constant 0 : index
    %c0_308 = arith.constant 0 : index
    %c0_309 = arith.constant 0 : index
    %371 = vector.load %arg55[%c0_307, %c0_308, %c0_309] : memref<3x160x160xbf16, #tpu.memory_space<vmem>>, vector<1x160x160xbf16>
    %372 = vector.shape_cast %371 : vector<1x160x160xbf16> to vector<160x160xbf16>
    %cst_310 = arith.constant dense<0.000000e+00> : vector<20x160xf32>
    %373 = tpu.matmul %368, %372, %cst_310 {dimension_numbers = #tpu.dot_dimension_numbers<[1], [0], [0], [1], [0, 0, 1, 1], [], []>} : vector<20x160xbf16>, vector<160x160xbf16>, vector<20x160xf32> -> vector<20x160xf32>
    %374 = arith.addf %364, %373 : vector<20x160xf32>
    %c0_311 = arith.constant 0 : index
    %c0_312 = arith.constant 0 : index
    %c0_313 = arith.constant 0 : index
    %375 = vector.load %arg56[%c0_311, %c0_312, %c0_313] : memref<3x160x160xbf16, #tpu.memory_space<vmem>>, vector<1x160x160xbf16>
    %376 = vector.shape_cast %375 : vector<1x160x160xbf16> to vector<160x160xbf16>
    %cst_314 = arith.constant dense<0.000000e+00> : vector<20x160xf32>
    %377 = tpu.matmul %370, %376, %cst_314 {dimension_numbers = #tpu.dot_dimension_numbers<[1], [0], [0], [1], [0, 0, 1, 1], [], []>} : vector<20x160xbf16>, vector<160x160xbf16>, vector<20x160xf32> -> vector<20x160xf32>
    %378 = arith.addf %374, %377 : vector<20x160xf32>
    %c1_315 = arith.constant 1 : index
    %c0_316 = arith.constant 0 : index
    %c0_317 = arith.constant 0 : index
    %379 = vector.load %arg55[%c1_315, %c0_316, %c0_317] : memref<3x160x160xbf16, #tpu.memory_space<vmem>>, vector<1x160x160xbf16>
    %380 = vector.shape_cast %379 : vector<1x160x160xbf16> to vector<160x160xbf16>
    %cst_318 = arith.constant dense<0.000000e+00> : vector<20x160xf32>
    %381 = tpu.matmul %336, %380, %cst_318 {dimension_numbers = #tpu.dot_dimension_numbers<[1], [0], [0], [1], [0, 0, 1, 1], [], []>} : vector<20x160xbf16>, vector<160x160xbf16>, vector<20x160xf32> -> vector<20x160xf32>
    %382 = arith.addf %378, %381 : vector<20x160xf32>
    %c1_319 = arith.constant 1 : index
    %c0_320 = arith.constant 0 : index
    %c0_321 = arith.constant 0 : index
    %383 = vector.load %arg56[%c1_319, %c0_320, %c0_321] : memref<3x160x160xbf16, #tpu.memory_space<vmem>>, vector<1x160x160xbf16>
    %384 = vector.shape_cast %383 : vector<1x160x160xbf16> to vector<160x160xbf16>
    %cst_322 = arith.constant dense<0.000000e+00> : vector<20x160xf32>
    %385 = tpu.matmul %363, %384, %cst_322 {dimension_numbers = #tpu.dot_dimension_numbers<[1], [0], [0], [1], [0, 0, 1, 1], [], []>} : vector<20x160xbf16>, vector<160x160xbf16>, vector<20x160xf32> -> vector<20x160xf32>
    %386 = arith.addf %382, %385 : vector<20x160xf32>
    %c1_323 = arith.constant 1 : index
    %c0_324 = arith.constant 0 : index
    %c0_325 = arith.constant 0 : index
    %387 = vector.load %arg54[%c1_323, %c0_324, %c0_325] : memref<2x20x20xbf16, #tpu.memory_space<vmem>>, vector<1x20x20xbf16>
    %388 = vector.shape_cast %387 : vector<1x20x20xbf16> to vector<20x20xbf16>
    %cst_326 = arith.constant dense<0.000000e+00> : vector<20x160xf32>
    %389 = tpu.matmul %388, %336, %cst_326 {dimension_numbers = #tpu.dot_dimension_numbers<[1], [0], [0], [1], [0, 0, 1, 1], [], []>} : vector<20x20xbf16>, vector<20x160xbf16>, vector<20x160xf32> -> vector<20x160xf32>
    %390 = arith.truncf %389 : vector<20x160xf32> to vector<20x160xbf16>
    %cst_327 = arith.constant dense<0.000000e+00> : vector<20x160xf32>
    %391 = tpu.matmul %388, %363, %cst_327 {dimension_numbers = #tpu.dot_dimension_numbers<[1], [0], [0], [1], [0, 0, 1, 1], [], []>} : vector<20x20xbf16>, vector<20x160xbf16>, vector<20x160xf32> -> vector<20x160xf32>
    %392 = arith.truncf %391 : vector<20x160xf32> to vector<20x160xbf16>
    %c2_328 = arith.constant 2 : index
    %c0_329 = arith.constant 0 : index
    %c0_330 = arith.constant 0 : index
    %393 = vector.load %arg55[%c2_328, %c0_329, %c0_330] : memref<3x160x160xbf16, #tpu.memory_space<vmem>>, vector<1x160x160xbf16>
    %394 = vector.shape_cast %393 : vector<1x160x160xbf16> to vector<160x160xbf16>
    %cst_331 = arith.constant dense<0.000000e+00> : vector<20x160xf32>
    %395 = tpu.matmul %390, %394, %cst_331 {dimension_numbers = #tpu.dot_dimension_numbers<[1], [0], [0], [1], [0, 0, 1, 1], [], []>} : vector<20x160xbf16>, vector<160x160xbf16>, vector<20x160xf32> -> vector<20x160xf32>
    %396 = arith.addf %386, %395 : vector<20x160xf32>
    %c2_332 = arith.constant 2 : index
    %c0_333 = arith.constant 0 : index
    %c0_334 = arith.constant 0 : index
    %397 = vector.load %arg56[%c2_332, %c0_333, %c0_334] : memref<3x160x160xbf16, #tpu.memory_space<vmem>>, vector<1x160x160xbf16>
    %398 = vector.shape_cast %397 : vector<1x160x160xbf16> to vector<160x160xbf16>
    %cst_335 = arith.constant dense<0.000000e+00> : vector<20x160xf32>
    %399 = tpu.matmul %392, %398, %cst_335 {dimension_numbers = #tpu.dot_dimension_numbers<[1], [0], [0], [1], [0, 0, 1, 1], [], []>} : vector<20x160xbf16>, vector<160x160xbf16>, vector<20x160xf32> -> vector<20x160xf32>
    %400 = arith.addf %396, %399 : vector<20x160xf32>
    %c0_336 = arith.constant 0 : index
    %c0_337 = arith.constant 0 : index
    %401 = vector.load %arg57[%c0_336, %c0_337] : memref<1x160xf32, #tpu.memory_space<vmem>>, vector<1x160xf32>
    %402 = vector.broadcast %401 : vector<1x160xf32> to vector<20x160xf32>
    %403 = arith.addf %400, %402 : vector<20x160xf32>
    %cst_338 = arith.constant 0.000000e+00 : f32
    %404 = vector.broadcast %cst_338 : f32 to vector<20x160xf32>
    %405 = arith.maximumf %403, %404 : vector<20x160xf32>
    %c0_339 = arith.constant 0 : index
    %c0_340 = arith.constant 0 : index
    %406 = vector.load %arg58[%c0_339, %c0_340] : memref<128x20xbf16, #tpu.memory_space<vmem>>, vector<128x20xbf16>
    %407 = arith.truncf %405 : vector<20x160xf32> to vector<20x160xbf16>
    %cst_341 = arith.constant dense<0.000000e+00> : vector<128x160xf32>
    %408 = tpu.matmul %406, %407, %cst_341 {dimension_numbers = #tpu.dot_dimension_numbers<[1], [0], [0], [1], [0, 0, 1, 1], [], []>} : vector<128x20xbf16>, vector<20x160xbf16>, vector<128x160xf32> -> vector<128x160xf32>
    %409 = arith.truncf %408 : vector<128x160xf32> to vector<128x160xbf16>
    %c0_342 = arith.constant 0 : index
    %c0_343 = arith.constant 0 : index
    %410 = vector.load %arg59[%c0_342, %c0_343] : memref<160x128xbf16, #tpu.memory_space<vmem>>, vector<160x128xbf16>
    %cst_344 = arith.constant dense<0.000000e+00> : vector<128x128xf32>
    %411 = tpu.matmul %409, %410, %cst_344 {dimension_numbers = #tpu.dot_dimension_numbers<[1], [0], [0], [1], [0, 0, 1, 1], [], []>} : vector<128x160xbf16>, vector<160x128xbf16>, vector<128x128xf32> -> vector<128x128xf32>
    %c0_345 = arith.constant 0 : index
    %c0_346 = arith.constant 0 : index
    %412 = vector.load %arg60[%c0_345, %c0_346] : memref<1x128xf32, #tpu.memory_space<vmem>>, vector<1x128xf32>
    %413 = vector.broadcast %412 : vector<1x128xf32> to vector<128x128xf32>
    %414 = arith.addf %411, %413 : vector<128x128xf32>
    %415 = arith.negf %414 : vector<128x128xf32>
    %416 = math.exp %415 : vector<128x128xf32>
    %cst_347 = arith.constant 1.000000e+00 : f32
    %417 = vector.broadcast %cst_347 : f32 to vector<128x128xf32>
    %418 = arith.addf %417, %416 : vector<128x128xf32>
    %419 = arith.divf %417, %418 : vector<128x128xf32>
    %c0_348 = arith.constant 0 : index
    %c0_349 = arith.constant 0 : index
    %c0_350 = arith.constant 0 : index
    %420 = vector.load %arg61[%c0_348, %c0_349, %c0_350] : memref<1x128x128xf32, #tpu.memory_space<vmem>>, vector<1x128x128xf32>
    %421 = vector.shape_cast %420 : vector<1x128x128xf32> to vector<128x128xf32>
    %422 = vector.shape_cast %419 : vector<128x128xf32> to vector<1x128x128xf32>
    tpu.vector_store %arg61[%c0_348, %c0_349, %c0_350], %422 {strides = array<i32>} : memref<1x128x128xf32, #tpu.memory_space<vmem>>, vector<1x128x128xf32>,
    return
  }
  func.func @transform_0(%arg0: i32) -> (i32, i32, i32) {
    %c0_i32 = arith.constant 0 : i32
    %c0_i32_0 = arith.constant 0 : i32
    %c0_i32_1 = arith.constant 0 : i32
    return %arg0, %c0_i32, %c0_i32_0 : i32, i32, i32
  }
  func.func @transform_1(%arg0: i32) -> (i32, i32, i32) {
    %c0_i32 = arith.constant 0 : i32
    %c0_i32_0 = arith.constant 0 : i32
    %c0_i32_1 = arith.constant 0 : i32
    return %arg0, %c0_i32, %c0_i32_0 : i32, i32, i32
  }
  func.func @transform_2(%arg0: i32) -> (i32, i32, i32) {
    %c0_i32 = arith.constant 0 : i32
    %c0_i32_0 = arith.constant 0 : i32
    %c0_i32_1 = arith.constant 0 : i32
    %c0_i32_2 = arith.constant 0 : i32
    return %c0_i32, %c0_i32_0, %c0_i32_1 : i32, i32, i32
  }
  func.func @transform_3(%arg0: i32) -> (i32, i32, i32) {
    %c0_i32 = arith.constant 0 : i32
    %c0_i32_0 = arith.constant 0 : i32
    %c0_i32_1 = arith.constant 0 : i32
    %c0_i32_2 = arith.constant 0 : i32
    return %c0_i32, %c0_i32_0, %c0_i32_1 : i32, i32, i32
  }
  func.func @transform_4(%arg0: i32) -> (i32, i32) {
    %c0_i32 = arith.constant 0 : i32
    %c0_i32_0 = arith.constant 0 : i32
    %c0_i32_1 = arith.constant 0 : i32
    return %c0_i32, %c0_i32_0 : i32, i32
  }
  func.func @transform_5(%arg0: i32) -> (i32, i32) {
    %c0_i32 = arith.constant 0 : i32
    %c0_i32_0 = arith.constant 0 : i32
    %c0_i32_1 = arith.constant 0 : i32
    return %c0_i32, %c0_i32_0 : i32, i32
  }
  func.func @transform_6(%arg0: i32) -> (i32, i32) {
    %c0_i32 = arith.constant 0 : i32
    %c0_i32_0 = arith.constant 0 : i32
    %c0_i32_1 = arith.constant 0 : i32
    return %c0_i32, %c0_i32_0 : i32, i32
  }
  func.func @transform_7(%arg0: i32) -> (i32, i32) {
    %c0_i32 = arith.constant 0 : i32
    %c0_i32_0 = arith.constant 0 : i32
    %c0_i32_1 = arith.constant 0 : i32
    return %c0_i32, %c0_i32_0 : i32, i32
  }
  func.func @transform_8(%arg0: i32) -> (i32, i32) {
    %c0_i32 = arith.constant 0 : i32
    %c0_i32_0 = arith.constant 0 : i32
    %c0_i32_1 = arith.constant 0 : i32
    return %c0_i32, %c0_i32_0 : i32, i32
  }
  func.func @transform_9(%arg0: i32) -> (i32, i32) {
    %c0_i32 = arith.constant 0 : i32
    %c0_i32_0 = arith.constant 0 : i32
    %c0_i32_1 = arith.constant 0 : i32
    return %c0_i32, %c0_i32_0 : i32, i32
  }
  func.func @transform_10(%arg0: i32) -> (i32, i32) {
    %c0_i32 = arith.constant 0 : i32
    %c0_i32_0 = arith.constant 0 : i32
    %c0_i32_1 = arith.constant 0 : i32
    return %c0_i32, %c0_i32_0 : i32, i32
  }
  func.func @transform_11(%arg0: i32) -> (i32, i32, i32) {
    %c0_i32 = arith.constant 0 : i32
    %c0_i32_0 = arith.constant 0 : i32
    %c0_i32_1 = arith.constant 0 : i32
    %c0_i32_2 = arith.constant 0 : i32
    return %c0_i32, %c0_i32_0, %c0_i32_1 : i32, i32, i32
  }
  func.func @transform_12(%arg0: i32) -> (i32, i32, i32) {
    %c0_i32 = arith.constant 0 : i32
    %c0_i32_0 = arith.constant 0 : i32
    %c0_i32_1 = arith.constant 0 : i32
    %c0_i32_2 = arith.constant 0 : i32
    return %c0_i32, %c0_i32_0, %c0_i32_1 : i32, i32, i32
  }
  func.func @transform_13(%arg0: i32) -> (i32, i32, i32) {
    %c0_i32 = arith.constant 0 : i32
    %c0_i32_0 = arith.constant 0 : i32
    %c0_i32_1 = arith.constant 0 : i32
    %c0_i32_2 = arith.constant 0 : i32
    return %c0_i32, %c0_i32_0, %c0_i32_1 : i32, i32, i32
  }
  func.func @transform_14(%arg0: i32) -> (i32, i32) {
    %c0_i32 = arith.constant 0 : i32
    %c0_i32_0 = arith.constant 0 : i32
    %c0_i32_1 = arith.constant 0 : i32
    return %c0_i32, %c0_i32_0 : i32, i32
  }
  func.func @transform_15(%arg0: i32) -> (i32, i32, i32) {
    %c0_i32 = arith.constant 0 : i32
    %c0_i32_0 = arith.constant 0 : i32
    %c0_i32_1 = arith.constant 0 : i32
    return %arg0, %c0_i32, %c0_i32_0 : i32, i32, i32
  }
  func.func @transform_16(%arg0: i32) -> (i32, i32, i32) {
    %c0_i32 = arith.constant 0 : i32
    %c0_i32_0 = arith.constant 0 : i32
    %c0_i32_1 = arith.constant 0 : i32
    %c0_i32_2 = arith.constant 0 : i32
    return %c0_i32, %c0_i32_0, %c0_i32_1 : i32, i32, i32
  }
  func.func @transform_17(%arg0: i32) -> (i32, i32, i32) {
    %c0_i32 = arith.constant 0 : i32
    %c0_i32_0 = arith.constant 0 : i32
    %c0_i32_1 = arith.constant 0 : i32
    %c0_i32_2 = arith.constant 0 : i32
    return %c0_i32, %c0_i32_0, %c0_i32_1 : i32, i32, i32
  }
  func.func @transform_18(%arg0: i32) -> (i32, i32) {
    %c0_i32 = arith.constant 0 : i32
    %c0_i32_0 = arith.constant 0 : i32
    %c0_i32_1 = arith.constant 0 : i32
    return %c0_i32, %c0_i32_0 : i32, i32
  }
  func.func @transform_19(%arg0: i32) -> (i32, i32) {
    %c0_i32 = arith.constant 0 : i32
    %c0_i32_0 = arith.constant 0 : i32
    %c0_i32_1 = arith.constant 0 : i32
    return %c0_i32, %c0_i32_0 : i32, i32
  }
  func.func @transform_20(%arg0: i32) -> (i32, i32) {
    %c0_i32 = arith.constant 0 : i32
    %c0_i32_0 = arith.constant 0 : i32
    %c0_i32_1 = arith.constant 0 : i32
    return %c0_i32, %c0_i32_0 : i32, i32
  }
  func.func @transform_21(%arg0: i32) -> (i32, i32) {
    %c0_i32 = arith.constant 0 : i32
    %c0_i32_0 = arith.constant 0 : i32
    %c0_i32_1 = arith.constant 0 : i32
    return %c0_i32, %c0_i32_0 : i32, i32
  }
  func.func @transform_22(%arg0: i32) -> (i32, i32) {
    %c0_i32 = arith.constant 0 : i32
    %c0_i32_0 = arith.constant 0 : i32
    %c0_i32_1 = arith.constant 0 : i32
    return %c0_i32, %c0_i32_0 : i32, i32
  }
  func.func @transform_23(%arg0: i32) -> (i32, i32) {
    %c0_i32 = arith.constant 0 : i32
    %c0_i32_0 = arith.constant 0 : i32
    %c0_i32_1 = arith.constant 0 : i32
    return %c0_i32, %c0_i32_0 : i32, i32
  }
  func.func @transform_24(%arg0: i32) -> (i32, i32) {
    %c0_i32 = arith.constant 0 : i32
    %c0_i32_0 = arith.constant 0 : i32
    %c0_i32_1 = arith.constant 0 : i32
    return %c0_i32, %c0_i32_0 : i32, i32
  }
  func.func @transform_25(%arg0: i32) -> (i32, i32, i32) {
    %c0_i32 = arith.constant 0 : i32
    %c0_i32_0 = arith.constant 0 : i32
    %c0_i32_1 = arith.constant 0 : i32
    %c0_i32_2 = arith.constant 0 : i32
    return %c0_i32, %c0_i32_0, %c0_i32_1 : i32, i32, i32
  }
  func.func @transform_26(%arg0: i32) -> (i32, i32, i32) {
    %c0_i32 = arith.constant 0 : i32
    %c0_i32_0 = arith.constant 0 : i32
    %c0_i32_1 = arith.constant 0 : i32
    %c0_i32_2 = arith.constant 0 : i32
    return %c0_i32, %c0_i32_0, %c0_i32_1 : i32, i32, i32
  }
  func.func @transform_27(%arg0: i32) -> (i32, i32, i32) {
    %c0_i32 = arith.constant 0 : i32
    %c0_i32_0 = arith.constant 0 : i32
    %c0_i32_1 = arith.constant 0 : i32
    %c0_i32_2 = arith.constant 0 : i32
    return %c0_i32, %c0_i32_0, %c0_i32_1 : i32, i32, i32
  }
  func.func @transform_28(%arg0: i32) -> (i32, i32) {
    %c0_i32 = arith.constant 0 : i32
    %c0_i32_0 = arith.constant 0 : i32
    %c0_i32_1 = arith.constant 0 : i32
    return %c0_i32, %c0_i32_0 : i32, i32
  }
  func.func @transform_29(%arg0: i32) -> (i32, i32, i32) {
    %c0_i32 = arith.constant 0 : i32
    %c0_i32_0 = arith.constant 0 : i32
    %c0_i32_1 = arith.constant 0 : i32
    return %arg0, %c0_i32, %c0_i32_0 : i32, i32, i32
  }
  func.func @transform_30(%arg0: i32) -> (i32, i32, i32) {
    %c0_i32 = arith.constant 0 : i32
    %c0_i32_0 = arith.constant 0 : i32
    %c0_i32_1 = arith.constant 0 : i32
    %c0_i32_2 = arith.constant 0 : i32
    return %c0_i32, %c0_i32_0, %c0_i32_1 : i32, i32, i32
  }
  func.func @transform_31(%arg0: i32) -> (i32, i32, i32) {
    %c0_i32 = arith.constant 0 : i32
    %c0_i32_0 = arith.constant 0 : i32
    %c0_i32_1 = arith.constant 0 : i32
    %c0_i32_2 = arith.constant 0 : i32
    return %c0_i32, %c0_i32_0, %c0_i32_1 : i32, i32, i32
  }
  func.func @transform_32(%arg0: i32) -> (i32, i32) {
    %c0_i32 = arith.constant 0 : i32
    %c0_i32_0 = arith.constant 0 : i32
    %c0_i32_1 = arith.constant 0 : i32
    return %c0_i32, %c0_i32_0 : i32, i32
  }
  func.func @transform_33(%arg0: i32) -> (i32, i32) {
    %c0_i32 = arith.constant 0 : i32
    %c0_i32_0 = arith.constant 0 : i32
    %c0_i32_1 = arith.constant 0 : i32
    return %c0_i32, %c0_i32_0 : i32, i32
  }
  func.func @transform_34(%arg0: i32) -> (i32, i32) {
    %c0_i32 = arith.constant 0 : i32
    %c0_i32_0 = arith.constant 0 : i32
    %c0_i32_1 = arith.constant 0 : i32
    return %c0_i32, %c0_i32_0 : i32, i32
  }
  func.func @transform_35(%arg0: i32) -> (i32, i32) {
    %c0_i32 = arith.constant 0 : i32
    %c0_i32_0 = arith.constant 0 : i32
    %c0_i32_1 = arith.constant 0 : i32
    return %c0_i32, %c0_i32_0 : i32, i32
  }
  func.func @transform_36(%arg0: i32) -> (i32, i32) {
    %c0_i32 = arith.constant 0 : i32
    %c0_i32_0 = arith.constant 0 : i32
    %c0_i32_1 = arith.constant 0 : i32
    return %c0_i32, %c0_i32_0 : i32, i32
  }
  func.func @transform_37(%arg0: i32) -> (i32, i32) {
    %c0_i32 = arith.constant 0 : i32
    %c0_i32_0 = arith.constant 0 : i32
    %c0_i32_1 = arith.constant 0 : i32
    return %c0_i32, %c0_i32_0 : i32, i32
  }
  func.func @transform_38(%arg0: i32) -> (i32, i32) {
    %c0_i32 = arith.constant 0 : i32
    %c0_i32_0 = arith.constant 0 : i32
    %c0_i32_1 = arith.constant 0 : i32
    return %c0_i32, %c0_i32_0 : i32, i32
  }
  func.func @transform_39(%arg0: i32) -> (i32, i32, i32) {
    %c0_i32 = arith.constant 0 : i32
    %c0_i32_0 = arith.constant 0 : i32
    %c0_i32_1 = arith.constant 0 : i32
    %c0_i32_2 = arith.constant 0 : i32
    return %c0_i32, %c0_i32_0, %c0_i32_1 : i32, i32, i32
  }
  func.func @transform_40(%arg0: i32) -> (i32, i32, i32) {
    %c0_i32 = arith.constant 0 : i32
    %c0_i32_0 = arith.constant 0 : i32
    %c0_i32_1 = arith.constant 0 : i32
    %c0_i32_2 = arith.constant 0 : i32
    return %c0_i32, %c0_i32_0, %c0_i32_1 : i32, i32, i32
  }
  func.func @transform_41(%arg0: i32) -> (i32, i32, i32) {
    %c0_i32 = arith.constant 0 : i32
    %c0_i32_0 = arith.constant 0 : i32
    %c0_i32_1 = arith.constant 0 : i32
    %c0_i32_2 = arith.constant 0 : i32
    return %c0_i32, %c0_i32_0, %c0_i32_1 : i32, i32, i32
  }
  func.func @transform_42(%arg0: i32) -> (i32, i32) {
    %c0_i32 = arith.constant 0 : i32
    %c0_i32_0 = arith.constant 0 : i32
    %c0_i32_1 = arith.constant 0 : i32
    return %c0_i32, %c0_i32_0 : i32, i32
  }
  func.func @transform_43(%arg0: i32) -> (i32, i32, i32) {
    %c0_i32 = arith.constant 0 : i32
    %c0_i32_0 = arith.constant 0 : i32
    %c0_i32_1 = arith.constant 0 : i32
    return %arg0, %c0_i32, %c0_i32_0 : i32, i32, i32
  }
  func.func @transform_44(%arg0: i32) -> (i32, i32, i32) {
    %c0_i32 = arith.constant 0 : i32
    %c0_i32_0 = arith.constant 0 : i32
    %c0_i32_1 = arith.constant 0 : i32
    %c0_i32_2 = arith.constant 0 : i32
    return %c0_i32, %c0_i32_0, %c0_i32_1 : i32, i32, i32
  }
  func.func @transform_45(%arg0: i32) -> (i32, i32, i32) {
    %c0_i32 = arith.constant 0 : i32
    %c0_i32_0 = arith.constant 0 : i32
    %c0_i32_1 = arith.constant 0 : i32
    %c0_i32_2 = arith.constant 0 : i32
    return %c0_i32, %c0_i32_0, %c0_i32_1 : i32, i32, i32
  }
  func.func @transform_46(%arg0: i32) -> (i32, i32) {
    %c0_i32 = arith.constant 0 : i32
    %c0_i32_0 = arith.constant 0 : i32
    %c0_i32_1 = arith.constant 0 : i32
    return %c0_i32, %c0_i32_0 : i32, i32
  }
  func.func @transform_47(%arg0: i32) -> (i32, i32) {
    %c0_i32 = arith.constant 0 : i32
    %c0_i32_0 = arith.constant 0 : i32
    %c0_i32_1 = arith.constant 0 : i32
    return %c0_i32, %c0_i32_0 : i32, i32
  }
  func.func @transform_48(%arg0: i32) -> (i32, i32) {
    %c0_i32 = arith.constant 0 : i32
    %c0_i32_0 = arith.constant 0 : i32
    %c0_i32_1 = arith.constant 0 : i32
    return %c0_i32, %c0_i32_0 : i32, i32
  }
  func.func @transform_49(%arg0: i32) -> (i32, i32) {
    %c0_i32 = arith.constant 0 : i32
    %c0_i32_0 = arith.constant 0 : i32
    %c0_i32_1 = arith.constant 0 : i32
    return %c0_i32, %c0_i32_0 : i32, i32
  }
  func.func @transform_50(%arg0: i32) -> (i32, i32) {
    %c0_i32 = arith.constant 0 : i32
    %c0_i32_0 = arith.constant 0 : i32
    %c0_i32_1 = arith.constant 0 : i32
    return %c0_i32, %c0_i32_0 : i32, i32
  }
  func.func @transform_51(%arg0: i32) -> (i32, i32) {
    %c0_i32 = arith.constant 0 : i32
    %c0_i32_0 = arith.constant 0 : i32
    %c0_i32_1 = arith.constant 0 : i32
    return %c0_i32, %c0_i32_0 : i32, i32
  }
  func.func @transform_52(%arg0: i32) -> (i32, i32) {
    %c0_i32 = arith.constant 0 : i32
    %c0_i32_0 = arith.constant 0 : i32
    %c0_i32_1 = arith.constant 0 : i32
    return %c0_i32, %c0_i32_0 : i32, i32
  }
  func.func @transform_53(%arg0: i32) -> (i32, i32, i32) {
    %c0_i32 = arith.constant 0 : i32
    %c0_i32_0 = arith.constant 0 : i32
    %c0_i32_1 = arith.constant 0 : i32
    %c0_i32_2 = arith.constant 0 : i32
    return %c0_i32, %c0_i32_0, %c0_i32_1 : i32, i32, i32
  }
  func.func @transform_54(%arg0: i32) -> (i32, i32, i32) {
    %c0_i32 = arith.constant 0 : i32
    %c0_i32_0 = arith.constant 0 : i32
    %c0_i32_1 = arith.constant 0 : i32
    %c0_i32_2 = arith.constant 0 : i32
    return %c0_i32, %c0_i32_0, %c0_i32_1 : i32, i32, i32
  }
  func.func @transform_55(%arg0: i32) -> (i32, i32, i32) {
    %c0_i32 = arith.constant 0 : i32
    %c0_i32_0 = arith.constant 0 : i32
    %c0_i32_1 = arith.constant 0 : i32
    %c0_i32_2 = arith.constant 0 : i32
    return %c0_i32, %c0_i32_0, %c0_i32_1 : i32, i32, i32
  }
  func.func @transform_56(%arg0: i32) -> (i32, i32) {
    %c0_i32 = arith.constant 0 : i32
    %c0_i32_0 = arith.constant 0 : i32
    %c0_i32_1 = arith.constant 0 : i32
    return %c0_i32, %c0_i32_0 : i32, i32
  }
  func.func @transform_57(%arg0: i32) -> (i32, i32) {
    %c0_i32 = arith.constant 0 : i32
    %c0_i32_0 = arith.constant 0 : i32
    %c0_i32_1 = arith.constant 0 : i32
    return %c0_i32, %c0_i32_0 : i32, i32
  }
  func.func @transform_58(%arg0: i32) -> (i32, i32) {
    %c0_i32 = arith.constant 0 : i32
    %c0_i32_0 = arith.constant 0 : i32
    %c0_i32_1 = arith.constant 0 : i32
    return %c0_i32, %c0_i32_0 : i32, i32
  }
  func.func @transform_59(%arg0: i32) -> (i32, i32) {
    %c0_i32 = arith.constant 0 : i32
    %c0_i32_0 = arith.constant 0 : i32
    %c0_i32_1 = arith.constant 0 : i32
    return %c0_i32, %c0_i32_0 : i32, i32
  }
  func.func @transform_60(%arg0: i32) -> (i32, i32, i32) {
    %c0_i32 = arith.constant 0 : i32
    %c0_i32_0 = arith.constant 0 : i32
    %c0_i32_1 = arith.constant 0 : i32
    return %arg0, %c0_i32, %c0_i32_0 : i32, i32, i32
  }
}

</mosaic_0001>

<bundles_post_ra>
// kernel: unet_decoder_forward.1
= control target key start
LH: loop header
LB: loop body
LE: loop exit
PB: predicated region body
PF: predicated region fallthrough
CT: control target
= control target key end

     0   :  { %s14344_s6 = smov 1   ;;  %s14345_s10 = smov 2   ;;  %s16747_s0 = inlined_call_operand.smem [shape: u32[61], index: -1, kind: input, shape index: {}] }
   0x1   :  { %s14422_s5 = sld [smem:[%s16747_s0]]   ;;  %s14346_s14 = smov 3  }
   0x2   :  { %s14427_s9 = sld [smem:[%s16747_s0 + %s14344_s6]]   ;;  %s14347_s18 = smov 4  }
   0x3   :  { %s14432_s13 = sld [smem:[%s16747_s0 + %s14345_s10]]   ;;  %s14348_s22 = smov 5  }
   0x4   :  { %s14437_s17 = sld [smem:[%s16747_s0 + %s14346_s14]]   ;;  %s14349_s26 = smov 6  }
   0x5   :  { %s14442_s21 = sld [smem:[%s16747_s0 + %s14347_s18]]   ;;  %s14350_s30 = smov 7  }
   0x6   :  { %s14447_s25 = sld [smem:[%s16747_s0 + %s14348_s22]]   ;;  %s14351_s4 = smov 8  }
   0x7   :  { %16818 = sst [smem:[#allocation23_spill]] %s14422_s5  ;;  %s14352_s10 = smov 9  }
   0x8   :  { %16819 = sst [smem:[#allocation24_spill]] %s14427_s9  ;;  %s14353_s15 = smov 10  }
   0x9   :  { %16820 = sst [smem:[#allocation25_spill]] %s14432_s13  ;;  %s14354_s20 = smov 11  }
   0xa   :  { %s14452_s29 = sld [smem:[%s16747_s0 + %s14349_s26]]   ;;  %s14355_s26 = smov 12  }
   0xb   :  { %s14457_s3 = sld [smem:[%s16747_s0 + %s14350_s30]]   ;;  %s14356_s1 = smov 13  }
   0xc   :  { %s14462_s8 = sld [smem:[%s16747_s0 + %s14351_s4]]   ;;  %s14357_s7 = smov 14  }
   0xd   :  { %s14467_s14 = sld [smem:[%s16747_s0 + %s14352_s10]]   ;;  %s14359_s22 = smov 16  }
   0xe   :  { %s14472_s19 = sld [smem:[%s16747_s0 + %s14353_s15]]   ;;  %s14358_s15 = smov 15  }
   0xf   :  { %s14477_s24 = sld [smem:[%s16747_s0 + %s14354_s20]]   ;;  %s14360_s28 = smov 17  }
  0x10   :  { %16821 = sst [smem:[#allocation26_spill]] %s14452_s29 }
  0x11   :  { %16822 = sst [smem:[#allocation27_spill]] %s14457_s3 }
  0x12   :  { %16823 = sst [smem:[#allocation28_spill]] %s14462_s8 }
  0x13   :  { %16824 = sst [smem:[#allocation29_spill]] %s14467_s14 }
  0x14   :  { %16825 = sst [smem:[#allocation30_spill]] %s14472_s19 }
  0x15   :  { %16826 = sst [smem:[#allocation31_spill]] %s14477_s24 }
  0x16   :  { %s14482_s30 = sld [smem:[%s16747_s0 + %s14355_s26]]  }
  0x17   :  { %s14487_s6 = sld [smem:[%s16747_s0 + %s14356_s1]]  }
  0x18   :  { %s14492_s12 = sld [smem:[%s16747_s0 + %s14357_s7]]   ;;  %s14361_s7 = smov 18  }
  0x19   :  { %s14497_s20 = sld [smem:[%s16747_s0 + %s14358_s15]]   ;;  %s14362_s15 = smov 19  }
  0x1a   :  { %s14502_s27 = sld [smem:[%s16747_s0 + %s14359_s22]]   ;;  %s14363_s22 = smov 20  }
  0x1b   :  { %s14507_s4 = sld [smem:[%s16747_s0 + %s14360_s28]]   ;;  %s14364_s28 = smov 21  }
  0x1c   :  { %16827 = sst [smem:[#allocation32_spill]] %s14482_s30 }
  0x1d   :  { %16828 = sst [smem:[#allocation33_spill]] %s14487_s6 }
  0x1e   :  { %16829 = sst [smem:[#allocation34_spill]] %s14492_s12 }
  0x1f   :  { %16830 = sst [smem:[#allocation35_spill]] %s14497_s20 }
  0x20   :  { %16831 = sst [smem:[#allocation36_spill]] %s14502_s27 }
  0x21   :  { %16832 = sst [smem:[#allocation37_spill]] %s14507_s4 }
  0x22   :  { %s14512_s12 = sld [smem:[%s16747_s0 + %s14361_s7]]   ;;  %s14365_s7 = smov 22  }
  0x23   :  { %s14517_s20 = sld [smem:[%s16747_s0 + %s14362_s15]]   ;;  %s14366_s15 = smov 23  }
  0x24   :  { %s14522_s27 = sld [smem:[%s16747_s0 + %s14363_s22]]   ;;  %s14367_s22 = smov 24  }
  0x25   :  { %s14527_s4 = sld [smem:[%s16747_s0 + %s14364_s28]]   ;;  %s14368_s28 = smov 25  }
  0x28   :  { %16833 = sst [smem:[#allocation38_spill]] %s14512_s12 }
  0x29   :  { %16834 = sst [smem:[#allocation39_spill]] %s14517_s20 }
  0x2a   :  { %16835 = sst [smem:[#allocation40_spill]] %s14522_s27 }
  0x2b   :  { %16836 = sst [smem:[#allocation41_spill]] %s14527_s4 }
  0x2c   :  { %s14532_s12 = sld [smem:[%s16747_s0 + %s14365_s7]]   ;;  %s14369_s7 = smov 26  }
  0x2d   :  { %s14537_s20 = sld [smem:[%s16747_s0 + %s14366_s15]]   ;;  %s14370_s15 = smov 27  }
  0x2e   :  { %s14542_s27 = sld [smem:[%s16747_s0 + %s14367_s22]]   ;;  %s14371_s22 = smov 28  }
  0x2f   :  { %s14547_s4 = sld [smem:[%s16747_s0 + %s14368_s28]]   ;;  %s14372_s28 = smov 29  }
  0x32   :  { %16837 = sst [smem:[#allocation42_spill]] %s14532_s12 }
  0x33   :  { %16838 = sst [smem:[#allocation43_spill]] %s14537_s20 }
  0x34   :  { %16839 = sst [smem:[#allocation44_spill]] %s14542_s27 }
  0x35   :  { %16840 = sst [smem:[#allocation45_spill]] %s14547_s4 }
  0x36   :  { %s14552_s12 = sld [smem:[%s16747_s0 + %s14369_s7]]   ;;  %s14373_s7 = smov 30  }
  0x37   :  { %s14557_s20 = sld [smem:[%s16747_s0 + %s14370_s15]]   ;;  %s14374_s15 = smov 31  }
  0x38   :  { %s14562_s27 = sld [smem:[%s16747_s0 + %s14371_s22]]   ;;  %s14375_s22 = smov 32  }
  0x39   :  { %s14567_s4 = sld [smem:[%s16747_s0 + %s14372_s28]]   ;;  %s14376_s28 = smov 33  }
  0x3a   :  { %s14582_s6 = sld [smem:[%s16747_s0 + %s14375_s22]]   ;;  %s14379_s22 = smov 36  }
  0x3b   :  { %s14602_s30 = sld [smem:[%s16747_s0 + %s14379_s22]]   ;;  %s14383_s22 = smov 40  }
  0x3c   :  { %16841 = sst [smem:[#allocation46_spill]] %s14552_s12 }
  0x3d   :  { %16842 = sst [smem:[#allocation47_spill]] %s14557_s20 }
  0x3e   :  { %s14572_s12 = sld [smem:[%s16747_s0 + %s14373_s7]]   ;;  %s14377_s7 = smov 34  }
  0x3f   :  { %16843 = sst [smem:[#allocation48_spill]] %s14567_s4 }
  0x40   :  { %s14577_s20 = sld [smem:[%s16747_s0 + %s14374_s15]]   ;;  %s14378_s15 = smov 35  }
  0x41   :  { %16846 = sst [smem:[#allocation51_spill]] %s14582_s6 }
  0x42   :  { %s14587_s4 = sld [smem:[%s16747_s0 + %s14376_s28]]   ;;  %s14380_s28 = smov 37  }
  0x43   :  { %s14622_s29 = sld [smem:[%s16747_s0 + %s14383_s22]]   ;;  %s14387_s22 = smov 44  }
  0x44   :  { %16844 = sst [smem:[#allocation49_spill]] %s14572_s12 }
  0x45   :  { %s14592_s12 = sld [smem:[%s16747_s0 + %s14377_s7]]   ;;  %s14381_s7 = smov 38  }
  0x46   :  { %16845 = sst [smem:[#allocation50_spill]] %s14577_s20 }
  0x47   :  { %s14597_s20 = sld [smem:[%s16747_s0 + %s14378_s15]]   ;;  %s14382_s15 = smov 39  }
  0x48   :  { %16847 = sst [smem:[#allocation52_spill]] %s14587_s4 }
  0x49   :  { %s14607_s4 = sld [smem:[%s16747_s0 + %s14380_s28]]   ;;  %s14384_s28 = smov 41  }
  0x4a   :  { %s14612_s19 = sld [smem:[%s16747_s0 + %s14381_s7]]   ;;  %s14385_s7 = smov 42  }
  0x4b   :  { %16848 = sst [smem:[#allocation53_spill]] %s14592_s12 }
  0x4c   :  { %16853 = sst [smem:[#allocation58_spill]] %s14622_s29 }
  0x4d   :  { %16849 = sst [smem:[#allocation54_spill]] %s14597_s20 }
  0x4e   :  { %s14617_s20 = sld [smem:[%s16747_s0 + %s14382_s15]]   ;;  %s14386_s15 = smov 43  }
  0x4f   :  { %16850 = sst [smem:[#allocation55_spill]] %s14607_s4 }
  0x50   :  { %16851 = sst [smem:[#allocation56_spill]] %s14612_s19 }
  0x51   :  { %s14627_s4 = sld [smem:[%s16747_s0 + %s14384_s28]]   ;;  %s14388_s28 = smov 45  }
  0x52   :  { %s14632_s19 = sld [smem:[%s16747_s0 + %s14385_s7]]   ;;  %s14389_s7 = smov 46  }
  0x53   :  { %s14642_s29 = sld [smem:[%s16747_s0 + %s14387_s22]]   ;;  %s14391_s22 = smov 48  }
  0x54   :  { %16852 = sst [smem:[#allocation57_spill]] %s14617_s20 }
  0x55   :  { %s14637_s20 = sld [smem:[%s16747_s0 + %s14386_s15]]   ;;  %s14390_s15 = smov 47  }
  0x56   :  { %s14652_s24 = sld [smem:[%s16747_s0 + %s14389_s7]]   ;;  %s14393_s7 = smov 50  }
  0x57   :  { %16854 = sst [smem:[#allocation59_spill]] %s14627_s4 }
  0x58   :  { %s14647_s4 = sld [smem:[%s16747_s0 + %s14388_s28]]   ;;  %s14392_s28 = smov 49  }
  0x59   :  { %16856 = sst [smem:[#allocation61_spill]] %s14642_s29 }
  0x5a   :  { %s14662_s29 = sld [smem:[%s16747_s0 + %s14391_s22]]   ;;  %s14395_s22 = smov 52  }
  0x5b   :  { %16855 = sst [smem:[#allocation60_spill]] %s14637_s20 }
  0x5c   :  { %16858 = sst [smem:[#allocation63_spill]] %s14652_s24 }
  0x5d   :  { %s14657_s20 = sld [smem:[%s16747_s0 + %s14390_s15]]   ;;  %s14394_s15 = smov 51  }
  0x5e   :  { %16857 = sst [smem:[#allocation62_spill]] %s14647_s4 }
  0x5f   :  { %s14667_s4 = sld [smem:[%s16747_s0 + %s14392_s28]]   ;;  %s14396_s28 = smov 53  }
  0x60   :  { %s14672_s24 = sld [smem:[%s16747_s0 + %s14393_s7]]   ;;  %s14397_s7 = smov 54  }
  0x61   :  { %s14682_s8 = sld [smem:[%s16747_s0 + %s14395_s22]]   ;;  %s14399_s22 = smov 56  }
  0x62   :  { %s14692_s14 = sld [smem:[%s16747_s0 + %s14397_s7]]   ;;  %s14401_s7 = smov 58  }
  0x63   :  { %16859 = sst [smem:[#allocation64_spill]] %s14657_s20 }
  0x64   :  { %s14677_s20 = sld [smem:[%s16747_s0 + %s14394_s15]]   ;;  %s14398_s15 = smov 55  }
  0x65   :  { %16860 = sst [smem:[#allocation65_spill]] %s14667_s4 }
  0x66   :  { %s14687_s4 = sld [smem:[%s16747_s0 + %s14396_s28]]   ;;  %s14400_s28 = smov 57  }
  0x67   :  { %16862 = sst [smem:[#allocation67_spill]] %s14682_s8 }
  0x68   :  { %16864 = sst [smem:[#allocation69_spill]] %s14692_s14 }
  0x69   :  { %s14702_s8 = sld [smem:[%s16747_s0 + %s14399_s22]]   ;;  %s14403_s22 = smov 60  }
  0x6a   :  { %16861 = sst [smem:[#allocation66_spill]] %s14677_s20 }
  0x6b   :  { %s14697_s20 = sld [smem:[%s16747_s0 + %s14398_s15]]   ;;  %s14402_s15 = smov 59  }
  0x6c   :  { %16863 = sst [smem:[#allocation68_spill]] %s14687_s4 }
  0x6d   :  { %s14707_s4 = sld [smem:[%s16747_s0 + %s14400_s28]]  }
  0x6e   :  { %s14712_s14 = sld [smem:[%s16747_s0 + %s14401_s7]]  }
  0x6f   :  { %16866 = sst [smem:[#allocation71_spill]] %s14702_s8 }
  0x70   :  { %s14722_s8 = sld [smem:[%s16747_s0 + %s14403_s22]]  }
  0x71   :  { %16865 = sst [smem:[#allocation70_spill]] %s14697_s20 }
  0x72   :  { %s14717_s20 = sld [smem:[%s16747_s0 + %s14402_s15]]  }
  0x73   :  { %16867 = sst [smem:[#allocation72_spill]] %s14707_s4 }
  0x76   :  { %16868 = sst [smem:[#allocation73_spill]] %s14722_s8 }
  0x77   :  { %126 = vsyncpa [#allocation3], 0 }
  0x78   :  { %127 = vsyncpa [#allocation6], 0 }
  0x79   :  { %128 = vsyncpa [#allocation9], 0 }
  0x7a   :  { %129 = vsyncpa [#allocation12], 0 }
  0x7b   :  { %130 = vsyncpa [#allocation15], 0 }
  0x7c   :  { %131 = vsyncpa [#allocation4], 0 }
  0x7d   :  { %133 = vsyncpa [#allocation4 + $0x1], 0  ;;  %s14724_s28 = smov 0   ;;  %s14726_s1 = smov 0  }
  0x7e   :  { %s14728_s2 = smov 0   ;;  %s14730_s7 = smov 0  }
  0x7f   :  { %16869 = sst [smem:[#allocation74_spill]] %s14728_s2 }
  0x80 LB: > { %s16871_s13 = sld [smem:[#allocation25_spill]]  ;;  %s14745_s0 = sadd.s32 4294967295, %s14342_s7   ;;  %s14330_s28 = sphi %s14724_s28, %s17063_s28   ;;  %s14342_s7 = sphi %s14730_s7, %s17062_s7   ;;  %s14334_s1 = sphi %s14726_s1, %s17064_s1  }
  0x81   : > { %s16872_s12 = sld [smem:[#allocation53_spill]]  ;;  %s10179_s10 = sadd.s32 4294967294, %s14342_s7  }
  0x82   : > { %s16873_s4 = sld [smem:[#allocation72_spill]]  ;;  %s14749_s11 = sadd.s32 1, %s14342_s7  }
  0x83   : > { %s16874_s6 = sld [smem:[#allocation51_spill]]  ;;  %s1428_s16 = ssub.s32 %s14342_s7, %s14749_s11 }
  0x84   : > { %s16875_s3 = sld [smem:[#allocation27_spill]]  ;;  %p1429_p1 = scmp.eq.s32.totalorder %s1428_s16, 0 }
  0x85   : > { %s16876_s2 = sld [smem:[#allocation74_spill]]  ;;  %p1442_p2 = scmp.eq.s32.totalorder %s14745_s0, 1 }
  0x86   : > { %16877 = sst [smem:[#allocation74_spill]] %s14330_s28  ;;  %p1447_p3 = scmp.ne.s32.totalorder %s14334_s1, %s14330_s28 }
  0x87   : > { %16878 = sst [smem:[#allocation75_spill]] %s14334_s1  ;;  %p1448_p4 = scmp.eq.s32.totalorder %s10179_s10, 1 }
  0x88   : > { %16880 = sst [smem:[#allocation77_spill]] %s14342_s7  ;;  %p10180_p7 = scmp.ge.s32.totalorder %s14342_s7, 1 }
  0x89   : > { %16881 = sst [smem:[#allocation78_spill]] %s14749_s11  ;;  %p14766_p6 = por %p1448_p4, %p1447_p3 }
  0x8a   : > { %p1455_p8 = scmp.lt.s32.totalorder %s14342_s7, 3  ;;  %p13738_p9 = scmp.eq.s32.totalorder %s14745_s0, 0 }
  0x8b   : > { %16879 = sst [smem:[#allocation76_spill]] %s16876_s2  ;;  %s1431_s15 = sadd.s32 1, %s16876_s2 }
  0x8c   : > { %p1441_p0 = scmp.ne.s32.totalorder %s16876_s2, %s14334_s1  ;;  %p14773_p10 = pnand %p10180_p7, %p1455_p8 }
  0x8d   : > { %s14760_s18 = scalar_select %p1429_p1, %s16876_s2, %s1431_s15  }
  0x8e   : > { %p14762_p5 = por %p1442_p2, %p1441_p0  ;;  %s1560_s10 = sshll.u32 %s16874_s6, 4  ;;  %s1561_s10 = int_to_ptr.hbm [resolvable:$true] %s1560_s10 }
  0x8f   : > { %16882 = sst [smem:[#allocation79_spill]] %s14760_s18  ;;  %p13709_p11 = pneg %p14773_p10 }
  0x90   : > { %s16883_s22 = scalar_select %p14762_p5, 1, 0 }
  0x91   : > { %s16885_s23 = scalar_select %p14766_p6, 1, 0 }
  0x92   : > { %16884 = sst [smem:[#allocation80_spill]] %s16883_s22  ;;  %s14404_s15 = smov [#allocation5]  }
  0x93   : > { %16886 = sst [smem:[#allocation81_spill]] %s16885_s23  ;;  %s1562_s16 = sshll.u32 %s14404_s15, 4  ;;  %s1563_s16 = int_to_ptr.vmem [resolvable:$true] %s1562_s16 }
  0x94   : > { %s1590_s18 = sshll.u32 %s14602_s30, 4  ;;  %p14783_p12 = pnand %p13738_p9, %p13709_p11  ;;  %s14787_s18 = int_to_ptr.hbm [resolvable:$true] %s1590_s18 }
  0x95   : > { %s1641_s11 = sshll.u32 %s14662_s29, 4  ;;  %s14405_s23 = smov [#allocation8]   ;;  %s14805_s11 = int_to_ptr.hbm [resolvable:$true] %s1641_s11 }
  0x96   : > { %s14790_s28 = sshll.u32 %s14405_s23, 4  ;;  %s14020_s7 = sshra.s32 %s1561_s10, 4  ;;  %s14021_s7 = int_to_ptr.hbm [resolvable:$true] %s14020_s7  ;;  %s1593_s28 = int_to_ptr.vmem [resolvable:$true] %s14790_s28 }
  0x97   : > { %s14022_s22 = scalar_lea.hbm %s14021_s7, 1  ;;  %p14794_p0 = pneg %p14783_p12 }
  0x98   : > { %p14023_p13 = scmp.ne.s32.totalorder %s14021_s7, %s14022_s22  ;;  %s14027_s8 = scalar_lea.hbm %s16874_s6, 1 }
  0x99   : > { %p14028_p3 = scmp.lt.s32.totalorder %s14021_s7, %s16874_s6  ;;  %p14029_p4 = scmp.lt.s32.totalorder %s14027_s8, %s14022_s22 }
  0x9a   : > { %p14025_p1 = pnand %p14794_p0, %p14023_p13 }
  0x9b   : > { %p14030_p7 = por %p14029_p4, %p14028_p3 }
  0x9c   : > { %p14026_p2 = pneg %p14025_p1 }
  0x9e   : > { %p14031_p8 = pnand %p14030_p7, %p14026_p2 }
  0xa0   : > { %14034 = shalt.err (!%p14031_p8)
}
  0xa1   : > { %13715 = dma.hbm_to_vmem [thread:$0]  (!%p14783_p12), %s1561_s10, 16, %s1563_s16, [#allocation6]  }
  0xa2   : > { %s14050_s23 = sshra.s32 %s14787_s18, 4  ;;  %s14057_s8 = scalar_lea.hbm %s14602_s30, 1  ;;  %s14051_s23 = int_to_ptr.hbm [resolvable:$true] %s14050_s23 }
  0xa3   : > { %s14052_s1 = scalar_lea.hbm %s14051_s23, 1  ;;  %p14058_p2 = scmp.lt.s32.totalorder %s14051_s23, %s14602_s30 }
  0xa4   : > { %p14053_p11 = scmp.ne.s32.totalorder %s14051_s23, %s14052_s1  ;;  %p14059_p3 = scmp.lt.s32.totalorder %s14057_s8, %s14052_s1 }
  0xa6   : > { %p14055_p13 = pnand %p14053_p11, %p14794_p0  ;;  %p14060_p4 = por %p14059_p3, %p14058_p2 }
  0xa8   : > { %p14056_p1 = pneg %p14055_p13 }
  0xaa   : > { %p14061_p7 = pnand %p14060_p4, %p14056_p1 }
  0xac   : > { %14064 = shalt.err (!%p14061_p7)
}
  0xad   : > { %13721 = dma.hbm_to_vmem [thread:$0]  (!%p14783_p12), %s14787_s18, 16, %s1593_s28, [#allocation9]  }
  0xae   : > { %s1542_s7 = sshll.u32 %s14562_s27, 4  ;;  %s14406_s22 = smov [#allocation11]   ;;  %s14816_s7 = int_to_ptr.hbm [resolvable:$true] %s1542_s7 }
  0xaf   : > { %s1643_s10 = sshll.u32 %s14406_s22, 4  ;;  %s14080_s16 = sshra.s32 %s14805_s11, 4  ;;  %s1644_s10 = int_to_ptr.vmem [resolvable:$true] %s1643_s10  ;;  %s14081_s16 = int_to_ptr.hbm [resolvable:$true] %s14080_s16 }
  0xb0   : > { %s14082_s1 = scalar_lea.hbm %s14081_s16, 1  ;;  %s14087_s23 = scalar_lea.hbm %s14662_s29, 1 }
  0xb1   : > { %p14083_p8 = scmp.ne.s32.totalorder %s14081_s16, %s14082_s1  ;;  %p14088_p1 = scmp.lt.s32.totalorder %s14081_s16, %s14662_s29 }
  0xb2   : > { %p14089_p2 = scmp.lt.s32.totalorder %s14087_s23, %s14082_s1 }
  0xb3   : > { %p14085_p11 = pnand %p14083_p8, %p14794_p0 }
  0xb4   : > { %p14090_p3 = por %p14089_p2, %p14088_p1 }
  0xb5   : > { %p14086_p13 = pneg %p14085_p11 }
  0xb7   : > { %p14091_p4 = pnand %p14090_p3, %p14086_p13 }
  0xb9   : > { %14094 = shalt.err (!%p14091_p4)
}
  0xba   : > { %13727 = dma.hbm_to_vmem [thread:$0]  (!%p14783_p12), %s14805_s11, 16, %s1644_s10, [#allocation12]  }
  0xbb   : > { %s14407_s28 = smov [#allocation2]   ;;  %s1575_s8 = sshll.u32 %s16872_s12, 4  ;;  %s14827_s8 = int_to_ptr.hbm [resolvable:$true] %s1575_s8 }
  0xbc   : > { %s1544_s18 = sshll.u32 %s14407_s28, 4  ;;  %s14110_s22 = sshra.s32 %s14816_s7, 4  ;;  %s1545_s18 = int_to_ptr.vmem [resolvable:$true] %s1544_s18  ;;  %s14111_s22 = int_to_ptr.hbm [resolvable:$true] %s14110_s22 }
  0xbd   : > { %s14112_s16 = scalar_lea.hbm %s14111_s22, 1  ;;  %s14117_s1 = scalar_lea.hbm %s14562_s27, 1 }
  0xbe   : > { %p14113_p7 = scmp.ne.s32.totalorder %s14111_s22, %s14112_s16  ;;  %p14118_p13 = scmp.lt.s32.totalorder %s14111_s22, %s14562_s27 }
  0xbf   : > { %p14119_p1 = scmp.lt.s32.totalorder %s14117_s1, %s14112_s16 }
  0xc0   : > { %p14115_p8 = pnand %p14113_p7, %p14794_p0 }
  0xc1   : > { %p14120_p2 = por %p14119_p1, %p14118_p13 }
  0xc2   : > { %p14116_p11 = pneg %p14115_p8 }
  0xc4   : > { %p14121_p3 = pnand %p14120_p2, %p14116_p11 }
  0xc6   : > { %14124 = shalt.err (!%p14121_p3)
}
  0xc7   : > { %13712 = dma.hbm_to_vmem [thread:$0]  (!%p14783_p12), %s14816_s7, 16, %s1545_s18, [#allocation3]  }
  0xc8   : > { %s1617_s11 = sshll.u32 %s14632_s19, 4  ;;  %s14408_s10 = smov [#allocation7]   ;;  %s14838_s11 = int_to_ptr.hbm [resolvable:$true] %s1617_s11 }
  0xc9   : > { %s1577_s23 = sshll.u32 %s14408_s10, 4  ;;  %s14140_s28 = sshra.s32 %s14827_s8, 4  ;;  %s1578_s23 = int_to_ptr.vmem [resolvable:$true] %s1577_s23  ;;  %s14141_s28 = int_to_ptr.hbm [resolvable:$true] %s14140_s28 }
  0xca   : > { %s14142_s22 = scalar_lea.hbm %s14141_s28, 1  ;;  %s14147_s16 = scalar_lea.hbm %s16872_s12, 1 }
  0xcb   : > { %p14143_p4 = scmp.ne.s32.totalorder %s14141_s28, %s14142_s22  ;;  %p14148_p11 = scmp.lt.s32.totalorder %s14141_s28, %s16872_s12 }
  0xcc   : > { %p14149_p13 = scmp.lt.s32.totalorder %s14147_s16, %s14142_s22 }
  0xcd   : > { %p14145_p7 = pnand %p14143_p4, %p14794_p0 }
  0xce   : > { %p14150_p1 = por %p14149_p13, %p14148_p11 }
  0xcf   : > { %p14146_p8 = pneg %p14145_p7 }
  0xd1   : > { %p14151_p2 = pnand %p14150_p1, %p14146_p8 }
  0xd3   : > { %14154 = shalt.err (!%p14151_p2)
}
  0xd4   : > { %13718 = dma.hbm_to_vmem [thread:$0]  (!%p14783_p12), %s14827_s8, 16, %s1578_s23, [#allocation6]  }
  0xd5   : > { %s14409_s7 = smov [#allocation10]   ;;  %s1656_s1 = sshll.u32 %s14672_s24, 4  ;;  %s14849_s1 = int_to_ptr.hbm [resolvable:$true] %s1656_s1 }
  0xd6   : > { %s1619_s18 = sshll.u32 %s14409_s7, 4  ;;  %s14170_s10 = sshra.s32 %s14838_s11, 4  ;;  %s1620_s18 = int_to_ptr.vmem [resolvable:$true] %s1619_s18  ;;  %s14171_s10 = int_to_ptr.hbm [resolvable:$true] %s14170_s10 }
  0xd7   : > { %s14172_s28 = scalar_lea.hbm %s14171_s10, 1  ;;  %s14177_s22 = scalar_lea.hbm %s14632_s19, 1 }
  0xd8   : > { %p14173_p3 = scmp.ne.s32.totalorder %s14171_s10, %s14172_s28  ;;  %p14178_p8 = scmp.lt.s32.totalorder %s14171_s10, %s14632_s19 }
  0xd9   : > { %p14179_p11 = scmp.lt.s32.totalorder %s14177_s22, %s14172_s28 }
  0xda   : > { %p14175_p4 = pnand %p14173_p3, %p14794_p0 }
  0xdb   : > { %p14180_p13 = por %p14179_p11, %p14178_p8 }
  0xdc   : > { %p14176_p7 = pneg %p14175_p4 }
  0xde   : > { %p14181_p1 = pnand %p14180_p13, %p14176_p7 }
  0xe0   : > { %14184 = shalt.err (!%p14181_p1)
}
  0xe1   : > { %13724 = dma.hbm_to_vmem [thread:$0]  (!%p14783_p12), %s14838_s11, 16, %s1620_s18, [#allocation9]  }
  0xe2   : > { %s1692_s8 = sshll.u32 %s14717_s20, 4  ;;  %s14410_s23 = smov [#allocation13]   ;;  %s14860_s8 = int_to_ptr.hbm [resolvable:$true] %s1692_s8 }
  0xe3   : > { %s1658_s16 = sshll.u32 %s14410_s23, 4  ;;  %s14200_s7 = sshra.s32 %s14849_s1, 4  ;;  %s1659_s16 = int_to_ptr.vmem [resolvable:$true] %s1658_s16  ;;  %s14201_s7 = int_to_ptr.hbm [resolvable:$true] %s14200_s7 }
  0xe4   : > { %s14202_s10 = scalar_lea.hbm %s14201_s7, 1  ;;  %s14207_s28 = scalar_lea.hbm %s14672_s24, 1 }
  0xe5   : > { %p14203_p2 = scmp.ne.s32.totalorder %s14201_s7, %s14202_s10  ;;  %p14208_p7 = scmp.lt.s32.totalorder %s14201_s7, %s14672_s24 }
  0xe6   : > { %p14209_p8 = scmp.lt.s32.totalorder %s14207_s28, %s14202_s10 }
  0xe7   : > { %p14205_p3 = pnand %p14203_p2, %p14794_p0 }
  0xe8   : > { %p14210_p11 = por %p14209_p8, %p14208_p7 }
  0xe9   : > { %p14206_p4 = pneg %p14205_p3 }
  0xeb   : > { %p14211_p13 = pnand %p14210_p11, %p14206_p4 }
  0xed   : > { %14214 = shalt.err (!%p14211_p13)
}
  0xee   : > { %13730 = dma.hbm_to_vmem [thread:$0]  (!%p14783_p12), %s14849_s1, 16, %s1659_s16, [#allocation12]  }
  0xef   : > { %s14411_s11 = smov [#allocation14]   ;;  %s14230_s22 = sshra.s32 %s14860_s8, 4  ;;  %s14231_s22 = int_to_ptr.hbm [resolvable:$true] %s14230_s22 }
  0xf0   : > { %s1694_s18 = sshll.u32 %s14411_s11, 4  ;;  %s14232_s23 = scalar_lea.hbm %s14231_s22, 1  ;;  %s1695_s18 = int_to_ptr.vmem [resolvable:$true] %s1694_s18 }
  0xf1   : > { %p14233_p1 = scmp.ne.s32.totalorder %s14231_s22, %s14232_s23  ;;  %s14237_s7 = scalar_lea.hbm %s14717_s20, 1 }
  0xf2   : > { %p14238_p4 = scmp.lt.s32.totalorder %s14231_s22, %s14717_s20  ;;  %p14239_p7 = scmp.lt.s32.totalorder %s14237_s7, %s14232_s23 }
  0xf3   : > { %p14235_p2 = pnand %p14233_p1, %p14794_p0 }
  0xf4   : > { %p14240_p8 = por %p14239_p7, %p14238_p4 }
  0xf5   : > { %p14236_p3 = pneg %p14235_p2 }
  0xf7   : > { %p14241_p11 = pnand %p14240_p8, %p14236_p3 }
  0xf9   : > { %14244 = shalt.err (!%p14241_p11)
}
  0xfa   : > { %13733 = dma.hbm_to_vmem [thread:$0]  (!%p14783_p12), %s14860_s8, 16, %s1695_s18, [#allocation15]  }
  0xfb   : > { %1746 = sbr.rel (%p14773_p10) target bundleno = 5330 (0x14d2), region = 260 }
 0x100   : > { %14305 = dma.done.wait (%p13738_p9), [#allocation3], 16  }
 0x101   : > { %14307 = vsyncadd (%p13738_p9), [#allocation3], 4294967280 }
 0x102   : > { %14309 = dma.done.wait (%p13738_p9), [#allocation6], 32  }
 0x103   : > { %14311 = vsyncadd (%p13738_p9), [#allocation6], 4294967264 }
 0x104   : > { %14313 = dma.done.wait (%p13738_p9), [#allocation9], 32  }
 0x105   : > { %14315 = vsyncadd (%p13738_p9), [#allocation9], 4294967264 }
 0x106   : > { %14317 = dma.done.wait (%p13738_p9), [#allocation12], 32  }
 0x107   : > { %14319 = vsyncadd (%p13738_p9), [#allocation12], 4294967264 }
 0x108   : > { %14321 = dma.done.wait (%p13738_p9), [#allocation15], 16  }
 0x109   : > { %14323 = vsyncadd (%p13738_p9), [#allocation15], 4294967280  ;;  %s16890_s5 = sld [smem:[#allocation23_spill]]  ;;  %p1939_p10 = scmp.lt.s32.totalorder %s14745_s0, 1  ;;  %vm16795_vm0 = vcmask 1041408   ;;  %v13131_v2 = vld [vmem:[%s14437_s17 + $0x78] sm:$0xff] }
 0x10a   : > { %v13123_v3 = vld [vmem:[%s14437_s17 + $0x38] sm:$0xff]  ;;  %v1966_v6 = vld [vmem:[%s16871_s13] sm:$0xf]  ;;  %vm1967_vm1 = vcmask 31744   ;;  %v10208_v7 = vld [vmem:[%s16871_s13 + $0x4] sm:$0xf] }
 0x10b   : > { %s14902_s2 = scalar_select %p1939_p10, %s14745_s0, 1  ;;  %v13139_v4 = vld [vmem:[%s14437_s17 + $0xb8] sm:$0xff]  ;;  %v10290_v8 = vld [vmem:[%s16871_s13 + $0x8] sm:$0xf]  ;;  %v13130_v9 = vld [vmem:[%s14437_s17 + $0x70] sm:$0xff]  ;;  %2150 = vmatpush.bf16.msra.mxu3 %v13123_v3  ;;  %vm2452_vm2 = vcmask 523264  }
 0x10c   : > { %v13122_v10 = vld [vmem:[%s14437_s17 + $0x30] sm:$0xff]  ;;  %v13129_v12 = vld [vmem:[%s14437_s17 + $0x68] sm:$0xff]  ;;  %v13128_v15 = vld [vmem:[%s14437_s17 + $0x60] sm:$0xff]  ;;  %s16891_s9 = sld [smem:[#allocation24_spill]]  ;;  %vm2615_vm3 = vcmask 1043456   ;;  %vm2611_vm4 = vcmask 64512  }
 0x10d   : > { %s10200_s26 = sshll.u32 %s14902_s2, 2  ;;  %v13138_v11 = vld [vmem:[%s14437_s17 + $0xb0] sm:$0xff]  ;;  %v13121_v13 = vld [vmem:[%s14437_s17 + $0x28] sm:$0xff]  ;;  %v13120_v16 = vld [vmem:[%s14437_s17 + $0x20] sm:$0xff]  ;;  %s13114_s1 = sshll.u32 %s14902_s2, 4  ;;  %vm16797_vm13 = vcmask 785408  }
 0x10e   : > { %v13137_v14 = vld [vmem:[%s14437_s17 + $0xa8] sm:$0xff]  ;;  %v13136_v17 = vld [vmem:[%s14437_s17 + $0xa0] sm:$0xff]  ;;  %v13127_v18 = vld [vmem:[%s14437_s17 + $0x58] sm:$0xff]  ;;  %s16892_s16 = sld [smem:[#allocation29_spill]]  ;;  %vm4038_vm14 = vcmask 1045504   ;;  %vm4034_vm15 = vcmask 97280  }
 0x10f   : > { %s1942_s15 = scalar_lea.vmem %s16890_s5, %s10200_s26  ;;  %2151 = vmatpush.bf16.msra.mxu3 %v13122_v10  ;;  %v13119_v19 = vld [vmem:[%s14437_s17 + $0x18] sm:$0xff]  ;;  %v13126_v21 = vld [vmem:[%s14437_s17 + $0x50] sm:$0xff]  ;;  %v13125_v24 = vld [vmem:[%s14437_s17 + $0x48] sm:$0xff]  ;;  %s16893_s10 = sld [smem:[#allocation28_spill]] }
 0x110   : > { %v1964_v0 = vld [vmem:[%s1942_s15] sm:$0xf]  ;;  %v13135_v20 = vld [vmem:[%s14437_s17 + $0x98] sm:$0xff]  ;;  %v13118_v22 = vld [vmem:[%s14437_s17 + $0x10] sm:$0xff]  ;;  %s16894_s28 = sld [smem:[#allocation31_spill]] }
 0x111   : > { %v1965_v1 = vpack.c.bf16 %v1964_v0, %v1964_v0  ;;  %v13134_v23 = vld [vmem:[%s14437_s17 + $0x90] sm:$0xff]  ;;  %v13124_v25 = vld [vmem:[%s14437_s17 + $0x40] sm:$0xff]  ;;  %v13117_v26 = vld [vmem:[%s14437_s17 + $0x8] sm:$0xff]  ;;  %s16896_s18 = sld [smem:[#allocation26_spill]] }
 0x112   : > { %v13133_v27 = vld [vmem:[%s14437_s17 + $0x88] sm:$0xff]  ;;  %v13116_v28 = vld [vmem:[%s14437_s17] sm:$0xff]  ;;  %v13155_v30 = vld [vmem:[%s16875_s3 + $0x38] sm:$0xff]  ;;  %s1947_s8 = scalar_lea.vmem %s16891_s9, %s13114_s1  ;;  %s16897_s22 = sld [smem:[#allocation30_spill]] }
 0x113   : > { %v1973_v5 = vsel %vm16795_vm0, %v1965_v1, 0  ;;  %2152 = vmatpush.bf16.msra.mxu3 %v13121_v13  ;;  %v13132_v29 = vld [vmem:[%s14437_s17 + $0x80] sm:$0xff]  ;;  %v13147_v31 = vld [vmem:[%s14447_s25 + $0x38] sm:$0xff]  ;;  %v13154_v32 = vld [vmem:[%s16875_s3 + $0x30] sm:$0xff]  ;;  %s16898_s23 = sld [smem:[#allocation32_spill]] }
 0x114   : > { %1982 = vmatpush.bf16.msra.mxu2 %v1973_v5  ;;  %2017 = vmatpush.bf16.msra.mxu1 %v1973_v5  ;;  %v13159_v33 = vld [vmem:[%s16875_s3 + $0x58] sm:$0xff]  ;;  %v13146_v34 = vld [vmem:[%s14447_s25 + $0x30] sm:$0xff]  ;;  %v13153_v36 = vld [vmem:[%s16875_s3 + $0x28] sm:$0xff]  ;;  %s16899_s7 = sld [smem:[#allocation33_spill]] }
 0x115   : > { %2175 = vmatpush.bf16.msra.mxu0 %v1973_v5  ;;  %v13158_v35 = vld [vmem:[%s16875_s3 + $0x50] sm:$0xff]  ;;  %v13145_v37 = vld [vmem:[%s14447_s25 + $0x28] sm:$0xff]  ;;  %v13152_v39 = vld [vmem:[%s16875_s3 + $0x20] sm:$0xff]  ;;  %s16901_s15 = sld [smem:[#allocation37_spill]] }
 0x116   : > { %v13157_v38 = vld [vmem:[%s16875_s3 + $0x48] sm:$0xff]  ;;  %v13144_v40 = vld [vmem:[%s14447_s25 + $0x20] sm:$0xff]  ;;  %v13151_v42 = vld [vmem:[%s16875_s3 + $0x18] sm:$0xff]  ;;  %s16895_s11 = smov %s16894_s28  ;;  %s16902_s1 = sld [smem:[#allocation34_spill]] }
 0x117   : > { %10207 = vmatmul.msk.bf16.vlgmr.msra.gmra.mxu2 %vm1967_vm1, %v1966_v6  ;;  %10209 = vmatmul.msk.bf16.vlgmr.msra.gmra.mxu1 %vm1967_vm1, %v10208_v7  ;;  %v13156_v41 = vld [vmem:[%s16875_s3 + $0x40] sm:$0xff]  ;;  %v13150_v44 = vld [vmem:[%s16875_s3 + $0x10] sm:$0xff]  ;;  %v13149_v48 = vld [vmem:[%s16875_s3 + $0x8] sm:$0xff]  ;;  %s16914_s5 = sld [smem:[#allocation44_spill]] }
 0x118   : > { %2089 = vmatpush.bf16.msrb.mxu2 %v13131_v2  ;;  %2247 = vmatpush.bf16.msrb.mxu1 %v13139_v4  ;;  %v13148_v52 = vld [vmem:[%s16875_s3] sm:$0xff]  ;;  %v13143_v57 = vld [vmem:[%s14447_s25 + $0x18] sm:$0xff]  ;;  %v14957_v58 = vld [vmem:[%s1947_s8 + $0x8] sm:$0xff] }
 0x119   : > { %10291 = vmatmul.msk.bf16.vlgmr.msra.gmra.mxu0 %vm1967_vm1, %v10290_v8  ;;  %2153 = vmatpush.bf16.msra.mxu3 %v13120_v16  ;;  %v14952_v54 = vld [vmem:[%s1947_s8] sm:$0xff]  ;;  %v2270_v59 = vpack.c.bf16 %v14957_v58, %v14957_v58  ;;  %v13142_v60 = vld [vmem:[%s14447_s25 + $0x10] sm:$0xff]  ;;  %v13141_v61 = vld [vmem:[%s14447_s25 + $0x8] sm:$0xff]  ;;  %s16903_s8 = sld [smem:[#allocation36_spill]]  ;;  %vm3913_vm1 = vcmask 392192  }
 0x11a   : > { %2339 = vmatpush.bf16.msrb.mxu0 %v13147_v31  ;;  %v2269_v56 = vpack.c.bf16 %v14952_v54, %v14952_v54  ;;  %v13140_v62 = vld [vmem:[%s14447_s25] sm:$0xff]  ;;  %v10447_v13 = vld [vmem:[%s16892_s16 + $0x30] sm:$0xf]  ;;  %v10441_v31 = vld [vmem:[%s16892_s16 + $0x28] sm:$0xf0]  ;;  %s16900_s26 = smov %s16899_s7 }
 0x11b   : > { %v13857_v4 = vld [vmem:[%s14442_s21] ss:$0 sm:$0xff] }
 0x11c   : > { %2090 = vmatpush.bf16.msrb.mxu2 %v13130_v9  ;;  %2248 = vmatpush.bf16.msrb.mxu1 %v13138_v11 }
 0x11d   : > { %2154 = vmatpush.bf16.msra.mxu3 %v13119_v19 }
 0x11e   : > { %2340 = vmatpush.bf16.msrb.mxu0 %v13146_v34  ;;  %v10433_v34 = vld [vmem:[%s16892_s16 + $0x18] sm:$0xf0] }
 0x120   : > { %2091 = vmatpush.bf16.msrb.mxu2 %v13129_v12  ;;  %2249 = vmatpush.bf16.msrb.mxu1 %v13137_v14  ;;  %v13167_v14 = vld [vmem:[%s16892_s16 + $0x34] sm:$0xf0] }
 0x121   : > { %2155 = vmatpush.bf16.msra.mxu3 %v13118_v22  ;;  %v10448_v16 = vor.u32 %v13167_v14, %v10447_v13 }
 0x122   : > { %2341 = vmatpush.bf16.msrb.mxu0 %v13145_v37  ;;  %v10425_v37 = vld [vmem:[%s16892_s16 + $0x8] sm:$0xf0] }
 0x124   : > { %2092 = vmatpush.bf16.msrb.mxu2 %v13128_v15  ;;  %2250 = vmatpush.bf16.msrb.mxu1 %v13136_v17  ;;  %v10439_v15 = vld [vmem:[%s16892_s16 + $0x20] sm:$0xf]  ;;  %v13165_v17 = vld [vmem:[%s16892_s16 + $0x24] sm:$0xf0] }
 0x125   : > { %2156 = vmatpush.bf16.msra.mxu3 %v13117_v26 }
 0x126   : > { %2342 = vmatpush.bf16.msrb.mxu0 %v13144_v40  ;;  %v14992_v40 = vld [vmem:[%s16894_s28] sm:$0xf]  ;;  %s16905_s28 = sld [smem:[#allocation39_spill]] }
 0x128   : > { %2093 = vmatpush.bf16.msrb.mxu2 %v13127_v18  ;;  %2251 = vmatpush.bf16.msrb.mxu1 %v13135_v20  ;;  %v10440_v18 = vor.u32 %v13165_v17, %v10439_v15  ;;  %v10431_v20 = vld [vmem:[%s16892_s16 + $0x10] sm:$0xf]  ;;  %v13175_v17 = vld [vmem:[%s16898_s23 + $0x38] sm:$0xff] }
 0x129   : > { %2157 = vmatpush.bf16.msra.mxu3 %v13116_v28  ;;  %v10449_v28 = vld [vmem:[%s16892_s16 + $0x38] sm:$0xf0] }
 0x12a   : > { %2343 = vmatpush.bf16.msrb.mxu0 %v13143_v57 }
 0x12c   : > { %2094 = vmatpush.bf16.msrb.mxu2 %v13126_v21  ;;  %2252 = vmatpush.bf16.msrb.mxu1 %v13134_v23  ;;  %v13163_v21 = vld [vmem:[%s16892_s16 + $0x14] sm:$0xf0] }
 0x12d   : > { %2473 = vmatpush.bf16.msrb.mxu3 %v13159_v33  ;;  %v10432_v23 = vor.u32 %v13163_v21, %v10431_v20  ;;  %v13162_v33 = vld [vmem:[%s16892_s16 + $0x14] sm:$0xf] }
 0x12e   : > { %2344 = vmatpush.bf16.msrb.mxu0 %v13142_v60  ;;  %v13174_v21 = vld [vmem:[%s16898_s23 + $0x30] sm:$0xff] }
 0x130   : > { %2095 = vmatpush.bf16.msrb.mxu2 %v13125_v24  ;;  %2253 = vmatpush.bf16.msrb.mxu1 %v13133_v27  ;;  %v10423_v24 = vld [vmem:[%s16892_s16] sm:$0xf]  ;;  %v13166_v27 = vld [vmem:[%s16892_s16 + $0x34] sm:$0xf] }
 0x131   : > { %2474 = vmatpush.bf16.msrb.mxu3 %v13158_v35  ;;  %v10436_v35 = vor.u32 %v13162_v33, %v10433_v34  ;;  %v13171_v34 = vld [vmem:[%s16898_s23 + $0x18] sm:$0xff] }
 0x132   : > { %2345 = vmatpush.bf16.msrb.mxu0 %v13141_v61 }
 0x134   : > { %2096 = vmatpush.bf16.msrb.mxu2 %v13124_v25  ;;  %2254 = vmatpush.bf16.msrb.mxu1 %v13132_v29  ;;  %v13161_v25 = vld [vmem:[%s16892_s16 + $0x4] sm:$0xf0]  ;;  %v10452_v29 = vor.u32 %v13166_v27, %v10449_v28 }
 0x135   : > { %2475 = vmatpush.bf16.msrb.mxu3 %v13157_v38  ;;  %v10424_v26 = vor.u32 %v13161_v25, %v10423_v24 }
 0x136   : > { %2346 = vmatpush.bf16.msrb.mxu0 %v13140_v62 }
 0x138   : > { %2456 = vmatpush.bf16.msra.mxu2 %v13155_v30  ;;  %v13164_v30 = vld [vmem:[%s16892_s16 + $0x24] sm:$0xf] }
 0x139   : > { %2476 = vmatpush.bf16.msrb.mxu3 %v13156_v41 }
 0x13c   : > { %2457 = vmatpush.bf16.msra.mxu2 %v13154_v32  ;;  %v10444_v32 = vor.u32 %v13164_v30, %v10441_v31 }
 0x140   : > { %2458 = vmatpush.bf16.msra.mxu2 %v13153_v36  ;;  %v13160_v36 = vld [vmem:[%s16892_s16 + $0x4] sm:$0xf] }
 0x141   : > { %v10428_v38 = vor.u32 %v13160_v36, %v10425_v37 }
 0x144   : > { %2459 = vmatpush.bf16.msra.mxu2 %v13152_v39  ;;  %v13858_v39 = vld [vmem:[%s16893_s10] ss:$0 sm:$0xff]  ;;  %s16904_s10 = sld [smem:[#allocation41_spill]] }
 0x148   : > { %2460 = vmatpush.bf16.msra.mxu2 %v13151_v42  ;;  %v13859_v42 = vld [vmem:[%s16896_s18] ss:$0 sm:$0xff]  ;;  %s16906_s18 = smov %s16905_s28 }
 0x14c   : > { %2461 = vmatpush.bf16.msra.mxu2 %v13150_v44 }
 0x150   : > { %2462 = vmatpush.bf16.msra.mxu2 %v13149_v48 }
 0x154   : > { %2463 = vmatpush.bf16.msra.mxu2 %v13148_v52 }
 0x194   : > { %v2019_v43 = vpop.f32.mrf.mxu1 }
 0x195   : > { %v2023_v45 = vpack.c.bf16 %v2019_v43, %v2019_v43 }
 0x196   : > { %v2177_v46 = vpop.f32.mrf.mxu0 }
 0x197   : > { %v2181_v47 = vpack.c.bf16 %v2177_v46, %v2177_v46  ;;  %2097 = vmatmul.bf16.vlgmr.msrb.gmra.mxu2 %v2023_v45 }
 0x199   : > { %2255 = vmatmul.bf16.vlgmr.msrb.gmra.mxu1 %v2181_v47 }
 0x19a   : > { %v1984_v49 = vpop.f32.mrf.mxu2 }
 0x19b   : > { %v1988_v50 = vpack.c.bf16 %v1984_v49, %v1984_v49 }
 0x19c   : > { %v2021_v51 = vpop.f32.mrf.mxu1 }
 0x19d   : > { %2158 = vmatmul.bf16.vlgmr.msra.gmra.mxu3 %v1988_v50  ;;  %v2493_v50 = vld [vmem:[%s16897_s22] sm:$0x3]  ;;  %s16907_s22 = sld [smem:[#allocation35_spill]] }
 0x19e   : > { %v2179_v53 = vpop.f32.mrf.mxu0  ;;  %2546 = vmatpush.bf16.msra.mxu3 %v10448_v16  ;;  %v2495_v51 = vperm.slane %v2493_v50, 0  ;;  %v2496_v60 = vperm.slane %v2493_v50, 1 }
 0x1a2   : > { %v1986_v55 = vpop.f32.mrf.mxu2  ;;  %2547 = vmatpush.bf16.msra.mxu3 %v10440_v18 }
 0x1a6   : > { %2548 = vmatpush.bf16.msra.mxu3 %v10432_v23 }
 0x1a7   : > { %2464 = vmatmul.bf16.vlgmr.msra.gmra.mxu2 %v2269_v56 }
 0x1aa   : > { %2549 = vmatpush.bf16.msra.mxu3 %v10424_v26 }
 0x1ad   : > { %10420 = vmatmul.msk.bf16.vlgmr.msrb.gmra.mxu3 %vm2452_vm2, %v2270_v59 }
 0x1ae   : > { %2559 = vmatpush.bf16.msrb.mxu3 %v10452_v29  ;;  %v13172_v29 = vld [vmem:[%s16898_s23 + $0x20] sm:$0xff] }
 0x1b2   : > { %2560 = vmatpush.bf16.msrb.mxu3 %v10444_v32 }
 0x1b6   : > { %2561 = vmatpush.bf16.msrb.mxu3 %v10436_v35  ;;  %v13195_v35 = vld [vmem:[%s16898_s23 + $0x78] sm:$0xff] }
 0x1ba   : > { %2562 = vmatpush.bf16.msrb.mxu3 %v10428_v38  ;;  %v13183_v38 = vld [vmem:[%s16899_s7 + $0x38] sm:$0xff]  ;;  %s13115_s7 = sshll.u32 %s14902_s2, 5 }
 0x216   : > { %v2256_v63 = vpop.f32.mrf.mxu1 }
 0x21a   : > { %v2098_v0 = vpop.f32.mrf.mxu2 }
 0x21e   : > { %v2258_v1 = vpop.f32.mrf.mxu1 }
 0x220   : > { %v2159_v2 = vpop.f32.mrf.mxu3 }
 0x221   : > { %v2160_v3 = vadd.f32 %v2159_v2, %v2098_v0 }
 0x222   : > { %v2100_v5 = vpop.f32.mrf.mxu2 }
 0x223   : > { %v2260_v6 = vadd.f32 %v2256_v63, %v2160_v3 }
 0x225   : > { %v2265_v7 = vadd.f32 %v13857_v4, %v2260_v6 }
 0x227   : > { %v14966_v8 = vpack.c.bf16 %v2265_v7, %v2265_v7 }
 0x228   : > { %v2161_v9 = vpop.f32.mrf.mxu3 }
 0x229   : > { %2347 = vmatmul.bf16.vlgmr.msrb.gmra.mxu0 %v14966_v8  ;;  %v14971_v10 = vsel %vm2615_vm3, %v14966_v8, 0 }
 0x22a   : > { %2626 = vmatpush.bf16.msra.mxu0 %v14971_v10  ;;  %v2465_v11 = vpop.f32.mrf.mxu2 }
 0x22b   : > { %v2466_v41 = vadd.f32 %v13858_v39, %v2465_v11  ;;  %v13194_v39 = vld [vmem:[%s16898_s23 + $0x70] sm:$0xff] }
 0x230   : > { %v2478_v19 = vpop.f32.mrf.mxu3 }
 0x231   : > { %v2479_v43 = vadd.f32 %v2478_v19, %v2466_v41  ;;  %v13182_v41 = vld [vmem:[%s16900_s26 + $0x30] sm:$0xff] }
 0x232   : > { %v2467_v12 = vpop.f32.mrf.mxu2 }
 0x238   : > { %v2480_v22 = vpop.f32.mrf.mxu3 }
 0x239   : > { %10457 = vmatmul.msk.bf16.vlgmr.msra.gmra.mxu0 %vm2611_vm4, %v14992_v40 }
 0x2a6   : > { %v2348_v44 = vpop.f32.mrf.mxu0 }
 0x2a7   : > { %v2349_v45 = vadd.f32 %v13859_v42, %v2348_v44  ;;  %v13187_v42 = vld [vmem:[%s16900_s26 + $0x58] sm:$0xff]  ;;  %v13169_v44 = vld [vmem:[%s16898_s23 + $0x8] sm:$0xff] }
 0x2a8   : > { %2799 = vmatpush.bf16.msrb.mxu0 %v13187_v42  ;;  %v13216_v42 = vld [vmem:[%s16900_s26 + $0xc0] sm:$0xff] }
 0x2a9   : > { %v2482_v46 = vadd.f32 %v2479_v43, %v2349_v45  ;;  %v13186_v43 = vld [vmem:[%s16900_s26 + $0x50] sm:$0xff]  ;;  %v13193_v45 = vld [vmem:[%s16898_s23 + $0x68] sm:$0xff] }
 0x2ab   : > { %v2483_v47 = vmax.f32 %v2482_v46, 0.0  ;;  %v13181_v46 = vld [vmem:[%s16900_s26 + $0x28] sm:$0xff] }
 0x2ac   : > { %2800 = vmatpush.bf16.msrb.mxu0 %v13186_v43 }
 0x2ad   : > { %v2484_v48 = vpack.c.bf16 %v2483_v47, %v2483_v47  ;;  %v13185_v47 = vld [vmem:[%s16900_s26 + $0x48] sm:$0xff] }
 0x2ae   : > { %v2350_v49 = vpop.f32.mrf.mxu0 }
 0x2af   : > { %10453 = vmatmul.msk.bf16.vlgmr.msra.gmra.mxu3 %vm2452_vm2, %v2484_v48  ;;  %v13192_v49 = vld [vmem:[%s16898_s23 + $0x60] sm:$0xff] }
 0x2b0   : > { %2782 = vmatpush.bf16.msra.mxu3 %v13183_v38  ;;  %2801 = vmatpush.bf16.msrb.mxu0 %v13185_v47  ;;  %v13226_v38 = vld [vmem:[%s16900_s26 + $0x110] sm:$0xff] }
 0x2b4   : > { %2783 = vmatpush.bf16.msra.mxu3 %v13182_v41  ;;  %v13225_v41 = vld [vmem:[%s16900_s26 + $0x108] sm:$0xff] }
 0x2b6   : > { %v2628_v26 = vpop.f32.mrf.mxu0 }
 0x2b7   : > { %v2632_v50 = vpack.c.bf16 %v2628_v26, %v2628_v26  ;;  %v13209_v26 = vld [vmem:[%s16898_s23 + $0x88] sm:$0xff] }
 0x2b8   : > { %2784 = vmatpush.bf16.msra.mxu3 %v13181_v46 }
 0x2be   : > { %v2630_v36 = vpop.f32.mrf.mxu0 }
 0x2bf   : > { %10454 = vmatmul.msk.bf16.vlgmr.msrb.gmra.mxu3 %vm2452_vm2, %v2484_v48  ;;  %v13168_v48 = vld [vmem:[%s16898_s23] sm:$0xff]  ;;  %v13227_v36 = vld [vmem:[%s16900_s26 + $0x118] sm:$0xff] }
 0x332   : > { %v2551_v52 = vpop.f32.mrf.mxu3 }
 0x333   : > { %v2552_v53 = vadd.f32 %v2551_v52, %v2495_v51  ;;  %v13184_v51 = vld [vmem:[%s16900_s26 + $0x40] sm:$0xff]  ;;  %v13191_v52 = vld [vmem:[%s16898_s23 + $0x58] sm:$0xff] }
 0x334   : > { %2802 = vmatpush.bf16.msrb.mxu0 %v13184_v51 }
 0x335   : > { %v10455_v55 = vmul.f32 -1.442695, %v2552_v53  ;;  %v13203_v53 = vld [vmem:[%s16900_s26 + $0x98] sm:$0xff] }
 0x337   : > { %13872 = vpow2.f32 %v10455_v55  ;;  %v13179_v55 = vld [vmem:[%s16900_s26 + $0x18] sm:$0xff] }
 0x338   : > { %3047 = vmatpush.bf16.msra.mxu0 %v13203_v53 }
 0x33a   : > { %v2553_v56 = vpop.f32.mrf.mxu3 }
 0x33b   : > { %v13190_v56 = vld [vmem:[%s16898_s23 + $0x50] sm:$0xff] }
 0x33d   : > { %v13873_v57 = vpop.eup %13872 }
 0x33e   : > { %v2574_v59 = vadd.f32 1.0, %v13873_v57  ;;  %v13178_v57 = vld [vmem:[%s16900_s26 + $0x10] sm:$0xff] }
 0x340   : > { %13874 = vrcp.f32 %v2574_v59  ;;  %v2587_v4 = vand.u32 2147483648, %v2574_v59  ;;  %v2585_v6 = vand.u32 2147483647, %v2574_v59  ;;  %vm2581_vm6 = vweird.f32 %v2574_v59 }
 0x342   : > { %v2564_v61 = vpop.f32.mrf.mxu3  ;;  %v2588_v12 = vor.u32 1.1754944e-38, %v2587_v4  ;;  %vm2586_vm8 = vcmp.eq.f32.partialorder %v2585_v6, 8.507059e+37  ;;  %v13201_v4 = vld [vmem:[%s16900_s26 + $0x88] sm:$0xff]  ;;  %v13198_v6 = vld [vmem:[%s16900_s26 + $0x70] sm:$0xff] }
 0x343   : > { %v2565_v62 = vadd.f32 %v2564_v61, %v2496_v60  ;;  %v13177_v60 = vld [vmem:[%s16900_s26 + $0x8] sm:$0xff]  ;;  %v13176_v61 = vld [vmem:[%s16900_s26] sm:$0xff] }
 0x345   : > { %v10456_v63 = vmul.f32 -1.442695, %v2565_v62  ;;  %v13207_v62 = vld [vmem:[%s16900_s26 + $0xb8] sm:$0xff] }
 0x346   : > { %v13875_v0 = vpop.eup %13874 }
 0x347   : > { %v2577_v1 = vmul.f32 %v13875_v0, %v2574_v59  ;;  %13876 = vpow2.f32 %v10456_v63  ;;  %vm2582_vm5 = vweird.f32 %v13875_v0  ;;  %v13189_v59 = vld [vmem:[%s16898_s23 + $0x48] sm:$0xff]  ;;  %v10662_v63 = vld [vmem:[%s16895_s11 + $0x4] sm:$0xf] }
 0x348   : > { %vm2583_vm7 = vmor %vm2581_vm6, %vm2582_vm5 }
 0x349   : > { %v2578_v2 = vsub.f32 1.0, %v2577_v1  ;;  %v13205_v1 = vld [vmem:[%s16900_s26 + $0xa8] sm:$0xff] }
 0x34a   : > { %v2566_v3 = vpop.f32.mrf.mxu3 }
 0x34b   : > { %v2579_v5 = vmul.f32 %v13875_v0, %v2578_v2  ;;  %v13202_v2 = vld [vmem:[%s16900_s26 + $0x90] sm:$0xff]  ;;  %v13204_v3 = vld [vmem:[%s16900_s26 + $0xa0] sm:$0xff] }
 0x34c   : > { %3048 = vmatpush.bf16.msra.mxu0 %v13202_v2 }
 0x34d   : > { %v13877_v7 = vpop.eup %13876  ;;  %v2580_v9 = vadd.f32 %v13875_v0, %v2579_v5  ;;  %v13200_v5 = vld [vmem:[%s16900_s26 + $0x80] sm:$0xff] }
 0x34e   : > { %v2575_v11 = vadd.f32 1.0, %v13877_v7  ;;  %v13197_v7 = vld [vmem:[%s16900_s26 + $0x68] sm:$0xff] }
 0x34f   : > { %v2584_v13 = vsel %vm2583_vm7, %v13875_v0, %v2580_v9  ;;  %v13206_v0 = vld [vmem:[%s16900_s26 + $0xb0] sm:$0xff]  ;;  %v13196_v9 = vld [vmem:[%s16900_s26 + $0x60] sm:$0xff] }
 0x350   : > { %13878 = vrcp.f32 %v2575_v11  ;;  %v2589_v14 = vsel %vm2586_vm8, %v2588_v12, %v2584_v13  ;;  %v2602_v23 = vand.u32 2147483648, %v2575_v11  ;;  %v2600_v25 = vand.u32 2147483647, %v2575_v11  ;;  %3049 = vmatpush.bf16.msra.mxu0 %v13201_v4  ;;  %v13235_v4 = vld [vmem:[%s16901_s15 + $0x30] sm:$0xff] }
 0x351   : > { %v2606_v15 = vmul.f32 %v2589_v14, %v14952_v54  ;;  %v13173_v54 = vld [vmem:[%s16898_s23 + $0x28] sm:$0xff]  ;;  %vm2596_vm10 = vweird.f32 %v2575_v11 }
 0x352   : > { %v2603_v28 = vor.u32 1.1754944e-38, %v2602_v23  ;;  %vm2601_vm12 = vcmp.eq.f32.partialorder %v2600_v25, 8.507059e+37 }
 0x353   : > { %v15001_v16 = vpack.c.bf16 %v2606_v15, %v2606_v15  ;;  %v13215_v15 = vld [vmem:[%s16898_s23 + $0xb8] sm:$0xff] }
 0x354   : > { %3050 = vmatpush.bf16.msra.mxu0 %v13200_v5  ;;  %v13234_v5 = vld [vmem:[%s16901_s15 + $0x28] sm:$0xff] }
 0x355   : > { %v15006_v18 = vsel %vm2615_vm3, %v15001_v16, 0 }
 0x356   : > { %v13879_v19 = vpop.eup %13878  ;;  %2646 = vmatpush.bf16.msra.mxu1 %v15006_v18 }
 0x357   : > { %v2592_v20 = vmul.f32 %v13879_v19, %v2575_v11  ;;  %vm2597_vm9 = vweird.f32 %v13879_v19 }
 0x358   : > { %vm2598_vm11 = vmor %vm2596_vm10, %vm2597_vm9 }
 0x359   : > { %v2593_v22 = vsub.f32 1.0, %v2592_v20  ;;  %10458 = vmatmul.msk.bf16.vlgmr.msra.gmra.mxu1 %vm2611_vm4, %v14992_v40  ;;  %v13213_v20 = vld [vmem:[%s16898_s23 + $0xa8] sm:$0xff] }
 0x35a   : > { %2856 = vmatpush.bf16.msrb.mxu1 %v13175_v17 }
 0x35b   : > { %v2594_v24 = vmul.f32 %v13879_v19, %v2593_v22  ;;  %v13212_v22 = vld [vmem:[%s16898_s23 + $0xa0] sm:$0xff] }
 0x35d   : > { %v2595_v27 = vadd.f32 %v13879_v19, %v2594_v24  ;;  %v13210_v24 = vld [vmem:[%s16898_s23 + $0x90] sm:$0xff] }
 0x35e   : > { %2857 = vmatpush.bf16.msrb.mxu1 %v13174_v21 }
 0x35f   : > { %v2599_v30 = vsel %vm2598_vm11, %v13879_v19, %v2595_v27  ;;  %v13208_v27 = vld [vmem:[%s16898_s23 + $0x80] sm:$0xff] }
 0x360   : > { %v2604_v31 = vsel %vm2601_vm12, %v2603_v28, %v2599_v30 }
 0x361   : > { %v2607_v32 = vmul.f32 %v2604_v31, %v14957_v58  ;;  %v13170_v58 = vld [vmem:[%s16898_s23 + $0x10] sm:$0xff]  ;;  %v13223_v31 = vld [vmem:[%s16900_s26 + $0xf8] sm:$0xff] }
 0x362   : > { %2858 = vmatpush.bf16.msrb.mxu1 %v13173_v54  ;;  %v13211_v54 = vld [vmem:[%s16898_s23 + $0x98] sm:$0xff] }
 0x363   : > { %v15015_v33 = vpack.c.bf16 %v2607_v32, %v2607_v32  ;;  %v13222_v32 = vld [vmem:[%s16900_s26 + $0xf0] sm:$0xff] }
 0x365   : > { %v15021_v37 = vsel %vm2615_vm3, %v15015_v33, 0 }
 0x366   : > { %2859 = vmatpush.bf16.msrb.mxu1 %v13172_v29  ;;  %2659 = vmatpush.bf16.msrb.mxu2 %v15021_v37 }
 0x369   : > { %10459 = vmatmul.msk.bf16.vlgmr.msrb.gmra.mxu2 %vm2611_vm4, %v14992_v40  ;;  %v13180_v40 = vld [vmem:[%s16900_s26 + $0x20] sm:$0xff] }
 0x36a   : > { %2860 = vmatpush.bf16.msrb.mxu1 %v13171_v34  ;;  %2934 = vmatpush.bf16.msra.mxu2 %v13195_v35  ;;  %v13220_v34 = vld [vmem:[%s16900_s26 + $0xe0] sm:$0xff]  ;;  %v13219_v35 = vld [vmem:[%s16900_s26 + $0xd8] sm:$0xff] }
 0x36b   : > { %2785 = vmatpush.bf16.msra.mxu3 %v13180_v40 }
 0x36e   : > { %2861 = vmatpush.bf16.msrb.mxu1 %v13170_v58  ;;  %2935 = vmatpush.bf16.msra.mxu2 %v13194_v39  ;;  %v13217_v58 = vld [vmem:[%s16900_s26 + $0xc8] sm:$0xff] }
 0x36f   : > { %2786 = vmatpush.bf16.msra.mxu3 %v13179_v55 }
 0x372   : > { %2862 = vmatpush.bf16.msrb.mxu1 %v13169_v44  ;;  %2936 = vmatpush.bf16.msra.mxu2 %v13193_v45  ;;  %v13224_v44 = vld [vmem:[%s16900_s26 + $0x100] sm:$0xff] }
 0x373   : > { %2787 = vmatpush.bf16.msra.mxu3 %v13178_v57 }
 0x376   : > { %2863 = vmatpush.bf16.msrb.mxu1 %v13168_v48  ;;  %2937 = vmatpush.bf16.msra.mxu2 %v13192_v49 }
 0x377   : > { %2788 = vmatpush.bf16.msra.mxu3 %v13177_v60 }
 0x379   : > { %2864 = vmatmul.bf16.vlgmr.msrb.gmra.mxu1 %v2632_v50 }
 0x37a   : > { %3086 = vmatpush.bf16.msra.mxu1 %v14971_v10  ;;  %2938 = vmatpush.bf16.msra.mxu2 %v13191_v52  ;;  %v13188_v10 = vld [vmem:[%s16898_s23 + $0x40] sm:$0xff] }
 0x37b   : > { %2789 = vmatpush.bf16.msra.mxu3 %v13176_v61 }
 0x37e   : > { %2939 = vmatpush.bf16.msra.mxu2 %v13190_v56  ;;  %3300 = vmatpush.bf16.msrb.mxu1 %v13223_v31  ;;  %v13251_v31 = vld [vmem:[%s16901_s15 + $0xa0] sm:$0xff] }
 0x37f   : > { %3064 = vmatpush.bf16.msrb.mxu3 %v13207_v62 }
 0x382   : > { %2940 = vmatpush.bf16.msra.mxu2 %v13189_v59  ;;  %3301 = vmatpush.bf16.msrb.mxu1 %v13222_v32  ;;  %v13242_v32 = vld [vmem:[%s16901_s15 + $0x60] sm:$0xff] }
 0x383   : > { %3065 = vmatpush.bf16.msrb.mxu3 %v13206_v0 }
 0x386   : > { %2941 = vmatpush.bf16.msra.mxu2 %v13188_v10 }
 0x387   : > { %3066 = vmatpush.bf16.msrb.mxu3 %v13205_v1 }
 0x389   : > { %2942 = vmatmul.bf16.vlgmr.msra.gmra.mxu2 %v14966_v8  ;;  %10663 = vmatmul.msk.bf16.vlgmr.msra.gmra.mxu1 %vm2611_vm4, %v10662_v63  ;;  %v13199_v8 = vld [vmem:[%s16900_s26 + $0x78] sm:$0xff] }
 0x38a   : > { %3100 = vmatpush.bf16.msrb.mxu2 %v15006_v18  ;;  %3051 = vmatpush.bf16.msra.mxu0 %v13199_v8  ;;  %v13214_v18 = vld [vmem:[%s16898_s23 + $0xb0] sm:$0xff]  ;;  %v13233_v8 = vld [vmem:[%s16901_s15 + $0x20] sm:$0xff] }
 0x38b   : > { %3067 = vmatpush.bf16.msrb.mxu3 %v13204_v3  ;;  %v13236_v3 = vld [vmem:[%s16901_s15 + $0x38] sm:$0xff] }
 0x38e   : > { %3052 = vmatpush.bf16.msra.mxu0 %v13198_v6  ;;  %3317 = vmatpush.bf16.msra.mxu2 %v13227_v36  ;;  %v13232_v36 = vld [vmem:[%s16901_s15 + $0x18] sm:$0xff] }
 0x392   : > { %3053 = vmatpush.bf16.msra.mxu0 %v13197_v7  ;;  %3318 = vmatpush.bf16.msra.mxu2 %v13226_v38  ;;  %v13240_v38 = vld [vmem:[%s16901_s15 + $0x50] sm:$0xff] }
 0x396   : > { %3054 = vmatpush.bf16.msra.mxu0 %v13196_v9  ;;  %3319 = vmatpush.bf16.msra.mxu2 %v13225_v41  ;;  %v13860_v9 = vld [vmem:[%s16902_s1] ss:$0 sm:$0xff]  ;;  %v13239_v41 = vld [vmem:[%s16901_s15 + $0x48] sm:$0xff]  ;;  %s1952_s1 = scalar_lea.vmem %s16907_s22, %s13115_s7  ;;  %s16909_s22 = sld [smem:[#allocation43_spill]] }
 0x397   : > { %s16910_s7 = sld [smem:[#allocation45_spill]] }
 0x399   : > { %10664 = vmatmul.msk.bf16.vlgmr.msrb.gmra.mxu2 %vm2611_vm4, %v10662_v63 }
 0x39a   : > { %3320 = vmatpush.bf16.msra.mxu2 %v13224_v44  ;;  %v13229_v44 = vld [vmem:[%s16901_s15] sm:$0xff] }
 0x39d   : > { %s16911_s3 = smov %s16910_s7 }
 0x3d6   : > { %v2648_v11 = vpop.f32.mrf.mxu1 }
 0x3d7   : > { %v2665_v12 = vpack.c.bf16 %v2648_v11, %v2648_v11 }
 0x3d9   : > { %2790 = vmatmul.bf16.vlgmr.msra.gmra.mxu3 %v2665_v12 }
 0x3da   : > { %3113 = vmatpush.bf16.msra.mxu3 %v15021_v37  ;;  %v13218_v37 = vld [vmem:[%s16900_s26 + $0xd0] sm:$0xff] }
 0x3de   : > { %v2650_v13 = vpop.f32.mrf.mxu1 }
 0x3e9   : > { %10661 = vmatmul.msk.bf16.vlgmr.msrb.gmra.mxu3 %vm2452_vm2, %v15015_v33  ;;  %v13221_v33 = vld [vmem:[%s16900_s26 + $0xe8] sm:$0xff] }
 0x3ea   : > { %3302 = vmatpush.bf16.msrb.mxu1 %v13221_v33  ;;  %v13250_v33 = vld [vmem:[%s16901_s15 + $0x98] sm:$0xff] }
 0x3ec   : > { %v2661_v14 = vpop.f32.mrf.mxu2 }
 0x3ed   : > { %v2666_v17 = vpack.c.bf16 %v2661_v14, %v2661_v14  ;;  %v10789_v14 = vld [vmem:[%s16903_s8] sm:$0xf] }
 0x3ee   : > { %3303 = vmatpush.bf16.msrb.mxu1 %v13220_v34  ;;  %v13249_v34 = vld [vmem:[%s16901_s15 + $0x90] sm:$0xff] }
 0x3ef   : > { %10508 = vmatmul.msk.bf16.vlgmr.msrb.gmra.mxu0 %vm2452_vm2, %v2666_v17  ;;  %v13228_v17 = vld [vmem:[%s16903_s8] sm:$0x30] }
 0x3f0   : > { %3186 = vmatpush.bf16.msrb.mxu0 %v13215_v15 }
 0x3f2   : > { %3304 = vmatpush.bf16.msrb.mxu1 %v13219_v35  ;;  %v13241_v35 = vld [vmem:[%s16901_s15 + $0x58] sm:$0xff] }
 0x3f4   : > { %3187 = vmatpush.bf16.msrb.mxu0 %v13214_v18  ;;  %v2663_v21 = vpop.f32.mrf.mxu2  ;;  %v10796_v18 = vld [vmem:[%s16903_s8 + $0x8] sm:$0xf] }
 0x3f5   : > { %v10883_v21 = vld [vmem:[%s16903_s8 + $0x10] sm:$0xf] }
 0x3f6   : > { %v2865_v19 = vpop.f32.mrf.mxu1  ;;  %3305 = vmatpush.bf16.msrb.mxu1 %v13218_v37  ;;  %v13248_v37 = vld [vmem:[%s16901_s15 + $0x88] sm:$0xff] }
 0x3f8   : > { %3188 = vmatpush.bf16.msrb.mxu0 %v13213_v20 }
 0x3f9   : > { %10665 = vmatmul.msk.bf16.vlgmr.msra.gmra.mxu3 %vm2611_vm4, %v10662_v63 }
 0x3fa   : > { %3306 = vmatpush.bf16.msrb.mxu1 %v13217_v58  ;;  %v13231_v58 = vld [vmem:[%s16901_s15 + $0x10] sm:$0xff] }
 0x3fc   : > { %3189 = vmatpush.bf16.msrb.mxu0 %v13212_v22  ;;  %v13246_v22 = vld [vmem:[%s16903_s8 + $0x10] sm:$0x30] }
 0x3fe   : > { %v2867_v23 = vpop.f32.mrf.mxu1  ;;  %3307 = vmatpush.bf16.msrb.mxu1 %v13216_v42  ;;  %v13230_v42 = vld [vmem:[%s16901_s15 + $0x8] sm:$0xff] }
 0x3ff   : > { %3055 = vmatmul.bf16.vlgmr.msra.gmra.mxu0 %v15001_v16  ;;  %v13254_v23 = vld [vmem:[%s16901_s15 + $0xb8] sm:$0xff] }
 0x400   : > { %3190 = vmatpush.bf16.msrb.mxu0 %v13211_v54  ;;  %v13245_v54 = vld [vmem:[%s16901_s15 + $0x78] sm:$0xff] }
 0x404   : > { %3191 = vmatpush.bf16.msrb.mxu0 %v13210_v24 }
 0x406   : > { %v3088_v25 = vpop.f32.mrf.mxu1 }
 0x407   : > { %v3092_v29 = vpack.c.bf16 %v3088_v25, %v3088_v25  ;;  %v10790_v25 = vor.u32 %v13228_v17, %v10789_v14  ;;  %v13255_v14 = vld [vmem:[%s16906_s18] sm:$0xff] }
 0x408   : > { %3192 = vmatpush.bf16.msrb.mxu0 %v13209_v26 }
 0x40c   : > { %v2943_v28 = vpop.f32.mrf.mxu2  ;;  %3193 = vmatpush.bf16.msrb.mxu0 %v13208_v27  ;;  %v10884_v27 = vor.u32 %v13246_v22, %v10883_v21 }
 0x40e   : > { %v3090_v30 = vpop.f32.mrf.mxu1 }
 0x40f   : > { %3194 = vmatmul.bf16.vlgmr.msrb.gmra.mxu0 %v3092_v29  ;;  %v13244_v29 = vld [vmem:[%s16901_s15 + $0x70] sm:$0xff]  ;;  %v13252_v30 = vld [vmem:[%s16901_s15 + $0xa8] sm:$0xff] }
 0x410   : > { %3531 = vmatpush.bf16.msra.mxu0 %v13236_v3  ;;  %v15144_v3 = vld [vmem:[%s1952_s1 + $0x10] sm:$0xf] }
 0x414   : > { %v2945_v16 = vpop.f32.mrf.mxu2  ;;  %3532 = vmatpush.bf16.msra.mxu0 %v13235_v4 }
 0x415   : > { %v13243_v16 = vld [vmem:[%s16901_s15 + $0x68] sm:$0xff] }
 0x418   : > { %3533 = vmatpush.bf16.msra.mxu0 %v13234_v5  ;;  %v13258_v5 = vld [vmem:[%s16906_s18 + $0x18] sm:$0xff] }
 0x41c   : > { %v3102_v39 = vpop.f32.mrf.mxu2  ;;  %3534 = vmatpush.bf16.msra.mxu0 %v13233_v8  ;;  %v13270_v8 = vld [vmem:[%s16904_s10 + $0x48] sm:$0xff] }
 0x41d   : > { %v3119_v43 = vpack.c.bf16 %v3102_v39, %v3102_v39  ;;  %v13247_v39 = vld [vmem:[%s16901_s15 + $0x80] sm:$0xff] }
 0x41f   : > { %3308 = vmatmul.bf16.vlgmr.msrb.gmra.mxu1 %v3119_v43  ;;  %v13238_v43 = vld [vmem:[%s16901_s15 + $0x40] sm:$0xff] }
 0x420   : > { %3535 = vmatpush.bf16.msra.mxu0 %v13232_v36  ;;  %v13276_v36 = vld [vmem:[%s16909_s22 + $0x14] sm:$0xf0] }
 0x424   : > { %v3104_v46 = vpop.f32.mrf.mxu2  ;;  %3536 = vmatpush.bf16.msra.mxu0 %v13231_v58  ;;  %v11020_v58 = vld [vmem:[%s16909_s22 + $0x18] sm:$0xf0] }
 0x425   : > { %v13267_v46 = vld [vmem:[%s16904_s10 + $0x30] sm:$0xff] }
 0x428   : > { %3537 = vmatpush.bf16.msra.mxu0 %v13230_v42  ;;  %v13274_v42 = vld [vmem:[%s16909_s22 + $0x4] sm:$0xf0] }
 0x42c   : > { %3538 = vmatpush.bf16.msra.mxu0 %v13229_v44 }
 0x45c   : > { %v2791_v45 = vpop.f32.mrf.mxu3 }
 0x464   : > { %v2793_v47 = vpop.f32.mrf.mxu3 }
 0x465   : > { %v13266_v47 = vld [vmem:[%s16904_s10 + $0x28] sm:$0xff] }
 0x46c   : > { %v2804_v48 = vpop.f32.mrf.mxu0  ;;  %v3069_v49 = vpop.f32.mrf.mxu3 }
 0x46d   : > { %v2805_v40 = vadd.f32 %v2804_v48, %v2791_v45  ;;  %v13268_v45 = vld [vmem:[%s16904_s10 + $0x38] sm:$0xff]  ;;  %v13265_v48 = vld [vmem:[%s16904_s10 + $0x20] sm:$0xff] }
 0x46f   : > { %v2866_v52 = vadd.f32 %v2865_v19, %v2805_v40  ;;  %v13237_v19 = vld [vmem:[%s16903_s8 + $0x8] sm:$0x30] }
 0x470   : > { %v10797_v26 = vor.u32 %v13237_v19, %v10796_v18 }
 0x471   : > { %v2947_v59 = vadd.f32 %v2943_v28, %v2866_v52  ;;  %v13253_v28 = vld [vmem:[%s16901_s15 + $0xb0] sm:$0xff] }
 0x474   : > { %v2806_v50 = vpop.f32.mrf.mxu0  ;;  %v3071_v51 = vpop.f32.mrf.mxu3 }
 0x475   : > { %v13263_v50 = vld [vmem:[%s16904_s10 + $0x10] sm:$0xff] }
 0x47c   : > { %v3056_v53 = vpop.f32.mrf.mxu0  ;;  %v3115_v55 = vpop.f32.mrf.mxu3 }
 0x47d   : > { %v3070_v56 = vadd.f32 %v3069_v49, %v3056_v53  ;;  %v3120_v57 = vpack.c.bf16 %v3115_v55, %v3115_v55  ;;  %v13264_v49 = vld [vmem:[%s16904_s10 + $0x18] sm:$0xff] }
 0x47f   : > { %10786 = vmatmul.msk.bf16.vlgmr.msra.gmra.mxu2 %vm2452_vm2, %v3120_v57  ;;  %v3073_v60 = vadd.f32 %v3070_v56, %v2947_v59 }
 0x484   : > { %v3058_v10 = vpop.f32.mrf.mxu0  ;;  %v3117_v61 = vpop.f32.mrf.mxu3 }
 0x485   : > { %v13260_v10 = vld [vmem:[%s16905_s28 + $0x28] sm:$0xff]  ;;  %s16908_s28 = sld [smem:[#allocation38_spill]] }
 0x486   : > { %v13262_v61 = vld [vmem:[%s16904_s10 + $0x8] sm:$0xff] }
 0x48c   : > { %v3195_v62 = vpop.f32.mrf.mxu0 }
 0x48d   : > { %v3199_v63 = vadd.f32 %v3195_v62, %v3073_v60  ;;  %v13272_v62 = vld [vmem:[%s16904_s10 + $0x58] sm:$0xff] }
 0x48e   : > { %3856 = vmatpush.bf16.msrb.mxu0 %v13272_v62 }
 0x494   : > { %v3197_v0 = vpop.f32.mrf.mxu0 }
 0x495   : > { %v13261_v0 = vld [vmem:[%s16904_s10] sm:$0xff] }
 0x49c   : > { %v3309_v1 = vpop.f32.mrf.mxu1 }
 0x4a4   : > { %v3311_v2 = vpop.f32.mrf.mxu1 }
 0x4a5   : > { %v15142_v2 = vld [vmem:[%s1952_s1] sm:$0xff] }
 0x4a6   : > { %v3663_v4 = vpack.c.bf16 %v15144_v3, %v15142_v2 }
 0x502   : > { %v3322_v6 = vpop.f32.mrf.mxu2 }
 0x503   : > { %v3323_v7 = vadd.f32 %v3322_v6, %v3309_v1  ;;  %v13271_v1 = vld [vmem:[%s16904_s10 + $0x50] sm:$0xff] }
 0x504   : > { %3857 = vmatpush.bf16.msrb.mxu0 %v13271_v1  ;;  %v13257_v6 = vld [vmem:[%s16906_s18 + $0x10] sm:$0xff] }
 0x505   : > { %v3326_v11 = vadd.f32 %v3323_v7, %v3199_v63  ;;  %v13259_v63 = vld [vmem:[%s16906_s18 + $0x20] sm:$0xff] }
 0x506   : > { %v13269_v7 = vld [vmem:[%s16904_s10 + $0x40] sm:$0xff] }
 0x507   : > { %v3331_v12 = vadd.f32 %v13860_v9, %v3326_v11  ;;  %v15152_v9 = vld [vmem:[%s1952_s1 + $0x8] sm:$0xff]  ;;  %v15154_v11 = vld [vmem:[%s1952_s1 + $0x18] sm:$0xf]  ;;  %s16912_s1 = sld [smem:[#allocation42_spill]] }
 0x508   : > { %3858 = vmatpush.bf16.msrb.mxu0 %v13270_v8 }
 0x509   : > { %v3332_v13 = vmax.f32 %v3331_v12, 0.0  ;;  %v3664_v12 = vpack.c.bf16 %v15154_v11, %v15152_v9 }
 0x50a   : > { %v3324_v15 = vpop.f32.mrf.mxu2 }
 0x50b   : > { %v3333_v20 = vpack.c.bf16 %v3332_v13, %v3332_v13  ;;  %v13256_v13 = vld [vmem:[%s16906_s18 + $0x8] sm:$0xff] }
 0x50c   : > { %3859 = vmatpush.bf16.msrb.mxu0 %v13269_v7 }
 0x50d   : > { %v3345_v24 = vsel %vm2615_vm3, %v3333_v20, 0 }
 0x50e   : > { %3354 = vmatpush.bf16.msrb.mxu3 %v3345_v24  ;;  %3396 = vmatpush.bf16.msrb.mxu2 %v3345_v24 }
 0x50f   : > { %3563 = vmatpush.bf16.msra.mxu1 %v3345_v24 }
 0x511   : > { %10791 = vmatmul.msk.bf16.vlgmr.msrb.gmra.mxu3 %vm2611_vm4, %v10790_v25  ;;  %10798 = vmatmul.msk.bf16.vlgmr.msrb.gmra.mxu2 %vm2611_vm4, %v10797_v26 }
 0x512   : > { %3636 = vmatpush.bf16.msra.mxu2 %v13254_v23  ;;  %3469 = vmatpush.bf16.msra.mxu3 %v13245_v54  ;;  %v13861_v23 = vld [vmem:[%s16908_s28] ss:$0 sm:$0xff]  ;;  %s16913_s28 = sld [smem:[#allocation40_spill]] }
 0x513   : > { %10885 = vmatmul.msk.bf16.vlgmr.msra.gmra.mxu1 %vm2611_vm4, %v10884_v27 }
 0x514   : > { %3723 = vmatpush.bf16.msrb.mxu1 %v13260_v10 }
 0x516   : > { %3637 = vmatpush.bf16.msra.mxu2 %v13253_v28  ;;  %3470 = vmatpush.bf16.msra.mxu3 %v13244_v29 }
 0x518   : > { %3724 = vmatpush.bf16.msrb.mxu1 %v13259_v63 }
 0x51a   : > { %3638 = vmatpush.bf16.msra.mxu2 %v13252_v30  ;;  %3471 = vmatpush.bf16.msra.mxu3 %v13243_v16  ;;  %v11026_v30 = vld [vmem:[%s16909_s22 + $0x20] sm:$0xf]  ;;  %v13278_v16 = vld [vmem:[%s16909_s22 + $0x24] sm:$0xf0] }
 0x51c   : > { %3725 = vmatpush.bf16.msrb.mxu1 %v13258_v5 }
 0x51e   : > { %3639 = vmatpush.bf16.msra.mxu2 %v13251_v31  ;;  %3472 = vmatpush.bf16.msra.mxu3 %v13242_v32  ;;  %v13277_v31 = vld [vmem:[%s16909_s22 + $0x24] sm:$0xf]  ;;  %v11027_v32 = vor.u32 %v13278_v16, %v11026_v30 }
 0x520   : > { %3726 = vmatpush.bf16.msrb.mxu1 %v13257_v6  ;;  %v3877_v6 = vld [vmem:[%s16914_s5] sm:$0x3]  ;;  %s16915_s5 = sld [smem:[#allocation46_spill]] }
 0x521   : > { %v3879_v7 = vperm.slane %v3877_v6, 0 }
 0x522   : > { %3640 = vmatpush.bf16.msra.mxu2 %v13250_v33  ;;  %3473 = vmatpush.bf16.msra.mxu3 %v13241_v35  ;;  %v11028_v33 = vld [vmem:[%s16909_s22 + $0x28] sm:$0xf0]  ;;  %v11018_v35 = vld [vmem:[%s16909_s22 + $0x10] sm:$0xf] }
 0x524   : > { %3727 = vmatpush.bf16.msrb.mxu1 %v13256_v13 }
 0x526   : > { %3641 = vmatpush.bf16.msra.mxu2 %v13249_v34  ;;  %3474 = vmatpush.bf16.msra.mxu3 %v13240_v38  ;;  %v11031_v34 = vor.u32 %v13277_v31, %v11028_v33  ;;  %v11019_v38 = vor.u32 %v13276_v36, %v11018_v35 }
 0x528   : > { %3728 = vmatpush.bf16.msrb.mxu1 %v13255_v14 }
 0x52a   : > { %3642 = vmatpush.bf16.msra.mxu2 %v13248_v37  ;;  %3475 = vmatpush.bf16.msra.mxu3 %v13239_v41  ;;  %v13275_v37 = vld [vmem:[%s16909_s22 + $0x14] sm:$0xf]  ;;  %v11010_v41 = vld [vmem:[%s16909_s22] sm:$0xf] }
 0x52b   : > { %v11011_v44 = vor.u32 %v13274_v42, %v11010_v41 }
 0x52c   : > { %3922 = vmatpush.bf16.msra.mxu1 %v11027_v32 }
 0x52e   : > { %3643 = vmatpush.bf16.msra.mxu2 %v13247_v39  ;;  %3476 = vmatpush.bf16.msra.mxu3 %v13238_v43  ;;  %v11023_v39 = vor.u32 %v13275_v37, %v11020_v58  ;;  %v13273_v43 = vld [vmem:[%s16909_s22 + $0x4] sm:$0xf] }
 0x530   : > { %3923 = vmatpush.bf16.msra.mxu1 %v11019_v38 }
 0x532   : > { %3838 = vmatpush.bf16.msrb.mxu3 %v13268_v45  ;;  %3936 = vmatpush.bf16.msrb.mxu2 %v11031_v34  ;;  %v11012_v45 = vld [vmem:[%s16909_s22 + $0x8] sm:$0xf0] }
 0x534   : > { %3924 = vmatpush.bf16.msra.mxu1 %v11011_v44 }
 0x536   : > { %3839 = vmatpush.bf16.msrb.mxu3 %v13267_v46  ;;  %3937 = vmatpush.bf16.msrb.mxu2 %v11023_v39  ;;  %v11015_v46 = vor.u32 %v13273_v43, %v11012_v45 }
 0x53a   : > { %3840 = vmatpush.bf16.msrb.mxu3 %v13266_v47  ;;  %3938 = vmatpush.bf16.msrb.mxu2 %v11015_v46  ;;  %v11040_v47 = vld [vmem:[%s16910_s7] sm:$0xf]  ;;  %s16916_s7 = sld [smem:[#allocation47_spill]] }
 0x53e   : > { %3841 = vmatpush.bf16.msrb.mxu3 %v13265_v48  ;;  %v13279_v48 = vld [vmem:[%s16911_s3] sm:$0x30] }
 0x540   : > { %s16917_s6 = smov %s16916_s7 }
 0x542   : > { %3842 = vmatpush.bf16.msrb.mxu3 %v13264_v49  ;;  %v15185_v49 = vor.u32 %v13279_v48, %v11040_v47 }
 0x546   : > { %3843 = vmatpush.bf16.msrb.mxu3 %v13263_v50 }
 0x54a   : > { %3844 = vmatpush.bf16.msrb.mxu3 %v13262_v61 }
 0x54e   : > { %3845 = vmatpush.bf16.msrb.mxu3 %v13261_v0 }
 0x590   : > { %v3565_v40 = vpop.f32.mrf.mxu1 }
 0x594   : > { %v3356_v51 = vpop.f32.mrf.mxu3  ;;  %v3398_v52 = vpop.f32.mrf.mxu2 }
 0x598   : > { %v3567_v53 = vpop.f32.mrf.mxu1 }
 0x599   : > { %v3570_v55 = vpack.c.bf16 %v3567_v53, %v3565_v40 }
 0x59b   : > { %3644 = vmatmul.bf16.vlgmr.msra.gmra.mxu2 %v3570_v55  ;;  %v13863_v55 = vld [vmem:[%s16913_s28] ss:$0 sm:$0xff]  ;;  %s16920_s28 = sld [smem:[#allocation50_spill]] }
 0x59c   : > { %v3358_v56 = vpop.f32.mrf.mxu3  ;;  %v3400_v57 = vpop.f32.mrf.mxu2 }
 0x59d   : > { %v3361_v59 = vpack.c.bf16 %v3358_v56, %v3356_v51  ;;  %v3403_v60 = vpack.c.bf16 %v3400_v57, %v3398_v52  ;;  %v13862_v51 = vld [vmem:[%s16912_s1] ss:$0 sm:$0xff]  ;;  %s16918_s1 = sld [smem:[#allocation49_spill]] }
 0x59f   : > { %3477 = vmatmul.bf16.vlgmr.msra.gmra.mxu3 %v3403_v60  ;;  %3539 = vmatmul.bf16.vlgmr.msra.gmra.mxu0 %v3361_v59 }
 0x5af   : > { %3846 = vmatmul.bf16.vlgmr.msrb.gmra.mxu3 %v3663_v4  ;;  %11007 = vmatmul.msk.bf16.vlgmr.msrb.gmra.mxu0 %vm2452_vm2, %v3664_v12 }
 0x61c   : > { %v3540_v15 = vpop.f32.mrf.mxu0 }
 0x61e   : > { %v3645_v17 = vpop.f32.mrf.mxu2 }
 0x622   : > { %v3478_v18 = vpop.f32.mrf.mxu3 }
 0x623   : > { %v3541_v19 = vadd.f32 %v3540_v15, %v3478_v18  ;;  %v3880_v15 = vperm.slane %v3877_v6, 1 }
 0x624   : > { %v3542_v20 = vpop.f32.mrf.mxu0 }
 0x625   : > { %v3650_v22 = vadd.f32 %v3645_v17, %v3541_v19 }
 0x626   : > { %v3647_v24 = vpop.f32.mrf.mxu2 }
 0x627   : > { %v3656_v26 = vadd.f32 %v13861_v23, %v3650_v22 }
 0x62a   : > { %v3480_v21 = vpop.f32.mrf.mxu3 }
 0x62b   : > { %v3543_v54 = vadd.f32 %v3542_v20, %v3480_v21 }
 0x62c   : > { %v3861_v50 = vpop.f32.mrf.mxu0 }
 0x62d   : > { %v3651_v25 = vadd.f32 %v3647_v24, %v3543_v54 }
 0x62f   : > { %v3657_v27 = vadd.f32 %v13861_v23, %v3651_v25 }
 0x631   : > { %v15162_v28 = vpack.c.bf16 %v3657_v27, %v3656_v26 }
 0x632   : > { %v3847_v40 = vpop.f32.mrf.mxu3 }
 0x633   : > { %10958 = vmatmul.msk.bf16.vlgmr.msrb.gmra.mxu1 %vm16797_vm13, %v15162_v28  ;;  %v15168_v29 = vsel %vm4038_vm14, %v15162_v28, 0  ;;  %v3848_v53 = vadd.f32 %v13862_v51, %v3847_v40 }
 0x634   : > { %4048 = vmatpush.bf16.msra.mxu0 %v15168_v29  ;;  %v3863_v10 = vpop.f32.mrf.mxu0 }
 0x635   : > { %v3862_v57 = vadd.f32 %v3861_v50, %v3848_v53 }
 0x637   : > { %11042 = vmatmul.msk.bf16.vlgmr.msra.gmra.mxu0 %vm4034_vm15, %v15185_v49 }
 0x63a   : > { %v3849_v56 = vpop.f32.mrf.mxu3 }
 0x63b   : > { %v3850_v59 = vadd.f32 %v13862_v51, %v3849_v56 }
 0x63d   : > { %v3864_v63 = vadd.f32 %v3863_v10, %v3850_v59 }
 0x6b0   : > { %v3730_v52 = vpop.f32.mrf.mxu1 }
 0x6b1   : > { %v3731_v60 = vadd.f32 %v13863_v55, %v3730_v52 }
 0x6b3   : > { %v3866_v62 = vadd.f32 %v3862_v57, %v3731_v60 }
 0x6b5   : > { %v3868_v4 = vmax.f32 %v3866_v62, 0.0 }
 0x6b8   : > { %v3732_v61 = vpop.f32.mrf.mxu1 }
 0x6b9   : > { %v3733_v0 = vadd.f32 %v13863_v55, %v3732_v61 }
 0x6bb   : > { %v3867_v1 = vadd.f32 %v3864_v63, %v3733_v0 }
 0x6bd   : > { %v3869_v5 = vmax.f32 %v3867_v1, 0.0 }
 0x6bf   : > { %v3870_v8 = vpack.c.bf16 %v3869_v5, %v3868_v4 }
 0x6c1   : > { %11032 = vmatmul.msk.bf16.vlgmr.msra.gmra.mxu1 %vm3913_vm1, %v3870_v8  ;;  %11033 = vmatmul.msk.bf16.vlgmr.msrb.gmra.mxu2 %vm3913_vm1, %v3870_v8 }
 0x73e   : > { %v3926_v12 = vpop.f32.mrf.mxu1 }
 0x73f   : > { %v3927_v13 = vadd.f32 %v3926_v12, %v3879_v7 }
 0x741   : > { %v11034_v14 = vmul.f32 -1.442695, %v3927_v13 }
 0x743   : > { %13880 = vpow2.f32 %v11034_v14  ;;  %v13285_v14 = vld [vmem:[%s16915_s5 + $0x28] sm:$0xff] }
 0x744   : > { %v3940_v17 = vpop.f32.mrf.mxu2 }
 0x745   : > { %v3941_v18 = vadd.f32 %v3940_v17, %v3880_v15 }
 0x746   : > { %v3928_v19 = vpop.f32.mrf.mxu1 }
 0x747   : > { %v11035_v20 = vmul.f32 -1.442695, %v3941_v18  ;;  %v3929_v21 = vadd.f32 %v3928_v19, %v3879_v7 }
 0x749   : > { %v13881_v22 = vpop.eup %13880  ;;  %13882 = vpow2.f32 %v11035_v20  ;;  %v11036_v23 = vmul.f32 -1.442695, %v3929_v21  ;;  %v13284_v20 = vld [vmem:[%s16915_s5 + $0x20] sm:$0xff] }
 0x74a   : > { %v3957_v54 = vadd.f32 1.0, %v13881_v22 }
 0x74b   : > { %13884 = vpow2.f32 %v11036_v23 }
 0x74c   : > { %13886 = vrcp.f32 %v3957_v54  ;;  %v3942_v24 = vpop.f32.mrf.mxu2  ;;  %v3972_v44 = vand.u32 2147483648, %v3957_v54  ;;  %vm3966_vm5 = vweird.f32 %v3957_v54  ;;  %v3970_v45 = vand.u32 2147483647, %v3957_v54 }
 0x74d   : > { %v3943_v25 = vadd.f32 %v3942_v24, %v3880_v15 }
 0x74e   : > { %v3973_v50 = vor.u32 1.1754944e-38, %v3972_v44  ;;  %vm3971_vm8 = vcmp.eq.f32.partialorder %v3970_v45, 8.507059e+37  ;;  %v11233_v44 = vld [vmem:[%s16911_s3 + $0x8] sm:$0xf]  ;;  %v13316_v45 = vld [vmem:[%s16911_s3 + $0x8] sm:$0x30]  ;;  %s16919_s3 = smov %s16918_s1 }
 0x74f   : > { %v13883_v26 = vpop.eup %13882  ;;  %v11037_v27 = vmul.f32 -1.442695, %v3943_v25  ;;  %v13283_v25 = vld [vmem:[%s16915_s5 + $0x18] sm:$0xff] }
 0x750   : > { %v3958_v30 = vadd.f32 1.0, %v13883_v26  ;;  %v13293_v26 = vld [vmem:[%s16916_s7 + $0x38] sm:$0xff]  ;;  %s16922_s7 = sld [smem:[#allocation54_spill]] }
 0x751   : > { %v13885_v16 = vpop.eup %13884  ;;  %13888 = vpow2.f32 %v11037_v27  ;;  %v13282_v27 = vld [vmem:[%s16915_s5 + $0x10] sm:$0xff]  ;;  %4203 = vmatpush.bf16.msra.mxu3 %v13293_v26  ;;  %v13323_v26 = vld [vmem:[%s16917_s6 + $0xc0] sm:$0xff] }
 0x752   : > { %v13887_v31 = vpop.eup %13886  ;;  %13890 = vrcp.f32 %v3958_v30  ;;  %v3959_v32 = vadd.f32 1.0, %v13885_v16  ;;  %vm3981_vm12 = vweird.f32 %v3958_v30  ;;  %v3987_v10 = vand.u32 2147483648, %v3958_v30  ;;  %v13297_v16 = vld [vmem:[%s16917_s6 + $0x58] sm:$0xff] }
 0x753   : > { %v3962_v33 = vmul.f32 %v13887_v31, %v3957_v54  ;;  %vm3967_vm4 = vweird.f32 %v13887_v31  ;;  %v3985_v63 = vand.u32 2147483647, %v3958_v30  ;;  %v13303_v54 = vld [vmem:[%s16915_s5 + $0x58] sm:$0xff]  ;;  %4221 = vmatpush.bf16.msrb.mxu0 %v13297_v16 }
 0x754   : > { %13892 = vrcp.f32 %v3959_v32  ;;  %vm3968_vm6 = vmor %vm3966_vm5, %vm3967_vm4  ;;  %v4002_v40 = vand.u32 2147483648, %v3959_v32  ;;  %v4000_v52 = vand.u32 2147483647, %v3959_v32  ;;  %vm3996_vm9 = vweird.f32 %v3959_v32 }
 0x755   : > { %v3963_v34 = vsub.f32 1.0, %v3962_v33  ;;  %v3988_v12 = vor.u32 1.1754944e-38, %v3987_v10  ;;  %v13281_v33 = vld [vmem:[%s16915_s5 + $0x8] sm:$0xff]  ;;  %v13304_v10 = vld [vmem:[%s16917_s6 + $0x60] sm:$0xff] }
 0x756   : > { %v4003_v60 = vor.u32 1.1754944e-38, %v4002_v40  ;;  %vm4001_vm4 = vcmp.eq.f32.partialorder %v4000_v52, 8.507059e+37  ;;  %v13314_v40 = vld [vmem:[%s16917_s6 + $0xb0] sm:$0xff] }
 0x757   : > { %v13889_v35 = vpop.eup %13888  ;;  %v3964_v36 = vmul.f32 %v13887_v31, %v3963_v34  ;;  %v13291_v34 = vld [vmem:[%s16917_s6 + $0x28] sm:$0xff]  ;;  %v13310_v52 = vld [vmem:[%s16917_s6 + $0x90] sm:$0xff] }
 0x758   : > { %v13891_v37 = vpop.eup %13890  ;;  %v3960_v38 = vadd.f32 1.0, %v13889_v35  ;;  %v13295_v35 = vld [vmem:[%s16917_s6 + $0x48] sm:$0xff] }
 0x759   : > { %v3977_v58 = vmul.f32 %v13891_v37, %v3958_v30  ;;  %v3965_v41 = vadd.f32 %v13887_v31, %v3964_v36  ;;  %vm3982_vm10 = vweird.f32 %v13891_v37  ;;  %v13292_v30 = vld [vmem:[%s16917_s6 + $0x30] sm:$0xff]  ;;  %v13280_v36 = vld [vmem:[%s16915_s5] sm:$0xff] }
 0x75a   : > { %v13893_v39 = vpop.eup %13892  ;;  %13894 = vrcp.f32 %v3960_v38  ;;  %vm3983_vm5 = vmor %vm3981_vm12, %vm3982_vm10  ;;  %v4015_v4 = vand.u32 2147483647, %v3960_v38  ;;  %v4017_v5 = vand.u32 2147483648, %v3960_v38  ;;  %4204 = vmatpush.bf16.msra.mxu3 %v13292_v30  ;;  %v13333_v30 = vld [vmem:[%s16917_s6 + $0x110] sm:$0xff] }
 0x75b   : > { %v3978_v42 = vsub.f32 1.0, %v3977_v58  ;;  %v3992_v43 = vmul.f32 %v13893_v39, %v3959_v32  ;;  %v3969_v48 = vsel %vm3968_vm6, %v13887_v31, %v3965_v41  ;;  %vm3997_vm7 = vweird.f32 %v13893_v39  ;;  %v13301_v31 = vld [vmem:[%s16915_s5 + $0x48] sm:$0xff]  ;;  %v13296_v32 = vld [vmem:[%s16917_s6 + $0x50] sm:$0xff]  ;;  %v13299_v58 = vld [vmem:[%s16915_s5 + $0x38] sm:$0xff] }
 0x75c   : > { %v3974_v56 = vsel %vm3971_vm8, %v3973_v50, %v3969_v48  ;;  %vm3998_vm11 = vmor %vm3996_vm9, %vm3997_vm7  ;;  %vm3986_vm7 = vcmp.eq.f32.partialorder %v3985_v63, 8.507059e+37  ;;  %vm4011_vm8 = vweird.f32 %v3960_v38  ;;  %vm4016_vm10 = vcmp.eq.f32.partialorder %v4015_v4, 8.507059e+37  ;;  %4222 = vmatpush.bf16.msrb.mxu0 %v13296_v32  ;;  %v13289_v41 = vld [vmem:[%s16917_s6 + $0x18] sm:$0xff]  ;;  %v13322_v4 = vld [vmem:[%s16915_s5 + $0x88] sm:$0xff] }
 0x75d   : > { %v3993_v46 = vsub.f32 1.0, %v3992_v43  ;;  %v3979_v47 = vmul.f32 %v13891_v37, %v3978_v42  ;;  %v4021_v1 = vmul.f32 %v3974_v56, %v15142_v2  ;;  %v4018_v2 = vor.u32 1.1754944e-38, %v4017_v5  ;;  %v13298_v42 = vld [vmem:[%s16915_s5 + $0x30] sm:$0xff]  ;;  %v13311_v50 = vld [vmem:[%s16917_s6 + $0x98] sm:$0xff]  ;;  %v13308_v56 = vld [vmem:[%s16917_s6 + $0x80] sm:$0xff] }
 0x75e   : > { %4205 = vmatpush.bf16.msra.mxu3 %v13291_v34  ;;  %v13288_v43 = vld [vmem:[%s16917_s6 + $0x10] sm:$0xff]  ;;  %v11234_v48 = vor.u32 %v13316_v45, %v11233_v44  ;;  %v13332_v32 = vld [vmem:[%s16917_s6 + $0x108] sm:$0xff]  ;;  %v13331_v34 = vld [vmem:[%s16917_s6 + $0x100] sm:$0xff] }
 0x75f   : > { %v3994_v51 = vmul.f32 %v13893_v39, %v3993_v46  ;;  %v3980_v59 = vadd.f32 %v13891_v37, %v3979_v47  ;;  %v13286_v46 = vld [vmem:[%s16917_s6] sm:$0xff]  ;;  %v13315_v47 = vld [vmem:[%s16917_s6 + $0xb8] sm:$0xff] }
 0x760   : > { %v13895_v53 = vpop.eup %13894  ;;  %4223 = vmatpush.bf16.msrb.mxu0 %v13295_v35 }
 0x761   : > { %v4007_v55 = vmul.f32 %v13895_v53, %v3960_v38  ;;  %v3995_v57 = vadd.f32 %v13893_v39, %v3994_v51  ;;  %v3984_v6 = vsel %vm3983_vm5, %v13891_v37, %v3980_v59  ;;  %vm4012_vm6 = vweird.f32 %v13895_v53  ;;  %v13290_v38 = vld [vmem:[%s16917_s6 + $0x20] sm:$0xff]  ;;  %v13313_v51 = vld [vmem:[%s16917_s6 + $0xa8] sm:$0xff]  ;;  %v13306_v59 = vld [vmem:[%s16917_s6 + $0x70] sm:$0xff] }
 0x762   : > { %v3989_v17 = vsel %vm3986_vm7, %v3988_v12, %v3984_v6  ;;  %vm4013_vm9 = vmor %vm4011_vm8, %vm4012_vm6  ;;  %4206 = vmatpush.bf16.msra.mxu3 %v13290_v38  ;;  %v13321_v6 = vld [vmem:[%s16915_s5 + $0x80] sm:$0xff] }
 0x763   : > { %v4008_v61 = vsub.f32 1.0, %v4007_v55  ;;  %v3999_v62 = vsel %vm3998_vm11, %v13893_v39, %v3995_v57  ;;  %v4022_v21 = vmul.f32 %v3989_v17, %v15152_v9  ;;  %v13302_v9 = vld [vmem:[%s16915_s5 + $0x50] sm:$0xff]  ;;  %v13309_v55 = vld [vmem:[%s16917_s6 + $0x88] sm:$0xff]  ;;  %v13307_v57 = vld [vmem:[%s16917_s6 + $0x78] sm:$0xff] }
 0x764   : > { %v4004_v0 = vsel %vm4001_vm4, %v4003_v60, %v3999_v62  ;;  %v13305_v60 = vld [vmem:[%s16917_s6 + $0x68] sm:$0xff] }
 0x765   : > { %v4023_v8 = vmul.f32 %v4004_v0, %v15144_v3  ;;  %v4009_v7 = vmul.f32 %v13895_v53, %v4008_v61 }
 0x766   : > { %4207 = vmatpush.bf16.msra.mxu3 %v13289_v41 }
 0x767   : > { %v15197_v13 = vpack.c.bf16 %v4023_v8, %v4021_v1  ;;  %v4010_v15 = vadd.f32 %v13895_v53, %v4009_v7  ;;  %v13320_v7 = vld [vmem:[%s16915_s5 + $0x78] sm:$0xff] }
 0x769   : > { %v4057_v18 = vsel %vm4038_vm14, %v15197_v13, 0  ;;  %v4014_v3 = vsel %vm4013_vm9, %v13895_v53, %v4010_v15  ;;  %v13312_v53 = vld [vmem:[%s16917_s6 + $0xa0] sm:$0xff]  ;;  %v13318_v15 = vld [vmem:[%s16915_s5 + $0x68] sm:$0xff] }
 0x76a   : > { %4069 = vmatpush.bf16.msrb.mxu1 %v4057_v18  ;;  %v4019_v19 = vsel %vm4016_vm10, %v4018_v2, %v4014_v3  ;;  %4208 = vmatpush.bf16.msra.mxu3 %v13288_v43  ;;  %v13317_v2 = vld [vmem:[%s16915_s5 + $0x60] sm:$0xff] }
 0x76b   : > { %v4024_v22 = vmul.f32 %v4019_v19, %v15154_v11  ;;  %v4050_v11 = vpop.f32.mrf.mxu0  ;;  %v13330_v19 = vld [vmem:[%s16917_s6 + $0xf8] sm:$0xff] }
 0x76d   : > { %11043 = vmatmul.msk.bf16.vlgmr.msrb.gmra.mxu1 %vm4034_vm15, %v15185_v49  ;;  %v15207_v23 = vpack.c.bf16 %v4024_v22, %v4022_v21  ;;  %v13329_v21 = vld [vmem:[%s16917_s6 + $0xf0] sm:$0xff]  ;;  %v13327_v22 = vld [vmem:[%s16917_s6 + $0xe0] sm:$0xff] }
 0x76e   : > { %4272 = vmatpush.bf16.msra.mxu1 %v13285_v14  ;;  %v13319_v14 = vld [vmem:[%s16915_s5 + $0x70] sm:$0xff] }
 0x76f   : > { %v15212_v24 = vsel %vm4038_vm14, %v15207_v23, 0 }
 0x770   : > { %4083 = vmatpush.bf16.msra.mxu2 %v15212_v24 }
 0x772   : > { %4273 = vmatpush.bf16.msra.mxu1 %v13284_v20 }
 0x773   : > { %11044 = vmatmul.msk.bf16.vlgmr.msra.gmra.mxu2 %vm4034_vm15, %v15185_v49  ;;  %v13300_v49 = vld [vmem:[%s16915_s5 + $0x40] sm:$0xff]  ;;  %v4052_v37 = vpop.f32.mrf.mxu0  ;;  %s16921_s5 = smov %s16920_s28 }
 0x774   : > { %4335 = vmatpush.bf16.msrb.mxu2 %v13303_v54  ;;  %v4055_v39 = vpack.c.bf16 %v4052_v37, %v4050_v11  ;;  %v13326_v54 = vld [vmem:[%s16917_s6 + $0xd8] sm:$0xff] }
 0x775   : > { %v13334_v11 = vld [vmem:[%s16917_s6 + $0x118] sm:$0xff] }
 0x776   : > { %4274 = vmatpush.bf16.msra.mxu1 %v13283_v25 }
 0x778   : > { %4336 = vmatpush.bf16.msrb.mxu2 %v13302_v9  ;;  %v13324_v9 = vld [vmem:[%s16917_s6 + $0xc8] sm:$0xff] }
 0x77a   : > { %4275 = vmatpush.bf16.msra.mxu1 %v13282_v27 }
 0x77c   : > { %4337 = vmatpush.bf16.msrb.mxu2 %v13301_v31 }
 0x77e   : > { %4276 = vmatpush.bf16.msra.mxu1 %v13281_v33 }
 0x780   : > { %4338 = vmatpush.bf16.msrb.mxu2 %v13300_v49 }
 0x782   : > { %4277 = vmatpush.bf16.msra.mxu1 %v13280_v36 }
 0x784   : > { %4339 = vmatpush.bf16.msrb.mxu2 %v13299_v58 }
 0x785   : > { %11118 = vmatmul.msk.bf16.vlgmr.msra.gmra.mxu1 %vm16797_vm13, %v4055_v39 }
 0x786   : > { %4496 = vmatpush.bf16.msrb.mxu1 %v15168_v29  ;;  %v13287_v29 = vld [vmem:[%s16917_s6 + $0x8] sm:$0xff] }
 0x787   : > { %4209 = vmatpush.bf16.msra.mxu3 %v13287_v29 }
 0x788   : > { %4340 = vmatpush.bf16.msrb.mxu2 %v13298_v42 }
 0x78a   : > { %4702 = vmatpush.bf16.msra.mxu1 %v13330_v19 }
 0x78b   : > { %11155 = vmatmul.msk.bf16.vlgmr.msrb.gmra.mxu2 %vm16797_vm13, %v15162_v28  ;;  %4210 = vmatpush.bf16.msra.mxu3 %v13286_v46  ;;  %v13294_v28 = vld [vmem:[%s16917_s6 + $0x40] sm:$0xff] }
 0x78c   : > { %4511 = vmatpush.bf16.msra.mxu2 %v4057_v18  ;;  %4224 = vmatpush.bf16.msrb.mxu0 %v13294_v28 }
 0x78e   : > { %4703 = vmatpush.bf16.msra.mxu1 %v13329_v21  ;;  %v13341_v21 = vld [vmem:[%s16921_s5 + $0x28] sm:$0xff] }
 0x78f   : > { %4466 = vmatpush.bf16.msrb.mxu3 %v13315_v47 }
 0x790   : > { %4448 = vmatpush.bf16.msra.mxu0 %v13311_v50  ;;  %4720 = vmatpush.bf16.msrb.mxu2 %v13334_v11 }
 0x793   : > { %4467 = vmatpush.bf16.msrb.mxu3 %v13314_v40 }
 0x794   : > { %4449 = vmatpush.bf16.msra.mxu0 %v13310_v52  ;;  %4721 = vmatpush.bf16.msrb.mxu2 %v13333_v30  ;;  %v13344_v30 = vld [vmem:[%s16921_s5 + $0x38] sm:$0xff] }
 0x795   : > { %11235 = vmatmul.msk.bf16.vlgmr.msrb.gmra.mxu1 %vm4034_vm15, %v11234_v48 }
 0x797   : > { %4468 = vmatpush.bf16.msrb.mxu3 %v13313_v51 }
 0x798   : > { %4450 = vmatpush.bf16.msra.mxu0 %v13309_v55  ;;  %4722 = vmatpush.bf16.msrb.mxu2 %v13332_v32  ;;  %v13336_v32 = vld [vmem:[%s16921_s5] sm:$0xff] }
 0x79b   : > { %11236 = vmatmul.msk.bf16.vlgmr.msra.gmra.mxu2 %vm4034_vm15, %v11234_v48  ;;  %4469 = vmatpush.bf16.msrb.mxu3 %v13312_v53 }
 0x79c   : > { %4451 = vmatpush.bf16.msra.mxu0 %v13308_v56  ;;  %4723 = vmatpush.bf16.msrb.mxu2 %v13331_v34  ;;  %v13354_v34 = vld [vmem:[%s16921_s5 + $0x80] sm:$0xff] }
 0x7a0   : > { %4452 = vmatpush.bf16.msra.mxu0 %v13307_v57 }
 0x7a4   : > { %4453 = vmatpush.bf16.msra.mxu0 %v13306_v59 }
 0x7a8   : > { %4454 = vmatpush.bf16.msra.mxu0 %v13305_v60  ;;  %v13864_v60 = vld [vmem:[#allocation2] ss:$0 sm:$0xff] }
 0x7ac   : > { %4455 = vmatpush.bf16.msra.mxu0 %v13304_v10 }
 0x7ea   : > { %v4071_v61 = vpop.f32.mrf.mxu1 }
 0x7f2   : > { %v4073_v62 = vpop.f32.mrf.mxu1 }
 0x7f3   : > { %v4090_v63 = vpack.c.bf16 %v4073_v62, %v4071_v61 }
 0x7f5   : > { %4211 = vmatmul.bf16.vlgmr.msra.gmra.mxu3 %v4090_v63 }
 0x7f6   : > { %4525 = vmatpush.bf16.msra.mxu3 %v15212_v24  ;;  %v4085_v0 = vpop.f32.mrf.mxu2  ;;  %v13325_v24 = vld [vmem:[%s16917_s6 + $0xd0] sm:$0xff] }
 0x7fe   : > { %v4087_v1 = vpop.f32.mrf.mxu2 }
 0x7ff   : > { %v4091_v5 = vpack.c.bf16 %v4087_v1, %v4085_v0 }
 0x801   : > { %11093 = vmatmul.msk.bf16.vlgmr.msrb.gmra.mxu0 %vm2452_vm2, %v4091_v5 }
 0x802   : > { %v4279_v8 = vpop.f32.mrf.mxu1  ;;  %4588 = vmatpush.bf16.msrb.mxu0 %v13322_v4 }
 0x805   : > { %11228 = vmatmul.msk.bf16.vlgmr.msrb.gmra.mxu3 %vm2452_vm2, %v15207_v23 }
 0x806   : > { %4589 = vmatpush.bf16.msrb.mxu0 %v13321_v6 }
 0x80a   : > { %v15265_v12 = vpop.f32.mrf.mxu1  ;;  %4590 = vmatpush.bf16.msrb.mxu0 %v13320_v7 }
 0x80e   : > { %4591 = vmatpush.bf16.msrb.mxu0 %v13319_v14  ;;  %v4342_v20 = vpop.f32.mrf.mxu2  ;;  %v13342_v14 = vld [vmem:[%s16919_s3 + $0xc] sm:$0xff] }
 0x811   : > { %4456 = vmatmul.bf16.vlgmr.msra.gmra.mxu0 %v15197_v13  ;;  %v13328_v13 = vld [vmem:[%s16917_s6 + $0xe8] sm:$0xff] }
 0x812   : > { %v4498_v17 = vpop.f32.mrf.mxu1  ;;  %4592 = vmatpush.bf16.msrb.mxu0 %v13318_v15  ;;  %4704 = vmatpush.bf16.msra.mxu1 %v13328_v13  ;;  %v4743_v15 = vld [vmem:[%s16919_s3 + $0x8] sm:$0xf]  ;;  %v13347_v13 = vld [vmem:[%s16921_s5 + $0x50] sm:$0xff] }
 0x815   : > { %11237 = vmatmul.msk.bf16.vlgmr.msra.gmra.mxu3 %vm4034_vm15, %v11234_v48 }
 0x816   : > { %4593 = vmatpush.bf16.msrb.mxu0 %v13317_v2  ;;  %v4344_v23 = vpop.f32.mrf.mxu2  ;;  %4705 = vmatpush.bf16.msra.mxu1 %v13327_v22  ;;  %v4749_v2 = vunpack.c.l.b16 %v4743_v15  ;;  %v13340_v22 = vld [vmem:[%s16921_s5 + $0x20] sm:$0xff] }
 0x81a   : > { %v4500_v18 = vpop.f32.mrf.mxu1  ;;  %4706 = vmatpush.bf16.msra.mxu1 %v13326_v54  ;;  %v13339_v54 = vld [vmem:[%s16921_s5 + $0x18] sm:$0xff] }
 0x81b   : > { %v4503_v3 = vpack.c.bf16 %v4500_v18, %v4498_v17  ;;  %v11356_v17 = vld [vmem:[%s16919_s3 + $0x14] sm:$0xf] }
 0x81c   : > { %v4802_v18 = vunpack.c.l.b16 %v11356_v17 }
 0x81e   : > { %v4513_v25 = vpop.f32.mrf.mxu2  ;;  %4707 = vmatpush.bf16.msra.mxu1 %v13325_v24  ;;  %v4804_v19 = vpack.c.b16 %v4802_v18, %v4802_v18  ;;  %v13349_v24 = vld [vmem:[%s16919_s3 + $0x18] sm:$0xff] }
 0x821   : > { %11274 = vmatmul.msk.bf16.vlgmr.msrb.gmra.mxu0 %vm16797_vm13, %v4503_v3  ;;  %v4751_v3 = vpack.c.b16 %v4749_v2, %v4749_v2 }
 0x822   : > { %4708 = vmatpush.bf16.msra.mxu1 %v13324_v9 }
 0x826   : > { %v4515_v27 = vpop.f32.mrf.mxu2  ;;  %4709 = vmatpush.bf16.msra.mxu1 %v13323_v26  ;;  %v13345_v26 = vld [vmem:[%s16921_s5 + $0x40] sm:$0xff] }
 0x827   : > { %v4532_v31 = vpack.c.bf16 %v4515_v27, %v4513_v25  ;;  %v11429_v25 = vld [vmem:[%s16919_s3 + $0x20] sm:$0xf]  ;;  %v13338_v27 = vld [vmem:[%s16921_s5 + $0x10] sm:$0xff]  ;;  %s16923_s3 = smov %s16922_s7 }
 0x828   : > { %v4973_v9 = vunpack.c.l.b16 %v11429_v25  ;;  %v13370_v15 = vld [vmem:[%s16923_s3 + $0x40] sm:$0xff] }
 0x829   : > { %4710 = vmatmul.bf16.vlgmr.msra.gmra.mxu1 %v4532_v31  ;;  %v13343_v31 = vld [vmem:[%s16921_s5 + $0x30] sm:$0xff] }
 0x82a   : > { %4948 = vmatpush.bf16.msrb.mxu1 %v13341_v21  ;;  %v4975_v11 = vpack.c.b16 %v4973_v9, %v4973_v9  ;;  %v13362_v21 = vld [vmem:[%s16923_s3] sm:$0xff] }
 0x82e   : > { %4949 = vmatpush.bf16.msrb.mxu1 %v13340_v22 }
 0x832   : > { %4950 = vmatpush.bf16.msrb.mxu1 %v13339_v54 }
 0x836   : > { %4951 = vmatpush.bf16.msrb.mxu1 %v13338_v27 }
 0x878   : > { %v4212_v16 = vpop.f32.mrf.mxu3 }
 0x87e   : > { %v4226_v33 = vpop.f32.mrf.mxu0 }
 0x87f   : > { %v4227_v36 = vadd.f32 %v4226_v33, %v4212_v16  ;;  %v13337_v16 = vld [vmem:[%s16921_s5 + $0x8] sm:$0xff] }
 0x880   : > { %v4214_v49 = vpop.f32.mrf.mxu3  ;;  %4952 = vmatpush.bf16.msrb.mxu1 %v13337_v16  ;;  %v13355_v33 = vld [vmem:[%s16921_s5 + $0x88] sm:$0xff] }
 0x881   : > { %v4280_v38 = vadd.f32 %v4279_v8, %v4227_v36 }
 0x883   : > { %v4347_v41 = vadd.f32 %v4342_v20, %v4280_v38  ;;  %v13348_v20 = vld [vmem:[%s16920_s28 + $0x58] sm:$0xff]  ;;  %v13351_v38 = vld [vmem:[%s16921_s5 + $0x68] sm:$0xff]  ;;  %s16926_s28 = sld [smem:[#allocation48_spill]] }
 0x884   : > { %4888 = vmatpush.bf16.msra.mxu0 %v13348_v20  ;;  %4953 = vmatpush.bf16.msrb.mxu1 %v13336_v32 }
 0x886   : > { %v4228_v35 = vpop.f32.mrf.mxu0 }
 0x887   : > { %v4229_v48 = vadd.f32 %v4228_v35, %v4214_v49  ;;  %v13353_v49 = vld [vmem:[%s16921_s5 + $0x78] sm:$0xff]  ;;  %v13352_v35 = vld [vmem:[%s16921_s5 + $0x70] sm:$0xff] }
 0x888   : > { %v4471_v37 = vpop.f32.mrf.mxu3  ;;  %4889 = vmatpush.bf16.msra.mxu0 %v13347_v13 }
 0x889   : > { %v4282_v50 = vadd.f32 %v15265_v12, %v4229_v48  ;;  %v13335_v12 = vld [vmem:[%s16918_s1] sm:$0xff]  ;;  %s16924_s1 = sld [smem:[#allocation52_spill]] }
 0x88b   : > { %v4348_v55 = vadd.f32 %v4344_v23, %v4282_v50  ;;  %v13346_v23 = vld [vmem:[%s16921_s5 + $0x48] sm:$0xff] }
 0x88c   : > { %4890 = vmatpush.bf16.msra.mxu0 %v13346_v23 }
 0x88e   : > { %v4457_v58 = vpop.f32.mrf.mxu0 }
 0x88f   : > { %v4472_v39 = vadd.f32 %v4471_v37, %v4457_v58  ;;  %v13350_v58 = vld [vmem:[%s16921_s5 + $0x60] sm:$0xff]  ;;  %s16925_s5 = smov %s16924_s1 }
 0x890   : > { %v4473_v42 = vpop.f32.mrf.mxu3  ;;  %4891 = vmatpush.bf16.msra.mxu0 %v13345_v26  ;;  %v13359_v20 = vld [vmem:[%s16925_s5 + $0x18] sm:$0xff]  ;;  %v13358_v26 = vld [vmem:[%s16925_s5 + $0x10] sm:$0xff]  ;;  %v13357_v27 = vld [vmem:[%s16925_s5 + $0x8] sm:$0xff] }
 0x891   : > { %v4476_v43 = vadd.f32 %v4472_v39, %v4347_v41 }
 0x894   : > { %4892 = vmatpush.bf16.msra.mxu0 %v13344_v30 }
 0x896   : > { %v4459_v46 = vpop.f32.mrf.mxu0 }
 0x897   : > { %v4474_v51 = vadd.f32 %v4473_v42, %v4459_v46 }
 0x898   : > { %v4527_v29 = vpop.f32.mrf.mxu3  ;;  %4893 = vmatpush.bf16.msra.mxu0 %v13343_v31  ;;  %v13356_v31 = vld [vmem:[%s16925_s5] sm:$0xff] }
 0x899   : > { %v4477_v57 = vadd.f32 %v4474_v51, %v4348_v55  ;;  %v13377_v55 = vld [vmem:[%s16922_s7 + $0x78] sm:$0xff]  ;;  %s13673_s7 = smul.u32 72, %s14902_s2 }
 0x89b   : > { %s15342_s6 = scalar_lea.vmem %s16926_s28, %s13673_s7  ;;  %s16930_s28 = sld [smem:[#allocation56_spill]] }
 0x89c   : > { %v15348_v17 = vld [vmem:[%s15342_s6 + $0x8] sm:$0xff]  ;;  %v15351_v2 = vld [vmem:[%s15342_s6 + $0x20] sm:$0xff]  ;;  %v15358_v13 = vld [vmem:[%s15342_s6 + $0x10] sm:$0xff]  ;;  %s16955_s7 = sld [smem:[#allocation58_spill]] }
 0x89d   : > { %v15361_v22 = vld [vmem:[%s15342_s6 + $0x28] sm:$0xff]  ;;  %v15366_v54 = vld [vmem:[%s15342_s6] sm:$0xff] }
 0x89e   : > { %v4595_v47 = vpop.f32.mrf.mxu0  ;;  %v5098_v23 = vpack.c.bf16 %v15361_v22, %v15358_v13 }
 0x89f   : > { %v4600_v53 = vadd.f32 %v4595_v47, %v4476_v43 }
 0x8a0   : > { %v4529_v44 = vpop.f32.mrf.mxu3 }
 0x8a1   : > { %v4533_v45 = vpack.c.bf16 %v4529_v44, %v4527_v29 }
 0x8a3   : > { %11347 = vmatmul.msk.bf16.vlgmr.msrb.gmra.mxu2 %vm2452_vm2, %v4533_v45  ;;  %vm16796_vm2 = vcmask 261120  }
 0x8a6   : > { %v4711_v28 = vpop.f32.mrf.mxu1  ;;  %v4597_v56 = vpop.f32.mrf.mxu0 }
 0x8a7   : > { %v4601_v62 = vadd.f32 %v4597_v56, %v4477_v57  ;;  %v13369_v56 = vld [vmem:[%s16923_s3 + $0x38] sm:$0xff]  ;;  %v13376_v57 = vld [vmem:[%s16923_s3 + $0x70] sm:$0xff] }
 0x8a8   : > { %5333 = vmatpush.bf16.msra.mxu1 %v13369_v56 }
 0x8ae   : > { %v4713_v10 = vpop.f32.mrf.mxu1 }
 0x926   : > { %v4725_v40 = vpop.f32.mrf.mxu2 }
 0x927   : > { %v4726_v52 = vadd.f32 %v4725_v40, %v4711_v28 }
 0x929   : > { %v4730_v59 = vadd.f32 %v4726_v52, %v4600_v53 }
 0x92b   : > { %v4736_v0 = vadd.f32 %v13864_v60, %v4730_v59  ;;  %v13368_v59 = vld [vmem:[%s16923_s3 + $0x30] sm:$0xff] }
 0x92c   : > { %5334 = vmatpush.bf16.msra.mxu1 %v13368_v59 }
 0x92d   : > { %v4738_v5 = vmax.f32 %v4736_v0, 0.0  ;;  %v13365_v0 = vld [vmem:[%s16923_s3 + $0x18] sm:$0xff] }
 0x92e   : > { %v4727_v61 = vpop.f32.mrf.mxu2 }
 0x92f   : > { %v4728_v63 = vadd.f32 %v4727_v61, %v4713_v10  ;;  %v13367_v10 = vld [vmem:[%s16923_s3 + $0x28] sm:$0xff]  ;;  %v13374_v61 = vld [vmem:[%s16923_s3 + $0x60] sm:$0xff] }
 0x930   : > { %5335 = vmatpush.bf16.msra.mxu1 %v13367_v10 }
 0x931   : > { %v4731_v1 = vadd.f32 %v4728_v63, %v4601_v62  ;;  %v13366_v62 = vld [vmem:[%s16923_s3 + $0x20] sm:$0xff]  ;;  %v13373_v63 = vld [vmem:[%s16923_s3 + $0x58] sm:$0xff] }
 0x933   : > { %v4737_v4 = vadd.f32 %v13864_v60, %v4731_v1  ;;  %v13375_v60 = vld [vmem:[%s16923_s3 + $0x68] sm:$0xff]  ;;  %v13372_v1 = vld [vmem:[%s16923_s3 + $0x50] sm:$0xff] }
 0x934   : > { %5336 = vmatpush.bf16.msra.mxu1 %v13366_v62 }
 0x935   : > { %v4739_v8 = vmax.f32 %v4737_v4, 0.0  ;;  %v13361_v4 = vld [vmem:[%s16924_s1 + $0x28] sm:$0xff]  ;;  %s16927_s1 = sld [smem:[#allocation55_spill]] }
 0x936   : > { %5162 = vmatpush.bf16.msrb.mxu0 %v13361_v4 }
 0x937   : > { %v4740_v6 = vpack.c.bf16 %v4739_v8, %v4738_v5  ;;  %v13379_v5 = vld [vmem:[%s16923_s3 + $0x88] sm:$0xff]  ;;  %v13360_v8 = vld [vmem:[%s16925_s5 + $0x20] sm:$0xff] }
 0x938   : > { %5337 = vmatpush.bf16.msra.mxu1 %v13365_v0 }
 0x939   : > { %v4759_v7 = vsel %vm4038_vm14, %v4740_v6, 0  ;;  %v13364_v6 = vld [vmem:[%s16923_s3 + $0x10] sm:$0xff]  ;;  %vm5720_vm14 = vcmask 195584  }
 0x93a   : > { %4768 = vmatpush.bf16.msrb.mxu3 %v4759_v7  ;;  %4818 = vmatpush.bf16.msra.mxu2 %v4759_v7 }
 0x93b   : > { %5163 = vmatpush.bf16.msrb.mxu0 %v13360_v8  ;;  %v11600_v59 = vld [vmem:[%s16927_s1 + $0x30] sm:$0xf] }
 0x93c   : > { %5338 = vmatpush.bf16.msra.mxu1 %v13364_v6 }
 0x93d   : > { %11352 = vmatmul.msk.bf16.vlgmr.msrb.gmra.mxu3 %vm4034_vm15, %v13335_v12  ;;  %11361 = vmatmul.msk.bf16.vlgmr.msra.gmra.mxu2 %vm4034_vm15, %v13342_v14  ;;  %v13378_v12 = vld [vmem:[%s16923_s3 + $0x80] sm:$0xff]  ;;  %v13363_v14 = vld [vmem:[%s16923_s3 + $0x8] sm:$0xff] }
 0x93e   : > { %4989 = vmatpush.bf16.msra.mxu3 %v4759_v7  ;;  %5059 = vmatpush.bf16.msrb.mxu2 %v13355_v33  ;;  %v13371_v7 = vld [vmem:[%s16923_s3 + $0x48] sm:$0xff]  ;;  %s16928_s3 = smov %s16927_s1  ;;  %s16957_s1 = sld [smem:[#allocation59_spill]] }
 0x93f   : > { %5164 = vmatpush.bf16.msrb.mxu0 %v13359_v20  ;;  %v13386_v10 = vld [vmem:[%s16928_s3 + $0x34] sm:$0xf]  ;;  %v11608_v0 = vld [vmem:[%s16928_s3 + $0x38] sm:$0xf] }
 0x940   : > { %5339 = vmatpush.bf16.msra.mxu1 %v13363_v14  ;;  %v11588_v6 = vld [vmem:[%s16928_s3 + $0x18] sm:$0xf] }
 0x942   : > { %5060 = vmatpush.bf16.msrb.mxu2 %v13354_v34  ;;  %5351 = vmatpush.bf16.msrb.mxu3 %v13377_v55  ;;  %v15378_v34 = vld [vmem:[%s15342_s6 + $0x38] sm:$0xff] }
 0x943   : > { %5165 = vmatpush.bf16.msrb.mxu0 %v13358_v26 }
 0x944   : > { %5340 = vmatpush.bf16.msra.mxu1 %v13362_v21  ;;  %s16958_s5 = smov %s16957_s1 }
 0x946   : > { %5061 = vmatpush.bf16.msrb.mxu2 %v13353_v49  ;;  %5352 = vmatpush.bf16.msrb.mxu3 %v13376_v57  ;;  %v5100_v49 = vpack.c.bf16 %v15378_v34, %v15378_v34 }
 0x947   : > { %5166 = vmatpush.bf16.msrb.mxu0 %v13357_v27  ;;  %v11578_v27 = vld [vmem:[%s16928_s3 + $0xc] sm:$0xf0] }
 0x94a   : > { %5062 = vmatpush.bf16.msrb.mxu2 %v13352_v35  ;;  %5353 = vmatpush.bf16.msrb.mxu3 %v13375_v60  ;;  %v15383_v35 = vld [vmem:[%s15342_s6 + $0x40] sm:$0xff]  ;;  %v13387_v60 = vld [vmem:[%s16928_s3 + $0x38] sm:$0xf0] }
 0x94b   : > { %5167 = vmatpush.bf16.msrb.mxu0 %v13356_v31  ;;  %v11601_v62 = vor.u32 %v13387_v60, %v11600_v59 }
 0x94d   : > { %11353 = vmatmul.msk.bf16.gmra.mxu3 %vm4034_vm15, %v4751_v3  ;;  %11362 = vmatmul.msk.bf16.gmra.mxu2 %vm4034_vm15, %v4804_v19  ;;  %v5097_v19 = vpack.c.bf16 %v15351_v2, %v15348_v17 }
 0x94e   : > { %5063 = vmatpush.bf16.msrb.mxu2 %v13351_v38  ;;  %5354 = vmatpush.bf16.msrb.mxu3 %v13374_v61 }
 0x952   : > { %5064 = vmatpush.bf16.msrb.mxu2 %v13350_v58  ;;  %5355 = vmatpush.bf16.msrb.mxu3 %v13373_v63  ;;  %v11602_v63 = vld [vmem:[%s16928_s3 + $0x3c] sm:$0xf0] }
 0x953   : > { %v11605_v4 = vor.u32 %v13386_v10, %v11602_v63 }
 0x956   : > { %5356 = vmatpush.bf16.msrb.mxu3 %v13372_v1  ;;  %5375 = vmatpush.bf16.msra.mxu2 %v13379_v5  ;;  %v13388_v1 = vld [vmem:[%s16928_s3 + $0x40] sm:$0xf0] }
 0x957   : > { %v11609_v5 = vor.u32 %v13388_v1, %v11608_v0 }
 0x95a   : > { %5357 = vmatpush.bf16.msrb.mxu3 %v13371_v7  ;;  %5376 = vmatpush.bf16.msra.mxu2 %v13378_v12  ;;  %v13384_v7 = vld [vmem:[%s16928_s3 + $0x20] sm:$0xf0]  ;;  %v13383_v12 = vld [vmem:[%s16928_s3 + $0x1c] sm:$0xf] }
 0x95d   : > { %11434 = vmatmul.msk.bf16.vlgmr.msra.gmra.mxu3 %vm4034_vm15, %v13349_v24  ;;  %v15369_v24 = vld [vmem:[%s15342_s6 + $0x18] sm:$0xff] }
 0x95e   : > { %5358 = vmatpush.bf16.msrb.mxu3 %v13370_v15  ;;  %v11589_v15 = vor.u32 %v13384_v7, %v11588_v6 }
 0x962   : > { %5510 = vmatpush.bf16.msra.mxu3 %v11609_v5 }
 0x96d   : > { %11435 = vmatmul.msk.bf16.gmra.mxu3 %vm4034_vm15, %v4975_v11  ;;  %v5096_v11 = vpack.c.bf16 %v15369_v24, %v15366_v54 }
 0x97d   : > { %5359 = vmatmul.bf16.vlgmr.msrb.gmra.mxu3 %v5097_v19  ;;  %v13385_v19 = vld [vmem:[%s16928_s3 + $0x28] sm:$0xf0] }
 0x98d   : > { %5364 = vmatmul.bf16.gmra.mxu3 %v5100_v49 }
 0x9c0   : > { %v4770_v36 = vpop.f32.mrf.mxu3  ;;  %v4820_v37 = vpop.f32.mrf.mxu2 }
 0x9c8   : > { %v4772_v39 = vpop.f32.mrf.mxu3  ;;  %v4822_v41 = vpop.f32.mrf.mxu2 }
 0x9c9   : > { %v4779_v42 = vpack.c.bf16 %v4772_v39, %v4770_v36  ;;  %v4829_v43 = vpack.c.bf16 %v4822_v41, %v4820_v37  ;;  %v5101_v36 = vpack.c.bf16 %v15383_v35, %v15383_v35  ;;  %v15388_v37 = vld [vmem:[%s15342_s6 + $0x30] sm:$0xff]  ;;  %s16929_s6 = sld [smem:[#allocation57_spill]] }
 0x9ca   : > { %v5099_v38 = vpack.c.bf16 %v15388_v37, %v15388_v37 }
 0x9cb   : > { %11399 = vmatmul.msk.bf16.vlgmr.msra.gmra.mxu0 %vm16797_vm13, %v4829_v43  ;;  %11425 = vmatmul.msk.bf16.vlgmr.msrb.gmra.mxu1 %vm16797_vm13, %v4779_v42  ;;  %v13865_v43 = vld [vmem:[#allocation5] ss:$0 sm:$0xff] }
 0x9cc   : > { %5474 = vmatpush.bf16.msra.mxu0 %v11601_v62  ;;  %5492 = vmatpush.bf16.msrb.mxu1 %v11605_v4 }
 0x9cf   : > { %v5711_v60 = vld [vmem:[%s16929_s6 + $0x8] sm:$0xf] }
 0x9d0   : > { %v4775_v29 = vpop.f32.mrf.mxu3  ;;  %v4825_v44 = vpop.f32.mrf.mxu2  ;;  %5475 = vmatpush.bf16.msra.mxu0 %v11589_v15  ;;  %v5717_v62 = vunpack.c.l.b16 %v5711_v60 }
 0x9d1   : > { %v4830_v45 = vpack.c.bf16 %v4825_v44, %v4825_v44  ;;  %v4780_v48 = vpack.c.bf16 %v4775_v29, %v4775_v29 }
 0x9d2   : > { %v15431_v4 = vpack.c.b16 %v5717_v62, %v5717_v62 }
 0x9d8   : > { %v4777_v46 = vpop.f32.mrf.mxu3  ;;  %v4827_v47 = vpop.f32.mrf.mxu2 }
 0x9db   : > { %11400 = vmatmul.msk.bf16.gmra.mxu0 %vm16797_vm13, %v4830_v45  ;;  %11426 = vmatmul.msk.bf16.gmra.mxu1 %vm16797_vm13, %v4780_v48 }
 0x9e0   : > { %v4991_v28 = vpop.f32.mrf.mxu3 }
 0x9e8   : > { %v4993_v40 = vpop.f32.mrf.mxu3 }
 0x9e9   : > { %v5000_v50 = vpack.c.bf16 %v4993_v40, %v4991_v28 }
 0x9eb   : > { %11472 = vmatmul.msk.bf16.vlgmr.msrb.gmra.mxu2 %vm16797_vm13, %v5000_v50  ;;  %5341 = vmatmul.bf16.vlgmr.msra.gmra.mxu1 %v5096_v11 }
 0x9f0   : > { %v4996_v51 = vpop.f32.mrf.mxu3 }
 0x9f1   : > { %v5001_v52 = vpack.c.bf16 %v4996_v51, %v4996_v51 }
 0x9f8   : > { %v4998_v53 = vpop.f32.mrf.mxu3 }
 0x9fb   : > { %11473 = vmatmul.msk.bf16.gmra.mxu2 %vm16797_vm13, %v5001_v52  ;;  %5346 = vmatmul.bf16.gmra.mxu1 %v5099_v38 }
 0xa00   : > { %v5360_v56 = vpop.f32.mrf.mxu3 }
 0xa08   : > { %v5362_v8 = vpop.f32.mrf.mxu3 }
 0xa0b   : > { %11572 = vmatmul.msk.bf16.vlgmr.msra.gmra.mxu2 %vm16796_vm2, %v5098_v23  ;;  %v11576_v23 = vld [vmem:[%s16928_s3] sm:$0xf] }
 0xa1b   : > { %11573 = vmatmul.msk.bf16.gmra.mxu2 %vm16796_vm2, %v5101_v36 }
 0xa48   : > { %v4895_v18 = vpop.f32.mrf.mxu0  ;;  %v4955_v3 = vpop.f32.mrf.mxu1 }
 0xa49   : > { %v4956_v39 = vadd.f32 %v4955_v3, %v4895_v18  ;;  %v11590_v18 = vld [vmem:[%s16928_s3 + $0x24] sm:$0xf0]  ;;  %v11596_v3 = vld [vmem:[%s16928_s3 + $0x20] sm:$0xf] }
 0xa4a   : > { %v11593_v20 = vor.u32 %v13383_v12, %v11590_v18  ;;  %v11597_v21 = vor.u32 %v13385_v19, %v11596_v3 }
 0xa4c   : > { %5493 = vmatpush.bf16.msrb.mxu1 %v11593_v20  ;;  %5511 = vmatpush.bf16.msra.mxu3 %v11597_v21 }
 0xa50   : > { %v4897_v25 = vpop.f32.mrf.mxu0  ;;  %v4957_v9 = vpop.f32.mrf.mxu1 }
 0xa51   : > { %v4958_v41 = vadd.f32 %v4957_v9, %v4897_v25  ;;  %v13381_v25 = vld [vmem:[%s16928_s3 + $0x8] sm:$0xf0]  ;;  %v13380_v9 = vld [vmem:[%s16928_s3 + $0x4] sm:$0xf] }
 0xa52   : > { %v11577_v26 = vor.u32 %v13381_v25, %v11576_v23  ;;  %v11581_v31 = vor.u32 %v13380_v9, %v11578_v27 }
 0xa54   : > { %5476 = vmatpush.bf16.msra.mxu0 %v11577_v26  ;;  %5494 = vmatpush.bf16.msrb.mxu1 %v11581_v31 }
 0xa58   : > { %v4900_v30 = vpop.f32.mrf.mxu0  ;;  %v4960_v16 = vpop.f32.mrf.mxu1 }
 0xa59   : > { %v4961_v48 = vadd.f32 %v4960_v16, %v4900_v30  ;;  %v11584_v30 = vld [vmem:[%s16928_s3 + $0x8] sm:$0xf]  ;;  %v13382_v16 = vld [vmem:[%s16928_s3 + $0x10] sm:$0xf0]  ;;  %s16956_s3 = smov %s16955_s7 }
 0xa60   : > { %v4962_v32 = vpop.f32.mrf.mxu1  ;;  %v4902_v33 = vpop.f32.mrf.mxu0 }
 0xa61   : > { %v11585_v32 = vor.u32 %v13382_v16, %v11584_v30  ;;  %v5365_v33 = vpop.f32.mrf.mxu3 }
 0xa63   : > { %5512 = vmatpush.bf16.msra.mxu3 %v11585_v32 }
 0xa68   : > { %v5342_v55 = vpop.f32.mrf.mxu1 }
 0xa69   : > { %v5367_v38 = vpop.f32.mrf.mxu3 }
 0xa6e   : > { %v5066_v58 = vpop.f32.mrf.mxu2 }
 0xa6f   : > { %v5075_v42 = vadd.f32 %v5066_v58, %v4956_v39  ;;  %v13866_v58 = vld [vmem:[#allocation8] ss:$0 sm:$0xff] }
 0xa70   : > { %v5344_v61 = vpop.f32.mrf.mxu1 }
 0xa71   : > { %v5082_v45 = vadd.f32 %v13865_v43, %v5075_v42 }
 0xa76   : > { %v5068_v29 = vpop.f32.mrf.mxu2 }
 0xa77   : > { %v5076_v44 = vadd.f32 %v5068_v29, %v4958_v41  ;;  %v5343_v41 = vadd.f32 %v13866_v58, %v5342_v55  ;;  %v5345_v29 = vadd.f32 %v13866_v58, %v5344_v61 }
 0xa78   : > { %v5347_v11 = vpop.f32.mrf.mxu1 }
 0xa79   : > { %v5083_v46 = vadd.f32 %v13865_v43, %v5076_v44  ;;  %v13867_v44 = vld [vmem:[#allocation7] ss:$0 sm:$0xff]  ;;  %v5348_v55 = vadd.f32 %v13866_v58, %v5347_v11 }
 0xa7b   : > { %v15393_v47 = vpack.c.bf16 %v5083_v46, %v5082_v45  ;;  %v15426_v45 = vld [vmem:[%s16929_s6] sm:$0xff]  ;;  %v5366_v0 = vadd.f32 %v5365_v33, %v5348_v55 }
 0xa7d   : > { %11498 = vmatmul.msk.bf16.vlgmr.msrb.gmra.mxu0 %vm16797_vm13, %v15393_v47 }
 0xa7e   : > { %v5071_v28 = vpop.f32.mrf.mxu2 }
 0xa7f   : > { %v5077_v40 = vadd.f32 %v5071_v28, %v4961_v48  ;;  %v5363_v48 = vadd.f32 %v5362_v8, %v5345_v29 }
 0xa80   : > { %v5349_v36 = vpop.f32.mrf.mxu1 }
 0xa81   : > { %v5084_v50 = vadd.f32 %v13865_v43, %v5077_v40  ;;  %v5361_v43 = vadd.f32 %v5360_v56, %v5343_v41 }
 0xa83   : > { %v15397_v51 = vpack.c.bf16 %v5084_v50, %v5084_v50 }
 0xa85   : > { %v15401_v52 = vsel %vm2615_vm3, %v15397_v51, 0 }
 0xa86   : > { %5735 = vmatpush.bf16.msrb.mxu2 %v15401_v52  ;;  %v5073_v53 = vpop.f32.mrf.mxu2 }
 0xa8a   : > { %5736 = vmatpush.bf16.msrb.mxu2 %v15393_v47 }
 0xa8d   : > { %11499 = vmatmul.msk.bf16.gmra.mxu0 %vm16797_vm13, %v15397_v51  ;;  %11629 = vmatmul.msk.bf16.vlgmr.msrb.gmra.mxu2 %vm5720_vm14, %v15426_v45 }
 0xa8e   : > { %v5378_v57 = vpop.f32.mrf.mxu2 }
 0xa8f   : > { %v5379_v46 = vadd.f32 %v5378_v57, %v5361_v43 }
 0xa96   : > { %v5380_v14 = vpop.f32.mrf.mxu2 }
 0xa97   : > { %v5381_v53 = vadd.f32 %v5380_v14, %v5363_v48  ;;  %v5407_v14 = vld [vmem:[%s16930_s28] sm:$0x7]  ;;  %s16970_s28 = sld [smem:[#allocation62_spill]] }
 0xa98   : > { %v5409_v15 = vperm.slane %v5407_v14, 0  ;;  %v5410_v18 = vperm.slane %v5407_v14, 1  ;;  %v5411_v9 = vperm.slane %v5407_v14, 2 }
 0xa9d   : > { %11630 = vmatmul.msk.bf16.gmra.mxu2 %vm5720_vm14, %v15431_v4 }
 0xa9e   : > { %v5383_v49 = vpop.f32.mrf.mxu2 }
 0xa9f   : > { %v5384_v5 = vadd.f32 %v5383_v49, %v5366_v0 }
 0xaa6   : > { %v5385_v39 = vpop.f32.mrf.mxu2 }
 0xafa   : > { %v5169_v42 = vpop.f32.mrf.mxu0 }
 0xafb   : > { %v5170_v28 = vadd.f32 %v13867_v44, %v5169_v42 }
 0xafd   : > { %v5387_v50 = vadd.f32 %v5379_v46, %v5170_v28 }
 0xaff   : > { %v5390_v56 = vmax.f32 %v5387_v50, 0.0 }
 0xb02   : > { %v5171_v40 = vpop.f32.mrf.mxu0 }
 0xb03   : > { %v5172_v59 = vadd.f32 %v13867_v44, %v5171_v40 }
 0xb05   : > { %v5388_v10 = vadd.f32 %v5381_v53, %v5172_v59 }
 0xb07   : > { %v5391_v61 = vmax.f32 %v5388_v10, 0.0 }
 0xb09   : > { %v5393_v63 = vpack.c.bf16 %v5391_v61, %v5390_v56 }
 0xb0a   : > { %v5174_v1 = vpop.f32.mrf.mxu0 }
 0xb0b   : > { %11610 = vmatmul.msk.bf16.vlgmr.msra.gmra.mxu0 %vm3913_vm1, %v5393_v63  ;;  %11612 = vmatmul.msk.bf16.vlgmr.msrb.gmra.mxu1 %vm3913_vm1, %v5393_v63  ;;  %v5175_v57 = vadd.f32 %v13867_v44, %v5174_v1 }
 0xb0c   : > { %11614 = vmatmul.msk.bf16.vlgmr.msra.gmra.mxu3 %vm3913_vm1, %v5393_v63 }
 0xb0d   : > { %v5389_v8 = vadd.f32 %v5384_v5, %v5175_v57 }
 0xb0f   : > { %v5392_v7 = vmax.f32 %v5389_v8, 0.0 }
 0xb11   : > { %v5394_v12 = vpack.c.bf16 %v5392_v7, %v5392_v7 }
 0xb12   : > { %v5176_v6 = vpop.f32.mrf.mxu0 }
 0xb1b   : > { %11611 = vmatmul.msk.bf16.gmra.mxu0 %vm3913_vm1, %v5394_v12  ;;  %11613 = vmatmul.msk.bf16.gmra.mxu1 %vm3913_vm1, %v5394_v12 }
 0xb1c   : > { %11615 = vmatmul.msk.bf16.gmra.mxu3 %vm3913_vm1, %v5394_v12 }
 0xb88   : > { %v5478_v3 = vpop.f32.mrf.mxu0  ;;  %v5496_v19 = vpop.f32.mrf.mxu1 }
 0xb89   : > { %v5479_v20 = vadd.f32 %v5478_v3, %v5409_v15  ;;  %v5497_v21 = vadd.f32 %v5496_v19, %v5410_v18 }
 0xb8b   : > { %v11616_v23 = vmul.f32 -1.442695, %v5479_v20  ;;  %v11617_v25 = vmul.f32 -1.442695, %v5497_v21 }
 0xb8d   : > { %13896 = vpow2.f32 %v11616_v23 }
 0xb8e   : > { %13898 = vpow2.f32 %v11617_v25 }
 0xb8f   : > { %v5514_v11 = vpop.f32.mrf.mxu3 }
 0xb90   : > { %v5515_v26 = vadd.f32 %v5514_v11, %v5411_v9  ;;  %v5480_v27 = vpop.f32.mrf.mxu0  ;;  %v5498_v30 = vpop.f32.mrf.mxu1 }
 0xb91   : > { %v5481_v16 = vadd.f32 %v5480_v27, %v5409_v15  ;;  %v5499_v31 = vadd.f32 %v5498_v30, %v5410_v18 }
 0xb92   : > { %v11618_v32 = vmul.f32 -1.442695, %v5515_v26 }
 0xb93   : > { %v13897_v33 = vpop.eup %13896  ;;  %v11619_v49 = vmul.f32 -1.442695, %v5481_v16  ;;  %v11620_v58 = vmul.f32 -1.442695, %v5499_v31 }
 0xb94   : > { %v13899_v36 = vpop.eup %13898  ;;  %v15442_v38 = vadd.f32 1.0, %v13897_v33  ;;  %13900 = vpow2.f32 %v11618_v32 }
 0xb95   : > { %v15444_v39 = vadd.f32 1.0, %v13899_v36  ;;  %13902 = vpow2.f32 %v11619_v49 }
 0xb96   : > { %13904 = vrcp.f32 %v15442_v38  ;;  %v5568_v57 = vand.u32 2147483647, %v15442_v38  ;;  %v5570_v14 = vand.u32 2147483648, %v15442_v38  ;;  %vm5564_vm15 = vweird.f32 %v15442_v38 }
 0xb97   : > { %13906 = vrcp.f32 %v15444_v39  ;;  %v5516_v41 = vpop.f32.mrf.mxu3  ;;  %v5583_v3 = vand.u32 2147483647, %v15444_v39  ;;  %v5585_v19 = vand.u32 2147483648, %v15444_v39  ;;  %vm5579_vm11 = vweird.f32 %v15444_v39 }
 0xb98   : > { %13908 = vpow2.f32 %v11620_v58  ;;  %v5517_v42 = vadd.f32 %v5516_v41, %v5411_v9  ;;  %v5483_v43 = vpop.f32.mrf.mxu0  ;;  %v5501_v29 = vpop.f32.mrf.mxu1  ;;  %vm15475_vm1 = vcmp.eq.f32.partialorder %v5568_v57, 8.507059e+37  ;;  %v5571_v16 = vor.u32 1.1754944e-38, %v5570_v14 }
 0xb99   : > { %v5484_v44 = vadd.f32 %v5483_v43, %v5409_v15  ;;  %v5502_v46 = vadd.f32 %v5501_v29, %v5410_v18  ;;  %vm15493_vm5 = vcmp.eq.f32.partialorder %v5583_v3, 8.507059e+37  ;;  %v5586_v36 = vor.u32 1.1754944e-38, %v5585_v19 }
 0xb9a   : > { %v13901_v48 = vpop.eup %13900  ;;  %v11621_v28 = vmul.f32 -1.442695, %v5517_v42 }
 0xb9b   : > { %v13903_v40 = vpop.eup %13902  ;;  %v15448_v50 = vadd.f32 1.0, %v13901_v48  ;;  %v11622_v53 = vmul.f32 -1.442695, %v5484_v44  ;;  %v11623_v10 = vmul.f32 -1.442695, %v5502_v46 }
 0xb9c   : > { %v15450_v59 = vpop.eup %13904  ;;  %v15452_v60 = vadd.f32 1.0, %v13903_v40  ;;  %13910 = vpow2.f32 %v11621_v28 }
 0xb9d   : > { %v15454_v55 = vpop.eup %13906  ;;  %v5560_v62 = vmul.f32 %v15450_v59, %v15442_v38  ;;  %13912 = vrcp.f32 %v15448_v50  ;;  %vm5565_vm12 = vweird.f32 %v15450_v59  ;;  %v5600_v3 = vand.u32 2147483648, %v15448_v50 }
 0xb9e   : > { %v13909_v56 = vpop.eup %13908  ;;  %v5575_v61 = vmul.f32 %v15454_v55, %v15444_v39  ;;  %13914 = vrcp.f32 %v15452_v60  ;;  %v5615_v26 = vand.u32 2147483648, %v15452_v60  ;;  %v5613_v31 = vand.u32 2147483647, %v15452_v60  ;;  %vm15505_vm6 = vmor %vm5564_vm15, %vm5565_vm12 }
 0xb9f   : > { %v5561_v63 = vsub.f32 1.0, %v5560_v62  ;;  %v15462_v0 = vadd.f32 1.0, %v13909_v56  ;;  %13916 = vpow2.f32 %v11622_v53  ;;  %v5519_v1 = vpop.f32.mrf.mxu3  ;;  %vm5609_vm4 = vweird.f32 %v15452_v60 }
 0xba0   : > { %v5576_v5 = vsub.f32 1.0, %v5575_v61  ;;  %13918 = vpow2.f32 %v11623_v10  ;;  %v5520_v8 = vadd.f32 %v5519_v1, %v5411_v9  ;;  %v5485_v6 = vpop.f32.mrf.mxu0  ;;  %v5503_v7 = vpop.f32.mrf.mxu1  ;;  %vm5580_vm7 = vweird.f32 %v15454_v55 }
 0xba1   : > { %13920 = vrcp.f32 %v15462_v0  ;;  %v5562_v12 = vmul.f32 %v15450_v59, %v5561_v63  ;;  %v5616_v28 = vor.u32 1.1754944e-38, %v5615_v26  ;;  %vm15518_vm8 = vcmp.eq.f32.partialorder %v5613_v31, 8.507059e+37  ;;  %vm15530_vm10 = vmor %vm5579_vm11, %vm5580_vm7 }
 0xba2   : > { %v13911_v15 = vpop.eup %13910  ;;  %v11624_v18 = vmul.f32 -1.442695, %v5520_v8  ;;  %v5577_v25 = vmul.f32 %v15454_v55, %v5576_v5  ;;  %vm5624_vm9 = vweird.f32 %v15462_v0  ;;  %v5628_v40 = vand.u32 2147483647, %v15462_v0 }
 0xba3   : > { %v15471_v20 = vpop.eup %13912  ;;  %v15473_v21 = vadd.f32 1.0, %v13911_v15  ;;  %v5563_v11 = vadd.f32 %v15450_v59, %v5562_v12  ;;  %v5630_v53 = vand.u32 2147483648, %v15462_v0  ;;  %v5598_v63 = vand.u32 2147483647, %v15448_v50 }
 0xba4   : > { %v15481_v9 = vpop.eup %13914  ;;  %13922 = vpow2.f32 %v11624_v18  ;;  %v5578_v44 = vadd.f32 %v15454_v55, %v5577_v25  ;;  %v5590_v62 = vmul.f32 %v15471_v20, %v15448_v50 }
 0xba5   : > { %v13917_v27 = vpop.eup %13916  ;;  %v5605_v30 = vmul.f32 %v15481_v9, %v15452_v60  ;;  %13924 = vrcp.f32 %v15473_v21  ;;  %v5567_v48 = vsel %vm15505_vm6, %v15450_v59, %v5563_v11  ;;  %vm5610_vm15 = vweird.f32 %v15481_v9 }
 0xba6   : > { %v13919_v32 = vpop.eup %13918  ;;  %v15490_v33 = vadd.f32 1.0, %v13917_v27  ;;  %v5572_v5 = vsel %vm15475_vm1, %v5571_v16, %v5567_v48  ;;  %v5582_v8 = vsel %vm15530_vm10, %v15454_v55, %v5578_v44  ;;  %vm15554_vm1 = vcmp.eq.f32.partialorder %v5628_v40, 8.507059e+37  ;;  %vm15561_vm12 = vmor %vm5609_vm4, %vm5610_vm15 }
 0xba7   : > { %v15497_v58 = vpop.eup %13920  ;;  %v5606_v41 = vsub.f32 1.0, %v5605_v30  ;;  %v15499_v42 = vadd.f32 1.0, %v13919_v32  ;;  %v5521_v43 = vpop.f32.mrf.mxu3  ;;  %v5591_v19 = vsub.f32 1.0, %v5590_v62  ;;  %v15566_v25 = vmul.f32 %v5572_v5, %v15366_v54 }
 0xba8   : > { %v5620_v46 = vmul.f32 %v15497_v58, %v15462_v0  ;;  %13926 = vrcp.f32 %v15490_v33  ;;  %v5658_v39 = vand.u32 2147483647, %v15490_v33  ;;  %v5660_v6 = vand.u32 2147483648, %v15490_v33 }
 0xba9   : > { %13928 = vrcp.f32 %v15499_v42  ;;  %v5607_v59 = vmul.f32 %v15481_v9, %v5606_v41  ;;  %v5673_v15 = vand.u32 2147483647, %v15499_v42  ;;  %v5675_v18 = vand.u32 2147483648, %v15499_v42 }
 0xbaa   : > { %v13923_v10 = vpop.eup %13922  ;;  %v5621_v56 = vsub.f32 1.0, %v5620_v46  ;;  %vm5654_vm11 = vweird.f32 %v15490_v33  ;;  %v15570_v11 = vsel %vm15493_vm5, %v5586_v36, %v5582_v8  ;;  %vm5625_vm4 = vweird.f32 %v15497_v58 }
 0xbab   : > { %v15535_v1 = vpop.eup %13924  ;;  %v15537_v57 = vadd.f32 1.0, %v13923_v10  ;;  %v5608_v7 = vadd.f32 %v15481_v9, %v5607_v59  ;;  %vm15579_vm6 = vcmp.eq.f32.partialorder %v5658_v39, 8.507059e+37  ;;  %v5661_v31 = vor.u32 1.1754944e-38, %v5660_v6  ;;  %vm15592_vm10 = vmor %vm5624_vm9, %vm5625_vm4 }
 0xbac   : > { %v5622_v12 = vmul.f32 %v15497_v58, %v5621_v56  ;;  %v5635_v14 = vmul.f32 %v15535_v1, %v15473_v21  ;;  %vm5669_vm5 = vweird.f32 %v15499_v42  ;;  %vm15584_vm7 = vcmp.eq.f32.partialorder %v5673_v15, 8.507059e+37 }
 0xbad   : > { %13930 = vrcp.f32 %v15537_v57  ;;  %v5612_v30 = vsel %vm15561_vm12, %v15481_v9, %v5608_v7  ;;  %v5676_v9 = vor.u32 1.1754944e-38, %v5675_v18  ;;  %v5631_v44 = vor.u32 1.1754944e-38, %v5630_v53 }
 0xbae   : > { %v13927_v55 = vpop.eup %13926  ;;  %v5623_v60 = vadd.f32 %v15497_v58, %v5622_v12  ;;  %v5636_v32 = vsub.f32 1.0, %v5635_v14  ;;  %v5617_v43 = vsel %vm15518_vm8, %v5616_v28, %v5612_v30  ;;  %vm5684_vm15 = vweird.f32 %v15537_v57 }
 0xbaf   : > { %v13929_v26 = vpop.eup %13928  ;;  %v5650_v27 = vmul.f32 %v13927_v55, %v15490_v33  ;;  %vm5655_vm12 = vweird.f32 %v13927_v55  ;;  %v5688_v10 = vand.u32 2147483647, %v15537_v57  ;;  %vm5594_vm8 = vweird.f32 %v15448_v50 }
 0xbb0   : > { %v5665_v16 = vmul.f32 %v13929_v26, %v15499_v42  ;;  %v5627_v40 = vsel %vm15592_vm10, %v15497_v58, %v5623_v60  ;;  %vm5670_vm9 = vweird.f32 %v13929_v26  ;;  %v5592_v38 = vmul.f32 %v15471_v20, %v5591_v19  ;;  %vm5656_vm4 = vmor %vm5654_vm11, %vm5655_vm12 }
 0xbb1   : > { %v5651_v49 = vsub.f32 1.0, %v5650_v27  ;;  %v5697_v62 = vmul.f32 %v5617_v43, %v15369_v24  ;;  %v5690_v56 = vand.u32 2147483648, %v15537_v57  ;;  %v5637_v59 = vmul.f32 %v15535_v1, %v5636_v32  ;;  %vm5671_vm0 = vmor %vm5669_vm5, %vm5670_vm9 }
 0xbb2   : > { %v5666_v41 = vsub.f32 1.0, %v5665_v16  ;;  %v5632_v5 = vsel %vm15554_vm1, %v5631_v44, %v5627_v40  ;;  %vm5595_vm10 = vweird.f32 %v15471_v20  ;;  %vm5640_vm13 = vweird.f32 %v15535_v1  ;;  %v13392_v44 = vld [vmem:[%s16956_s3 + $0x10] sm:$0xff]  ;;  %v13437_v40 = vld [vmem:[%s16957_s1 + $0x118] sm:$0xff]  ;;  %s16983_s1 = sld [smem:[#allocation65_spill]] }
 0xbb3   : > { %v13931_v46 = vpop.eup %13930  ;;  %v5652_v48 = vmul.f32 %v13927_v55, %v5651_v49  ;;  %v5638_v24 = vadd.f32 %v15535_v1, %v5637_v59  ;;  %v5593_v7 = vadd.f32 %v15471_v20, %v5592_v38  ;;  %vm5639_vm1 = vweird.f32 %v15473_v21  ;;  %v13403_v38 = vld [vmem:[%s16958_s5 + $0x38] sm:$0xff]  ;;  %v13408_v59 = vld [vmem:[%s16958_s5 + $0x60] sm:$0xff] }
 0xbb4   : > { %v5680_v0 = vmul.f32 %v13931_v46, %v15537_v57  ;;  %v5667_v28 = vmul.f32 %v13929_v26, %v5666_v41  ;;  %vm5685_vm2 = vweird.f32 %v13931_v46  ;;  %v5643_v42 = vand.u32 2147483647, %v15473_v21  ;;  %vm15626_vm11 = vmor %vm5639_vm1, %vm5640_vm13  ;;  %5980 = vmatpush.bf16.msra.mxu2 %v13403_v38 }
 0xbb5   : > { %v5653_v53 = vadd.f32 %v13927_v55, %v5652_v48  ;;  %v5645_v19 = vand.u32 2147483648, %v15473_v21  ;;  %v5698_v27 = vmul.f32 %v5632_v5, %v15351_v2  ;;  %vm15646_vm13 = vmor %vm5594_vm8, %vm5595_vm10  ;;  %v5738_v2 = vpop.f32.mrf.mxu2  ;;  %v5601_v32 = vor.u32 1.1754944e-38, %v5600_v3  ;;  %v13413_v5 = vld [vmem:[%s16958_s5 + $0x88] sm:$0xff]  ;;  %v13426_v3 = vld [vmem:[%s16958_s5 + $0xc0] sm:$0xff] }
 0xbb6   : > { %v5681_v61 = vsub.f32 1.0, %v5680_v0  ;;  %v5668_v58 = vadd.f32 %v13929_v26, %v5667_v28  ;;  %v5695_v36 = vmul.f32 %v15570_v11, %v15348_v17  ;;  %vm5599_vm5 = vcmp.eq.f32.partialorder %v5598_v63, 8.507059e+37  ;;  %v13395_v63 = vld [vmem:[%s16955_s7 + $0x28] sm:$0xff]  ;;  %v13394_v11 = vld [vmem:[%s16956_s3 + $0x20] sm:$0xff]  ;;  %v13411_v28 = vld [vmem:[%s16958_s5 + $0x78] sm:$0xff]  ;;  %s16973_s7 = sld [smem:[#allocation61_spill]] }
 0xbb7   : > { %v5657_v8 = vsel %vm5656_vm4, %v13927_v55, %v5653_v53  ;;  %v5646_v57 = vor.u32 1.1754944e-38, %v5645_v19  ;;  %v13410_v53 = vld [vmem:[%s16958_s5 + $0x70] sm:$0xff]  ;;  %vm16961_vm12 = vcmask 261120   ;;  %v13396_v55 = vld [vmem:[%s16958_s5] sm:$0xff]  ;;  %v13419_v19 = vld [vmem:[%s16956_s3 + $0x58] sm:$0xff] }
 0xbb8   : > { %v5662_v39 = vsel %vm15579_vm6, %v5661_v31, %v5657_v8  ;;  %v5672_v33 = vsel %vm5671_vm0, %v13929_v26, %v5668_v58  ;;  %v5682_v6 = vmul.f32 %v13931_v46, %v5681_v61  ;;  %vm5686_vm0 = vmor %vm5684_vm15, %vm5685_vm2  ;;  %vm5689_vm6 = vcmp.eq.f32.partialorder %v5688_v10, 8.507059e+37  ;;  %v13436_v10 = vld [vmem:[%s16958_s5 + $0x110] sm:$0xff]  ;;  %v13401_v61 = vld [vmem:[%s16958_s5 + $0x28] sm:$0xff] }
 0xbb9   : > { %v5700_v12 = vmul.f32 %v5662_v39, %v15388_v37  ;;  %v5677_v14 = vsel %vm15584_vm7, %v5676_v9, %v5672_v33  ;;  %v5691_v37 = vor.u32 1.1754944e-38, %v5690_v56  ;;  %vm5644_vm2 = vcmp.eq.f32.partialorder %v5643_v42, 8.507059e+37  ;;  %v13402_v56 = vld [vmem:[%s16958_s5 + $0x30] sm:$0xff]  ;;  %v13407_v58 = vld [vmem:[%s16958_s5 + $0x58] sm:$0xff]  ;;  %v13400_v8 = vld [vmem:[%s16958_s5 + $0x20] sm:$0xff] }
 0xbba   : > { %v5701_v15 = vmul.f32 %v5677_v14, %v15378_v34  ;;  %v5683_v18 = vadd.f32 %v13931_v46, %v5682_v6  ;;  %v5642_v34 = vsel %vm15626_vm11, %v15535_v1, %v5638_v24  ;;  %v5597_v1 = vsel %vm15646_vm13, %v15471_v20, %v5593_v7  ;;  %5981 = vmatpush.bf16.msra.mxu2 %v13402_v56  ;;  %v13406_v24 = vld [vmem:[%s16958_s5 + $0x50] sm:$0xff]  ;;  %v13412_v39 = vld [vmem:[%s16958_s5 + $0x80] sm:$0xff]  ;;  %v13435_v33 = vld [vmem:[%s16958_s5 + $0x108] sm:$0xff] }
 0xbbb   : > { %v15631_v23 = vpack.c.bf16 %v5700_v12, %v5700_v12  ;;  %v5647_v49 = vsel %vm5644_vm2, %v5646_v57, %v5642_v34  ;;  %v15669_v20 = vpack.c.bf16 %v5697_v62, %v15566_v25  ;;  %v5602_v41 = vsel %vm5599_vm5, %v5601_v32, %v5597_v1  ;;  %v13399_v6 = vld [vmem:[%s16958_s5 + $0x18] sm:$0xff]  ;;  %v13405_v7 = vld [vmem:[%s16958_s5 + $0x48] sm:$0xff]  ;;  %v13434_v12 = vld [vmem:[%s16958_s5 + $0x100] sm:$0xff] }
 0xbbc   : > { %v15639_v26 = vpack.c.bf16 %v5701_v15, %v5701_v15  ;;  %v5687_v30 = vsel %vm5686_vm0, %v13931_v46, %v5683_v18  ;;  %v15673_v43 = vpack.c.bf16 %v5698_v27, %v5695_v36  ;;  %v5696_v50 = vmul.f32 %v5602_v41, %v15358_v13  ;;  %v13393_v13 = vld [vmem:[%s16956_s3 + $0x18] sm:$0xff]  ;;  %v13391_v46 = vld [vmem:[%s16956_s3 + $0x8] sm:$0xff]  ;;  %v13398_v14 = vld [vmem:[%s16958_s5 + $0x10] sm:$0xff] }
 0xbbd   : > { %v15652_v60 = vsel %vm2615_vm3, %v15631_v23, 0  ;;  %v5692_v16 = vsel %vm5689_vm6, %v5691_v37, %v5687_v30  ;;  %vm16959_vm7 = vcmask 785408   ;;  %v13404_v42 = vld [vmem:[%s16958_s5 + $0x40] sm:$0xff]  ;;  %v13427_v15 = vld [vmem:[%s16958_s5 + $0xc8] sm:$0xff]  ;;  %v13425_v37 = vld [vmem:[%s16958_s5 + $0xb8] sm:$0xff] }
 0xbbe   : > { %5764 = vmatpush.bf16.msrb.mxu0 %v15652_v60  ;;  %v15660_v54 = vsel %vm2615_vm3, %v15639_v26, 0  ;;  %v5702_v31 = vmul.f32 %v5692_v16, %v15383_v35  ;;  %v5699_v35 = vmul.f32 %v5647_v49, %v15361_v22  ;;  %v5740_v22 = vpop.f32.mrf.mxu2  ;;  %vm16960_vm15 = vmmov %vm16959_vm7  ;;  %5982 = vmatpush.bf16.msra.mxu2 %v13401_v61  ;;  %v13397_v18 = vld [vmem:[%s16958_s5 + $0x8] sm:$0xff]  ;;  %v13418_v34 = vld [vmem:[%s16956_s3 + $0x50] sm:$0xff] }
 0xbbf   : > { %5782 = vmatpush.bf16.msra.mxu1 %v15660_v54  ;;  %v5747_v0 = vpack.c.bf16 %v5740_v22, %v5738_v2  ;;  %v13424_v27 = vld [vmem:[%s16958_s5 + $0xb0] sm:$0xff]  ;;  %v13417_v30 = vld [vmem:[%s16956_s3 + $0x48] sm:$0xff]  ;;  %vm16962_vm8 = vmmov %vm16961_vm12 }
 0xbc0   : > { %v15671_v9 = vpack.c.bf16 %v5702_v31, %v5702_v31  ;;  %v15684_v25 = vpack.c.bf16 %v5699_v35, %v5696_v50  ;;  %v13423_v21 = vld [vmem:[%s16958_s5 + $0xa8] sm:$0xff]  ;;  %v13416_v57 = vld [vmem:[%s16956_s3 + $0x40] sm:$0xff]  ;;  %v13433_v1 = vld [vmem:[%s16958_s5 + $0xf8] sm:$0xff] }
 0xbc1   : > { %v13422_v16 = vld [vmem:[%s16958_s5 + $0xa0] sm:$0xff]  ;;  %v13415_v2 = vld [vmem:[%s16956_s3 + $0x38] sm:$0xff]  ;;  %v13432_v32 = vld [vmem:[%s16958_s5 + $0xf0] sm:$0xff] }
 0xbc2   : > { %5765 = vmatpush.bf16.msrb.mxu0 %v15669_v20  ;;  %v5756_v17 = vsel %vm2615_vm3, %v15671_v9, 0  ;;  %5983 = vmatpush.bf16.msra.mxu2 %v13400_v8  ;;  %v13421_v31 = vld [vmem:[%s16958_s5 + $0x98] sm:$0xff]  ;;  %v13414_v49 = vld [vmem:[%s16956_s3 + $0x30] sm:$0xff]  ;;  %v13430_v41 = vld [vmem:[%s16958_s5 + $0xe0] sm:$0xff] }
 0xbc3   : > { %5783 = vmatpush.bf16.msra.mxu1 %v15673_v43  ;;  %5800 = vmatpush.bf16.msrb.mxu3 %v5756_v17  ;;  %v13420_v36 = vld [vmem:[%s16958_s5 + $0x90] sm:$0xff]  ;;  %v13429_v35 = vld [vmem:[%s16958_s5 + $0xd8] sm:$0xff]  ;;  %vm16963_vm9 = vmmov %vm16962_vm8 }
 0xbc4   : > { %vm16964_vm4 = vmmov %vm16962_vm8  ;;  %v11887_v56 = vld [vmem:[%s16929_s6 + $0x14] sm:$0xf] }
 0xbc5   : > { %11631 = vmatmul.msk.bf16.vlgmr.msrb.gmra.mxu0 %vm5720_vm14, %v15426_v45  ;;  %vm16965_vm10 = vmmov %vm16959_vm7 }
 0xbc6   : > { %11633 = vmatmul.msk.bf16.vlgmr.msra.gmra.mxu1 %vm5720_vm14, %v15426_v45  ;;  %v5743_v29 = vpop.f32.mrf.mxu2  ;;  %5998 = vmatpush.bf16.msra.mxu0 %v13411_v28  ;;  %vm16966_vm1 = vmmov %vm16959_vm7 }
 0xbc7   : > { %5801 = vmatpush.bf16.msrb.mxu3 %v15684_v25  ;;  %v5748_v62 = vpack.c.bf16 %v5743_v29, %v5743_v29  ;;  %6022 = vmatpush.bf16.msrb.mxu1 %v13413_v5  ;;  %vm16967_vm11 = vmmov %vm16964_vm4 }
 0xbc8   : > { %5984 = vmatpush.bf16.msra.mxu2 %v13399_v6  ;;  %v13452_v6 = vld [vmem:[%s16958_s5 + $0x158] sm:$0xff]  ;;  %vm16968_vm0 = vmmov %vm16964_vm4 }
 0xbc9   : > { %vm16969_vm6 = vmmov %vm16966_vm1 }
 0xbca   : > { %11635 = vmatmul.msk.bf16.vlgmr.msrb.gmra.mxu3 %vm5720_vm14, %v15426_v45  ;;  %v13390_v45 = vld [vmem:[%s16956_s3] sm:$0xff]  ;;  %5999 = vmatpush.bf16.msra.mxu0 %v13410_v53  ;;  %vm16972_vm13 = vmmov %vm16966_vm1 }
 0xbcb   : > { %6078 = vmatpush.bf16.msra.mxu3 %v13395_v63  ;;  %6023 = vmatpush.bf16.msrb.mxu1 %v13412_v39  ;;  %vm16976_vm2 = vmmov %vm16966_vm1 }
 0xbcc   : > { %5985 = vmatpush.bf16.msra.mxu2 %v13398_v14  ;;  %vm16977_vm5 = vmmov %vm16966_vm1 }
 0xbce   : > { %v5745_v48 = vpop.f32.mrf.mxu2 }
 0xbcf   : > { %6079 = vmatpush.bf16.msra.mxu3 %v13394_v11  ;;  %6332 = vmatpush.bf16.msra.mxu1 %v13435_v33 }
 0xbd0   : > { %5986 = vmatpush.bf16.msra.mxu2 %v13397_v18 }
 0xbd3   : > { %6080 = vmatpush.bf16.msra.mxu3 %v13393_v13  ;;  %6333 = vmatpush.bf16.msra.mxu1 %v13434_v12  ;;  %v13451_v12 = vld [vmem:[%s16958_s5 + $0x150] sm:$0xff] }
 0xbd4   : > { %5987 = vmatpush.bf16.msra.mxu2 %v13396_v55 }
 0xbd5   : > { %11632 = vmatmul.msk.bf16.gmra.mxu0 %vm5720_vm14, %v15431_v4 }
 0xbd6   : > { %11634 = vmatmul.msk.bf16.gmra.mxu1 %vm5720_vm14, %v15431_v4 }
 0xbd7   : > { %6081 = vmatpush.bf16.msra.mxu3 %v13392_v44  ;;  %6334 = vmatpush.bf16.msra.mxu1 %v13433_v1  ;;  %v13462_v1 = vld [vmem:[%s16958_s5 + $0x1a8] sm:$0xff] }
 0xbd8   : > { %6145 = vmatpush.bf16.msrb.mxu2 %v13419_v19  ;;  %v13449_v19 = vld [vmem:[%s16958_s5 + $0x140] sm:$0xff] }
 0xbda   : > { %11636 = vmatmul.msk.bf16.gmra.mxu3 %vm5720_vm14, %v15431_v4  ;;  %v13409_v4 = vld [vmem:[%s16958_s5 + $0x68] sm:$0xff] }
 0xbdb   : > { %6082 = vmatpush.bf16.msra.mxu3 %v13391_v46  ;;  %6000 = vmatpush.bf16.msra.mxu0 %v13409_v4 }
 0xbdc   : > { %6146 = vmatpush.bf16.msrb.mxu2 %v13418_v34  ;;  %6335 = vmatpush.bf16.msra.mxu1 %v13432_v32  ;;  %v13444_v34 = vld [vmem:[%s16956_s3 + $0x88] sm:$0xff] }
 0xbdf   : > { %6083 = vmatpush.bf16.msra.mxu3 %v13390_v45  ;;  %6001 = vmatpush.bf16.msra.mxu0 %v13408_v59  ;;  %v6380_v59 = vunpack.c.l.b16 %v11887_v56 }
 0xbe0   : > { %6147 = vmatpush.bf16.msrb.mxu2 %v13417_v30 }
 0xbe1   : > { %v6382_v61 = vpack.c.b16 %v6380_v59, %v6380_v59  ;;  %v13453_v59 = vld [vmem:[%s16958_s5 + $0x160] sm:$0xff] }
 0xbe3   : > { %6356 = vmatpush.bf16.msrb.mxu3 %v13437_v40  ;;  %6002 = vmatpush.bf16.msra.mxu0 %v13407_v58 }
 0xbe4   : > { %6148 = vmatpush.bf16.msrb.mxu2 %v13416_v57  ;;  %v13448_v57 = vld [vmem:[%s16958_s5 + $0x138] sm:$0xff] }
 0xbe7   : > { %6357 = vmatpush.bf16.msrb.mxu3 %v13436_v10  ;;  %6003 = vmatpush.bf16.msra.mxu0 %v13406_v24 }
 0xbe8   : > { %6149 = vmatpush.bf16.msrb.mxu2 %v13415_v2  ;;  %v13443_v2 = vld [vmem:[%s16956_s3 + $0x80] sm:$0xff] }
 0xbea   : > { %11735 = vmatmul.msk.bf16.vlgmr.msra.gmra.mxu3 %vm16959_vm7, %v5747_v0  ;;  %vm16978_vm7 = vmmov %vm16966_vm1 }
 0xbeb   : > { %6451 = vmatpush.bf16.msra.mxu3 %v5756_v17  ;;  %6004 = vmatpush.bf16.msra.mxu0 %v13405_v7  ;;  %v13428_v17 = vld [vmem:[%s16958_s5 + $0xd0] sm:$0xff] }
 0xbec   : > { %6150 = vmatpush.bf16.msrb.mxu2 %v13414_v49  ;;  %v13447_v49 = vld [vmem:[%s16958_s5 + $0x130] sm:$0xff] }
 0xbef   : > { %6452 = vmatpush.bf16.msra.mxu3 %v15684_v25  ;;  %6005 = vmatpush.bf16.msra.mxu0 %v13404_v42 }
 0xbf3   : > { %6314 = vmatpush.bf16.msrb.mxu0 %v13427_v15  ;;  %v13450_v15 = vld [vmem:[%s16958_s5 + $0x148] sm:$0xff] }
 0xbf7   : > { %6315 = vmatpush.bf16.msrb.mxu0 %v13426_v3 }
 0xbfa   : > { %11736 = vmatmul.msk.bf16.gmra.mxu3 %vm16960_vm15, %v5748_v62  ;;  %vm16979_vm15 = vmmov %vm16966_vm1 }
 0xbfb   : > { %6316 = vmatpush.bf16.msrb.mxu0 %v13425_v37  ;;  %v13460_v37 = vld [vmem:[%s16958_s5 + $0x198] sm:$0xff] }
 0xbff   : > { %6317 = vmatpush.bf16.msrb.mxu0 %v13424_v27 }
 0xc03   : > { %6318 = vmatpush.bf16.msrb.mxu0 %v13423_v21 }
 0xc07   : > { %6319 = vmatpush.bf16.msrb.mxu0 %v13422_v16  ;;  %v13459_v16 = vld [vmem:[%s16958_s5 + $0x190] sm:$0xff] }
 0xc0a   : > { %11883 = vmatmul.msk.bf16.vlgmr.msrb.gmra.mxu3 %vm16961_vm12, %v15684_v25  ;;  %vm16980_vm12 = vmmov %vm16966_vm1 }
 0xc0b   : > { %6320 = vmatpush.bf16.msrb.mxu0 %v13421_v31  ;;  %6738 = vmatpush.bf16.msrb.mxu3 %v13462_v1 }
 0xc0f   : > { %6321 = vmatpush.bf16.msrb.mxu0 %v13420_v36  ;;  %v13458_v36 = vld [vmem:[%s16958_s5 + $0x188] sm:$0xff] }
 0xc1a   : > { %11884 = vmatmul.msk.bf16.gmra.mxu3 %vm16962_vm8, %v15671_v9  ;;  %v13431_v9 = vld [vmem:[%s16958_s5 + $0xe8] sm:$0xff]  ;;  %vm16981_vm8 = vmmov %vm16966_vm1 }
 0xc1b   : > { %6336 = vmatpush.bf16.msra.mxu1 %v13431_v9  ;;  %v13461_v9 = vld [vmem:[%s16958_s5 + $0x1a0] sm:$0xff] }
 0xc1c   : > { %6739 = vmatpush.bf16.msrb.mxu3 %v13461_v9 }
 0xc1f   : > { %6337 = vmatpush.bf16.msra.mxu1 %v13430_v41  ;;  %v13442_v41 = vld [vmem:[%s16956_s3 + $0x78] sm:$0xff] }
 0xc23   : > { %6338 = vmatpush.bf16.msra.mxu1 %v13429_v35 }
 0xc27   : > { %6339 = vmatpush.bf16.msra.mxu1 %v13428_v17 }
 0xc42   : > { %v5767_v50 = vpop.f32.mrf.mxu0 }
 0xc43   : > { %v5785_v63 = vpop.f32.mrf.mxu1 }
 0xc4a   : > { %v5769_v25 = vpop.f32.mrf.mxu0 }
 0xc4b   : > { %v5812_v22 = vpack.c.bf16 %v5769_v25, %v5767_v50  ;;  %v5787_v11 = vpop.f32.mrf.mxu1  ;;  %v13446_v50 = vld [vmem:[%s16958_s5 + $0x128] sm:$0xff]  ;;  %v13457_v25 = vld [vmem:[%s16958_s5 + $0x180] sm:$0xff] }
 0xc4c   : > { %v5813_v13 = vpack.c.bf16 %v5787_v11, %v5785_v63  ;;  %v13441_v11 = vld [vmem:[%s16956_s3 + $0x70] sm:$0xff] }
 0xc4d   : > { %5988 = vmatmul.bf16.vlgmr.msra.gmra.mxu2 %v5812_v22  ;;  %v5803_v29 = vpop.f32.mrf.mxu3 }
 0xc4e   : > { %6006 = vmatmul.bf16.vlgmr.msra.gmra.mxu0 %v5813_v13  ;;  %6395 = vmatpush.bf16.msra.mxu2 %v15401_v52 }
 0xc4f   : > { %6415 = vmatpush.bf16.msra.mxu0 %v15652_v60  ;;  %v13438_v60 = vld [vmem:[%s16929_s6 + $0xc] sm:$0xff] }
 0xc50   : > { %11898 = vmatmul.msk.bf16.vlgmr.msra.gmra.mxu3 %vm5720_vm14, %v13438_v60 }
 0xc52   : > { %6396 = vmatpush.bf16.msra.mxu2 %v15393_v47  ;;  %v5772_v44 = vpop.f32.mrf.mxu0 }
 0xc53   : > { %6416 = vmatpush.bf16.msra.mxu0 %v15669_v20  ;;  %v5790_v46 = vpop.f32.mrf.mxu1  ;;  %v5815_v40 = vpack.c.bf16 %v5772_v44, %v5772_v44  ;;  %v13445_v44 = vld [vmem:[%s16958_s5 + $0x120] sm:$0xff] }
 0xc54   : > { %v5816_v10 = vpack.c.bf16 %v5790_v46, %v5790_v46  ;;  %v13456_v46 = vld [vmem:[%s16958_s5 + $0x178] sm:$0xff] }
 0xc55   : > { %v5805_v48 = vpop.f32.mrf.mxu3 }
 0xc56   : > { %v5814_v45 = vpack.c.bf16 %v5805_v48, %v5803_v29  ;;  %v13440_v48 = vld [vmem:[%s16956_s3 + $0x68] sm:$0xff] }
 0xc58   : > { %11709 = vmatmul.msk.bf16.vlgmr.msrb.gmra.mxu1 %vm16963_vm9, %v5814_v45  ;;  %vm16982_vm9 = vmmov %vm16966_vm1 }
 0xc59   : > { %6433 = vmatpush.bf16.msrb.mxu1 %v15660_v54 }
 0xc5a   : > { %v5774_v0 = vpop.f32.mrf.mxu0 }
 0xc5b   : > { %v5792_v28 = vpop.f32.mrf.mxu1 }
 0xc5d   : > { %5993 = vmatmul.bf16.gmra.mxu2 %v5815_v40  ;;  %6434 = vmatpush.bf16.msrb.mxu1 %v15673_v43  ;;  %v5808_v52 = vpop.f32.mrf.mxu3 }
 0xc5e   : > { %6011 = vmatmul.bf16.gmra.mxu0 %v5816_v10  ;;  %v5817_v38 = vpack.c.bf16 %v5808_v52, %v5808_v52  ;;  %v13455_v10 = vld [vmem:[%s16958_s5 + $0x170] sm:$0xff]  ;;  %v13439_v52 = vld [vmem:[%s16956_s3 + $0x60] sm:$0xff]  ;;  %s16971_s3 = smov %s16970_s28 }
 0xc5f   : > { %v13488_v9 = vld [vmem:[%s16971_s3 + $0xb4] sm:$0xf0] }
 0xc60   : > { %11899 = vmatmul.msk.bf16.gmra.mxu3 %vm5720_vm14, %v6382_v61 }
 0xc65   : > { %v5810_v53 = vpop.f32.mrf.mxu3 }
 0xc66   : > { %v13454_v53 = vld [vmem:[%s16958_s5 + $0x168] sm:$0xff]  ;;  %s16974_s5 = smov %s16973_s7 }
 0xc68   : > { %11710 = vmatmul.msk.bf16.gmra.mxu1 %vm16964_vm4, %v5817_v38  ;;  %vm16989_vm4 = vmmov %vm16966_vm1 }
 0xc6d   : > { %11773 = vmatmul.msk.bf16.vlgmr.msrb.gmra.mxu2 %vm16965_vm10, %v15393_v47  ;;  %v15763_v54 = vpop.f32.mrf.mxu3  ;;  %vm16990_vm10 = vmmov %vm16966_vm1 }
 0xc6e   : > { %6322 = vmatmul.bf16.vlgmr.msrb.gmra.mxu0 %v15669_v20  ;;  %6526 = vmatpush.bf16.msrb.mxu2 %v13444_v34 }
 0xc6f   : > { %6696 = vmatpush.bf16.msrb.mxu0 %v13452_v6 }
 0xc72   : > { %6527 = vmatpush.bf16.msrb.mxu2 %v13443_v2 }
 0xc73   : > { %6697 = vmatpush.bf16.msrb.mxu0 %v13451_v12 }
 0xc75   : > { %v15766_v4 = vpop.f32.mrf.mxu3 }
 0xc76   : > { %6528 = vmatpush.bf16.msrb.mxu2 %v13442_v41  ;;  %v12109_v41 = vld [vmem:[%s16971_s3 + $0xa0] sm:$0xf] }
 0xc77   : > { %6698 = vmatpush.bf16.msrb.mxu0 %v13450_v15 }
 0xc78   : > { %6340 = vmatmul.bf16.vlgmr.msra.gmra.mxu1 %v15673_v43 }
 0xc79   : > { %6714 = vmatpush.bf16.msra.mxu1 %v13460_v37 }
 0xc7a   : > { %6529 = vmatpush.bf16.msrb.mxu2 %v13441_v11  ;;  %v12093_v11 = vld [vmem:[%s16971_s3 + $0x80] sm:$0xf] }
 0xc7b   : > { %6699 = vmatpush.bf16.msrb.mxu0 %v13449_v19 }
 0xc7d   : > { %11774 = vmatmul.msk.bf16.gmra.mxu2 %vm16966_vm1, %v15397_v51  ;;  %v15771_v62 = vpop.f32.mrf.mxu3  ;;  %6715 = vmatpush.bf16.msra.mxu1 %v13459_v16 }
 0xc7e   : > { %6327 = vmatmul.bf16.gmra.mxu0 %v15631_v23  ;;  %6530 = vmatpush.bf16.msrb.mxu2 %v13440_v48  ;;  %v13482_v48 = vld [vmem:[%s16971_s3 + $0x84] sm:$0xf0] }
 0xc7f   : > { %6700 = vmatpush.bf16.msrb.mxu0 %v13448_v57 }
 0xc81   : > { %6716 = vmatpush.bf16.msra.mxu1 %v13458_v36  ;;  %v12117_v36 = vld [vmem:[%s16970_s28 + $0xb0] sm:$0xf]  ;;  %s16985_s28 = sld [smem:[#allocation64_spill]] }
 0xc82   : > { %6531 = vmatpush.bf16.msrb.mxu2 %v13439_v52  ;;  %v12077_v52 = vld [vmem:[%s16971_s3 + $0x60] sm:$0xf] }
 0xc83   : > { %6701 = vmatpush.bf16.msrb.mxu0 %v13447_v49 }
 0xc85   : > { %v6092_v47 = vpop.f32.mrf.mxu3  ;;  %6717 = vmatpush.bf16.msra.mxu1 %v13457_v25  ;;  %v12101_v25 = vld [vmem:[%s16971_s3 + $0x90] sm:$0xf] }
 0xc87   : > { %6702 = vmatpush.bf16.msrb.mxu0 %v13446_v50  ;;  %v13486_v50 = vld [vmem:[%s16971_s3 + $0xa4] sm:$0xf0]  ;;  %s16986_s6 = smov %s16985_s28 }
 0xc88   : > { %6345 = vmatmul.bf16.gmra.mxu1 %v15639_v26 }
 0xc89   : > { %6718 = vmatpush.bf16.msra.mxu1 %v13456_v46 }
 0xc8b   : > { %6703 = vmatpush.bf16.msrb.mxu0 %v13445_v44 }
 0xc8d   : > { %11892 = vmatmul.msk.bf16.vlgmr.msra.gmra.mxu2 %vm5720_vm14, %v13438_v60  ;;  %v15778_v20 = vpop.f32.mrf.mxu3  ;;  %6719 = vmatpush.bf16.msra.mxu1 %v13455_v10  ;;  %v13480_v10 = vld [vmem:[%s16971_s3 + $0x74] sm:$0xf0] }
 0xc8e   : > { %11894 = vmatmul.msk.bf16.vlgmr.msra.gmra.mxu0 %vm5720_vm14, %v13438_v60 }
 0xc91   : > { %6720 = vmatpush.bf16.msra.mxu1 %v13454_v53 }
 0xc95   : > { %v15781_v51 = vpop.f32.mrf.mxu3  ;;  %6721 = vmatpush.bf16.msra.mxu1 %v13453_v59 }
 0xc98   : > { %11896 = vmatmul.msk.bf16.vlgmr.msrb.gmra.mxu1 %vm5720_vm14, %v13438_v60 }
 0xc9d   : > { %v15784_v23 = vpop.f32.mrf.mxu3  ;;  %11893 = vmatmul.msk.bf16.gmra.mxu2 %vm5720_vm14, %v6382_v61 }
 0xc9e   : > { %11895 = vmatmul.msk.bf16.gmra.mxu0 %vm5720_vm14, %v6382_v61 }
 0xca5   : > { %v6366_v43 = vpop.f32.mrf.mxu3 }
 0xca8   : > { %11897 = vmatmul.msk.bf16.gmra.mxu1 %vm5720_vm14, %v6382_v61 }
 0xccb   : > { %v6007_v26 = vpop.f32.mrf.mxu0 }
 0xcd0   : > { %v5989_v58 = vpop.f32.mrf.mxu2 }
 0xcd1   : > { %v6008_v5 = vadd.f32 %v6007_v26, %v5989_v58 }
 0xcd3   : > { %v15789_v8 = vpop.f32.mrf.mxu0  ;;  %v6454_v55 = vpop.f32.mrf.mxu3 }
 0xcd5   : > { %v6025_v24 = vpop.f32.mrf.mxu1 }
 0xcd6   : > { %v6026_v39 = vadd.f32 %v6025_v24, %v6008_v5 }
 0xcd8   : > { %v15791_v33 = vpop.f32.mrf.mxu2  ;;  %v6086_v63 = vadd.f32 %v15763_v54, %v6026_v39 }
 0xcdb   : > { %v6012_v7 = vpop.f32.mrf.mxu0  ;;  %v6456_v32 = vpop.f32.mrf.mxu3 }
 0xcdc   : > { %v6465_v17 = vpack.c.bf16 %v6456_v32, %v6454_v55 }
 0xcdd   : > { %v15795_v14 = vpop.f32.mrf.mxu1 }
 0xcde   : > { %12046 = vmatmul.msk.bf16.vlgmr.msrb.gmra.mxu3 %vm16967_vm11, %v6465_v17  ;;  %vm16991_vm11 = vmmov %vm16968_vm0 }
 0xce0   : > { %v5994_v42 = vpop.f32.mrf.mxu2 }
 0xce1   : > { %v6013_v18 = vadd.f32 %v6012_v7, %v5994_v42 }
 0xce3   : > { %v6014_v3 = vpop.f32.mrf.mxu0  ;;  %v6459_v26 = vpop.f32.mrf.mxu3 }
 0xce4   : > { %v6468_v5 = vpack.c.bf16 %v6459_v26, %v6459_v26 }
 0xce5   : > { %v6030_v27 = vpop.f32.mrf.mxu1 }
 0xce6   : > { %v6031_v30 = vadd.f32 %v6030_v27, %v6013_v18 }
 0xce8   : > { %v5996_v21 = vpop.f32.mrf.mxu2  ;;  %v6091_v56 = vadd.f32 %v15771_v62, %v6031_v30 }
 0xceb   : > { %v6323_v31 = vpop.f32.mrf.mxu0  ;;  %v6461_v62 = vpop.f32.mrf.mxu3 }
 0xced   : > { %v6032_v35 = vpop.f32.mrf.mxu1 }
 0xcee   : > { %12047 = vmatmul.msk.bf16.gmra.mxu3 %vm16968_vm0, %v6468_v5  ;;  %v12118_v35 = vor.u32 %v13488_v9, %v12117_v36 }
 0xcf0   : > { %v6152_v22 = vpop.f32.mrf.mxu2  ;;  %6936 = vmatpush.bf16.msrb.mxu1 %v12118_v35  ;;  %v13475_v35 = vld [vmem:[%s16971_s3 + $0x54] sm:$0xf0] }
 0xcf1   : > { %v6161_v13 = vadd.f32 %v6152_v22, %v6086_v63  ;;  %v12110_v63 = vor.u32 %v13486_v50, %v12109_v41  ;;  %v13484_v22 = vld [vmem:[%s16971_s3 + $0x94] sm:$0xf0]  ;;  %v12169_v41 = vld [vmem:[%s16971_s3 + $0x50] sm:$0xf] }
 0xcf2   : > { %v12102_v44 = vor.u32 %v13484_v22, %v12101_v25  ;;  %v12171_v25 = vld [vmem:[%s16971_s3 + $0x58] sm:$0xf0] }
 0xcf3   : > { %v15814_v29 = vpop.f32.mrf.mxu0 }
 0xcf4   : > { %6937 = vmatpush.bf16.msrb.mxu1 %v12110_v63  ;;  %v13474_v63 = vld [vmem:[%s16971_s3 + $0x54] sm:$0xf] }
 0xcf5   : > { %v6341_v45 = vpop.f32.mrf.mxu1 }
 0xcf6   : > { %v6342_v40 = vadd.f32 %v6341_v45, %v6323_v31  ;;  %v12094_v45 = vor.u32 %v13482_v48, %v12093_v11  ;;  %v12170_v11 = vor.u32 %v13475_v35, %v12169_v41  ;;  %v12161_v48 = vld [vmem:[%s16971_s3 + $0x40] sm:$0xf] }
 0xcf8   : > { %v6360_v0 = vadd.f32 %v15778_v20, %v6342_v40  ;;  %v15821_v28 = vpop.f32.mrf.mxu2  ;;  %6938 = vmatpush.bf16.msrb.mxu1 %v12102_v44  ;;  %v12085_v40 = vld [vmem:[%s16971_s3 + $0x70] sm:$0xf]  ;;  %v13463_v44 = vld [vmem:[%s16973_s7] sm:$0xff]  ;;  %s16988_s7 = sld [smem:[#allocation60_spill]] }
 0xcfa   : > { %v15824_v60 = vadd.f32 %v6360_v0, %v6161_v13  ;;  %v12086_v0 = vor.u32 %v13480_v10, %v12085_v40  ;;  %v13476_v40 = vld [vmem:[%s16974_s5 + $0xc] sm:$0xff]  ;;  %v13472_v10 = vld [vmem:[%s16971_s3 + $0x44] sm:$0xf] }
 0xcfb   : > { %v6328_v38 = vpop.f32.mrf.mxu0 }
 0xcfc   : > { %6939 = vmatpush.bf16.msrb.mxu1 %v12094_v45  ;;  %v13473_v45 = vld [vmem:[%s16971_s3 + $0x44] sm:$0xf0] }
 0xcfd   : > { %v15827_v54 = vpop.f32.mrf.mxu1 }
 0xcfe   : > { %v6344_v26 = vadd.f32 %v15827_v54, %v15814_v29 }
 0xd00   : > { %v6157_v61 = vpop.f32.mrf.mxu2  ;;  %6940 = vmatpush.bf16.msrb.mxu1 %v12086_v0  ;;  %v12163_v0 = vld [vmem:[%s16971_s3 + $0x48] sm:$0xf0] }
 0xd01   : > { %v6163_v47 = vadd.f32 %v6157_v61, %v6091_v56 }
 0xd03   : > { %v6330_v43 = vpop.f32.mrf.mxu0 }
 0xd05   : > { %v6346_v20 = vpop.f32.mrf.mxu1 }
 0xd06   : > { %v6347_v58 = vadd.f32 %v6346_v20, %v6328_v38  ;;  %v13478_v38 = vld [vmem:[%s16971_s3 + $0x64] sm:$0xf0] }
 0xd07   : > { %v12078_v59 = vor.u32 %v13478_v38, %v12077_v52  ;;  %v12162_v52 = vor.u32 %v13473_v45, %v12161_v48  ;;  %v12166_v38 = vor.u32 %v13472_v10, %v12163_v0  ;;  %v13500_v48 = vld [vmem:[%s16971_s3 + $0x114] sm:$0xf]  ;;  %v12234_v0 = vld [vmem:[%s16971_s3 + $0x100] sm:$0xf] }
 0xd08   : > { %v6365_v24 = vadd.f32 %v15784_v23, %v6347_v58  ;;  %v6159_v39 = vpop.f32.mrf.mxu2 }
 0xd09   : > { %6941 = vmatpush.bf16.msrb.mxu1 %v12078_v59  ;;  %v6362_v39 = vadd.f32 %v15781_v51, %v6344_v26  ;;  %v12095_v26 = vld [vmem:[%s16971_s3 + $0x88] sm:$0xf0] }
 0xd0a   : > { %v15833_v6 = vadd.f32 %v6365_v24, %v6163_v47  ;;  %v6010_v47 = vadd.f32 %v15789_v8, %v15791_v33 }
 0xd0b   : > { %v6418_v7 = vpop.f32.mrf.mxu0 }
 0xd0c   : > { %v6028_v20 = vadd.f32 %v15795_v14, %v6010_v47 }
 0xd0d   : > { %v6348_v12 = vpop.f32.mrf.mxu1 }
 0xd0e   : > { %v6088_v24 = vadd.f32 %v15766_v4, %v6028_v20  ;;  %v13481_v20 = vld [vmem:[%s16971_s3 + $0x84] sm:$0xf] }
 0xd10   : > { %v6398_v42 = vpop.f32.mrf.mxu2  ;;  %v6162_v12 = vadd.f32 %v15821_v28, %v6088_v24  ;;  %v13471_v24 = vld [vmem:[%s16971_s3 + $0x34] sm:$0xf0] }
 0xd12   : > { %v6369_v8 = vadd.f32 %v6362_v39, %v6162_v12  ;;  %v13470_v39 = vld [vmem:[%s16971_s3 + $0x34] sm:$0xf] }
 0xd13   : > { %v6420_v15 = vpop.f32.mrf.mxu0 }
 0xd14   : > { %v6463_v18 = vpack.c.bf16 %v6420_v15, %v6418_v7 }
 0xd15   : > { %v6436_v3 = vpop.f32.mrf.mxu1 }
 0xd16   : > { %6704 = vmatmul.bf16.vlgmr.msrb.gmra.mxu0 %v6463_v18 }
 0xd18   : > { %v6400_v55 = vpop.f32.mrf.mxu2 }
 0xd19   : > { %v6407_v19 = vpack.c.bf16 %v6400_v55, %v6398_v42 }
 0xd1b   : > { %11936 = vmatmul.msk.bf16.vlgmr.msrb.gmra.mxu2 %vm16969_vm6, %v6407_v19  ;;  %v6423_v37 = vpop.f32.mrf.mxu0  ;;  %v13868_v19 = vld [vmem:[#allocation10] ss:$0 sm:$0xff]  ;;  %vm16993_vm6 = vmmov %vm16968_vm0 }
 0xd1c   : > { %v6466_v30 = vpack.c.bf16 %v6423_v37, %v6423_v37  ;;  %v13487_v37 = vld [vmem:[%s16971_s3 + $0xb4] sm:$0xf] }
 0xd1d   : > { %v6438_v34 = vpop.f32.mrf.mxu1 }
 0xd1e   : > { %v6464_v23 = vpack.c.bf16 %v6438_v34, %v6436_v3  ;;  %v12119_v34 = vld [vmem:[%s16971_s3 + $0xb8] sm:$0xf0] }
 0xd20   : > { %6722 = vmatmul.bf16.vlgmr.msra.gmra.mxu1 %v6464_v23  ;;  %v6403_v27 = vpop.f32.mrf.mxu2 }
 0xd21   : > { %v6408_v16 = vpack.c.bf16 %v6403_v27, %v6403_v27  ;;  %v12122_v27 = vor.u32 %v13487_v37, %v12119_v34  ;;  %v13466_v37 = vld [vmem:[%s16971_s3 + $0x14] sm:$0xf]  ;;  %v12139_v34 = vld [vmem:[%s16971_s3 + $0x18] sm:$0xf0] }
 0xd23   : > { %v6425_v21 = vpop.f32.mrf.mxu0  ;;  %6954 = vmatpush.bf16.msra.mxu3 %v12122_v27  ;;  %v12142_v27 = vor.u32 %v13466_v37, %v12139_v34  ;;  %v12204_v34 = vld [vmem:[%s16971_s3 + $0xc8] sm:$0xf0] }
 0xd24   : > { %v12111_v21 = vld [vmem:[%s16971_s3 + $0xa8] sm:$0xf0] }
 0xd25   : > { %v6441_v57 = vpop.f32.mrf.mxu1 }
 0xd26   : > { %6709 = vmatmul.bf16.gmra.mxu0 %v6466_v30  ;;  %v6467_v2 = vpack.c.bf16 %v6441_v57, %v6441_v57  ;;  %v13485_v30 = vld [vmem:[%s16971_s3 + $0xa4] sm:$0xf] }
 0xd28   : > { %v6405_v1 = vpop.f32.mrf.mxu2 }
 0xd2b   : > { %11937 = vmatmul.msk.bf16.gmra.mxu2 %vm16972_vm13, %v6408_v16  ;;  %vm16996_vm13 = vcmask 1041408  }
 0xd2d   : > { %v6443_v31 = vpop.f32.mrf.mxu1 }
 0xd2e   : > { %v13483_v31 = vld [vmem:[%s16971_s3 + $0x94] sm:$0xf] }
 0xd30   : > { %6727 = vmatmul.bf16.gmra.mxu1 %v6467_v2 }
 0xd61   : > { %v6741_v32 = vpop.f32.mrf.mxu3 }
 0xd69   : > { %v6743_v49 = vpop.f32.mrf.mxu3 }
 0xd71   : > { %v6746_v17 = vpop.f32.mrf.mxu3 }
 0xd79   : > { %v6748_v46 = vpop.f32.mrf.mxu3 }
 0xd7a   : > { %v12174_v46 = vor.u32 %v13474_v63, %v12171_v25  ;;  %v13489_v25 = vld [vmem:[%s16974_s5 + $0x18] sm:$0xff] }
 0xd93   : > { %v6705_v13 = vpop.f32.mrf.mxu0 }
 0xd9b   : > { %v6707_v53 = vpop.f32.mrf.mxu0 }
 0xd9d   : > { %v6723_v56 = vpop.f32.mrf.mxu1 }
 0xd9e   : > { %v6533_v61 = vpop.f32.mrf.mxu2  ;;  %v6724_v62 = vadd.f32 %v6723_v56, %v6705_v13  ;;  %v6767_v56 = vld [vmem:[%s16974_s5 + $0x8] sm:$0x3] }
 0xd9f   : > { %v6542_v51 = vadd.f32 %v6533_v61, %v15824_v60  ;;  %v12114_v60 = vor.u32 %v13485_v30, %v12111_v21  ;;  %v6773_v61 = vunpack.c.l.b16 %v6767_v56  ;;  %v12129_v30 = vld [vmem:[%s16971_s3] sm:$0xf]  ;;  %v13465_v21 = vld [vmem:[%s16971_s3 + $0x4] sm:$0xf0]  ;;  %v12236_v56 = vld [vmem:[%s16971_s3 + $0x108] sm:$0xf0] }
 0xda0   : > { %v6742_v54 = vadd.f32 %v6741_v32, %v6724_v62  ;;  %v12103_v32 = vld [vmem:[%s16971_s3 + $0x98] sm:$0xf0] }
 0xda1   : > { %6955 = vmatpush.bf16.msra.mxu3 %v12114_v60 }
 0xda2   : > { %v6750_v23 = vadd.f32 %v6742_v54, %v6542_v51  ;;  %v12079_v51 = vld [vmem:[%s16971_s3 + $0x68] sm:$0xf0] }
 0xda3   : > { %v6710_v43 = vpop.f32.mrf.mxu0 }
 0xda5   : > { %v6725_v58 = vpop.f32.mrf.mxu1 }
 0xda6   : > { %v6535_v5 = vpop.f32.mrf.mxu2  ;;  %v6726_v7 = vadd.f32 %v6725_v58, %v6707_v53  ;;  %v12056_v53 = vld [vmem:[%s16974_s5 + $0x14] sm:$0x3]  ;;  %v12153_v58 = vld [vmem:[%s16971_s3 + $0x30] sm:$0xf] }
 0xda7   : > { %v6543_v18 = vadd.f32 %v6535_v5, %v6369_v8  ;;  %v6826_v59 = vunpack.c.l.b16 %v12056_v53  ;;  %v12098_v5 = vor.u32 %v13481_v20, %v12095_v26  ;;  %v12154_v12 = vor.u32 %v13471_v24, %v12153_v58  ;;  %v12087_v8 = vld [vmem:[%s16971_s3 + $0x78] sm:$0xf0]  ;;  %v12218_v24 = vld [vmem:[%s16971_s3 + $0xe0] sm:$0xf] }
 0xda8   : > { %v6744_v33 = vadd.f32 %v6743_v49, %v6726_v7  ;;  %v6757_v49 = vadd.f32 %v13868_v19, %v6750_v23  ;;  %v12155_v7 = vld [vmem:[%s16971_s3 + $0x38] sm:$0xf0] }
 0xda9   : > { %v6828_v47 = vpack.c.b16 %v6826_v59, %v6826_v59  ;;  %v12158_v62 = vor.u32 %v13470_v39, %v12155_v7  ;;  %v12228_v26 = vld [vmem:[%s16971_s3 + $0xf8] sm:$0xf0]  ;;  %v13495_v39 = vld [vmem:[%s16971_s3 + $0xe4] sm:$0xf0]  ;;  %v13494_v7 = vld [vmem:[%s16971_s3 + $0xe4] sm:$0xf] }
 0xdaa   : > { %v6751_v55 = vadd.f32 %v6744_v33, %v6543_v18  ;;  %v6760_v22 = vmax.f32 %v6757_v49, 0.0  ;;  %v12147_v18 = vld [vmem:[%s16971_s3 + $0x28] sm:$0xf0] }
 0xdab   : > { %v6712_v42 = vpop.f32.mrf.mxu0 }
 0xdac   : > { %v13479_v42 = vld [vmem:[%s16971_s3 + $0x74] sm:$0xf] }
 0xdad   : > { %v6728_v14 = vpop.f32.mrf.mxu1  ;;  %v12090_v33 = vor.u32 %v13479_v42, %v12087_v8  ;;  %v12210_v42 = vld [vmem:[%s16971_s3 + $0xd0] sm:$0xf]  ;;  %v13493_v8 = vld [vmem:[%s16971_s3 + $0xd4] sm:$0xf0] }
 0xdae   : > { %v6538_v15 = vpop.f32.mrf.mxu2  ;;  %v6729_v29 = vadd.f32 %v6728_v14, %v6710_v43  ;;  %v6775_v43 = vpack.c.b16 %v6773_v61, %v6773_v61  ;;  %v12145_v14 = vld [vmem:[%s16971_s3 + $0x20] sm:$0xf]  ;;  %v12226_v61 = vld [vmem:[%s16971_s3 + $0xf0] sm:$0xf] }
 0xdaf   : > { %v6544_v4 = vadd.f32 %v6538_v15, %v15833_v6  ;;  %v6758_v6 = vadd.f32 %v13868_v19, %v6751_v55  ;;  %v13469_v15 = vld [vmem:[%s16971_s3 + $0x24] sm:$0xf0]  ;;  %v12137_v55 = vld [vmem:[%s16971_s3 + $0x10] sm:$0xf] }
 0xdb0   : > { %v6747_v3 = vadd.f32 %v6746_v17, %v6729_v29  ;;  %v12106_v17 = vor.u32 %v13483_v31, %v12103_v32  ;;  %v13468_v29 = vld [vmem:[%s16971_s3 + $0x24] sm:$0xf]  ;;  %v12146_v54 = vor.u32 %v13469_v15, %v12145_v14  ;;  %v13492_v14 = vld [vmem:[%s16971_s3 + $0xd4] sm:$0xf]  ;;  %v12212_v15 = vld [vmem:[%s16971_s3 + $0xd8] sm:$0xf0] }
 0xdb1   : > { %v6761_v9 = vmax.f32 %v6758_v6, 0.0  ;;  %v12131_v6 = vld [vmem:[%s16971_s3 + $0x8] sm:$0xf0] }
 0xdb2   : > { %v6752_v28 = vadd.f32 %v6747_v3, %v6544_v4  ;;  %6956 = vmatpush.bf16.msra.mxu3 %v12106_v17  ;;  %v12150_v4 = vor.u32 %v13468_v29, %v12147_v18  ;;  %v13477_v3 = vld [vmem:[%s16971_s3 + $0x64] sm:$0xf]  ;;  %v12211_v29 = vor.u32 %v13493_v8, %v12210_v42 }
 0xdb3   : > { %v6763_v13 = vpack.c.bf16 %v6761_v9, %v6760_v22  ;;  %v12181_v22 = vld [vmem:[%s16974_s5 + $0x20] sm:$0x3]  ;;  %s16984_s5 = smov %s16983_s1 }
 0xdb4   : > { %v6759_v57 = vadd.f32 %v13868_v19, %v6752_v28  ;;  %v12082_v28 = vor.u32 %v13477_v3, %v12079_v51  ;;  %v13467_v19 = vld [vmem:[%s16971_s3 + $0x14] sm:$0xf0] }
 0xdb5   : > { %v6730_v16 = vpop.f32.mrf.mxu1  ;;  %v12138_v23 = vor.u32 %v13467_v19, %v12137_v55  ;;  %v12202_v55 = vld [vmem:[%s16971_s3 + $0xc0] sm:$0xf]  ;;  %v13490_v19 = vld [vmem:[%s16971_s3 + $0xc4] sm:$0xf] }
 0xdb6   : > { %v6540_v1 = vpop.f32.mrf.mxu2  ;;  %v6762_v2 = vmax.f32 %v6759_v57, 0.0  ;;  %6957 = vmatpush.bf16.msra.mxu3 %v12098_v5  ;;  %v13464_v57 = vld [vmem:[%s16971_s3 + $0x4] sm:$0xf]  ;;  %v12130_v16 = vor.u32 %v13465_v21, %v12129_v30 }
 0xdb7   : > { %v12134_v60 = vor.u32 %v13464_v57, %v12131_v6 }
 0xdb8   : > { %v6764_v36 = vpack.c.bf16 %v6762_v2, %v6762_v2 }
 0xdba   : > { %v6783_v50 = vsel %vm2615_vm3, %v6764_v36, 0  ;;  %6958 = vmatpush.bf16.msra.mxu3 %v12090_v33  ;;  %vm16975_vm3 = vmmov %vm16966_vm1 }
 0xdbb   : > { %6791 = vmatpush.bf16.msra.mxu2 %v6783_v50  ;;  %6841 = vmatpush.bf16.msra.mxu0 %v6783_v50 }
 0xdbc   : > { %7096 = vmatpush.bf16.msra.mxu1 %v6783_v50 }
 0xdbe   : > { %6959 = vmatpush.bf16.msra.mxu3 %v12082_v28  ;;  %v13491_v28 = vld [vmem:[%s16971_s3 + $0xc4] sm:$0xf0] }
 0xdbf   : > { %6792 = vmatpush.bf16.msra.mxu2 %v6763_v13  ;;  %6842 = vmatpush.bf16.msra.mxu0 %v6763_v13  ;;  %v12203_v37 = vor.u32 %v13491_v28, %v12202_v55 }
 0xdc0   : > { %7097 = vmatpush.bf16.msra.mxu1 %v6763_v13 }
 0xdc2   : > { %12052 = vmatmul.msk.bf16.vlgmr.msra.gmra.mxu2 %vm5720_vm14, %v13463_v44  ;;  %12061 = vmatmul.msk.bf16.vlgmr.msra.gmra.mxu0 %vm5720_vm14, %v13476_v40  ;;  %v12242_v44 = vld [vmem:[%s16971_s3 + $0x110] sm:$0xf]  ;;  %v12244_v40 = vld [vmem:[%s16971_s3 + $0x118] sm:$0xf0] }
 0xdc3   : > { %7038 = vmatpush.bf16.msrb.mxu2 %v12170_v11  ;;  %7056 = vmatpush.bf16.msrb.mxu0 %v12174_v46  ;;  %v7081_v11 = vunpack.c.l.b16 %v12181_v22  ;;  %v13501_v46 = vld [vmem:[%s16971_s3 + $0x114] sm:$0xf0]  ;;  %v12247_v10 = vor.u32 %v13500_v48, %v12244_v40  ;;  %v13517_v22 = vld [vmem:[%s16984_s5 + $0x28] sm:$0xff] }
 0xdc4   : > { %v12243_v45 = vor.u32 %v13501_v46, %v12242_v44  ;;  %v13516_v44 = vld [vmem:[%s16984_s5 + $0x20] sm:$0xff]  ;;  %v13515_v40 = vld [vmem:[%s16984_s5 + $0x18] sm:$0xff] }
 0xdc5   : > { %v7083_v13 = vpack.c.b16 %v7081_v11, %v7081_v11  ;;  %v13507_v11 = vld [vmem:[%s16986_s6 + $0x28] sm:$0xff]  ;;  %v13506_v46 = vld [vmem:[%s16986_s6 + $0x20] sm:$0xff] }
 0xdc6   : > { %7191 = vmatpush.bf16.msrb.mxu3 %v12243_v45 }
 0xdc7   : > { %7039 = vmatpush.bf16.msrb.mxu2 %v12162_v52  ;;  %7057 = vmatpush.bf16.msrb.mxu0 %v12166_v38  ;;  %v13499_v52 = vld [vmem:[%s16971_s3 + $0x104] sm:$0xf0]  ;;  %v13498_v38 = vld [vmem:[%s16971_s3 + $0x104] sm:$0xf] }
 0xdc8   : > { %v12235_v53 = vor.u32 %v13499_v52, %v12234_v0  ;;  %v12239_v59 = vor.u32 %v13498_v38, %v12236_v56  ;;  %v13513_v52 = vld [vmem:[%s16984_s5 + $0x8] sm:$0xff]  ;;  %v13512_v38 = vld [vmem:[%s16984_s5] sm:$0xff] }
 0xdca   : > { %7192 = vmatpush.bf16.msrb.mxu3 %v12235_v53 }
 0xdcb   : > { %7040 = vmatpush.bf16.msrb.mxu2 %v12154_v12  ;;  %7058 = vmatpush.bf16.msrb.mxu0 %v12158_v62  ;;  %v12219_v12 = vor.u32 %v13495_v39, %v12218_v24  ;;  %v12220_v62 = vld [vmem:[%s16971_s3 + $0xe8] sm:$0xf0]  ;;  %v13504_v24 = vld [vmem:[%s16986_s6 + $0x10] sm:$0xff] }
 0xdcc   : > { %v12223_v33 = vor.u32 %v13494_v7, %v12220_v62  ;;  %v13503_v39 = vld [vmem:[%s16986_s6 + $0x8] sm:$0xff]  ;;  %v13510_v62 = vld [vmem:[%s16986_s6 + $0x40] sm:$0xff] }
 0xdcd   : > { %v13511_v7 = vld [vmem:[%s16986_s6 + $0x48] sm:$0xff] }
 0xdcf   : > { %7041 = vmatpush.bf16.msrb.mxu2 %v12146_v54  ;;  %7059 = vmatpush.bf16.msrb.mxu0 %v12150_v4  ;;  %v12215_v54 = vor.u32 %v13492_v14, %v12212_v15 }
 0xdd2   : > { %12062 = vmatmul.msk.bf16.gmra.mxu0 %vm5720_vm14, %v6828_v47  ;;  %12053 = vmatmul.msk.bf16.gmra.mxu2 %vm5720_vm14, %v6775_v43  ;;  %v13497_v47 = vld [vmem:[%s16971_s3 + $0xf4] sm:$0xf0]  ;;  %v13496_v43 = vld [vmem:[%s16971_s3 + $0xf4] sm:$0xf] }
 0xdd3   : > { %7042 = vmatpush.bf16.msrb.mxu2 %v12138_v23  ;;  %7060 = vmatpush.bf16.msrb.mxu0 %v12142_v27  ;;  %v12227_v20 = vor.u32 %v13497_v47, %v12226_v61  ;;  %v12231_v58 = vor.u32 %v13496_v43, %v12228_v26  ;;  %v12207_v23 = vor.u32 %v13490_v19, %v12204_v34  ;;  %v13520_v61 = vld [vmem:[%s16984_s5 + $0x40] sm:$0xff] }
 0xdd5   : > { %7193 = vmatpush.bf16.msrb.mxu3 %v12227_v20 }
 0xdd7   : > { %7043 = vmatpush.bf16.msrb.mxu2 %v12130_v16  ;;  %7061 = vmatpush.bf16.msrb.mxu0 %v12134_v60 }
 0xdd9   : > { %7194 = vmatpush.bf16.msrb.mxu3 %v12219_v12  ;;  %v13502_v12 = vld [vmem:[%s16986_s6] sm:$0xff] }
 0xddb   : > { %7209 = vmatpush.bf16.msra.mxu2 %v12247_v10  ;;  %v13514_v10 = vld [vmem:[%s16984_s5 + $0x10] sm:$0xff] }
 0xddd   : > { %7195 = vmatpush.bf16.msrb.mxu3 %v12211_v29 }
 0xddf   : > { %7210 = vmatpush.bf16.msra.mxu2 %v12239_v59  ;;  %v13505_v59 = vld [vmem:[%s16986_s6 + $0x18] sm:$0xff] }
 0xde1   : > { %7196 = vmatpush.bf16.msrb.mxu3 %v12203_v37 }
 0xde3   : > { %7211 = vmatpush.bf16.msra.mxu2 %v12231_v58 }
 0xde7   : > { %7212 = vmatpush.bf16.msra.mxu2 %v12223_v33 }
 0xdeb   : > { %7213 = vmatpush.bf16.msra.mxu2 %v12215_v54 }
 0xdef   : > { %7214 = vmatpush.bf16.msra.mxu2 %v12207_v23 }
 0xe3f   : > { %v6844_v1 = vpop.f32.mrf.mxu0 }
 0xe45   : > { %v6794_v2 = vpop.f32.mrf.mxu2 }
 0xe47   : > { %v6846_v31 = vpop.f32.mrf.mxu0 }
 0xe48   : > { %v6853_v32 = vpack.c.bf16 %v6846_v31, %v6844_v1 }
 0xe4a   : > { %12123 = vmatmul.msk.bf16.vlgmr.msrb.gmra.mxu1 %vm16975_vm3, %v6853_v32  ;;  %12125 = vmatmul.msk.bf16.vlgmr.msra.gmra.mxu3 %vm16976_vm2, %v6853_v32  ;;  %v13519_v32 = vld [vmem:[%s16983_s1 + $0x38] sm:$0xff]  ;;  %s13674_s1 = smul.u32 48, %s14902_s2  ;;  %s16992_s2 = sld [smem:[#allocation63_spill]]  ;;  %vm16997_vm3 = vmmov %vm16996_vm13 }
 0xe4b   : > { %7473 = vmatpush.bf16.msra.mxu3 %v13519_v32  ;;  %7371 = vmatpush.bf16.msrb.mxu1 %v13511_v7  ;;  %vm16998_vm2 = vmmov %vm16968_vm0 }
 0xe4d   : > { %v6796_v49 = vpop.f32.mrf.mxu2 }
 0xe4e   : > { %v6803_v36 = vpack.c.bf16 %v6796_v49, %v6794_v2 }
 0xe4f   : > { %v6849_v9 = vpop.f32.mrf.mxu0  ;;  %7372 = vmatpush.bf16.msrb.mxu1 %v13510_v62 }
 0xe50   : > { %12175 = vmatmul.msk.bf16.vlgmr.msrb.gmra.mxu2 %vm16977_vm5, %v6803_v36  ;;  %12177 = vmatmul.msk.bf16.vlgmr.msrb.gmra.mxu0 %vm16978_vm7, %v6803_v36  ;;  %v6854_v35 = vpack.c.bf16 %v6849_v9, %v6849_v9  ;;  %v13509_v36 = vld [vmem:[%s16985_s28 + $0x38] sm:$0xff]  ;;  %s1962_s28 = scalar_lea.vmem %s16988_s7, %s13674_s1  ;;  %v7231_v54 = vld [vmem:[%s16992_s2] sm:$0x3]  ;;  %s16994_s7 = sld [smem:[#allocation66_spill]]  ;;  %vm7583_vm5 = vcmask 654336   ;;  %vm7761_vm7 = vcmask 162816  }
 0xe51   : > { %7347 = vmatpush.bf16.msra.mxu0 %v13509_v36  ;;  %v15977_v47 = vld [vmem:[%s1962_s28] sm:$0xff]  ;;  %v15979_v43 = vld [vmem:[%s1962_s28 + $0x10] sm:$0xff]  ;;  %v15981_v20 = vld [vmem:[%s1962_s28 + $0x8] sm:$0xff]  ;;  %v7233_v28 = vperm.slane %v7231_v54, 0  ;;  %v7234_v37 = vperm.slane %v7231_v54, 1  ;;  %s16999_s1 = sld [smem:[#allocation67_spill]] }
 0xe52   : > { %v15983_v26 = vld [vmem:[%s1962_s28 + $0x18] sm:$0xff]  ;;  %v7253_v58 = vpack.c.bf16 %v15979_v43, %v15977_v47  ;;  %v15995_v42 = vld [vmem:[%s1962_s28 + $0x20] sm:$0xf]  ;;  %v15997_v8 = vld [vmem:[%s1962_s28 + $0x28] sm:$0xf]  ;;  %s17000_s28 = sld [smem:[#allocation68_spill]] }
 0xe53   : > { %v7255_v33 = vpack.c.bf16 %v15995_v42, %v15995_v42  ;;  %v7256_v14 = vpack.c.bf16 %v15997_v8, %v15997_v8  ;;  %s17008_s2 = sld [smem:[#allocation70_spill]] }
 0xe55   : > { %v6799_v41 = vpop.f32.mrf.mxu2 }
 0xe56   : > { %v6804_v50 = vpack.c.bf16 %v6799_v41, %v6799_v41  ;;  %v13518_v41 = vld [vmem:[%s16984_s5 + $0x30] sm:$0xff]  ;;  %s16995_s3 = smov %s16994_s7 }
 0xe57   : > { %v6851_v17 = vpop.f32.mrf.mxu0  ;;  %7474 = vmatpush.bf16.msra.mxu3 %v13518_v41  ;;  %v13525_v7 = vld [vmem:[%s16995_s3 + $0x14] sm:$0xf0]  ;;  %v13524_v62 = vld [vmem:[%s16995_s3 + $0x14] sm:$0xf] }
 0xe5a   : > { %12124 = vmatmul.msk.bf16.gmra.mxu1 %vm16979_vm15, %v6854_v35  ;;  %12126 = vmatmul.msk.bf16.gmra.mxu3 %vm16980_vm12, %v6854_v35 }
 0xe5b   : > { %7475 = vmatpush.bf16.msra.mxu3 %v13517_v22  ;;  %v12370_v22 = vld [vmem:[%s16994_s7 + $0x40] sm:$0xf]  ;;  %s17018_s7 = sld [smem:[#allocation69_spill]] }
 0xe5d   : > { %v6801_v63 = vpop.f32.mrf.mxu2 }
 0xe5e   : > { %v13521_v63 = vld [vmem:[%s16984_s5 + $0x48] sm:$0xff]  ;;  %s17009_s5 = smov %s17008_s2 }
 0xe5f   : > { %7497 = vmatpush.bf16.msrb.mxu2 %v13521_v63  ;;  %7476 = vmatpush.bf16.msra.mxu3 %v13516_v44 }
 0xe60   : > { %12176 = vmatmul.msk.bf16.gmra.mxu2 %vm16981_vm8, %v6804_v50  ;;  %12178 = vmatmul.msk.bf16.gmra.mxu0 %vm16982_vm9, %v6804_v50  ;;  %v13508_v50 = vld [vmem:[%s16986_s6 + $0x30] sm:$0xff] }
 0xe61   : > { %7348 = vmatpush.bf16.msra.mxu0 %v13508_v50  ;;  %s17019_s6 = smov %s17018_s7 }
 0xe63   : > { %7477 = vmatpush.bf16.msra.mxu3 %v13515_v40  ;;  %7498 = vmatpush.bf16.msrb.mxu2 %v13520_v61  ;;  %v13527_v61 = vld [vmem:[%s16995_s3 + $0x24] sm:$0xf0] }
 0xe65   : > { %7349 = vmatpush.bf16.msra.mxu0 %v13507_v11  ;;  %v13531_v11 = vld [vmem:[%s16995_s3 + $0x44] sm:$0xf0] }
 0xe66   : > { %v12371_v44 = vor.u32 %v13531_v11, %v12370_v22 }
 0xe67   : > { %7478 = vmatpush.bf16.msra.mxu3 %v13514_v10  ;;  %v13528_v10 = vld [vmem:[%s16995_s3 + $0x34] sm:$0xf] }
 0xe69   : > { %7350 = vmatpush.bf16.msra.mxu0 %v13506_v46  ;;  %v12372_v46 = vld [vmem:[%s16995_s3 + $0x48] sm:$0xf0] }
 0xe6a   : > { %12186 = vmatmul.msk.bf16.vlgmr.msra.gmra.mxu1 %vm5720_vm14, %v13489_v25 }
 0xe6b   : > { %7479 = vmatpush.bf16.msra.mxu3 %v13513_v52 }
 0xe6d   : > { %7351 = vmatpush.bf16.msra.mxu0 %v13505_v59  ;;  %v12354_v59 = vld [vmem:[%s16995_s3 + $0x20] sm:$0xf] }
 0xe6f   : > { %7480 = vmatpush.bf16.msra.mxu3 %v13512_v38 }
 0xe71   : > { %7352 = vmatpush.bf16.msra.mxu0 %v13504_v24  ;;  %v12356_v24 = vld [vmem:[%s16995_s3 + $0x28] sm:$0xf0] }
 0xe75   : > { %7353 = vmatpush.bf16.msra.mxu0 %v13503_v39  ;;  %v12346_v39 = vld [vmem:[%s16995_s3 + $0x10] sm:$0xf] }
 0xe79   : > { %7354 = vmatpush.bf16.msra.mxu0 %v13502_v12 }
 0xe7a   : > { %12187 = vmatmul.msk.bf16.gmra.mxu1 %vm5720_vm14, %v7083_v13  ;;  %vm16987_vm14 = vmmov %vm16966_vm1 }
 0xe7d   : > { %7593 = vmatpush.bf16.msrb.mxu0 %v12371_v44 }
 0xec7   : > { %v6943_v5 = vpop.f32.mrf.mxu1 }
 0xecd   : > { %v6961_v18 = vpop.f32.mrf.mxu3  ;;  %v7063_v4 = vpop.f32.mrf.mxu0 }
 0xece   : > { %v15936_v3 = vadd.f32 %v7063_v4, %v6961_v18 }
 0xecf   : > { %v15938_v51 = vpop.f32.mrf.mxu1 }
 0xed3   : > { %v7045_v27 = vpop.f32.mrf.mxu2 }
 0xed4   : > { %v15944_v30 = vadd.f32 %v7045_v27, %v6943_v5  ;;  %v7254_v5 = vpack.c.bf16 %v15983_v26, %v15981_v20 }
 0xed5   : > { %v15946_v21 = vpop.f32.mrf.mxu3  ;;  %v15948_v57 = vpop.f32.mrf.mxu0 }
 0xed6   : > { %v7066_v18 = vadd.f32 %v15948_v57, %v15946_v21 }
 0xed7   : > { %v6948_v16 = vpop.f32.mrf.mxu1 }
 0xedb   : > { %v15950_v6 = vpop.f32.mrf.mxu2 }
 0xedc   : > { %v7048_v4 = vadd.f32 %v15950_v6, %v15938_v51 }
 0xedd   : > { %v6966_v60 = vpop.f32.mrf.mxu3  ;;  %v7068_v1 = vpop.f32.mrf.mxu0 }
 0xede   : > { %v15952_v2 = vadd.f32 %v7068_v1, %v6966_v60 }
 0xedf   : > { %v6950_v31 = vpop.f32.mrf.mxu1 }
 0xee3   : > { %v7050_v49 = vpop.f32.mrf.mxu2 }
 0xee4   : > { %v15956_v9 = vadd.f32 %v7050_v49, %v6948_v16 }
 0xee5   : > { %v6968_v35 = vpop.f32.mrf.mxu3  ;;  %v7070_v17 = vpop.f32.mrf.mxu0 }
 0xee7   : > { %v7099_v25 = vpop.f32.mrf.mxu1 }
 0xeeb   : > { %v7052_v13 = vpop.f32.mrf.mxu2 }
 0xeec   : > { %v13530_v13 = vld [vmem:[%s16995_s3 + $0x44] sm:$0xf] }
 0xeed   : > { %v12375_v40 = vor.u32 %v13530_v13, %v12372_v46 }
 0xeef   : > { %v7101_v48 = vpop.f32.mrf.mxu1  ;;  %7611 = vmatpush.bf16.msra.mxu1 %v12375_v40 }
 0xef0   : > { %v7108_v45 = vpack.c.bf16 %v7101_v48, %v7099_v25  ;;  %v12362_v48 = vld [vmem:[%s16995_s3 + $0x30] sm:$0xf] }
 0xef2   : > { %12248 = vmatmul.msk.bf16.vlgmr.msrb.gmra.mxu3 %vm16987_vm14, %v7108_v45  ;;  %12250 = vmatmul.msk.bf16.vlgmr.msra.gmra.mxu2 %vm16989_vm4, %v7108_v45  ;;  %v13529_v45 = vld [vmem:[%s16995_s3 + $0x34] sm:$0xf0] }
 0xef3   : > { %v12363_v52 = vor.u32 %v13529_v45, %v12362_v48 }
 0xef5   : > { %7594 = vmatpush.bf16.msrb.mxu0 %v12363_v52 }
 0xef7   : > { %v7104_v0 = vpop.f32.mrf.mxu1 }
 0xef8   : > { %v7109_v53 = vpack.c.bf16 %v7104_v0, %v7104_v0  ;;  %v12364_v0 = vld [vmem:[%s16995_s3 + $0x38] sm:$0xf0] }
 0xeff   : > { %v7106_v56 = vpop.f32.mrf.mxu1 }
 0xf00   : > { %v12367_v56 = vor.u32 %v13528_v10, %v12364_v0 }
 0xf02   : > { %12249 = vmatmul.msk.bf16.gmra.mxu3 %vm16990_vm10, %v7109_v53  ;;  %12251 = vmatmul.msk.bf16.gmra.mxu2 %vm16966_vm1, %v7109_v53 }
 0xf03   : > { %7612 = vmatpush.bf16.msra.mxu1 %v12367_v56 }
 0xf12   : > { %7481 = vmatmul.bf16.vlgmr.msra.gmra.mxu3 %v7253_v58  ;;  %12334 = vmatmul.msk.bf16.vlgmr.msrb.gmra.mxu2 %vm16991_vm11, %v7254_v5  ;;  %v13526_v58 = vld [vmem:[%s16995_s3 + $0x24] sm:$0xf]  ;;  %v12355_v5 = vor.u32 %v13527_v61, %v12354_v59  ;;  %v7527_v59 = vld [vmem:[%s16999_s1] sm:$0x3]  ;;  %s17043_s1 = sld [smem:[#allocation71_spill]] }
 0xf13   : > { %v12359_v12 = vor.u32 %v13526_v58, %v12356_v24  ;;  %v7529_v61 = vperm.slane %v7527_v59, 0  ;;  %v7530_v58 = vperm.slane %v7527_v59, 1 }
 0xf14   : > { %7595 = vmatpush.bf16.msrb.mxu0 %v12355_v5 }
 0xf15   : > { %7613 = vmatpush.bf16.msra.mxu1 %v12359_v12 }
 0xf22   : > { %7486 = vmatmul.bf16.gmra.mxu3 %v7255_v33  ;;  %12335 = vmatmul.msk.bf16.gmra.mxu2 %vm16968_vm0, %v7256_v14  ;;  %v12348_v33 = vld [vmem:[%s16995_s3 + $0x18] sm:$0xf0] }
 0xf23   : > { %v12351_v54 = vor.u32 %v13524_v62, %v12348_v33 }
 0xf25   : > { %7614 = vmatpush.bf16.msra.mxu1 %v12351_v54 }
 0xf75   : > { %v7198_v15 = vpop.f32.mrf.mxu3  ;;  %v7216_v29 = vpop.f32.mrf.mxu2 }
 0xf76   : > { %v7225_v55 = vadd.f32 %v7198_v15, %v15944_v30  ;;  %v7226_v19 = vadd.f32 %v7216_v29, %v15936_v3  ;;  %v12347_v29 = vor.u32 %v13525_v7, %v12346_v39 }
 0xf78   : > { %v7237_v60 = vadd.f32 %v7233_v28, %v7225_v55  ;;  %v7238_v1 = vadd.f32 %v7234_v37, %v7226_v19  ;;  %v13522_v55 = vld [vmem:[%s16995_s3 + $0x4] sm:$0xf]  ;;  %7596 = vmatpush.bf16.msrb.mxu0 %v12347_v29 }
 0xf7d   : > { %v7200_v34 = vpop.f32.mrf.mxu3  ;;  %v7218_v23 = vpop.f32.mrf.mxu2 }
 0xf7e   : > { %v7227_v27 = vadd.f32 %v7200_v34, %v7048_v4  ;;  %v7228_v16 = vadd.f32 %v7218_v23, %v7066_v18  ;;  %v12338_v18 = vld [vmem:[%s16995_s3] sm:$0xf]  ;;  %v13523_v4 = vld [vmem:[%s16995_s3 + $0x4] sm:$0xf0] }
 0xf7f   : > { %v12339_v19 = vor.u32 %v13523_v4, %v12338_v18 }
 0xf80   : > { %v7239_v31 = vadd.f32 %v7233_v28, %v7227_v27  ;;  %v7240_v32 = vadd.f32 %v7234_v37, %v7228_v16  ;;  %v13869_v27 = vld [vmem:[#allocation13] ss:$0 sm:$0xff]  ;;  %v13870_v16 = vld [vmem:[#allocation11] ss:$0 sm:$0xff] }
 0xf81   : > { %7597 = vmatpush.bf16.msrb.mxu0 %v12339_v19 }
 0xf82   : > { %v16011_v49 = vpack.c.bf16 %v7239_v31, %v7237_v60  ;;  %v16013_v21 = vpack.c.bf16 %v7240_v32, %v7238_v1 }
 0xf84   : > { %7355 = vmatmul.bf16.vlgmr.msra.gmra.mxu0 %v16011_v49  ;;  %12292 = vmatmul.msk.bf16.vlgmr.msrb.gmra.mxu1 %vm16993_vm6, %v16013_v21 }
 0xf85   : > { %v7203_v51 = vpop.f32.mrf.mxu3  ;;  %v7221_v3 = vpop.f32.mrf.mxu2 }
 0xf86   : > { %v7229_v30 = vadd.f32 %v7203_v51, %v15956_v9  ;;  %v7230_v57 = vadd.f32 %v7221_v3, %v15952_v2 }
 0xf88   : > { %v7241_v6 = vadd.f32 %v7233_v28, %v7229_v30  ;;  %v7242_v36 = vadd.f32 %v7234_v37, %v7230_v57  ;;  %v12340_v28 = vld [vmem:[%s16995_s3 + $0x8] sm:$0xf0]  ;;  %s17001_s3 = smov %s17000_s28 }
 0xf89   : > { %v12343_v37 = vor.u32 %v13522_v55, %v12340_v28 }
 0xf8a   : > { %v16020_v41 = vpack.c.bf16 %v7241_v6, %v7241_v6  ;;  %v16022_v35 = vpack.c.bf16 %v7242_v36, %v7242_v36 }
 0xf8b   : > { %7615 = vmatpush.bf16.msra.mxu1 %v12343_v37 }
 0xf8c   : > { %v16026_v17 = vsel %vm16996_vm13, %v16020_v41, 0  ;;  %v16030_v50 = vsel %vm16997_vm3, %v16022_v35, 0 }
 0xf8d   : > { %7779 = vmatpush.bf16.msrb.mxu3 %v16026_v17  ;;  %7797 = vmatpush.bf16.msra.mxu2 %v16030_v50  ;;  %v7205_v2 = vpop.f32.mrf.mxu3  ;;  %v7223_v9 = vpop.f32.mrf.mxu2 }
 0xf91   : > { %7780 = vmatpush.bf16.msrb.mxu3 %v16011_v49  ;;  %7798 = vmatpush.bf16.msra.mxu2 %v16013_v21 }
 0xf94   : > { %7360 = vmatmul.bf16.gmra.mxu0 %v16020_v41  ;;  %12293 = vmatmul.msk.bf16.gmra.mxu1 %vm16998_vm2, %v16022_v35 }
 0xf95   : > { %v7482_v63 = vpop.f32.mrf.mxu3  ;;  %v7500_v25 = vpop.f32.mrf.mxu2 }
 0xf96   : > { %v7483_v31 = vadd.f32 %v13869_v27, %v7482_v63 }
 0xf98   : > { %v7501_v51 = vadd.f32 %v7500_v25, %v7483_v31 }
 0xf9d   : > { %v7484_v38 = vpop.f32.mrf.mxu3  ;;  %v7502_v53 = vpop.f32.mrf.mxu2 }
 0xf9e   : > { %v7485_v30 = vadd.f32 %v13869_v27, %v7484_v38 }
 0xfa0   : > { %v7503_v9 = vadd.f32 %v7502_v53, %v7485_v30 }
 0xfa5   : > { %v7487_v14 = vpop.f32.mrf.mxu3  ;;  %v7505_v15 = vpop.f32.mrf.mxu2 }
 0xfa6   : > { %v7488_v63 = vadd.f32 %v13869_v27, %v7487_v14 }
 0xfa8   : > { %v7506_v10 = vadd.f32 %v7505_v15, %v7488_v63 }
 0xfad   : > { %v7489_v34 = vpop.f32.mrf.mxu3  ;;  %v7507_v23 = vpop.f32.mrf.mxu2 }
0x1001   : > { %v7356_v60 = vpop.f32.mrf.mxu0  ;;  %v7374_v1 = vpop.f32.mrf.mxu1 }
0x1002   : > { %v7357_v32 = vadd.f32 %v13870_v16, %v7356_v60 }
0x1004   : > { %v7375_v3 = vadd.f32 %v7374_v1, %v7357_v32 }
0x1006   : > { %v7509_v2 = vadd.f32 %v7501_v51, %v7375_v3 }
0x1008   : > { %v7512_v13 = vmax.f32 %v7509_v2, 0.0 }
0x1009   : > { %v7358_v57 = vpop.f32.mrf.mxu0  ;;  %v7376_v6 = vpop.f32.mrf.mxu1 }
0x100a   : > { %v7359_v36 = vadd.f32 %v13870_v16, %v7358_v57 }
0x100c   : > { %v7377_v22 = vadd.f32 %v7376_v6, %v7359_v36  ;;  %v16077_v36 = vld [vmem:[%s17000_s28] sm:$0xff]  ;;  %s17054_s28 = sld [smem:[#allocation75_spill]] }
0x100d   : > { %12390 = vmatmul.msk.bf16.vlgmr.msrb.gmra.mxu3 %vm7761_vm7, %v16077_v36  ;;  %12392 = vmatmul.msk.bf16.vlgmr.msra.gmra.mxu2 %vm7761_vm7, %v16077_v36 }
0x100e   : > { %v7510_v11 = vadd.f32 %v7503_v9, %v7377_v22 }
0x1010   : > { %v7513_v44 = vmax.f32 %v7510_v11, 0.0 }
0x1011   : > { %v7361_v46 = vpop.f32.mrf.mxu0  ;;  %v7379_v48 = vpop.f32.mrf.mxu1 }
0x1012   : > { %v7515_v45 = vpack.c.bf16 %v7513_v44, %v7512_v13  ;;  %v7362_v40 = vadd.f32 %v13870_v16, %v7361_v46 }
0x1014   : > { %12376 = vmatmul.msk.bf16.vlgmr.msrb.gmra.mxu0 %vm7583_vm5, %v7515_v45  ;;  %12378 = vmatmul.msk.bf16.vlgmr.msra.gmra.mxu1 %vm7583_vm5, %v7515_v45  ;;  %v7380_v25 = vadd.f32 %v7379_v48, %v7362_v40 }
0x1016   : > { %v7511_v38 = vadd.f32 %v7506_v10, %v7380_v25 }
0x1018   : > { %v7514_v56 = vmax.f32 %v7511_v38, 0.0 }
0x1019   : > { %v7363_v0 = vpop.f32.mrf.mxu0  ;;  %v7381_v52 = vpop.f32.mrf.mxu1 }
0x101a   : > { %v7516_v53 = vpack.c.bf16 %v7514_v56, %v7514_v56 }
0x1024   : > { %12377 = vmatmul.msk.bf16.gmra.mxu0 %vm7583_vm5, %v7516_v53  ;;  %12379 = vmatmul.msk.bf16.gmra.mxu1 %vm7583_vm5, %v7516_v53 }
0x1091   : > { %v7599_v5 = vpop.f32.mrf.mxu0  ;;  %v7617_v24 = vpop.f32.mrf.mxu1 }
0x1092   : > { %v7600_v39 = vadd.f32 %v7599_v5, %v7529_v61  ;;  %v7618_v7 = vadd.f32 %v7617_v24, %v7530_v58 }
0x1094   : > { %v12380_v12 = vmul.f32 -1.442695, %v7600_v39  ;;  %v12381_v62 = vmul.f32 -1.442695, %v7618_v7  ;;  %v7752_v39 = vld [vmem:[%s17001_s3 + $0x8] sm:$0x3] }
0x1096   : > { %13932 = vpow2.f32 %v12380_v12 }
0x1097   : > { %13934 = vpow2.f32 %v12381_v62 }
0x1099   : > { %v7601_v33 = vpop.f32.mrf.mxu0  ;;  %v7619_v14 = vpop.f32.mrf.mxu1 }
0x109a   : > { %v7602_v15 = vadd.f32 %v7601_v33, %v7529_v61  ;;  %v7620_v29 = vadd.f32 %v7619_v14, %v7530_v58 }
0x109c   : > { %v13933_v54 = vpop.eup %13932  ;;  %v12382_v18 = vmul.f32 -1.442695, %v7602_v15  ;;  %v12383_v55 = vmul.f32 -1.442695, %v7620_v29 }
0x109d   : > { %v13935_v4 = vpop.eup %13934  ;;  %v16060_v28 = vadd.f32 1.0, %v13933_v54 }
0x109e   : > { %13936 = vpow2.f32 %v12382_v18  ;;  %v16062_v19 = vadd.f32 1.0, %v13935_v4 }
0x109f   : > { %13938 = vpow2.f32 %v12383_v55  ;;  %v7661_v25 = vand.u32 2147483648, %v16060_v28  ;;  %vm7655_vm15 = vweird.f32 %v16060_v28  ;;  %v7659_v53 = vand.u32 2147483647, %v16060_v28 }
0x10a0   : > { %13940 = vrcp.f32 %v16060_v28  ;;  %v7676_v52 = vand.u32 2147483648, %v16062_v19  ;;  %v7674_v24 = vand.u32 2147483647, %v16062_v19  ;;  %vm7670_vm4 = vweird.f32 %v16062_v19 }
0x10a1   : > { %v7604_v37 = vpop.f32.mrf.mxu0  ;;  %v7622_v34 = vpop.f32.mrf.mxu1  ;;  %13942 = vrcp.f32 %v16062_v19  ;;  %v16109_v5 = vor.u32 1.1754944e-38, %v7661_v25  ;;  %v7758_v55 = vunpack.c.l.b16 %v7752_v39  ;;  %vm16136_vm11 = vcmp.eq.f32.partialorder %v7659_v53, 8.507059e+37 }
0x10a2   : > { %v7605_v23 = vadd.f32 %v7604_v37, %v7529_v61  ;;  %v7623_v27 = vadd.f32 %v7622_v34, %v7530_v58  ;;  %v16116_v62 = vor.u32 1.1754944e-38, %v7676_v52 }
0x10a4   : > { %v13937_v16 = vpop.eup %13936  ;;  %v12384_v60 = vmul.f32 -1.442695, %v7605_v23  ;;  %v12385_v1 = vmul.f32 -1.442695, %v7623_v27 }
0x10a5   : > { %v16066_v31 = vadd.f32 1.0, %v13937_v16  ;;  %v13939_v32 = vpop.eup %13938 }
0x10a6   : > { %13944 = vpow2.f32 %v12384_v60  ;;  %v16069_v51 = vpop.eup %13940  ;;  %v16071_v3 = vadd.f32 1.0, %v13939_v32  ;;  %v13562_v60 = vld [vmem:[%s17009_s5 + $0x44] sm:$0xf0] }
0x10a7   : > { %13946 = vrcp.f32 %v16066_v31  ;;  %v16073_v30 = vpop.eup %13942  ;;  %v7651_v9 = vmul.f32 %v16069_v51, %v16060_v28  ;;  %v7691_v38 = vand.u32 2147483648, %v16066_v31  ;;  %v7689_v59 = vand.u32 2147483647, %v16066_v31  ;;  %v13558_v28 = vld [vmem:[%s17009_s5 + $0x24] sm:$0xf0] }
0x10a8   : > { %13948 = vpow2.f32 %v12385_v1  ;;  %v7666_v22 = vmul.f32 %v16073_v30, %v16062_v19  ;;  %vm7656_vm12 = vweird.f32 %v16069_v51  ;;  %vm7685_vm8 = vweird.f32 %v16066_v31 }
0x10a9   : > { %v7606_v57 = vpop.f32.mrf.mxu0  ;;  %v7624_v6 = vpop.f32.mrf.mxu1  ;;  %13950 = vrcp.f32 %v16071_v3  ;;  %v7652_v40 = vsub.f32 1.0, %v7651_v9  ;;  %v7692_v14 = vor.u32 1.1754944e-38, %v7691_v38  ;;  %vm7671_vm9 = vweird.f32 %v16073_v30  ;;  %vm16148_vm13 = vmor %vm7655_vm15, %vm7656_vm12  ;;  %v13568_v38 = vld [vmem:[%s17009_s5 + $0x74] sm:$0xf0] }
0x10aa   : > { %v7667_v63 = vsub.f32 1.0, %v7666_v22  ;;  %vm7700_vm14 = vweird.f32 %v16071_v3  ;;  %vm16122_vm10 = vcmp.eq.f32.partialorder %v7689_v59, 8.507059e+37  ;;  %v7704_v18 = vand.u32 2147483647, %v16071_v3  ;;  %v13560_v9 = vld [vmem:[%s17009_s5 + $0x34] sm:$0xf0] }
0x10ab   : > { %v7653_v61 = vmul.f32 %v16069_v51, %v7652_v40  ;;  %v7706_v4 = vand.u32 2147483648, %v16071_v3 }
0x10ac   : > { %v13945_v2 = vpop.eup %13944  ;;  %v7668_v58 = vmul.f32 %v16073_v30, %v7667_v63 }
0x10ad   : > { %v16083_v11 = vpop.eup %13946  ;;  %v16085_v13 = vadd.f32 1.0, %v13945_v2  ;;  %v7654_v23 = vadd.f32 %v16069_v51, %v7653_v61  ;;  %v7707_v52 = vor.u32 1.1754944e-38, %v7706_v4  ;;  %v12440_v4 = vld [vmem:[%s17009_s5 + $0x50] sm:$0xf] }
0x10ae   : > { %v13949_v44 = vpop.eup %13948  ;;  %v7681_v46 = vmul.f32 %v16083_v11, %v16066_v31  ;;  %v16132_v27 = vadd.f32 %v16073_v30, %v7668_v58  ;;  %vm7686_vm0 = vweird.f32 %v16083_v11  ;;  %v13566_v58 = vld [vmem:[%s17009_s5 + $0x64] sm:$0xf0] }
0x10af   : > { %13952 = vrcp.f32 %v16085_v13  ;;  %v16094_v48 = vadd.f32 1.0, %v13949_v44  ;;  %v16096_v45 = vpop.eup %13950  ;;  %vm7715_vm1 = vweird.f32 %v16085_v13  ;;  %v7721_v16 = vand.u32 2147483648, %v16085_v13  ;;  %vm16159_vm5 = vmor %vm7685_vm8, %vm7686_vm0 }
0x10b0   : > { %v7682_v10 = vsub.f32 1.0, %v7681_v46  ;;  %v7696_v0 = vmul.f32 %v16096_v45, %v16071_v3  ;;  %v7719_v6 = vand.u32 2147483647, %v16085_v13  ;;  %vm7701_vm3 = vweird.f32 %v16096_v45 }
0x10b1   : > { %13954 = vrcp.f32 %v16094_v48  ;;  %v7736_v2 = vand.u32 2147483648, %v16094_v48  ;;  %v16154_v44 = vpack.c.b16 %v7758_v55, %v7758_v55  ;;  %v7734_v63 = vand.u32 2147483647, %v16094_v48  ;;  %v13564_v55 = vld [vmem:[%s17009_s5 + $0x54] sm:$0xf0] }
0x10b2   : > { %v7697_v56 = vsub.f32 1.0, %v7696_v0  ;;  %v7683_v12 = vmul.f32 %v16083_v11, %v7682_v10  ;;  %v7722_v25 = vor.u32 1.1754944e-38, %v7721_v16  ;;  %v7658_v10 = vsel %vm16148_vm13, %v16069_v51, %v7654_v23  ;;  %v12432_v16 = vld [vmem:[%s17009_s5 + $0x40] sm:$0xf]  ;;  %v13559_v51 = vld [vmem:[%s17009_s5 + $0x34] sm:$0xf] }
0x10b3   : > { %12391 = vmatmul.msk.bf16.gmra.mxu3 %vm7761_vm7, %v16154_v44  ;;  %12393 = vmatmul.msk.bf16.gmra.mxu2 %vm7761_vm7, %v16154_v44  ;;  %vm7720_vm12 = vcmp.eq.f32.partialorder %v7719_v6, 8.507059e+37  ;;  %vm7730_vm8 = vweird.f32 %v16094_v48  ;;  %v7737_v53 = vor.u32 1.1754944e-38, %v7736_v2  ;;  %vm7705_vm13 = vcmp.eq.f32.partialorder %v7704_v18, 8.507059e+37  ;;  %v12458_v18 = vld [vmem:[%s17009_s5 + $0x78] sm:$0xf0] }
0x10b4   : > { %v7698_v54 = vmul.f32 %v16096_v45, %v7697_v56  ;;  %v7684_v1 = vadd.f32 %v16083_v11, %v7683_v12  ;;  %v7663_v29 = vsel %vm16136_vm11, %v16109_v5, %v7658_v10  ;;  %v12441_v19 = vor.u32 %v13564_v55, %v12440_v4  ;;  %v12424_v2 = vld [vmem:[%s17009_s5 + $0x30] sm:$0xf]  ;;  %v12434_v10 = vld [vmem:[%s17009_s5 + $0x48] sm:$0xf0]  ;;  %v13547_v4 = vld [vmem:[%s17019_s6 + $0x74] sm:$0xf] }
0x10b5   : > { %v13953_v7 = vpop.eup %13952  ;;  %v7740_v23 = vmul.f32 %v7663_v29, %v15977_v47  ;;  %v13553_v29 = vld [vmem:[%s17009_s5 + $0x4] sm:$0xf]  ;;  %vm17020_vm11 = vcmask 261120  }
0x10b6   : > { %v7711_v33 = vmul.f32 %v13953_v7, %v16085_v13  ;;  %vm7716_vm6 = vweird.f32 %v13953_v7  ;;  %v7699_v22 = vadd.f32 %v16096_v45, %v7698_v54  ;;  %v7688_v0 = vsel %vm16159_vm5, %v16083_v11, %v7684_v1  ;;  %v12456_v11 = vld [vmem:[%s17008_s2 + $0x70] sm:$0xf]  ;;  %v12450_v1 = vld [vmem:[%s17009_s5 + $0x68] sm:$0xf0]  ;;  %s16808_s2 = sand.u32 1, %s17054_s28  }
0x10b7   : > { %v13955_v15 = vpop.eup %13954  ;;  %vm7717_vm15 = vmor %vm7715_vm1, %vm7716_vm6  ;;  %v12457_v61 = vor.u32 %v13568_v38, %v12456_v11 }
0x10b8   : > { %v7712_v37 = vsub.f32 1.0, %v7711_v33  ;;  %v7726_v34 = vmul.f32 %v13955_v15, %v16094_v48  ;;  %vm7731_vm2 = vweird.f32 %v13955_v15  ;;  %vm16180_vm1 = vmor %vm7700_vm14, %vm7701_vm3  ;;  %v12448_v48 = vld [vmem:[%s17009_s5 + $0x60] sm:$0xf]  ;;  %vm7735_vm14 = vcmp.eq.f32.partialorder %v7734_v63, 8.507059e+37 }
0x10b9   : > { %vm7732_vm0 = vmor %vm7730_vm8, %vm7731_vm2  ;;  %v7703_v59 = vsel %vm16180_vm1, %v16096_v45, %v7699_v22  ;;  %8005 = vmatpush.bf16.msra.mxu3 %v12457_v61  ;;  %v12449_v33 = vor.u32 %v13566_v58, %v12448_v48  ;;  %v13563_v22 = vld [vmem:[%s17009_s5 + $0x54] sm:$0xf]  ;;  %v12416_v63 = vld [vmem:[%s17009_s5 + $0x20] sm:$0xf] }
0x10ba   : > { %v7727_v32 = vsub.f32 1.0, %v7726_v34  ;;  %v7713_v57 = vmul.f32 %v13953_v7, %v7712_v37  ;;  %vm16199_vm6 = vmor %vm7670_vm4, %vm7671_vm9  ;;  %v7708_v54 = vsel %vm7705_vm13, %v7707_v52, %v7703_v59  ;;  %vm7675_vm9 = vcmp.eq.f32.partialorder %v7674_v24, 8.507059e+37  ;;  %v13557_v59 = vld [vmem:[%s17009_s5 + $0x24] sm:$0xf]  ;;  %v12418_v61 = vld [vmem:[%s17009_s5 + $0x28] sm:$0xf0] }
0x10bb   : > { %vm17016_vm4 = vcmask 1041408   ;;  %v12540_v48 = vld [vmem:[%s17018_s7 + $0x70] sm:$0xf]  ;;  %v13548_v58 = vld [vmem:[%s17019_s6 + $0x74] sm:$0xf0]  ;;  %vm17021_vm3 = vmmov %vm17020_vm11  ;;  %s10199_s7 = sshll.u32 %s16808_s2, 7 }
0x10bc   : > { %v7714_v46 = vadd.f32 %v13953_v7, %v7713_v57  ;;  %v7728_v40 = vmul.f32 %v13955_v15, %v7727_v32  ;;  %v12433_v57 = vor.u32 %v13562_v60, %v12432_v16  ;;  %v12410_v45 = vld [vmem:[%s17009_s5 + $0x18] sm:$0xf0]  ;;  %v13543_v16 = vld [vmem:[%s17019_s6 + $0x54] sm:$0xf]  ;;  %vm17022_vm2 = vmmov %vm17021_vm3 }
0x10bd   : > { %8006 = vmatpush.bf16.msra.mxu3 %v12449_v33  ;;  %v13546_v33 = vld [vmem:[%s17019_s6 + $0x64] sm:$0xf0]  ;;  %v12526_v60 = vld [vmem:[%s17019_s6 + $0x58] sm:$0xf0]  ;;  %vm17023_vm5 = vmmov %vm17022_vm2 }
0x10be   : > { %v7718_v31 = vsel %vm7717_vm15, %v13953_v7, %v7714_v46  ;;  %v7729_v13 = vadd.f32 %v13955_v15, %v7728_v40  ;;  %v7693_v7 = vsel %vm16122_vm10, %v7692_v14, %v7688_v0  ;;  %vm17017_vm10 = vmmov %vm17016_vm4  ;;  %v12425_v46 = vor.u32 %v13560_v9, %v12424_v2  ;;  %v12518_v2 = vld [vmem:[%s17019_s6 + $0x48] sm:$0xf0]  ;;  %v12472_v9 = vld [vmem:[%s17009_s5 + $0x90] sm:$0xf] }
0x10bf   : > { %v7723_v56 = vsel %vm7720_vm12, %v7722_v25, %v7718_v31  ;;  %v7742_v37 = vmul.f32 %v7693_v7, %v15979_v43  ;;  %v7743_v43 = vmul.f32 %v7708_v54, %v15983_v26  ;;  %v13565_v26 = vld [vmem:[%s17009_s5 + $0x64] sm:$0xf]  ;;  %v12417_v0 = vor.u32 %v13558_v28, %v12416_v63  ;;  %v12408_v31 = vld [vmem:[%s17009_s5 + $0x10] sm:$0xf]  ;;  %v13555_v7 = vld [vmem:[%s17009_s5 + $0x14] sm:$0xf] }
0x10c0   : > { %v7744_v3 = vmul.f32 %v7723_v56, %v15995_v42  ;;  %v7733_v39 = vsel %vm7732_vm0, %v13955_v15, %v7729_v13  ;;  %v7673_v42 = vsel %vm16199_vm6, %v16073_v30, %v16132_v27  ;;  %v13567_v30 = vld [vmem:[%s17009_s5 + $0x74] sm:$0xf]  ;;  %v12453_v6 = vor.u32 %v13565_v26, %v12450_v1  ;;  %v13561_v25 = vld [vmem:[%s17009_s5 + $0x44] sm:$0xf]  ;;  %v13556_v13 = vld [vmem:[%s17009_s5 + $0x14] sm:$0xf0] }
0x10c1   : > { %v7738_v12 = vsel %vm7735_vm14, %v7737_v53, %v7733_v39  ;;  %v7678_v5 = vsel %vm7675_vm9, %v16116_v62, %v7673_v42  ;;  %v12461_v27 = vor.u32 %v13567_v30, %v12458_v18  ;;  %v16237_v62 = vpack.c.bf16 %v7742_v37, %v7740_v23  ;;  %8007 = vmatpush.bf16.msra.mxu3 %v12441_v19  ;;  %v12400_v56 = vld [vmem:[%s17009_s5] sm:$0xf]  ;;  %v13554_v53 = vld [vmem:[%s17009_s5 + $0x4] sm:$0xf0]  ;;  %v12402_v54 = vld [vmem:[%s17009_s5 + $0x8] sm:$0xf0] }
0x10c2   : > { %v16207_v15 = vpack.c.bf16 %v7744_v3, %v7744_v3  ;;  %v7745_v14 = vmul.f32 %v7738_v12, %v15997_v8  ;;  %v7741_v47 = vmul.f32 %v7678_v5, %v15981_v20  ;;  %v12442_v20 = vld [vmem:[%s17009_s5 + $0x58] sm:$0xf0]  ;;  %v12437_v52 = vor.u32 %v13561_v25, %v12434_v10  ;;  %v12532_v42 = vld [vmem:[%s17019_s6 + $0x60] sm:$0xf]  ;;  %v12524_v30 = vld [vmem:[%s17019_s6 + $0x50] sm:$0xf] }
0x10c3   : > { %v12445_v40 = vor.u32 %v13563_v22, %v12442_v20  ;;  %v12409_v11 = vor.u32 %v13556_v13, %v12408_v31  ;;  %v12401_v3 = vor.u32 %v13554_v53, %v12400_v56  ;;  %v12421_v39 = vor.u32 %v13557_v59, %v12418_v61  ;;  %v12542_v37 = vld [vmem:[%s17019_s6 + $0x78] sm:$0xf0]  ;;  %v13544_v18 = vld [vmem:[%s17019_s6 + $0x54] sm:$0xf0]  ;;  %v12534_v19 = vld [vmem:[%s17019_s6 + $0x68] sm:$0xf0] }
0x10c4   : > { %v16222_v8 = vsel %vm17016_vm4, %v16207_v15, 0  ;;  %v16224_v34 = vpack.c.bf16 %v7745_v14, %v7745_v14  ;;  %v16243_v32 = vpack.c.bf16 %v7743_v43, %v7741_v47  ;;  %v12541_v12 = vor.u32 %v13548_v58, %v12540_v48  ;;  %v13545_v43 = vld [vmem:[%s17019_s6 + $0x64] sm:$0xf]  ;;  %v12516_v26 = vld [vmem:[%s17019_s6 + $0x40] sm:$0xf]  ;;  %vm17024_vm15 = vmmov %vm17022_vm2 }
0x10c5   : > { %7825 = vmatpush.bf16.msra.mxu0 %v16222_v8  ;;  %8008 = vmatpush.bf16.msra.mxu3 %v12433_v57  ;;  %v12413_v14 = vor.u32 %v13555_v7, %v12410_v45  ;;  %v12533_v55 = vor.u32 %v13546_v33, %v12532_v42  ;;  %v12405_v5 = vor.u32 %v13553_v29, %v12402_v54  ;;  %v13542_v1 = vld [vmem:[%s17019_s6 + $0x44] sm:$0xf0]  ;;  %v13541_v57 = vld [vmem:[%s17019_s6 + $0x44] sm:$0xf]  ;;  %v13572_v22 = vld [vmem:[%s17009_s5 + $0x94] sm:$0xf0] }
0x10c6   : > { %v16232_v24 = vsel %vm17017_vm10, %v16224_v34, 0  ;;  %v12545_v23 = vor.u32 %v13547_v4, %v12542_v37  ;;  %v12529_v47 = vor.u32 %v13543_v16, %v12526_v60  ;;  %v12521_v20 = vor.u32 %v13541_v57, %v12518_v2  ;;  %v12474_v63 = vld [vmem:[%s17009_s5 + $0x98] sm:$0xf0]  ;;  %v12508_v28 = vld [vmem:[%s17019_s6 + $0x30] sm:$0xf]  ;;  %vm17025_vm12 = vmmov %vm17022_vm2 }
0x10c7   : > { %7843 = vmatpush.bf16.msrb.mxu1 %v16232_v24  ;;  %v13540_v10 = vld [vmem:[%s17019_s6 + $0x34] sm:$0xf0]  ;;  %v12466_v56 = vld [vmem:[%s17009_s5 + $0x88] sm:$0xf0]  ;;  %v12500_v53 = vld [vmem:[%s17019_s6 + $0x20] sm:$0xf] }
0x10c8   : > { %v12509_v31 = vor.u32 %v13540_v10, %v12508_v28  ;;  %v13538_v59 = vld [vmem:[%s17019_s6 + $0x24] sm:$0xf0]  ;;  %v13537_v58 = vld [vmem:[%s17019_s6 + $0x24] sm:$0xf]  ;;  %v13536_v45 = vld [vmem:[%s17019_s6 + $0x14] sm:$0xf0] }
0x10c9   : > { %7826 = vmatpush.bf16.msra.mxu0 %v16237_v62  ;;  %8009 = vmatpush.bf16.msra.mxu3 %v12425_v46  ;;  %v12473_v46 = vor.u32 %v13572_v22, %v12472_v9  ;;  %v12501_v48 = vor.u32 %v13538_v59, %v12500_v53  ;;  %v12494_v42 = vld [vmem:[%s17019_s6 + $0x18] sm:$0xf0]  ;;  %v12484_v29 = vld [vmem:[%s17019_s6] sm:$0xf]  ;;  %v13534_v54 = vld [vmem:[%s17019_s6 + $0x4] sm:$0xf0] }
0x10ca   : > { %v13533_v4 = vld [vmem:[%s17019_s6 + $0x4] sm:$0xf]  ;;  %v12486_v37 = vld [vmem:[%s17019_s6 + $0x8] sm:$0xf0]  ;;  %v12644_v9 = vld [vmem:[%s17019_s6 + $0x110] sm:$0xf] }
0x10cb   : > { %7844 = vmatpush.bf16.msrb.mxu1 %v16243_v32  ;;  %8029 = vmatpush.bf16.msrb.mxu2 %v12473_v46  ;;  %v12550_v2 = vld [vmem:[%s17019_s6 + $0x88] sm:$0xf0]  ;;  %v13587_v46 = vld [vmem:[%s17019_s6 + $0x114] sm:$0xf]  ;;  %v12628_v59 = vld [vmem:[%s17019_s6 + $0xf0] sm:$0xf] }
0x10cc   : > { %12394 = vmatmul.msk.bf16.vlgmr.msra.gmra.mxu0 %vm7761_vm7, %v16077_v36  ;;  %vm17026_vm8 = vmmov %vm17022_vm2 }
0x10cd   : > { %8041 = vmatpush.bf16.msrb.mxu0 %v12461_v27  ;;  %8010 = vmatpush.bf16.msra.mxu3 %v12417_v0  ;;  %v12537_v27 = vor.u32 %v13545_v43, %v12534_v19  ;;  %v13539_v0 = vld [vmem:[%s17019_s6 + $0x34] sm:$0xf]  ;;  %v13552_v43 = vld [vmem:[%s17019_s6 + $0x94] sm:$0xf0]  ;;  %vm17027_vm1 = vmmov %vm17022_vm2 }
0x10ce   : > { %12396 = vmatmul.msk.bf16.vlgmr.msrb.gmra.mxu1 %vm7761_vm7, %v16077_v36  ;;  %v12426_v36 = vld [vmem:[%s17009_s5 + $0x38] sm:$0xf0]  ;;  %v13551_v19 = vld [vmem:[%s17019_s6 + $0x94] sm:$0xf]  ;;  %vm17028_vm0 = vmmov %vm17027_vm1 }
0x10cf   : > { %v12429_v38 = vor.u32 %v13559_v51, %v12426_v36  ;;  %v12464_v51 = vld [vmem:[%s17009_s5 + $0x80] sm:$0xf]  ;;  %v13570_v36 = vld [vmem:[%s17009_s5 + $0x84] sm:$0xf0]  ;;  %vm17029_vm14 = vmmov %vm17028_vm0 }
0x10d0   : > { %vm17030_vm6 = vmmov %vm17028_vm0 }
0x10d1   : > { %8042 = vmatpush.bf16.msrb.mxu0 %v12453_v6  ;;  %8011 = vmatpush.bf16.msra.mxu3 %v12409_v11  ;;  %v12517_v6 = vor.u32 %v13542_v1, %v12516_v26  ;;  %v13569_v11 = vld [vmem:[%s17009_s5 + $0x84] sm:$0xf]  ;;  %v12548_v26 = vld [vmem:[%s17019_s6 + $0x80] sm:$0xf]  ;;  %v13550_v1 = vld [vmem:[%s17019_s6 + $0x84] sm:$0xf0] }
0x10d2   : > { %v12469_v61 = vor.u32 %v13569_v11, %v12466_v56  ;;  %v12549_v57 = vor.u32 %v13550_v1, %v12548_v26  ;;  %v12604_v26 = vld [vmem:[%s17019_s6 + $0xc0] sm:$0xf]  ;;  %vm17031_vm13 = vmmov %vm17028_vm0 }
0x10d3   : > { %vm17032_vm9 = vmmov %vm17028_vm0 }
0x10d4   : > { %vm17033_vm4 = vmmov %vm17028_vm0 }
0x10d5   : > { %8043 = vmatpush.bf16.msrb.mxu0 %v12445_v40  ;;  %8012 = vmatpush.bf16.msra.mxu3 %v12401_v3  ;;  %v13571_v40 = vld [vmem:[%s17009_s5 + $0x94] sm:$0xf]  ;;  %v12502_v3 = vld [vmem:[%s17019_s6 + $0x28] sm:$0xf0]  ;;  %vm17034_vm10 = vmmov %vm17028_vm0 }
0x10d6   : > { %v12477_v25 = vor.u32 %v13571_v40, %v12474_v63  ;;  %v12505_v7 = vor.u32 %v13537_v58, %v12502_v3  ;;  %v12646_v40 = vld [vmem:[%s17019_s6 + $0x118] sm:$0xf0] }
0x10d7   : > { %v12630_v58 = vld [vmem:[%s17019_s6 + $0xf8] sm:$0xf0] }
0x10d8   : > { %8065 = vmatpush.bf16.msra.mxu1 %v12477_v25 }
0x10d9   : > { %8044 = vmatpush.bf16.msrb.mxu0 %v12437_v52  ;;  %8183 = vmatpush.bf16.msrb.mxu3 %v12541_v12  ;;  %v12510_v52 = vld [vmem:[%s17019_s6 + $0x38] sm:$0xf0]  ;;  %v13535_v12 = vld [vmem:[%s17019_s6 + $0x14] sm:$0xf] }
0x10da   : > { %v12513_v13 = vor.u32 %v13539_v0, %v12510_v52  ;;  %v12649_v0 = vor.u32 %v13587_v46, %v12646_v40  ;;  %v12636_v52 = vld [vmem:[%s17019_s6 + $0x100] sm:$0xf]  ;;  %v12596_v46 = vld [vmem:[%s17019_s6 + $0xb0] sm:$0xf]  ;;  %v13576_v40 = vld [vmem:[%s17019_s6 + $0xb4] sm:$0xf0] }
0x10dc   : > { %12395 = vmatmul.msk.bf16.gmra.mxu0 %vm7761_vm7, %v16154_v44  ;;  %8066 = vmatpush.bf16.msra.mxu1 %v12469_v61  ;;  %v13584_v61 = vld [vmem:[%s17019_s6 + $0xf4] sm:$0xf0] }
0x10dd   : > { %8045 = vmatpush.bf16.msrb.mxu0 %v12429_v38  ;;  %8184 = vmatpush.bf16.msrb.mxu3 %v12533_v55  ;;  %v12465_v38 = vor.u32 %v13570_v36, %v12464_v51  ;;  %v12485_v55 = vor.u32 %v13534_v54, %v12484_v29  ;;  %v13585_v51 = vld [vmem:[%s17019_s6 + $0x104] sm:$0xf]  ;;  %v12638_v36 = vld [vmem:[%s17019_s6 + $0x108] sm:$0xf0] }
0x10de   : > { %12397 = vmatmul.msk.bf16.gmra.mxu1 %vm7761_vm7, %v16154_v44  ;;  %v12525_v44 = vor.u32 %v13544_v18, %v12524_v30  ;;  %v12489_v30 = vor.u32 %v13533_v4, %v12486_v37  ;;  %v16314_v18 = vpop.f32.mrf.mxu3  ;;  %v12641_v53 = vor.u32 %v13585_v51, %v12638_v36  ;;  %v12622_v29 = vld [vmem:[%s17019_s6 + $0xe8] sm:$0xf0]  ;;  %v12612_v37 = vld [vmem:[%s17019_s6 + $0xd0] sm:$0xf]  ;;  %v13591_v51 = vld [vmem:[%s17019_s6 + $0x134] sm:$0xf] }
0x10df   : > { %8030 = vmatpush.bf16.msrb.mxu2 %v12465_v38  ;;  %v12662_v36 = vld [vmem:[%s17019_s6 + $0x138] sm:$0xf0] }
0x10e1   : > { %8046 = vmatpush.bf16.msrb.mxu0 %v12421_v39  ;;  %8185 = vmatpush.bf16.msrb.mxu3 %v12525_v44  ;;  %v12492_v39 = vld [vmem:[%s17019_s6 + $0x10] sm:$0xf] }
0x10e2   : > { %v12493_v33 = vor.u32 %v13536_v45, %v12492_v39  ;;  %v12629_v45 = vor.u32 %v13584_v61, %v12628_v59  ;;  %v12590_v59 = vld [vmem:[%s17019_s6 + $0xa8] sm:$0xf0]  ;;  %v12665_v61 = vor.u32 %v13591_v51, %v12662_v36  ;;  %v13601_v51 = vld [vmem:[%s17009_s5 + $0xe4] sm:$0xf] }
0x10e3   : > { %v12726_v36 = vld [vmem:[%s17009_s5 + $0xe8] sm:$0xf0] }
0x10e5   : > { %8047 = vmatpush.bf16.msrb.mxu0 %v12413_v14  ;;  %8186 = vmatpush.bf16.msrb.mxu3 %v12517_v6  ;;  %v12497_v14 = vor.u32 %v13535_v12, %v12494_v42  ;;  %v13549_v6 = vld [vmem:[%s17019_s6 + $0x84] sm:$0xf]  ;;  %v12620_v42 = vld [vmem:[%s17019_s6 + $0xe0] sm:$0xf] }
0x10e6   : > { %v12553_v22 = vor.u32 %v13549_v6, %v12550_v2  ;;  %v16330_v63 = vpop.f32.mrf.mxu3  ;;  %v13577_v6 = vld [vmem:[%s17019_s6 + $0xc4] sm:$0xf]  ;;  %v12606_v2 = vld [vmem:[%s17019_s6 + $0xc8] sm:$0xf0] }
0x10e9   : > { %8048 = vmatpush.bf16.msrb.mxu0 %v12405_v5  ;;  %8187 = vmatpush.bf16.msrb.mxu3 %v12509_v31  ;;  %v16316_v5 = vpop.f32.mrf.mxu2 }
0x10ed   : > { %8219 = vmatpush.bf16.msra.mxu0 %v12545_v23  ;;  %8188 = vmatpush.bf16.msrb.mxu3 %v12501_v48  ;;  %v12556_v23 = vld [vmem:[%s17019_s6 + $0x90] sm:$0xf]  ;;  %v13583_v48 = vld [vmem:[%s17019_s6 + $0xf4] sm:$0xf] }
0x10ee   : > { %v12557_v16 = vor.u32 %v13552_v43, %v12556_v23  ;;  %v12633_v12 = vor.u32 %v13583_v48, %v12630_v58  ;;  %v13579_v23 = vld [vmem:[%s17019_s6 + $0xd4] sm:$0xf]  ;;  %v12652_v48 = vld [vmem:[%s17019_s6 + $0x120] sm:$0xf]  ;;  %v13590_v58 = vld [vmem:[%s17019_s6 + $0x124] sm:$0xf0] }
0x10f0   : > { %8207 = vmatpush.bf16.msra.mxu2 %v12557_v16 }
0x10f1   : > { %8220 = vmatpush.bf16.msra.mxu0 %v12537_v27  ;;  %8189 = vmatpush.bf16.msrb.mxu3 %v12493_v33  ;;  %v12558_v27 = vld [vmem:[%s17019_s6 + $0x98] sm:$0xf0]  ;;  %v16332_v28 = vpop.f32.mrf.mxu2  ;;  %v13582_v33 = vld [vmem:[%s17019_s6 + $0xe4] sm:$0xf0] }
0x10f2   : > { %v12561_v60 = vor.u32 %v13551_v19, %v12558_v27  ;;  %v12621_v4 = vor.u32 %v13582_v33, %v12620_v42 }
0x10f4   : > { %8243 = vmatpush.bf16.msrb.mxu1 %v12561_v60  ;;  %8208 = vmatpush.bf16.msra.mxu2 %v12549_v57  ;;  %v13578_v57 = vld [vmem:[%s17019_s6 + $0xc4] sm:$0xf0] }
0x10f5   : > { %8221 = vmatpush.bf16.msra.mxu0 %v12529_v47  ;;  %8190 = vmatpush.bf16.msrb.mxu3 %v12485_v55 }
0x10f8   : > { %8244 = vmatpush.bf16.msrb.mxu1 %v12553_v22  ;;  %v12605_v22 = vor.u32 %v13578_v57, %v12604_v26  ;;  %v12742_v26 = vld [vmem:[%s17009_s5 + $0x108] sm:$0xf0] }
0x10f9   : > { %8222 = vmatpush.bf16.msra.mxu0 %v12521_v20  ;;  %v13588_v20 = vld [vmem:[%s17019_s6 + $0x114] sm:$0xf0] }
0x10fa   : > { %v12645_v10 = vor.u32 %v13588_v20, %v12644_v9  ;;  %v12609_v20 = vor.u32 %v13577_v6, %v12606_v2  ;;  %v12756_v6 = vld [vmem:[%s17009_s5 + $0x120] sm:$0xf]  ;;  %v7810_v2 = vpack.c.bf16 %v16332_v28, %v16316_v5  ;;  %v13603_v5 = vld [vmem:[%s17009_s5 + $0xf4] sm:$0xf]  ;;  %v12734_v28 = vld [vmem:[%s17009_s5 + $0xf8] sm:$0xf0] }
0x10fd   : > { %8223 = vmatpush.bf16.msra.mxu0 %v12513_v13  ;;  %v13586_v13 = vld [vmem:[%s17019_s6 + $0x104] sm:$0xf0] }
0x10fe   : > { %v12637_v56 = vor.u32 %v13586_v13, %v12636_v52  ;;  %v13592_v52 = vld [vmem:[%s17019_s6 + $0x134] sm:$0xf0] }
0x1101   : > { %8224 = vmatpush.bf16.msra.mxu0 %v12505_v7 }
0x1105   : > { %8225 = vmatpush.bf16.msra.mxu0 %v12497_v14  ;;  %v13581_v14 = vld [vmem:[%s17019_s6 + $0xe4] sm:$0xf] }
0x1106   : > { %v12625_v55 = vor.u32 %v13581_v14, %v12622_v29  ;;  %v12748_v29 = vld [vmem:[%s17009_s5 + $0x110] sm:$0xf] }
0x1109   : > { %8226 = vmatpush.bf16.msra.mxu0 %v12489_v30  ;;  %v13580_v30 = vld [vmem:[%s17019_s6 + $0xd4] sm:$0xf0] }
0x110a   : > { %v12613_v60 = vor.u32 %v13580_v30, %v12612_v37  ;;  %v12764_v37 = vld [vmem:[%s17009_s5 + $0x130] sm:$0xf]  ;;  %v13612_v30 = vld [vmem:[%s17009_s5 + $0x134] sm:$0xf0] }
0x1136   : > { %v16344_v3 = vpop.f32.mrf.mxu3  ;;  %v16346_v39 = vpop.f32.mrf.mxu2 }
0x113e   : > { %v7789_v43 = vpop.f32.mrf.mxu3  ;;  %v7807_v19 = vpop.f32.mrf.mxu2 }
0x1149   : > { %v7828_v44 = vpop.f32.mrf.mxu0 }
0x114b   : > { %v7846_v47 = vpop.f32.mrf.mxu1 }
0x1151   : > { %v7830_v25 = vpop.f32.mrf.mxu0 }
0x1152   : > { %v7855_v31 = vpack.c.bf16 %v7830_v25, %v7828_v44  ;;  %v12614_v44 = vld [vmem:[%s17019_s6 + $0xd8] sm:$0xf0]  ;;  %v13575_v25 = vld [vmem:[%s17019_s6 + $0xb4] sm:$0xf] }
0x1153   : > { %v7848_v11 = vpop.f32.mrf.mxu1 }
0x1154   : > { %v7856_v38 = vpack.c.bf16 %v7848_v11, %v7846_v47  ;;  %8013 = vmatmul.bf16.vlgmr.msra.gmra.mxu3 %v7855_v31  ;;  %8049 = vmatmul.bf16.vlgmr.msrb.gmra.mxu0 %v7855_v31  ;;  %v12617_v47 = vor.u32 %v13579_v23, %v12614_v44  ;;  %v12588_v31 = vld [vmem:[%s17019_s6 + $0xa0] sm:$0xf]  ;;  %v12597_v11 = vor.u32 %v13576_v40, %v12596_v46  ;;  %v13611_v23 = vld [vmem:[%s17009_s5 + $0x134] sm:$0xf]  ;;  %v12766_v44 = vld [vmem:[%s17009_s5 + $0x138] sm:$0xf0] }
0x1155   : > { %8376 = vmatpush.bf16.msra.mxu3 %v12645_v10  ;;  %8412 = vmatpush.bf16.msrb.mxu0 %v12649_v0  ;;  %v12598_v10 = vld [vmem:[%s17019_s6 + $0xb8] sm:$0xf0]  ;;  %v12660_v0 = vld [vmem:[%s17019_s6 + $0x130] sm:$0xf]  ;;  %v12769_v57 = vor.u32 %v13611_v23, %v12766_v44  ;;  %v13604_v40 = vld [vmem:[%s17009_s5 + $0xf4] sm:$0xf0] }
0x1156   : > { %12478 = vmatmul.msk.bf16.vlgmr.msrb.gmra.mxu2 %vm17020_vm11, %v7856_v38  ;;  %12480 = vmatmul.msk.bf16.vlgmr.msra.gmra.mxu1 %vm17021_vm3, %v7856_v38  ;;  %v12661_v13 = vor.u32 %v13592_v52, %v12660_v0  ;;  %v12601_v38 = vor.u32 %v13575_v25, %v12598_v10  ;;  %v12732_v46 = vld [vmem:[%s17009_s5 + $0xf0] sm:$0xf]  ;;  %v12737_v52 = vor.u32 %v13603_v5, %v12734_v28  ;;  %v12692_v23 = vld [vmem:[%s17009_s5 + $0xa0] sm:$0xf]  ;;  %v13594_v44 = vld [vmem:[%s17009_s5 + $0xa4] sm:$0xf0] }
0x1157   : > { %8436 = vmatpush.bf16.msra.mxu1 %v12665_v61  ;;  %v12733_v0 = vor.u32 %v13604_v40, %v12732_v46  ;;  %v12718_v61 = vld [vmem:[%s17009_s5 + $0xd8] sm:$0xf0]  ;;  %vm17035_vm11 = vmmov %vm17028_vm0 }
0x1158   : > { %8400 = vmatpush.bf16.msrb.mxu2 %v12661_v13  ;;  %v13602_v13 = vld [vmem:[%s17009_s5 + $0xe4] sm:$0xf0]  ;;  %vm17036_vm3 = vmmov %vm17028_vm0 }
0x1159   : > { %v7833_v7 = vpop.f32.mrf.mxu0  ;;  %8377 = vmatpush.bf16.msra.mxu3 %v12637_v56  ;;  %8413 = vmatpush.bf16.msrb.mxu0 %v12641_v53  ;;  %v13574_v56 = vld [vmem:[%s17019_s6 + $0xa4] sm:$0xf0]  ;;  %v13573_v53 = vld [vmem:[%s17019_s6 + $0xa4] sm:$0xf] }
0x115a   : > { %v7857_v27 = vpack.c.bf16 %v7833_v7, %v7833_v7  ;;  %v13589_v7 = vld [vmem:[%s17019_s6 + $0x124] sm:$0xf]  ;;  %v12589_v33 = vor.u32 %v13574_v56, %v12588_v31  ;;  %v12593_v14 = vor.u32 %v13573_v53, %v12590_v59  ;;  %v12724_v31 = vld [vmem:[%s17009_s5 + $0xe0] sm:$0xf]  ;;  %v12716_v56 = vld [vmem:[%s17009_s5 + $0xd0] sm:$0xf] }
0x115b   : > { %v7851_v54 = vpop.f32.mrf.mxu1  ;;  %v13600_v53 = vld [vmem:[%s17009_s5 + $0xd4] sm:$0xf0]  ;;  %v13599_v59 = vld [vmem:[%s17009_s5 + $0xd4] sm:$0xf] }
0x115c   : > { %v7858_v1 = vpack.c.bf16 %v7851_v54, %v7851_v54  ;;  %v13608_v54 = vld [vmem:[%s17009_s5 + $0x114] sm:$0xf0] }
0x115d   : > { %8378 = vmatpush.bf16.msra.mxu3 %v12629_v45  ;;  %8414 = vmatpush.bf16.msrb.mxu0 %v12633_v12  ;;  %v12653_v45 = vor.u32 %v13590_v58, %v12652_v48  ;;  %v12654_v12 = vld [vmem:[%s17019_s6 + $0x128] sm:$0xf0]  ;;  %v12749_v43 = vor.u32 %v13608_v54, %v12748_v29  ;;  %v7811_v48 = vpack.c.bf16 %v16344_v3, %v16344_v3  ;;  %v12700_v54 = vld [vmem:[%s17009_s5 + $0xb0] sm:$0xf] }
0x115e   : > { %v12657_v42 = vor.u32 %v13589_v7, %v12654_v12  ;;  %v12717_v58 = vor.u32 %v13600_v53, %v12716_v56  ;;  %v12721_v7 = vor.u32 %v13599_v59, %v12718_v61  ;;  %v7812_v12 = vpack.c.bf16 %v16346_v39, %v16346_v39  ;;  %v13595_v39 = vld [vmem:[%s17009_s5 + $0xb4] sm:$0xf] }
0x115f   : > { %8401 = vmatpush.bf16.msrb.mxu2 %v12653_v45  ;;  %v12708_v45 = vld [vmem:[%s17009_s5 + $0xc0] sm:$0xf] }
0x1160   : > { %8437 = vmatpush.bf16.msra.mxu1 %v12657_v42  ;;  %v13598_v42 = vld [vmem:[%s17009_s5 + $0xc4] sm:$0xf0] }
0x1161   : > { %v7835_v16 = vpop.f32.mrf.mxu0  ;;  %8379 = vmatpush.bf16.msra.mxu3 %v12621_v4  ;;  %8415 = vmatpush.bf16.msrb.mxu0 %v12625_v55  ;;  %v13607_v4 = vld [vmem:[%s17009_s5 + $0x114] sm:$0xf]  ;;  %v12750_v55 = vld [vmem:[%s17009_s5 + $0x118] sm:$0xf0]  ;;  %v12709_v3 = vor.u32 %v13598_v42, %v12708_v45 }
0x1162   : > { %v12753_v19 = vor.u32 %v13607_v4, %v12750_v55  ;;  %v7809_v16 = vpack.c.bf16 %v16330_v63, %v16314_v18  ;;  %v13596_v4 = vld [vmem:[%s17009_s5 + $0xb4] sm:$0xf0]  ;;  %v12702_v55 = vld [vmem:[%s17009_s5 + $0xb8] sm:$0xf0] }
0x1163   : > { %v7853_v9 = vpop.f32.mrf.mxu1 }
0x1164   : > { %8018 = vmatmul.bf16.gmra.mxu3 %v7857_v27  ;;  %8054 = vmatmul.bf16.gmra.mxu0 %v7857_v27  ;;  %v12740_v27 = vld [vmem:[%s17009_s5 + $0x100] sm:$0xf]  ;;  %v13610_v9 = vld [vmem:[%s17009_s5 + $0x124] sm:$0xf0] }
0x1165   : > { %8380 = vmatpush.bf16.msra.mxu3 %v12613_v60  ;;  %8416 = vmatpush.bf16.msrb.mxu0 %v12617_v47  ;;  %v13606_v60 = vld [vmem:[%s17009_s5 + $0x104] sm:$0xf0]  ;;  %v13605_v47 = vld [vmem:[%s17009_s5 + $0x104] sm:$0xf]  ;;  %v12757_v25 = vor.u32 %v13610_v9, %v12756_v6 }
0x1166   : > { %12479 = vmatmul.msk.bf16.gmra.mxu2 %vm17022_vm2, %v7858_v1  ;;  %12481 = vmatmul.msk.bf16.gmra.mxu1 %vm17023_vm5, %v7858_v1  ;;  %v12765_v1 = vor.u32 %v13612_v30, %v12764_v37  ;;  %v12741_v18 = vor.u32 %v13606_v60, %v12740_v27  ;;  %v12745_v63 = vor.u32 %v13605_v47, %v12742_v26  ;;  %vm17037_vm2 = vmmov %vm17028_vm0 }
0x1167   : > { %v12701_v37 = vor.u32 %v13596_v4, %v12700_v54  ;;  %v12705_v30 = vor.u32 %v13595_v39, %v12702_v55  ;;  %v12693_v27 = vor.u32 %v13594_v44, %v12692_v23  ;;  %vm17038_vm5 = vmmov %vm17028_vm0 }
0x1169   : > { %8381 = vmatpush.bf16.msra.mxu3 %v12605_v22  ;;  %8417 = vmatpush.bf16.msrb.mxu0 %v12609_v20  ;;  %v13609_v22 = vld [vmem:[%s17009_s5 + $0x124] sm:$0xf]  ;;  %v12758_v20 = vld [vmem:[%s17009_s5 + $0x128] sm:$0xf0] }
0x116a   : > { %v12761_v10 = vor.u32 %v13609_v22, %v12758_v20 }
0x116d   : > { %8382 = vmatpush.bf16.msra.mxu3 %v12597_v11  ;;  %8418 = vmatpush.bf16.msrb.mxu0 %v12601_v38  ;;  %v12725_v11 = vor.u32 %v13602_v13, %v12724_v31  ;;  %v12729_v38 = vor.u32 %v13601_v51, %v12726_v36 }
0x1171   : > { %8383 = vmatpush.bf16.msra.mxu3 %v12589_v33  ;;  %8419 = vmatpush.bf16.msrb.mxu0 %v12593_v14  ;;  %v13597_v33 = vld [vmem:[%s17009_s5 + $0xc4] sm:$0xf]  ;;  %v12710_v14 = vld [vmem:[%s17009_s5 + $0xc8] sm:$0xf0] }
0x1172   : > { %v12713_v29 = vor.u32 %v13597_v33, %v12710_v14 }
0x1174   : > { %8191 = vmatmul.bf16.vlgmr.msrb.gmra.mxu3 %v7809_v16  ;;  %8227 = vmatmul.bf16.vlgmr.msra.gmra.mxu0 %v7809_v16 }
0x1175   : > { %8580 = vmatpush.bf16.msrb.mxu3 %v12749_v43  ;;  %8616 = vmatpush.bf16.msra.mxu0 %v12753_v19  ;;  %v13593_v43 = vld [vmem:[%s17009_s5 + $0xa4] sm:$0xf]  ;;  %v12694_v19 = vld [vmem:[%s17009_s5 + $0xa8] sm:$0xf0] }
0x1176   : > { %12562 = vmatmul.msk.bf16.vlgmr.msra.gmra.mxu2 %vm17024_vm15, %v7810_v2  ;;  %12564 = vmatmul.msk.bf16.vlgmr.msrb.gmra.mxu1 %vm17025_vm12, %v7810_v2  ;;  %v12697_v16 = vor.u32 %v13593_v43, %v12694_v19  ;;  %vm17039_vm15 = vmmov %vm17028_vm0 }
0x1177   : > { %8604 = vmatpush.bf16.msra.mxu2 %v12765_v1  ;;  %8640 = vmatpush.bf16.msrb.mxu1 %v12769_v57  ;;  %vm17040_vm12 = vmmov %vm17028_vm0 }
0x1179   : > { %8581 = vmatpush.bf16.msrb.mxu3 %v12741_v18  ;;  %8617 = vmatpush.bf16.msra.mxu0 %v12745_v63 }
0x117b   : > { %8605 = vmatpush.bf16.msra.mxu2 %v12757_v25  ;;  %8641 = vmatpush.bf16.msrb.mxu1 %v12761_v10 }
0x117d   : > { %8582 = vmatpush.bf16.msrb.mxu3 %v12733_v0  ;;  %8618 = vmatpush.bf16.msra.mxu0 %v12737_v52 }
0x1181   : > { %8583 = vmatpush.bf16.msrb.mxu3 %v12725_v11  ;;  %8619 = vmatpush.bf16.msra.mxu0 %v12729_v38 }
0x1184   : > { %8196 = vmatmul.bf16.gmra.mxu3 %v7811_v48  ;;  %8232 = vmatmul.bf16.gmra.mxu0 %v7811_v48 }
0x1185   : > { %8584 = vmatpush.bf16.msrb.mxu3 %v12717_v58  ;;  %8620 = vmatpush.bf16.msra.mxu0 %v12721_v7 }
0x1186   : > { %12563 = vmatmul.msk.bf16.gmra.mxu2 %vm17026_vm8, %v7812_v12  ;;  %12565 = vmatmul.msk.bf16.gmra.mxu1 %vm17027_vm1, %v7812_v12  ;;  %vm17041_vm8 = vmmov %vm17028_vm0 }
0x1187   : > { %vm17042_vm1 = vmmov %vm17028_vm0 }
0x1189   : > { %8585 = vmatpush.bf16.msrb.mxu3 %v12709_v3  ;;  %8621 = vmatpush.bf16.msra.mxu0 %v12713_v29 }
0x118d   : > { %8586 = vmatpush.bf16.msrb.mxu3 %v12701_v37  ;;  %8622 = vmatpush.bf16.msra.mxu0 %v12705_v30 }
0x1191   : > { %8587 = vmatpush.bf16.msrb.mxu3 %v12693_v27  ;;  %8623 = vmatpush.bf16.msra.mxu0 %v12697_v16 }
0x1194   : > { %8384 = vmatmul.bf16.vlgmr.msra.gmra.mxu3 %v16011_v49  ;;  %8420 = vmatmul.bf16.vlgmr.msrb.gmra.mxu0 %v16011_v49 }
0x1195   : > { %8682 = vmatpush.bf16.msra.mxu3 %v16026_v17  ;;  %8722 = vmatpush.bf16.msrb.mxu0 %v16222_v8  ;;  %v12776_v8 = vld [vmem:[%s17001_s3 + $0x14] sm:$0x3] }
0x1196   : > { %12666 = vmatmul.msk.bf16.vlgmr.msrb.gmra.mxu2 %vm17028_vm0, %v16013_v21  ;;  %12668 = vmatmul.msk.bf16.vlgmr.msra.gmra.mxu1 %vm17029_vm14, %v16013_v21  ;;  %vm17044_vm14 = vcmask 1041408  }
0x1197   : > { %8700 = vmatpush.bf16.msrb.mxu2 %v16030_v50  ;;  %8740 = vmatpush.bf16.msra.mxu1 %v16232_v24 }
0x1199   : > { %8683 = vmatpush.bf16.msra.mxu3 %v16011_v49  ;;  %8723 = vmatpush.bf16.msrb.mxu0 %v16237_v62  ;;  %v13613_v49 = vld [vmem:[%s17001_s3 + $0xc] sm:$0xff]  ;;  %s13672_s3 = sshll.u32 %s14745_s0, 7 }
0x119b   : > { %8701 = vmatpush.bf16.msrb.mxu2 %v16013_v21  ;;  %8741 = vmatpush.bf16.msra.mxu1 %v16243_v32 }
0x11a4   : > { %8389 = vmatmul.bf16.gmra.mxu3 %v16020_v41  ;;  %8425 = vmatmul.bf16.gmra.mxu0 %v16020_v41 }
0x11a6   : > { %12667 = vmatmul.msk.bf16.gmra.mxu2 %vm17030_vm6, %v16022_v35  ;;  %12669 = vmatmul.msk.bf16.gmra.mxu1 %vm17031_vm13, %v16022_v35  ;;  %vm17045_vm6 = vmmov %vm17044_vm14 }
0x11a7   : > { %vm17046_vm13 = vmmov %vm17028_vm0 }
0x11b4   : > { %8588 = vmatmul.bf16.vlgmr.msrb.gmra.mxu3 %v16237_v62  ;;  %8624 = vmatmul.bf16.vlgmr.msra.gmra.mxu0 %v16237_v62 }
0x11b6   : > { %12770 = vmatmul.msk.bf16.vlgmr.msra.gmra.mxu2 %vm17032_vm9, %v16243_v32  ;;  %12772 = vmatmul.msk.bf16.vlgmr.msrb.gmra.mxu1 %vm17033_vm4, %v16243_v32  ;;  %vm17047_vm9 = vmmov %vm17028_vm0 }
0x11b7   : > { %vm17049_vm4 = vmmov %vm17028_vm0 }
0x11c4   : > { %8593 = vmatmul.bf16.gmra.mxu3 %v16207_v15  ;;  %8629 = vmatmul.bf16.gmra.mxu0 %v16207_v15 }
0x11c6   : > { %12771 = vmatmul.msk.bf16.gmra.mxu2 %vm17034_vm10, %v16224_v34  ;;  %12773 = vmatmul.msk.bf16.gmra.mxu1 %vm17035_vm11, %v16224_v34  ;;  %v8667_v34 = vunpack.c.l.b16 %v12776_v8  ;;  %vm17050_vm10 = vmmov %vm17028_vm0 }
0x11c7   : > { %vm17051_vm11 = vmmov %vm17028_vm0 }
0x11c8   : > { %v8669_v60 = vpack.c.b16 %v8667_v34, %v8667_v34 }
0x11d1   : > { %v8050_v21 = vpop.f32.mrf.mxu0 }
0x11d3   : > { %v8068_v41 = vpop.f32.mrf.mxu1 }
0x11d4   : > { %v8069_v35 = vadd.f32 %v8068_v41, %v8050_v21  ;;  %12781 = vmatmul.msk.bf16.vlgmr.msra.gmra.mxu3 %vm7761_vm7, %v13613_v49  ;;  %12785 = vmatmul.msk.bf16.vlgmr.msrb.gmra.mxu0 %vm7761_vm7, %v13613_v49  ;;  %v13629_v21 = vld [vmem:[%s17019_s6 + $0x1b4] sm:$0xf0]  ;;  %v13628_v41 = vld [vmem:[%s17019_s6 + $0x1b4] sm:$0xf] }
0x11d6   : > { %12783 = vmatmul.msk.bf16.vlgmr.msrb.gmra.mxu2 %vm7761_vm7, %v13613_v49  ;;  %12787 = vmatmul.msk.bf16.vlgmr.msra.gmra.mxu1 %vm7761_vm7, %v13613_v49  ;;  %v12867_v49 = vld [vmem:[%s17019_s6 + $0x1b0] sm:$0xf] }
0x11d7   : > { %v8014_v17 = vpop.f32.mrf.mxu3 }
0x11d9   : > { %v8032_v50 = vpop.f32.mrf.mxu2  ;;  %v16467_v15 = vpop.f32.mrf.mxu0 }
0x11da   : > { %v8033_v24 = vadd.f32 %v8032_v50, %v8014_v17  ;;  %v12868_v17 = vor.u32 %v13629_v21, %v12867_v49  ;;  %v12869_v50 = vld [vmem:[%s17019_s6 + $0x1b8] sm:$0xf0] }
0x11db   : > { %v16470_v62 = vpop.f32.mrf.mxu1  ;;  %v12872_v8 = vor.u32 %v13628_v41, %v12869_v50  ;;  %v12819_v41 = vld [vmem:[%s17019_s6 + $0x150] sm:$0xf] }
0x11dc   : > { %8883 = vmatpush.bf16.msrb.mxu3 %v12868_v17  ;;  %v13633_v17 = vld [vmem:[%s17019_s6 + $0x1d4] sm:$0xf0] }
0x11dd   : > { %8919 = vmatpush.bf16.msra.mxu0 %v12872_v8 }
0x11df   : > { %v16472_v32 = vpop.f32.mrf.mxu3 }
0x11e1   : > { %v16474_v47 = vpop.f32.mrf.mxu2  ;;  %v8055_v26 = vpop.f32.mrf.mxu0 }
0x11e3   : > { %v8073_v1 = vpop.f32.mrf.mxu1 }
0x11e4   : > { %v8074_v57 = vadd.f32 %v8073_v1, %v8055_v26  ;;  %12782 = vmatmul.msk.bf16.gmra.mxu3 %vm7761_vm7, %v8669_v60  ;;  %12786 = vmatmul.msk.bf16.gmra.mxu0 %vm7761_vm7, %v8669_v60 }
0x11e6   : > { %12784 = vmatmul.msk.bf16.gmra.mxu2 %vm7761_vm7, %v8669_v60  ;;  %12788 = vmatmul.msk.bf16.gmra.mxu1 %vm7761_vm7, %v8669_v60 }
0x11e7   : > { %v8019_v6 = vpop.f32.mrf.mxu3 }
0x11e9   : > { %v8037_v2 = vpop.f32.mrf.mxu2  ;;  %v8057_v9 = vpop.f32.mrf.mxu0 }
0x11ea   : > { %v8038_v22 = vadd.f32 %v8037_v2, %v8019_v6  ;;  %v13627_v6 = vld [vmem:[%s17019_s6 + $0x1a4] sm:$0xf0]  ;;  %v13626_v2 = vld [vmem:[%s17019_s6 + $0x1a4] sm:$0xf] }
0x11eb   : > { %v8075_v20 = vpop.f32.mrf.mxu1 }
0x11ec   : > { %v12851_v20 = vld [vmem:[%s17019_s6 + $0x190] sm:$0xf] }
0x11ef   : > { %v8021_v18 = vpop.f32.mrf.mxu3 }
0x11f0   : > { %v13625_v18 = vld [vmem:[%s17019_s6 + $0x194] sm:$0xf0] }
0x11f1   : > { %v8039_v63 = vpop.f32.mrf.mxu2  ;;  %v8228_v46 = vpop.f32.mrf.mxu0 }
0x11f2   : > { %v8229_v40 = vadd.f32 %v8228_v46, %v8069_v35  ;;  %v13624_v46 = vld [vmem:[%s17019_s6 + $0x194] sm:$0xf] }
0x11f3   : > { %v8246_v5 = vpop.f32.mrf.mxu1 }
0x11f4   : > { %v8247_v28 = vadd.f32 %v8246_v5, %v8229_v40  ;;  %v12853_v40 = vld [vmem:[%s17019_s6 + $0x198] sm:$0xf0] }
0x11f7   : > { %v8192_v25 = vpop.f32.mrf.mxu3 }
0x11f8   : > { %v8193_v10 = vadd.f32 %v8192_v25, %v8033_v24  ;;  %v12856_v25 = vor.u32 %v13624_v46, %v12853_v40  ;;  %v13615_v46 = vld [vmem:[%s17019_s6 + $0x144] sm:$0xf0]  ;;  %v12875_v40 = vld [vmem:[%s17019_s6 + $0x1c0] sm:$0xf] }
0x11f9   : > { %v8210_v0 = vpop.f32.mrf.mxu2  ;;  %v16480_v52 = vpop.f32.mrf.mxu0 }
0x11fa   : > { %v8211_v31 = vadd.f32 %v8210_v0, %v8193_v10 }
0x11fb   : > { %v16482_v13 = vpop.f32.mrf.mxu1 }
0x11ff   : > { %v16484_v51 = vpop.f32.mrf.mxu3 }
0x1201   : > { %v16486_v36 = vpop.f32.mrf.mxu2  ;;  %v8233_v11 = vpop.f32.mrf.mxu0 }
0x1202   : > { %v8234_v38 = vadd.f32 %v8233_v11, %v8074_v57  ;;  %v12859_v57 = vld [vmem:[%s17019_s6 + $0x1a0] sm:$0xf]  ;;  %v13623_v11 = vld [vmem:[%s17019_s6 + $0x184] sm:$0xf0] }
0x1203   : > { %v8251_v56 = vpop.f32.mrf.mxu1  ;;  %v12860_v9 = vor.u32 %v13627_v6, %v12859_v57  ;;  %v13616_v57 = vld [vmem:[%s17019_s6 + $0x154] sm:$0xf]  ;;  %v12821_v6 = vld [vmem:[%s17019_s6 + $0x158] sm:$0xf0] }
0x1204   : > { %v8252_v53 = vadd.f32 %v8251_v56, %v8234_v38  ;;  %v13622_v38 = vld [vmem:[%s17019_s6 + $0x184] sm:$0xf]  ;;  %v12845_v56 = vld [vmem:[%s17019_s6 + $0x188] sm:$0xf0] }
0x1205   : > { %8884 = vmatpush.bf16.msrb.mxu3 %v12860_v9 }
0x1207   : > { %v8197_v59 = vpop.f32.mrf.mxu3 }
0x1208   : > { %v8198_v61 = vadd.f32 %v8197_v59, %v8038_v22  ;;  %v12861_v22 = vld [vmem:[%s17019_s6 + $0x1a8] sm:$0xf0] }
0x1209   : > { %v8215_v48 = vpop.f32.mrf.mxu2  ;;  %v8235_v58 = vpop.f32.mrf.mxu0  ;;  %v12864_v63 = vor.u32 %v13626_v2, %v12861_v22  ;;  %v12824_v22 = vor.u32 %v13616_v57, %v12821_v6 }
0x120a   : > { %v8216_v7 = vadd.f32 %v8215_v48, %v8198_v61  ;;  %v12848_v48 = vor.u32 %v13622_v38, %v12845_v56  ;;  %v12835_v58 = vld [vmem:[%s17019_s6 + $0x170] sm:$0xf]  ;;  %v13630_v56 = vld [vmem:[%s17019_s6 + $0x1c4] sm:$0xf] }
0x120b   : > { %v8253_v45 = vpop.f32.mrf.mxu1  ;;  %8920 = vmatpush.bf16.msra.mxu0 %v12864_v63  ;;  %v12811_v63 = vld [vmem:[%s17019_s6 + $0x140] sm:$0xf] }
0x120c   : > { %v13620_v45 = vld [vmem:[%s17019_s6 + $0x174] sm:$0xf] }
0x120f   : > { %v8199_v12 = vpop.f32.mrf.mxu3  ;;  %8921 = vmatpush.bf16.msra.mxu0 %v12856_v25  ;;  %v13631_v25 = vld [vmem:[%s17019_s6 + $0x1c4] sm:$0xf0] }
0x1210   : > { %v12837_v12 = vld [vmem:[%s17019_s6 + $0x178] sm:$0xf0] }
0x1211   : > { %v8217_v42 = vpop.f32.mrf.mxu2  ;;  %v8421_v33 = vpop.f32.mrf.mxu0 }
0x1213   : > { %v8439_v14 = vpop.f32.mrf.mxu1  ;;  %8922 = vmatpush.bf16.msra.mxu0 %v12848_v48  ;;  %v13649_v48 = vld [vmem:[%s17009_s5 + $0x1b4] sm:$0xf0] }
0x1214   : > { %v8440_v3 = vadd.f32 %v8439_v14, %v8421_v33 }
0x1216   : > { %v8449_v29 = vadd.f32 %v8440_v3, %v8247_v28  ;;  %v12852_v28 = vor.u32 %v13625_v18, %v12851_v20  ;;  %v12840_v3 = vor.u32 %v13620_v45, %v12837_v12 }
0x1217   : > { %v8385_v54 = vpop.f32.mrf.mxu3 }
0x1218   : > { %8885 = vmatpush.bf16.msrb.mxu3 %v12852_v28  ;;  %8923 = vmatpush.bf16.msra.mxu0 %v12840_v3  ;;  %v12812_v28 = vor.u32 %v13615_v46, %v12811_v63  ;;  %v12949_v63 = vld [vmem:[%s17009_s5 + $0x188] sm:$0xf0] }
0x1219   : > { %v8403_v4 = vpop.f32.mrf.mxu2  ;;  %v16488_v39 = vpop.f32.mrf.mxu0 }
0x121a   : > { %v8404_v55 = vadd.f32 %v8403_v4, %v8385_v54 }
0x121b   : > { %v16490_v37 = vpop.f32.mrf.mxu1 }
0x121c   : > { %v16492_v30 = vadd.f32 %v8404_v55, %v8211_v31  ;;  %v12843_v31 = vld [vmem:[%s17019_s6 + $0x180] sm:$0xf] }
0x121d   : > { %v12844_v59 = vor.u32 %v13623_v11, %v12843_v31  ;;  %v12827_v55 = vld [vmem:[%s17019_s6 + $0x160] sm:$0xf]  ;;  %v12876_v11 = vor.u32 %v13631_v25, %v12875_v40  ;;  %v13640_v25 = vld [vmem:[%s17009_s5 + $0x174] sm:$0xf] }
0x121f   : > { %v16494_v23 = vpop.f32.mrf.mxu3  ;;  %8886 = vmatpush.bf16.msrb.mxu3 %v12844_v59  ;;  %v12971_v59 = vld [vmem:[%s17009_s5 + $0x1b0] sm:$0xf] }
0x1220   : > { %v12972_v12 = vor.u32 %v13649_v48, %v12971_v59  ;;  %v12933_v59 = vld [vmem:[%s17009_s5 + $0x168] sm:$0xf0]  ;;  %v13653_v48 = vld [vmem:[%s17009_s5 + $0x1d4] sm:$0xf0] }
0x1221   : > { %v16496_v44 = vpop.f32.mrf.mxu2  ;;  %v8426_v43 = vpop.f32.mrf.mxu0 }
0x1223   : > { %v8444_v19 = vpop.f32.mrf.mxu1 }
0x1224   : > { %v8445_v27 = vadd.f32 %v8444_v19, %v8426_v43  ;;  %v13619_v43 = vld [vmem:[%s17019_s6 + $0x164] sm:$0xf0]  ;;  %v13618_v19 = vld [vmem:[%s17019_s6 + $0x164] sm:$0xf] }
0x1225   : > { %v12828_v21 = vor.u32 %v13619_v43, %v12827_v55  ;;  %v12963_v43 = vld [vmem:[%s17009_s5 + $0x1a0] sm:$0xf] }
0x1226   : > { %v16498_v16 = vadd.f32 %v8445_v27, %v8252_v53  ;;  %v12829_v27 = vld [vmem:[%s17019_s6 + $0x168] sm:$0xf0] }
0x1227   : > { %v8390_v35 = vpop.f32.mrf.mxu3  ;;  %v12832_v8 = vor.u32 %v13618_v19, %v12829_v27  ;;  %v13646_v19 = vld [vmem:[%s17009_s5 + $0x1a4] sm:$0xf] }
0x1229   : > { %v8408_v24 = vpop.f32.mrf.mxu2  ;;  %v8428_v34 = vpop.f32.mrf.mxu0  ;;  %8924 = vmatpush.bf16.msra.mxu0 %v12832_v8 }
0x122a   : > { %v8409_v60 = vadd.f32 %v8408_v24, %v8390_v35  ;;  %v12883_v35 = vld [vmem:[%s17019_s6 + $0x1d0] sm:$0xf]  ;;  %v13617_v24 = vld [vmem:[%s17019_s6 + $0x154] sm:$0xf0] }
0x122b   : > { %v8446_v26 = vpop.f32.mrf.mxu1  ;;  %v12884_v34 = vor.u32 %v13633_v17, %v12883_v35  ;;  %v13645_v35 = vld [vmem:[%s17009_s5 + $0x194] sm:$0xf0] }
0x122c   : > { %v16504_v1 = vadd.f32 %v8409_v60, %v8216_v7  ;;  %v13621_v7 = vld [vmem:[%s17019_s6 + $0x174] sm:$0xf0]  ;;  %v13632_v60 = vld [vmem:[%s17019_s6 + $0x1d4] sm:$0xf]  ;;  %v12885_v26 = vld [vmem:[%s17019_s6 + $0x1d8] sm:$0xf0] }
0x122d   : > { %v12836_v14 = vor.u32 %v13621_v7, %v12835_v58  ;;  %v12888_v2 = vor.u32 %v13632_v60, %v12885_v26  ;;  %8907 = vmatpush.bf16.msra.mxu2 %v12884_v34  ;;  %8925 = vmatpush.bf16.msra.mxu0 %v12824_v22  ;;  %v13648_v58 = vld [vmem:[%s17009_s5 + $0x1b4] sm:$0xf]  ;;  %v12973_v7 = vld [vmem:[%s17009_s5 + $0x1b8] sm:$0xf0] }
0x122e   : > { %v12957_v34 = vld [vmem:[%s17009_s5 + $0x198] sm:$0xf0] }
0x122f   : > { %v8392_v5 = vpop.f32.mrf.mxu3  ;;  %8887 = vmatpush.bf16.msrb.mxu3 %v12836_v14  ;;  %8943 = vmatpush.bf16.msrb.mxu1 %v12888_v2  ;;  %v12947_v2 = vld [vmem:[%s17009_s5 + $0x180] sm:$0xf] }
0x1231   : > { %v8410_v10 = vpop.f32.mrf.mxu2  ;;  %v8625_v0 = vpop.f32.mrf.mxu0  ;;  %8908 = vmatpush.bf16.msra.mxu2 %v12876_v11  ;;  %v12931_v11 = vld [vmem:[%s17009_s5 + $0x160] sm:$0xf] }
0x1232   : > { %v13614_v10 = vld [vmem:[%s17019_s6 + $0x144] sm:$0xf] }
0x1233   : > { %v8643_v53 = vpop.f32.mrf.mxu1  ;;  %8888 = vmatpush.bf16.msrb.mxu3 %v12828_v21  ;;  %v12965_v21 = vld [vmem:[%s17009_s5 + $0x1a8] sm:$0xf0] }
0x1234   : > { %v8644_v61 = vadd.f32 %v8643_v53, %v8625_v0  ;;  %v12813_v0 = vld [vmem:[%s17019_s6 + $0x148] sm:$0xf0]  ;;  %v12968_v8 = vor.u32 %v13646_v19, %v12965_v21  ;;  %v13651_v19 = vld [vmem:[%s17009_s5 + $0x1c4] sm:$0xf0] }
0x1235   : > { %v12816_v38 = vor.u32 %v13614_v10, %v12813_v0  ;;  %v12877_v53 = vld [vmem:[%s17019_s6 + $0x1c8] sm:$0xf0]  ;;  %v12941_v0 = vld [vmem:[%s17009_s5 + $0x178] sm:$0xf0] }
0x1236   : > { %v16522_v42 = vadd.f32 %v8644_v61, %v8449_v29  ;;  %v12880_v61 = vor.u32 %v13630_v56, %v12877_v53  ;;  %v13638_v56 = vld [vmem:[%s17009_s5 + $0x164] sm:$0xf]  ;;  %v12981_v21 = vld [vmem:[%s17009_s5 + $0x1c8] sm:$0xf0] }
0x1237   : > { %v8589_v33 = vpop.f32.mrf.mxu3  ;;  %8926 = vmatpush.bf16.msra.mxu0 %v12816_v38  ;;  %v13639_v38 = vld [vmem:[%s17009_s5 + $0x164] sm:$0xf0] }
0x1238   : > { %8944 = vmatpush.bf16.msrb.mxu1 %v12880_v61  ;;  %v12987_v61 = vld [vmem:[%s17009_s5 + $0x1d0] sm:$0xf] }
0x1239   : > { %v8607_v54 = vpop.f32.mrf.mxu2  ;;  %v16524_v4 = vpop.f32.mrf.mxu0 }
0x123a   : > { %v8608_v29 = vadd.f32 %v8607_v54, %v8589_v33  ;;  %v12976_v33 = vor.u32 %v13648_v58, %v12973_v7  ;;  %v12988_v58 = vor.u32 %v13653_v48, %v12987_v61  ;;  %v13652_v7 = vld [vmem:[%s17009_s5 + $0x1d4] sm:$0xf] }
0x123b   : > { %v16530_v49 = vpop.f32.mrf.mxu1 }
0x123c   : > { %v16536_v50 = vadd.f32 %v8608_v29, %v16492_v30  ;;  %v12820_v30 = vor.u32 %v13617_v24, %v12819_v41  ;;  %9124 = vmatpush.bf16.msrb.mxu0 %v12976_v33  ;;  %v12955_v41 = vld [vmem:[%s17009_s5 + $0x190] sm:$0xf]  ;;  %v13644_v24 = vld [vmem:[%s17009_s5 + $0x194] sm:$0xf]  ;;  %v12932_v33 = vor.u32 %v13639_v38, %v12931_v11  ;;  %9112 = vmatpush.bf16.msrb.mxu2 %v12988_v58 }
0x123d   : > { %v12956_v60 = vor.u32 %v13645_v35, %v12955_v41  ;;  %v12960_v26 = vor.u32 %v13644_v24, %v12957_v34  ;;  %v12925_v24 = vld [vmem:[%s17009_s5 + $0x158] sm:$0xf0] }
0x123e   : > { %8889 = vmatpush.bf16.msrb.mxu3 %v12820_v30  ;;  %v13643_v30 = vld [vmem:[%s17009_s5 + $0x184] sm:$0xf0] }
0x123f   : > { %v16543_v9 = vpop.f32.mrf.mxu3 }
0x1240   : > { %9125 = vmatpush.bf16.msrb.mxu0 %v12968_v8  ;;  %v13636_v8 = vld [vmem:[%s17009_s5 + $0x154] sm:$0xf] }
0x1241   : > { %v16545_v20 = vpop.f32.mrf.mxu2  ;;  %v8630_v18 = vpop.f32.mrf.mxu0 }
0x1242   : > { %8890 = vmatpush.bf16.msrb.mxu3 %v12812_v28  ;;  %v13641_v28 = vld [vmem:[%s17009_s5 + $0x174] sm:$0xf0] }
0x1243   : > { %v8648_v5 = vpop.f32.mrf.mxu1 }
0x1244   : > { %v8649_v31 = vadd.f32 %v8648_v5, %v8630_v18  ;;  %9126 = vmatpush.bf16.msrb.mxu0 %v12960_v26  ;;  %v12948_v18 = vor.u32 %v13643_v30, %v12947_v2  ;;  %v12939_v5 = vld [vmem:[%s17009_s5 + $0x170] sm:$0xf]  ;;  %v12915_v26 = vld [vmem:[%s17009_s5 + $0x140] sm:$0xf]  ;;  %v12928_v2 = vor.u32 %v13636_v8, %v12925_v24 }
0x1245   : > { %v12940_v10 = vor.u32 %v13641_v28, %v12939_v5 }
0x1246   : > { %v16560_v45 = vadd.f32 %v8649_v31, %v16498_v16  ;;  %9088 = vmatpush.bf16.msra.mxu3 %v12972_v12  ;;  %v13647_v16 = vld [vmem:[%s17009_s5 + $0x1a4] sm:$0xf0]  ;;  %v12944_v31 = vor.u32 %v13640_v25, %v12941_v0 }
0x1247   : > { %v8594_v14 = vpop.f32.mrf.mxu3  ;;  %v12964_v27 = vor.u32 %v13647_v16, %v12963_v43  ;;  %v12979_v16 = vld [vmem:[%s17009_s5 + $0x1c0] sm:$0xf] }
0x1249   : > { %v8612_v3 = vpop.f32.mrf.mxu2  ;;  %v8632_v54 = vpop.f32.mrf.mxu0 }
0x124a   : > { %v8613_v55 = vadd.f32 %v8612_v3, %v8594_v14  ;;  %9089 = vmatpush.bf16.msra.mxu3 %v12964_v27  ;;  %v12923_v14 = vld [vmem:[%s17009_s5 + $0x150] sm:$0xf]  ;;  %v12989_v3 = vld [vmem:[%s17009_s5 + $0x1d8] sm:$0xf0]  ;;  %v12936_v54 = vor.u32 %v13638_v56, %v12933_v59  ;;  %v13650_v27 = vld [vmem:[%s17009_s5 + $0x1c4] sm:$0xf] }
0x124b   : > { %v8650_v29 = vpop.f32.mrf.mxu1  ;;  %v12992_v43 = vor.u32 %v13652_v7, %v12989_v3  ;;  %v12984_v34 = vor.u32 %v13650_v27, %v12981_v21 }
0x124c   : > { %v16569_v17 = vadd.f32 %v8613_v55, %v16504_v1  ;;  %v13642_v1 = vld [vmem:[%s17009_s5 + $0x184] sm:$0xf]  ;;  %v13637_v55 = vld [vmem:[%s17009_s5 + $0x154] sm:$0xf0]  ;;  %v12980_v29 = vor.u32 %v13651_v19, %v12979_v16 }
0x124d   : > { %v12952_v40 = vor.u32 %v13642_v1, %v12949_v63  ;;  %9148 = vmatpush.bf16.msra.mxu1 %v12992_v43  ;;  %v13634_v1 = vld [vmem:[%s17009_s5 + $0x144] sm:$0xf] }
0x124e   : > { %9090 = vmatpush.bf16.msra.mxu3 %v12956_v60  ;;  %v12924_v60 = vor.u32 %v13637_v55, %v12923_v14  ;;  %9113 = vmatpush.bf16.msrb.mxu2 %v12980_v29 }
0x124f   : > { %v8596_v57 = vpop.f32.mrf.mxu3  ;;  %9127 = vmatpush.bf16.msrb.mxu0 %v12952_v40 }
0x1250   : > { %v13635_v57 = vld [vmem:[%s17009_s5 + $0x144] sm:$0xf0] }
0x1251   : > { %v8614_v6 = vpop.f32.mrf.mxu2  ;;  %v16576_v22 = vpop.f32.mrf.mxu0  ;;  %9149 = vmatpush.bf16.msra.mxu1 %v12984_v34  ;;  %v12916_v40 = vor.u32 %v13635_v57, %v12915_v26 }
0x1252   : > { %9091 = vmatpush.bf16.msra.mxu3 %v12948_v18  ;;  %v12917_v18 = vld [vmem:[%s17009_s5 + $0x148] sm:$0xf0] }
0x1253   : > { %v16579_v46 = vpop.f32.mrf.mxu1  ;;  %9128 = vmatpush.bf16.msrb.mxu0 %v12944_v31  ;;  %v12920_v28 = vor.u32 %v13634_v1, %v12917_v18  ;;  %v8035_v18 = vadd.f32 %v16474_v47, %v16472_v32 }
0x1256   : > { %9092 = vmatpush.bf16.msra.mxu3 %v12940_v10 }
0x1257   : > { %v8685_v53 = vpop.f32.mrf.mxu3  ;;  %9129 = vmatpush.bf16.msrb.mxu0 %v12936_v54 }
0x1259   : > { %v8703_v12 = vpop.f32.mrf.mxu2  ;;  %v8727_v41 = vpop.f32.mrf.mxu0 }
0x125a   : > { %9093 = vmatpush.bf16.msra.mxu3 %v12932_v33  ;;  %v8752_v48 = vpack.c.bf16 %v8727_v41, %v16576_v22 }
0x125b   : > { %v8745_v35 = vpop.f32.mrf.mxu1  ;;  %9130 = vmatpush.bf16.msrb.mxu0 %v12928_v2 }
0x125c   : > { %v8753_v58 = vpack.c.bf16 %v8745_v35, %v16579_v46 }
0x125e   : > { %9094 = vmatpush.bf16.msra.mxu3 %v12924_v60  ;;  %v8071_v60 = vadd.f32 %v16470_v62, %v16467_v15  ;;  %v8195_v15 = vadd.f32 %v16484_v51, %v8035_v18  ;;  %v9166_v51 = vld [vmem:[%s17043_s1] sm:$0x3]  ;;  %s16689_s1 = scalar_lea.vmem [#allocation16], %s10199_s7  ;;  %s17055_s7 = sld [smem:[#allocation73_spill]] }
0x125f   : > { %v8687_v6 = vpop.f32.mrf.mxu3  ;;  %9131 = vmatpush.bf16.msrb.mxu0 %v12920_v28  ;;  %s9927_s5 = sshll.u32 %s16689_s1, 4  ;;  %s9928_s5 = int_to_ptr.vmem [resolvable:$true] %s9927_s5 }
0x1260   : > { %v8712_v30 = vpack.c.bf16 %v8687_v6, %v8685_v53  ;;  %v8231_v57 = vadd.f32 %v16480_v52, %v8071_v60  ;;  %v8213_v47 = vadd.f32 %v16486_v36, %v8195_v15  ;;  %v13655_v15 = vld [vmem:[%s16873_s4 + $0x8] sm:$0xff] }
0x1261   : > { %v8705_v63 = vpop.f32.mrf.mxu2  ;;  %v8730_v25 = vpop.f32.mrf.mxu0 }
0x1262   : > { %v8713_v5 = vpack.c.bf16 %v8705_v63, %v8703_v12  ;;  %8891 = vmatmul.bf16.vlgmr.msrb.gmra.mxu3 %v8712_v30  ;;  %8927 = vmatmul.bf16.vlgmr.msra.gmra.mxu0 %v8712_v30  ;;  %v8754_v7 = vpack.c.bf16 %v8730_v25, %v8730_v25  ;;  %v8442_v30 = vadd.f32 %v16490_v37, %v16488_v39 }
0x1263   : > { %v8748_v10 = vpop.f32.mrf.mxu1  ;;  %9095 = vmatpush.bf16.msra.mxu3 %v12916_v40  ;;  %v8249_v63 = vadd.f32 %v16482_v13, %v8231_v57  ;;  %v8646_v40 = vadd.f32 %v16530_v49, %v16524_v4  ;;  %v8406_v25 = vadd.f32 %v16496_v44, %v16494_v23  ;;  %v8610_v13 = vadd.f32 %v16545_v20, %v16543_v9 }
0x1264   : > { %12889 = vmatmul.msk.bf16.vlgmr.msra.gmra.mxu2 %vm17036_vm3, %v8713_v5  ;;  %12891 = vmatmul.msk.bf16.vlgmr.msrb.gmra.mxu1 %vm17037_vm2, %v8713_v5  ;;  %v8755_v12 = vpack.c.bf16 %v8748_v10, %v8748_v10  ;;  %vm17052_vm3 = vmmov %vm17028_vm0  ;;  %s17056_s2 = smov %s17055_s7 }
0x1265   : > { %v8451_v62 = vadd.f32 %v8442_v30, %v8249_v63  ;;  %v13654_v30 = vld [vmem:[%s16873_s4] sm:$0xff]  ;;  %vm17053_vm2 = vmmov %vm17028_vm0 }
0x1267   : > { %v8690_v0 = vpop.f32.mrf.mxu3  ;;  %v8655_v39 = vadd.f32 %v8646_v40, %v8451_v62  ;;  %v13656_v62 = vld [vmem:[%s16873_s4 + $0x10] sm:$0xff] }
0x1268   : > { %v8714_v56 = vpack.c.bf16 %v8690_v0, %v8690_v0 }
0x1269   : > { %v8708_v31 = vpop.f32.mrf.mxu2  ;;  %v8732_v11 = vpop.f32.mrf.mxu0 }
0x126a   : > { %v8715_v59 = vpack.c.bf16 %v8708_v31, %v8708_v31 }
0x126b   : > { %v8750_v38 = vpop.f32.mrf.mxu1 }
0x126f   : > { %v8692_v53 = vpop.f32.mrf.mxu3 }
0x1271   : > { %v8710_v61 = vpop.f32.mrf.mxu2 }
0x1272   : > { %8896 = vmatmul.bf16.gmra.mxu3 %v8714_v56  ;;  %8932 = vmatmul.bf16.gmra.mxu0 %v8714_v56  ;;  %v8450_v56 = vadd.f32 %v8406_v25, %v8213_v47  ;;  %v9169_v61 = vperm.slane %v9166_v51, 1  ;;  %v13659_v25 = vld [vmem:[%s16873_s4 + $0x28] sm:$0xff]  ;;  %v13664_v47 = vld [vmem:[%s14712_s14 + $0x10] sm:$0xff] }
0x1274   : > { %12890 = vmatmul.msk.bf16.gmra.mxu2 %vm17038_vm5, %v8715_v59  ;;  %12892 = vmatmul.msk.bf16.gmra.mxu1 %vm17039_vm15, %v8715_v59 }
0x1282   : > { %9096 = vmatmul.bf16.vlgmr.msra.gmra.mxu3 %v8752_v48  ;;  %9132 = vmatmul.bf16.vlgmr.msrb.gmra.mxu0 %v8752_v48 }
0x1284   : > { %12993 = vmatmul.msk.bf16.vlgmr.msrb.gmra.mxu2 %vm17040_vm12, %v8753_v58  ;;  %12995 = vmatmul.msk.bf16.vlgmr.msra.gmra.mxu1 %vm17041_vm8, %v8753_v58  ;;  %v8654_v58 = vadd.f32 %v8610_v13, %v8450_v56  ;;  %v13671_v13 = vld [vmem:[%s14712_s14 + $0x48] sm:$0xff] }
0x1285   : > { %9551 = vmatpush.bf16.msrb.mxu1 %v13671_v13 }
0x1292   : > { %9101 = vmatmul.bf16.gmra.mxu3 %v8754_v7  ;;  %9137 = vmatmul.bf16.gmra.mxu0 %v8754_v7 }
0x1294   : > { %12994 = vmatmul.msk.bf16.gmra.mxu2 %vm17042_vm1, %v8755_v12  ;;  %12996 = vmatmul.msk.bf16.gmra.mxu1 %vm17028_vm0, %v8755_v12 }
0x12df   : > { %v8928_v33 = vpop.f32.mrf.mxu0 }
0x12e1   : > { %v8946_v14 = vpop.f32.mrf.mxu1 }
0x12e2   : > { %v8947_v37 = vadd.f32 %v8946_v14, %v8928_v33 }
0x12e4   : > { %v8956_v23 = vadd.f32 %v8947_v37, %v16522_v42  ;;  %v13667_v37 = vld [vmem:[%s14712_s14 + $0x28] sm:$0xff] }
0x12e5   : > { %v8892_v3 = vpop.f32.mrf.mxu3 }
0x12e7   : > { %v8910_v22 = vpop.f32.mrf.mxu2  ;;  %v8930_v54 = vpop.f32.mrf.mxu0 }
0x12e8   : > { %v8911_v36 = vadd.f32 %v8910_v22, %v8892_v3 }
0x12e9   : > { %v8948_v46 = vpop.f32.mrf.mxu1 }
0x12ea   : > { %v8949_v5 = vadd.f32 %v8948_v46, %v8930_v54 }
0x12ec   : > { %v8958_v4 = vadd.f32 %v8949_v5, %v8655_v39  ;;  %v13657_v5 = vld [vmem:[%s16873_s4 + $0x18] sm:$0xff]  ;;  %v13668_v39 = vld [vmem:[%s14712_s14 + $0x30] sm:$0xff] }
0x12ed   : > { %v8894_v55 = vpop.f32.mrf.mxu3 }
0x12ef   : > { %v8912_v43 = vpop.f32.mrf.mxu2  ;;  %v8933_v16 = vpop.f32.mrf.mxu0 }
0x12f0   : > { %v8913_v44 = vadd.f32 %v8912_v43, %v8894_v55  ;;  %v8955_v55 = vadd.f32 %v8911_v36, %v16536_v50 }
0x12f1   : > { %v8951_v19 = vpop.f32.mrf.mxu1 }
0x12f2   : > { %v8952_v28 = vadd.f32 %v8951_v19, %v8933_v16  ;;  %v8957_v33 = vadd.f32 %v8913_v44, %v8654_v58 }
0x12f4   : > { %v8960_v11 = vadd.f32 %v8952_v28, %v16560_v45  ;;  %v13669_v28 = vld [vmem:[%s14712_s14 + $0x38] sm:$0xff] }
0x12f5   : > { %v8897_v29 = vpop.f32.mrf.mxu3  ;;  %9496 = vmatpush.bf16.msra.mxu0 %v13669_v28 }
0x12f7   : > { %v8915_v27 = vpop.f32.mrf.mxu2  ;;  %v8935_v21 = vpop.f32.mrf.mxu0 }
0x12f8   : > { %v8916_v59 = vadd.f32 %v8915_v27, %v8897_v29  ;;  %v9168_v21 = vperm.slane %v9166_v51, 0  ;;  %v13662_v51 = vld [vmem:[%s14712_s14] sm:$0xff] }
0x12f9   : > { %v8953_v41 = vpop.f32.mrf.mxu1  ;;  %9497 = vmatpush.bf16.msra.mxu0 %v13668_v39 }
0x12fa   : > { %v8959_v16 = vadd.f32 %v8916_v59, %v16569_v17 }
0x12fd   : > { %v8899_v35 = vpop.f32.mrf.mxu3  ;;  %9498 = vmatpush.bf16.msra.mxu0 %v13667_v37 }
0x12ff   : > { %v8917_v8 = vpop.f32.mrf.mxu2  ;;  %v9133_v24 = vpop.f32.mrf.mxu0 }
0x1301   : > { %v9151_v34 = vpop.f32.mrf.mxu1 }
0x1302   : > { %v9152_v49 = vadd.f32 %v9151_v34, %v9133_v24 }
0x1304   : > { %v9161_v7 = vadd.f32 %v9152_v49, %v8956_v23  ;;  %v13661_v49 = vld [vmem:[%s16873_s4 + $0x38] sm:$0xff] }
0x1305   : > { %v9097_v26 = vpop.f32.mrf.mxu3 }
0x1306   : > { %v9173_v43 = vadd.f32 %v9169_v61, %v9161_v7 }
0x1307   : > { %v9115_v6 = vpop.f32.mrf.mxu2  ;;  %v9135_v2 = vpop.f32.mrf.mxu0 }
0x1308   : > { %v9116_v14 = vadd.f32 %v9115_v6, %v9097_v26  ;;  %v9179_v34 = vmax.f32 %v9173_v43, 0.0 }
0x1309   : > { %v9153_v1 = vpop.f32.mrf.mxu1 }
0x130a   : > { %v9154_v10 = vadd.f32 %v9153_v1, %v9135_v2  ;;  %v9160_v41 = vadd.f32 %v9116_v14, %v8955_v55 }
0x130c   : > { %v9163_v53 = vadd.f32 %v9154_v10, %v8958_v4  ;;  %v9172_v57 = vadd.f32 %v9168_v21, %v9160_v41  ;;  %v13660_v10 = vld [vmem:[%s16873_s4 + $0x30] sm:$0xff]  ;;  %v13663_v4 = vld [vmem:[%s14712_s14 + $0x8] sm:$0xff] }
0x130d   : > { %v9099_v52 = vpop.f32.mrf.mxu3 }
0x130e   : > { %v9175_v54 = vadd.f32 %v9169_v61, %v9163_v53  ;;  %v9178_v63 = vmax.f32 %v9172_v57, 0.0 }
0x130f   : > { %v9117_v0 = vpop.f32.mrf.mxu2  ;;  %v9138_v32 = vpop.f32.mrf.mxu0 }
0x1310   : > { %v9118_v12 = vadd.f32 %v9117_v0, %v9099_v52  ;;  %v9181_v35 = vmax.f32 %v9175_v54, 0.0  ;;  %v13658_v52 = vld [vmem:[%s16873_s4 + $0x20] sm:$0xff]  ;;  %s9926_s4 = scalar_lea.hbm %s17055_s7, %s13672_s3  ;;  %s17058_s3 = sand.u32 1, %s17054_s28  }
0x1311   : > { %v9156_v31 = vpop.f32.mrf.mxu1  ;;  %v13666_v0 = vld [vmem:[%s14712_s14 + $0x20] sm:$0xff]  ;;  %s9929_s6 = sshll.u32 %s9926_s4, 4  ;;  %s9915_s0 = scalar_lea.sflag [#allocation4], %s17058_s3  ;;  %s9930_s6 = int_to_ptr.hbm [resolvable:$true] %s9929_s6 }
0x1312   : > { %v9157_v38 = vadd.f32 %v9156_v31, %v9138_v32  ;;  %v9162_v29 = vadd.f32 %v9118_v12, %v8957_v33  ;;  %v9201_v6 = vpack.c.bf16 %v9181_v35, %v9179_v34  ;;  %9499 = vmatpush.bf16.msra.mxu0 %v13666_v0  ;;  %v13665_v32 = vld [vmem:[%s14712_s14 + $0x18] sm:$0xff]  ;;  %v13670_v31 = vld [vmem:[%s14712_s14 + $0x40] sm:$0xff]  ;;  %s14274_s7 = sshra.s32 %s9930_s6, 4  ;;  %s14280_s4 = scalar_lea.hbm %s17056_s2, 256  ;;  %s14275_s7 = int_to_ptr.hbm [resolvable:$true] %s14274_s7 }
0x1313   : > { %9552 = vmatpush.bf16.msrb.mxu1 %v13670_v31  ;;  %s14276_s9 = scalar_lea.hbm %s14275_s7, 128  ;;  %p14281_p13 = scmp.lt.s32.totalorder %s14275_s7, %s17056_s2 }
0x1314   : > { %v9165_v48 = vadd.f32 %v9157_v38, %v8960_v11  ;;  %v9174_v60 = vadd.f32 %v9168_v21, %v9162_v29  ;;  %p14277_p9 = scmp.ne.s32.totalorder %s14275_s7, %s14276_s9  ;;  %p14282_p1 = scmp.lt.s32.totalorder %s14280_s4, %s14276_s9 }
0x1315   : > { %v9102_v9 = vpop.f32.mrf.mxu3 }
0x1316   : > { %v9177_v20 = vadd.f32 %v9169_v61, %v9165_v48  ;;  %v9180_v1 = vmax.f32 %v9174_v60, 0.0  ;;  %9500 = vmatpush.bf16.msra.mxu0 %v13665_v32  ;;  %p14278_p12 = pnand %p14277_p9, %p14762_p5  ;;  %p14283_p2 = por %p14282_p1, %p14281_p13 }
0x1317   : > { %v9120_v46 = vpop.f32.mrf.mxu2  ;;  %v9140_v45 = vpop.f32.mrf.mxu0 }
0x1318   : > { %v9183_v19 = vmax.f32 %v9177_v20, 0.0  ;;  %v9121_v42 = vadd.f32 %v9120_v46, %v9102_v9  ;;  %v9200_v40 = vpack.c.bf16 %v9180_v1, %v9178_v63  ;;  %p14279_p0 = pneg %p14278_p12 }
0x1319   : > { %v9158_v27 = vpop.f32.mrf.mxu1 }
0x131a   : > { %v9164_v3 = vadd.f32 %v9121_v42, %v8959_v16  ;;  %v9203_v22 = vpack.c.bf16 %v9183_v19, %v9183_v19  ;;  %9501 = vmatpush.bf16.msra.mxu0 %v13664_v47  ;;  %p14284_p3 = pnand %p14283_p2, %p14279_p0 }
0x131c   : > { %v9176_v8 = vadd.f32 %v9168_v21, %v9164_v3  ;;  %v9272_v24 = vsel %vm17044_vm14, %v9203_v22, 0 }
0x131d   : > { %9329 = vmatpush.bf16.msra.mxu2 %v9272_v24  ;;  %v9104_v17 = vpop.f32.mrf.mxu3 }
0x131e   : > { %v9182_v26 = vmax.f32 %v9176_v8, 0.0  ;;  %9502 = vmatpush.bf16.msra.mxu0 %v13663_v4 }
0x131f   : > { %v9122_v50 = vpop.f32.mrf.mxu2 }
0x1320   : > { %v9202_v2 = vpack.c.bf16 %v9182_v26, %v9182_v26 }
0x1321   : > { %9330 = vmatpush.bf16.msra.mxu2 %v9201_v6 }
0x1322   : > { %v9269_v18 = vsel %vm17045_vm6, %v9202_v2, 0  ;;  %9503 = vmatpush.bf16.msra.mxu0 %v13662_v51 }
0x1323   : > { %9280 = vmatpush.bf16.msrb.mxu3 %v9269_v18 }
0x1324   : > { %13037 = vmatmul.msk.bf16.vlgmr.msra.gmra.mxu2 %vm7761_vm7, %v13654_v30 }
0x1327   : > { %9281 = vmatpush.bf16.msrb.mxu3 %v9200_v40 }
0x132a   : > { %13029 = vmatmul.msk.bf16.vlgmr.msrb.gmra.mxu3 %vm7761_vm7, %v13654_v30 }
0x1334   : > { %13038 = vmatmul.msk.bf16.gmra.mxu2 %vm7761_vm7, %v13655_v15 }
0x133a   : > { %13030 = vmatmul.msk.bf16.gmra.mxu3 %vm7761_vm7, %v13655_v15 }
0x1344   : > { %13039 = vmatmul.msk.bf16.gmra.mxu2 %vm7761_vm7, %v13656_v62 }
0x134a   : > { %13031 = vmatmul.msk.bf16.gmra.mxu3 %vm7761_vm7, %v13656_v62 }
0x1354   : > { %13040 = vmatmul.msk.bf16.gmra.mxu2 %vm7761_vm7, %v13657_v5 }
0x135a   : > { %13032 = vmatmul.msk.bf16.gmra.mxu3 %vm7761_vm7, %v13657_v5  ;;  %v16680_v5 = vld [vmem:[#allocation14] ss:$0 sm:$0xff] }
0x1364   : > { %13041 = vmatmul.msk.bf16.gmra.mxu2 %vm7761_vm7, %v13658_v52 }
0x136a   : > { %13033 = vmatmul.msk.bf16.gmra.mxu3 %vm7761_vm7, %v13658_v52 }
0x1374   : > { %13042 = vmatmul.msk.bf16.gmra.mxu2 %vm7761_vm7, %v13659_v25 }
0x137a   : > { %13034 = vmatmul.msk.bf16.gmra.mxu3 %vm7761_vm7, %v13659_v25 }
0x1384   : > { %13043 = vmatmul.msk.bf16.gmra.mxu2 %vm7761_vm7, %v13660_v10 }
0x138a   : > { %13035 = vmatmul.msk.bf16.gmra.mxu3 %vm7761_vm7, %v13660_v10 }
0x1394   : > { %13044 = vmatmul.msk.bf16.gmra.mxu2 %vm7761_vm7, %v13661_v49 }
0x139a   : > { %13036 = vmatmul.msk.bf16.gmra.mxu3 %vm7761_vm7, %v13661_v49  ;;  %vm17048_vm7 = vmmov %vm17028_vm0 }
0x13a7   : > { %v9332_v11 = vpop.f32.mrf.mxu2 }
0x13ad   : > { %v9283_v38 = vpop.f32.mrf.mxu3 }
0x13af   : > { %v9334_v56 = vpop.f32.mrf.mxu2 }
0x13b0   : > { %v9373_v23 = vpack.c.bf16 %v9334_v56, %v9332_v11 }
0x13b2   : > { %13085 = vmatmul.msk.bf16.vlgmr.msrb.gmra.mxu1 %vm17046_vm13, %v9373_v23 }
0x13b5   : > { %v9285_v44 = vpop.f32.mrf.mxu3 }
0x13b6   : > { %v9372_v53 = vpack.c.bf16 %v9285_v44, %v9283_v38 }
0x13b7   : > { %v9337_v59 = vpop.f32.mrf.mxu2 }
0x13b8   : > { %9504 = vmatmul.bf16.vlgmr.msra.gmra.mxu0 %v9372_v53 }
0x13bd   : > { %v9288_v61 = vpop.f32.mrf.mxu3 }
0x13bf   : > { %v9339_v48 = vpop.f32.mrf.mxu2 }
0x13c0   : > { %v9375_v58 = vpack.c.bf16 %v9339_v48, %v9337_v59 }
0x13c2   : > { %13086 = vmatmul.msk.bf16.gmra.mxu1 %vm17047_vm9, %v9375_v58 }
0x13c5   : > { %v9290_v36 = vpop.f32.mrf.mxu3 }
0x13c6   : > { %v9374_v7 = vpack.c.bf16 %v9290_v36, %v9288_v61 }
0x13c7   : > { %v9342_v12 = vpop.f32.mrf.mxu2 }
0x13c8   : > { %9509 = vmatmul.bf16.gmra.mxu0 %v9374_v7 }
0x13cd   : > { %v9293_v9 = vpop.f32.mrf.mxu3 }
0x13cf   : > { %v9344_v20 = vpop.f32.mrf.mxu2 }
0x13d0   : > { %v9377_v33 = vpack.c.bf16 %v9344_v20, %v9342_v12 }
0x13d2   : > { %13087 = vmatmul.msk.bf16.gmra.mxu1 %vm17048_vm7, %v9377_v33 }
0x13d5   : > { %v9295_v14 = vpop.f32.mrf.mxu3 }
0x13d6   : > { %v9376_v54 = vpack.c.bf16 %v9295_v14, %v9293_v9 }
0x13d7   : > { %v9347_v46 = vpop.f32.mrf.mxu2 }
0x13d8   : > { %9514 = vmatmul.bf16.gmra.mxu0 %v9376_v54 }
0x13dd   : > { %v9298_v45 = vpop.f32.mrf.mxu3 }
0x13df   : > { %v9349_v16 = vpop.f32.mrf.mxu2 }
0x13e0   : > { %v9379_v19 = vpack.c.bf16 %v9349_v16, %v9347_v46 }
0x13e2   : > { %13088 = vmatmul.msk.bf16.gmra.mxu1 %vm17049_vm4, %v9379_v19 }
0x13e5   : > { %v9300_v42 = vpop.f32.mrf.mxu3 }
0x13e6   : > { %v9378_v55 = vpack.c.bf16 %v9300_v42, %v9298_v45 }
0x13e7   : > { %v9352_v43 = vpop.f32.mrf.mxu2 }
0x13e8   : > { %9519 = vmatmul.bf16.gmra.mxu0 %v9378_v55 }
0x13ed   : > { %v9303_v29 = vpop.f32.mrf.mxu3 }
0x13ef   : > { %v9354_v27 = vpop.f32.mrf.mxu2 }
0x13f0   : > { %v9381_v21 = vpack.c.bf16 %v9354_v27, %v9352_v43 }
0x13f2   : > { %13089 = vmatmul.msk.bf16.gmra.mxu1 %vm17050_vm10, %v9381_v21 }
0x13f5   : > { %v9305_v3 = vpop.f32.mrf.mxu3 }
0x13f6   : > { %v9380_v22 = vpack.c.bf16 %v9305_v3, %v9303_v29 }
0x13f7   : > { %v9357_v41 = vpop.f32.mrf.mxu2 }
0x13f8   : > { %9524 = vmatmul.bf16.gmra.mxu0 %v9380_v22 }
0x13fd   : > { %v9308_v35 = vpop.f32.mrf.mxu3 }
0x13ff   : > { %v9359_v8 = vpop.f32.mrf.mxu2 }
0x1400   : > { %v9383_v24 = vpack.c.bf16 %v9359_v8, %v9357_v41 }
0x1402   : > { %13090 = vmatmul.msk.bf16.gmra.mxu1 %vm17051_vm11, %v9383_v24 }
0x1405   : > { %v9310_v34 = vpop.f32.mrf.mxu3 }
0x1406   : > { %v9382_v60 = vpack.c.bf16 %v9310_v34, %v9308_v35 }
0x1407   : > { %v9362_v17 = vpop.f32.mrf.mxu2 }
0x1408   : > { %9529 = vmatmul.bf16.gmra.mxu0 %v9382_v60 }
0x140d   : > { %v9313_v26 = vpop.f32.mrf.mxu3 }
0x140f   : > { %v9364_v57 = vpop.f32.mrf.mxu2 }
0x1410   : > { %v9385_v50 = vpack.c.bf16 %v9364_v57, %v9362_v17 }
0x1412   : > { %13091 = vmatmul.msk.bf16.gmra.mxu1 %vm17052_vm3, %v9385_v50 }
0x1415   : > { %v9315_v6 = vpop.f32.mrf.mxu3 }
0x1416   : > { %v9384_v2 = vpack.c.bf16 %v9315_v6, %v9313_v26 }
0x1417   : > { %v9367_v30 = vpop.f32.mrf.mxu2 }
0x1418   : > { %9534 = vmatmul.bf16.gmra.mxu0 %v9384_v2 }
0x141d   : > { %v9318_v1 = vpop.f32.mrf.mxu3 }
0x141f   : > { %v9369_v18 = vpop.f32.mrf.mxu2 }
0x1420   : > { %v9387_v63 = vpack.c.bf16 %v9369_v18, %v9367_v30 }
0x1422   : > { %13092 = vmatmul.msk.bf16.gmra.mxu1 %vm17053_vm2, %v9387_v63 }
0x1425   : > { %v9320_v40 = vpop.f32.mrf.mxu3 }
0x1426   : > { %v9386_v15 = vpack.c.bf16 %v9320_v40, %v9318_v1 }
0x1428   : > { %9539 = vmatmul.bf16.gmra.mxu0 %v9386_v15 }
0x142f   : > { %v9554_v62 = vpop.f32.mrf.mxu1 }
0x1435   : > { %v9505_v52 = vpop.f32.mrf.mxu0 }
0x1436   : > { %v9506_v28 = vadd.f32 %v16680_v5, %v9505_v52 }
0x1437   : > { %v9556_v25 = vpop.f32.mrf.mxu1 }
0x1438   : > { %v9555_v39 = vadd.f32 %v9554_v62, %v9506_v28 }
0x143a   : > { %v13093_v37 = vmul.f32 -1.442695, %v9555_v39 }
0x143c   : > { %13956 = vpow2.f32 %v13093_v37 }
0x143d   : > { %v9507_v10 = vpop.f32.mrf.mxu0 }
0x143e   : > { %v9508_v0 = vadd.f32 %v16680_v5, %v9507_v10 }
0x143f   : > { %v9559_v32 = vpop.f32.mrf.mxu1 }
0x1440   : > { %v9557_v47 = vadd.f32 %v9556_v25, %v9508_v0 }
0x1442   : > { %v13957_v13 = vpop.eup %13956  ;;  %v13094_v4 = vmul.f32 -1.442695, %v9557_v47 }
0x1443   : > { %v9642_v49 = vadd.f32 1.0, %v13957_v13 }
0x1444   : > { %13958 = vpow2.f32 %v13094_v4 }
0x1445   : > { %13960 = vrcp.f32 %v9642_v49  ;;  %v9510_v51 = vpop.f32.mrf.mxu0  ;;  %v9669_v36 = vand.u32 2147483648, %v9642_v49  ;;  %v9667_v9 = vand.u32 2147483647, %v9642_v49  ;;  %vm9663_vm15 = vweird.f32 %v9642_v49 }
0x1446   : > { %v9511_v31 = vadd.f32 %v16680_v5, %v9510_v51 }
0x1447   : > { %v9561_v11 = vpop.f32.mrf.mxu1  ;;  %v9670_v45 = vor.u32 1.1754944e-38, %v9669_v36  ;;  %vm9668_vm8 = vcmp.eq.f32.partialorder %v9667_v9, 8.507059e+37 }
0x1448   : > { %v9560_v38 = vadd.f32 %v9559_v32, %v9511_v31 }
0x144a   : > { %v13959_v56 = vpop.eup %13958  ;;  %v13095_v23 = vmul.f32 -1.442695, %v9560_v38 }
0x144b   : > { %v13961_v44 = vpop.eup %13960  ;;  %v9643_v53 = vadd.f32 1.0, %v13959_v56 }
0x144c   : > { %v9659_v59 = vmul.f32 %v13961_v44, %v9642_v49  ;;  %13962 = vpow2.f32 %v13095_v23  ;;  %vm9664_vm5 = vweird.f32 %v13961_v44 }
0x144d   : > { %13964 = vrcp.f32 %v9643_v53  ;;  %v9512_v61 = vpop.f32.mrf.mxu0  ;;  %vm9665_vm12 = vmor %vm9663_vm15, %vm9664_vm5  ;;  %v9684_v21 = vand.u32 2147483648, %v9643_v53  ;;  %v9682_v41 = vand.u32 2147483647, %v9643_v53  ;;  %vm9678_vm0 = vweird.f32 %v9643_v53 }
0x144e   : > { %v9660_v48 = vsub.f32 1.0, %v9659_v59  ;;  %v9513_v58 = vadd.f32 %v16680_v5, %v9512_v61 }
0x144f   : > { %v9564_v7 = vpop.f32.mrf.mxu1  ;;  %v9685_v17 = vor.u32 1.1754944e-38, %v9684_v21  ;;  %vm9683_vm6 = vcmp.eq.f32.partialorder %v9682_v41, 8.507059e+37 }
0x1450   : > { %v9661_v12 = vmul.f32 %v13961_v44, %v9660_v48  ;;  %v9562_v20 = vadd.f32 %v9561_v11, %v9513_v58 }
0x1452   : > { %v13963_v33 = vpop.eup %13962  ;;  %v9662_v14 = vadd.f32 %v13961_v44, %v9661_v12  ;;  %v13096_v54 = vmul.f32 -1.442695, %v9562_v20 }
0x1453   : > { %v13965_v46 = vpop.eup %13964  ;;  %v9644_v16 = vadd.f32 1.0, %v13963_v33 }
0x1454   : > { %v9666_v19 = vsel %vm9665_vm12, %v13961_v44, %v9662_v14  ;;  %v9674_v42 = vmul.f32 %v13965_v46, %v9643_v53  ;;  %13966 = vpow2.f32 %v13096_v54  ;;  %vm9679_vm1 = vweird.f32 %v13965_v46 }
0x1455   : > { %v9671_v55 = vsel %vm9668_vm8, %v9670_v45, %v9666_v19  ;;  %13968 = vrcp.f32 %v9644_v16  ;;  %v9515_v43 = vpop.f32.mrf.mxu0  ;;  %vm9680_vm14 = vmor %vm9678_vm0, %vm9679_vm1  ;;  %v9699_v18 = vand.u32 2147483648, %v9644_v16  ;;  %v9697_v15 = vand.u32 2147483647, %v9644_v16 }
0x1456   : > { %9898 = vst [vmem:[%s16689_s1] sm:$0xff] %v9671_v55  ;;  %v9675_v29 = vsub.f32 1.0, %v9674_v42  ;;  %v9516_v27 = vadd.f32 %v16680_v5, %v9515_v43  ;;  %vm9693_vm9 = vweird.f32 %v9644_v16 }
0x1457   : > { %v9566_v3 = vpop.f32.mrf.mxu1  ;;  %v9700_v37 = vor.u32 1.1754944e-38, %v9699_v18  ;;  %vm9698_vm4 = vcmp.eq.f32.partialorder %v9697_v15, 8.507059e+37 }
0x1458   : > { %v9676_v22 = vmul.f32 %v13965_v46, %v9675_v29  ;;  %v9565_v35 = vadd.f32 %v9564_v7, %v9516_v27 }
0x145a   : > { %v13967_v8 = vpop.eup %13966  ;;  %v9677_v24 = vadd.f32 %v13965_v46, %v9676_v22  ;;  %v13097_v34 = vmul.f32 -1.442695, %v9565_v35 }
0x145b   : > { %v13969_v60 = vpop.eup %13968  ;;  %v9645_v26 = vadd.f32 1.0, %v13967_v8 }
0x145c   : > { %v9681_v57 = vsel %vm9680_vm14, %v13965_v46, %v9677_v24  ;;  %v9689_v50 = vmul.f32 %v13969_v60, %v9644_v16  ;;  %13970 = vpow2.f32 %v13097_v34  ;;  %vm9694_vm13 = vweird.f32 %v13969_v60 }
0x145d   : > { %v9686_v6 = vsel %vm9683_vm6, %v9685_v17, %v9681_v57  ;;  %13972 = vrcp.f32 %v9645_v26  ;;  %v9517_v2 = vpop.f32.mrf.mxu0  ;;  %vm9695_vm7 = vmor %vm9693_vm9, %vm9694_vm13  ;;  %v9714_v51 = vand.u32 2147483648, %v9645_v26  ;;  %v9712_v38 = vand.u32 2147483647, %v9645_v26 }
0x145e   : > { %9899 = vst [vmem:[%s16689_s1 + $0x8] sm:$0xff] %v9686_v6  ;;  %v9690_v30 = vsub.f32 1.0, %v9689_v50  ;;  %v9518_v1 = vadd.f32 %v16680_v5, %v9517_v2  ;;  %vm9708_vm11 = vweird.f32 %v9645_v26 }
0x145f   : > { %v9569_v63 = vpop.f32.mrf.mxu1  ;;  %v9715_v61 = vor.u32 1.1754944e-38, %v9714_v51  ;;  %vm9713_vm2 = vcmp.eq.f32.partialorder %v9712_v38, 8.507059e+37 }
0x1460   : > { %v9691_v40 = vmul.f32 %v13969_v60, %v9690_v30  ;;  %v9567_v62 = vadd.f32 %v9566_v3, %v9518_v1 }
0x1462   : > { %v13971_v52 = vpop.eup %13970  ;;  %v9692_v28 = vadd.f32 %v13969_v60, %v9691_v40  ;;  %v13098_v25 = vmul.f32 -1.442695, %v9567_v62 }
0x1463   : > { %v13973_v39 = vpop.eup %13972  ;;  %v9646_v10 = vadd.f32 1.0, %v13971_v52 }
0x1464   : > { %v9696_v0 = vsel %vm9695_vm7, %v13969_v60, %v9692_v28  ;;  %v9704_v32 = vmul.f32 %v13973_v39, %v9645_v26  ;;  %13974 = vpow2.f32 %v13098_v25  ;;  %vm9709_vm10 = vweird.f32 %v13973_v39 }
0x1465   : > { %v9701_v47 = vsel %vm9698_vm4, %v9700_v37, %v9696_v0  ;;  %13976 = vrcp.f32 %v9646_v10  ;;  %v9520_v13 = vpop.f32.mrf.mxu0  ;;  %vm9710_vm3 = vmor %vm9708_vm11, %vm9709_vm10  ;;  %v9729_v33 = vand.u32 2147483648, %v9646_v10  ;;  %v9727_v46 = vand.u32 2147483647, %v9646_v10 }
0x1466   : > { %9900 = vst [vmem:[%s16689_s1 + $0x10] sm:$0xff] %v9701_v47  ;;  %v9705_v4 = vsub.f32 1.0, %v9704_v32  ;;  %v9521_v49 = vadd.f32 %v16680_v5, %v9520_v13  ;;  %vm9723_vm15 = vweird.f32 %v9646_v10 }
0x1467   : > { %v9571_v31 = vpop.f32.mrf.mxu1  ;;  %v9730_v43 = vor.u32 1.1754944e-38, %v9729_v33  ;;  %vm9728_vm8 = vcmp.eq.f32.partialorder %v9727_v46, 8.507059e+37 }
0x1468   : > { %v9706_v11 = vmul.f32 %v13973_v39, %v9705_v4  ;;  %v9570_v56 = vadd.f32 %v9569_v63, %v9521_v49 }
0x146a   : > { %v13975_v23 = vpop.eup %13974  ;;  %v9707_v44 = vadd.f32 %v13973_v39, %v9706_v11  ;;  %v13099_v53 = vmul.f32 -1.442695, %v9570_v56 }
0x146b   : > { %v13977_v59 = vpop.eup %13976  ;;  %v9647_v48 = vadd.f32 1.0, %v13975_v23 }
0x146c   : > { %v9711_v58 = vsel %vm9710_vm3, %v13973_v39, %v9707_v44  ;;  %v9719_v36 = vmul.f32 %v13977_v59, %v9646_v10  ;;  %13978 = vpow2.f32 %v13099_v53  ;;  %vm9724_vm5 = vweird.f32 %v13977_v59 }
0x146d   : > { %v9716_v7 = vsel %vm9713_vm2, %v9715_v61, %v9711_v58  ;;  %13980 = vrcp.f32 %v9647_v48  ;;  %v9522_v12 = vpop.f32.mrf.mxu0  ;;  %vm9725_vm12 = vmor %vm9723_vm15, %vm9724_vm5  ;;  %v9744_v8 = vand.u32 2147483648, %v9647_v48  ;;  %v9742_v60 = vand.u32 2147483647, %v9647_v48 }
0x146e   : > { %9901 = vst [vmem:[%s16689_s1 + $0x18] sm:$0xff] %v9716_v7  ;;  %v9720_v9 = vsub.f32 1.0, %v9719_v36  ;;  %v9523_v20 = vadd.f32 %v16680_v5, %v9522_v12  ;;  %vm9738_vm0 = vweird.f32 %v9647_v48 }
0x146f   : > { %v9574_v14 = vpop.f32.mrf.mxu1  ;;  %v9745_v2 = vor.u32 1.1754944e-38, %v9744_v8  ;;  %vm9743_vm6 = vcmp.eq.f32.partialorder %v9742_v60, 8.507059e+37 }
0x1470   : > { %v9721_v54 = vmul.f32 %v13977_v59, %v9720_v9  ;;  %v9572_v45 = vadd.f32 %v9571_v31, %v9523_v20 }
0x1472   : > { %v13979_v16 = vpop.eup %13978  ;;  %v9722_v19 = vadd.f32 %v13977_v59, %v9721_v54  ;;  %v13100_v42 = vmul.f32 -1.442695, %v9572_v45 }
0x1473   : > { %v13981_v55 = vpop.eup %13980  ;;  %v9648_v29 = vadd.f32 1.0, %v13979_v16 }
0x1474   : > { %v9726_v27 = vsel %vm9725_vm12, %v13977_v59, %v9722_v19  ;;  %v9734_v21 = vmul.f32 %v13981_v55, %v9647_v48  ;;  %13982 = vpow2.f32 %v13100_v42  ;;  %vm9739_vm1 = vweird.f32 %v13981_v55 }
0x1475   : > { %v9731_v3 = vsel %vm9728_vm8, %v9730_v43, %v9726_v27  ;;  %13984 = vrcp.f32 %v9648_v29  ;;  %v9525_v22 = vpop.f32.mrf.mxu0  ;;  %vm9740_vm14 = vmor %vm9738_vm0, %vm9739_vm1  ;;  %v9759_v52 = vand.u32 2147483648, %v9648_v29  ;;  %v9757_v39 = vand.u32 2147483647, %v9648_v29 }
0x1476   : > { %9902 = vst [vmem:[%s16689_s1 + $0x20] sm:$0xff] %v9731_v3  ;;  %v9735_v41 = vsub.f32 1.0, %v9734_v21  ;;  %v9526_v35 = vadd.f32 %v16680_v5, %v9525_v22  ;;  %vm9753_vm9 = vweird.f32 %v9648_v29 }
0x1477   : > { %v9576_v24 = vpop.f32.mrf.mxu1  ;;  %v9760_v13 = vor.u32 1.1754944e-38, %v9759_v52  ;;  %vm9758_vm4 = vcmp.eq.f32.partialorder %v9757_v39, 8.507059e+37 }
0x1478   : > { %v9736_v34 = vmul.f32 %v13981_v55, %v9735_v41  ;;  %v9575_v17 = vadd.f32 %v9574_v14, %v9526_v35 }
0x147a   : > { %v13983_v26 = vpop.eup %13982  ;;  %v9737_v57 = vadd.f32 %v13981_v55, %v9736_v34  ;;  %v13101_v50 = vmul.f32 -1.442695, %v9575_v17 }
0x147b   : > { %v13985_v6 = vpop.eup %13984  ;;  %v9649_v30 = vadd.f32 1.0, %v13983_v26 }
0x147c   : > { %v9741_v1 = vsel %vm9740_vm14, %v13981_v55, %v9737_v57  ;;  %v9749_v18 = vmul.f32 %v13985_v6, %v9648_v29  ;;  %13986 = vpow2.f32 %v13101_v50  ;;  %vm9754_vm13 = vweird.f32 %v13985_v6 }
0x147d   : > { %v9746_v63 = vsel %vm9743_vm6, %v9745_v2, %v9741_v1  ;;  %13988 = vrcp.f32 %v9649_v30  ;;  %v9527_v40 = vpop.f32.mrf.mxu0  ;;  %vm9755_vm7 = vmor %vm9753_vm9, %vm9754_vm13  ;;  %v9774_v23 = vand.u32 2147483648, %v9649_v30  ;;  %v9772_v59 = vand.u32 2147483647, %v9649_v30 }
0x147e   : > { %9903 = vst [vmem:[%s16689_s1 + $0x28] sm:$0xff] %v9746_v63  ;;  %v9750_v15 = vsub.f32 1.0, %v9749_v18  ;;  %v9528_v62 = vadd.f32 %v16680_v5, %v9527_v40  ;;  %vm9768_vm11 = vweird.f32 %v9649_v30 }
0x147f   : > { %v9579_v28 = vpop.f32.mrf.mxu1  ;;  %v9775_v12 = vor.u32 1.1754944e-38, %v9774_v23  ;;  %vm9773_vm2 = vcmp.eq.f32.partialorder %v9772_v59, 8.507059e+37 }
0x1480   : > { %v9751_v25 = vmul.f32 %v13985_v6, %v9750_v15  ;;  %v9577_v37 = vadd.f32 %v9576_v24, %v9528_v62 }
0x1482   : > { %v13987_v10 = vpop.eup %13986  ;;  %v9752_v0 = vadd.f32 %v13985_v6, %v9751_v25  ;;  %v13102_v32 = vmul.f32 -1.442695, %v9577_v37 }
0x1483   : > { %v13989_v47 = vpop.eup %13988  ;;  %v9650_v4 = vadd.f32 1.0, %v13987_v10 }
0x1484   : > { %v9756_v49 = vsel %vm9755_vm7, %v13985_v6, %v9752_v0  ;;  %v9764_v51 = vmul.f32 %v13989_v47, %v9649_v30  ;;  %13990 = vpow2.f32 %v13102_v32  ;;  %vm9769_vm10 = vweird.f32 %v13989_v47 }
0x1485   : > { %v9761_v31 = vsel %vm9758_vm4, %v9760_v13, %v9756_v49  ;;  %13992 = vrcp.f32 %v9650_v4  ;;  %v9530_v11 = vpop.f32.mrf.mxu0  ;;  %vm9770_vm3 = vmor %vm9768_vm11, %vm9769_vm10  ;;  %v9789_v16 = vand.u32 2147483648, %v9650_v4  ;;  %v9787_v42 = vand.u32 2147483647, %v9650_v4 }
0x1486   : > { %9904 = vst [vmem:[%s16689_s1 + $0x30] sm:$0xff] %v9761_v31  ;;  %v9765_v38 = vsub.f32 1.0, %v9764_v51  ;;  %v9531_v56 = vadd.f32 %v16680_v5, %v9530_v11  ;;  %vm9783_vm15 = vweird.f32 %v9650_v4 }
0x1487   : > { %v9581_v44 = vpop.f32.mrf.mxu1  ;;  %v9790_v22 = vor.u32 1.1754944e-38, %v9789_v16  ;;  %vm9788_vm8 = vcmp.eq.f32.partialorder %v9787_v42, 8.507059e+37 }
0x1488   : > { %v9766_v53 = vmul.f32 %v13989_v47, %v9765_v38  ;;  %v9580_v61 = vadd.f32 %v9579_v28, %v9531_v56 }
0x148a   : > { %v13991_v48 = vpop.eup %13990  ;;  %v9767_v58 = vadd.f32 %v13989_v47, %v9766_v53  ;;  %v13103_v36 = vmul.f32 -1.442695, %v9580_v61 }
0x148b   : > { %v13993_v7 = vpop.eup %13992  ;;  %v9651_v9 = vadd.f32 1.0, %v13991_v48 }
0x148c   : > { %v9771_v20 = vsel %vm9770_vm3, %v13989_v47, %v9767_v58  ;;  %v9779_v33 = vmul.f32 %v13993_v7, %v9650_v4  ;;  %13994 = vpow2.f32 %v13103_v36  ;;  %vm9784_vm5 = vweird.f32 %v13993_v7 }
0x148d   : > { %v9776_v14 = vsel %vm9773_vm2, %v9775_v12, %v9771_v20  ;;  %13996 = vrcp.f32 %v9651_v9  ;;  %v9532_v54 = vpop.f32.mrf.mxu0  ;;  %vm9785_vm12 = vmor %vm9783_vm15, %vm9784_vm5  ;;  %v9804_v26 = vand.u32 2147483648, %v9651_v9  ;;  %v9802_v50 = vand.u32 2147483647, %v9651_v9 }
0x148e   : > { %9905 = vst [vmem:[%s16689_s1 + $0x38] sm:$0xff] %v9776_v14  ;;  %v9780_v46 = vsub.f32 1.0, %v9779_v33  ;;  %v9533_v45 = vadd.f32 %v16680_v5, %v9532_v54  ;;  %vm9798_vm0 = vweird.f32 %v9651_v9 }
0x148f   : > { %v9584_v43 = vpop.f32.mrf.mxu1  ;;  %v9805_v63 = vor.u32 1.1754944e-38, %v9804_v26  ;;  %vm9803_vm6 = vcmp.eq.f32.partialorder %v9802_v50, 8.507059e+37 }
0x1490   : > { %v9781_v19 = vmul.f32 %v13993_v7, %v9780_v46  ;;  %v9582_v55 = vadd.f32 %v9581_v44, %v9533_v45 }
0x1492   : > { %v13995_v29 = vpop.eup %13994  ;;  %v9782_v27 = vadd.f32 %v13993_v7, %v9781_v19  ;;  %v13104_v21 = vmul.f32 -1.442695, %v9582_v55 }
0x1493   : > { %v13997_v3 = vpop.eup %13996  ;;  %v9652_v41 = vadd.f32 1.0, %v13995_v29 }
0x1494   : > { %v9786_v35 = vsel %vm9785_vm12, %v13993_v7, %v9782_v27  ;;  %v9794_v8 = vmul.f32 %v13997_v3, %v9651_v9  ;;  %13998 = vpow2.f32 %v13104_v21  ;;  %vm9799_vm1 = vweird.f32 %v13997_v3 }
0x1495   : > { %v9791_v24 = vsel %vm9788_vm8, %v9790_v22, %v9786_v35  ;;  %14000 = vrcp.f32 %v9652_v41  ;;  %v9535_v34 = vpop.f32.mrf.mxu0  ;;  %vm9800_vm14 = vmor %vm9798_vm0, %vm9799_vm1  ;;  %v9819_v10 = vand.u32 2147483648, %v9652_v41  ;;  %v9817_v32 = vand.u32 2147483647, %v9652_v41 }
0x1496   : > { %9906 = vst [vmem:[%s16689_s1 + $0x40] sm:$0xff] %v9791_v24  ;;  %v9795_v60 = vsub.f32 1.0, %v9794_v8  ;;  %v9536_v17 = vadd.f32 %v16680_v5, %v9535_v34  ;;  %vm9813_vm9 = vweird.f32 %v9652_v41 }
0x1497   : > { %v9586_v15 = vpop.f32.mrf.mxu1  ;;  %v9820_v31 = vor.u32 1.1754944e-38, %v9819_v10  ;;  %vm9818_vm4 = vcmp.eq.f32.partialorder %v9817_v32, 8.507059e+37 }
0x1498   : > { %v9796_v57 = vmul.f32 %v13997_v3, %v9795_v60  ;;  %v9585_v6 = vadd.f32 %v9584_v43, %v9536_v17 }
0x149a   : > { %v13999_v2 = vpop.eup %13998  ;;  %v9797_v30 = vadd.f32 %v13997_v3, %v9796_v57  ;;  %v13105_v1 = vmul.f32 -1.442695, %v9585_v6 }
0x149b   : > { %v14001_v18 = vpop.eup %14000  ;;  %v9653_v40 = vadd.f32 1.0, %v13999_v2 }
0x149c   : > { %v9801_v62 = vsel %vm9800_vm14, %v13997_v3, %v9797_v30  ;;  %v9809_v52 = vmul.f32 %v14001_v18, %v9652_v41  ;;  %14002 = vpow2.f32 %v13105_v1  ;;  %vm9814_vm13 = vweird.f32 %v14001_v18 }
0x149d   : > { %v9806_v28 = vsel %vm9803_vm6, %v9805_v63, %v9801_v62  ;;  %14004 = vrcp.f32 %v9653_v40  ;;  %v9537_v25 = vpop.f32.mrf.mxu0  ;;  %vm9815_vm7 = vmor %vm9813_vm9, %vm9814_vm13  ;;  %v9834_v48 = vand.u32 2147483648, %v9653_v40  ;;  %v9832_v36 = vand.u32 2147483647, %v9653_v40 }
0x149e   : > { %9907 = vst [vmem:[%s16689_s1 + $0x48] sm:$0xff] %v9806_v28  ;;  %v9810_v39 = vsub.f32 1.0, %v9809_v52  ;;  %v9538_v37 = vadd.f32 %v16680_v5, %v9537_v25  ;;  %vm9828_vm11 = vweird.f32 %v9653_v40 }
0x149f   : > { %v9589_v53 = vpop.f32.mrf.mxu1  ;;  %v9835_v14 = vor.u32 1.1754944e-38, %v9834_v48  ;;  %vm9833_vm2 = vcmp.eq.f32.partialorder %v9832_v36, 8.507059e+37 }
0x14a0   : > { %v9811_v0 = vmul.f32 %v14001_v18, %v9810_v39  ;;  %v9587_v47 = vadd.f32 %v9586_v15, %v9538_v37 }
0x14a2   : > { %v14003_v13 = vpop.eup %14002  ;;  %v9812_v4 = vadd.f32 %v14001_v18, %v9811_v0  ;;  %v13106_v49 = vmul.f32 -1.442695, %v9587_v47 }
0x14a3   : > { %v14005_v51 = vpop.eup %14004  ;;  %v9654_v11 = vadd.f32 1.0, %v14003_v13 }
0x14a4   : > { %v9816_v38 = vsel %vm9815_vm7, %v14001_v18, %v9812_v4  ;;  %v9824_v56 = vmul.f32 %v14005_v51, %v9653_v40  ;;  %14006 = vpow2.f32 %v13106_v49  ;;  %vm9829_vm10 = vweird.f32 %v14005_v51 }
0x14a5   : > { %v9821_v23 = vsel %vm9818_vm4, %v9820_v31, %v9816_v38  ;;  %14008 = vrcp.f32 %v9654_v11  ;;  %v9540_v44 = vpop.f32.mrf.mxu0  ;;  %vm9830_vm3 = vmor %vm9828_vm11, %vm9829_vm10  ;;  %v9849_v43 = vand.u32 2147483648, %v9654_v11  ;;  %v9847_v21 = vand.u32 2147483647, %v9654_v11 }
0x14a6   : > { %9908 = vst [vmem:[%s16689_s1 + $0x50] sm:$0xff] %v9821_v23  ;;  %v9825_v59 = vsub.f32 1.0, %v9824_v56  ;;  %v9541_v61 = vadd.f32 %v16680_v5, %v9540_v44  ;;  %vm9843_vm15 = vweird.f32 %v9654_v11 }
0x14a7   : > { %v9591_v29 = vpop.f32.mrf.mxu1  ;;  %v9850_v24 = vor.u32 1.1754944e-38, %v9849_v43  ;;  %vm9848_vm8 = vcmp.eq.f32.partialorder %v9847_v21, 8.507059e+37 }
0x14a8   : > { %v9826_v58 = vmul.f32 %v14005_v51, %v9825_v59  ;;  %v9590_v7 = vadd.f32 %v9589_v53, %v9541_v61 }
0x14aa   : > { %v14007_v12 = vpop.eup %14006  ;;  %v9827_v9 = vadd.f32 %v14005_v51, %v9826_v58  ;;  %v13107_v20 = vmul.f32 -1.442695, %v9590_v7 }
0x14ab   : > { %v14009_v33 = vpop.eup %14008  ;;  %v9655_v54 = vadd.f32 1.0, %v14007_v12 }
0x14ac   : > { %v9831_v46 = vsel %vm9830_vm3, %v14005_v51, %v9827_v9  ;;  %v9839_v45 = vmul.f32 %v14009_v33, %v9654_v11  ;;  %14010 = vpow2.f32 %v13107_v20  ;;  %vm9844_vm5 = vweird.f32 %v14009_v33 }
0x14ad   : > { %v9836_v16 = vsel %vm9833_vm2, %v9835_v14, %v9831_v46  ;;  %14012 = vrcp.f32 %v9655_v54  ;;  %v9542_v19 = vpop.f32.mrf.mxu0  ;;  %vm9845_vm12 = vmor %vm9843_vm15, %vm9844_vm5  ;;  %v9864_v57 = vand.u32 2147483648, %v9655_v54  ;;  %v9862_v6 = vand.u32 2147483647, %v9655_v54 }
0x14ae   : > { %9909 = vst [vmem:[%s16689_s1 + $0x58] sm:$0xff] %v9836_v16  ;;  %v9840_v42 = vsub.f32 1.0, %v9839_v45  ;;  %v9543_v55 = vadd.f32 %v16680_v5, %v9542_v19  ;;  %vm9858_vm0 = vweird.f32 %v9655_v54 }
0x14af   : > { %v9865_v18 = vor.u32 1.1754944e-38, %v9864_v57  ;;  %vm9863_vm6 = vcmp.eq.f32.partialorder %v9862_v6, 8.507059e+37 }
0x14b0   : > { %v9841_v27 = vmul.f32 %v14009_v33, %v9840_v42  ;;  %v9592_v3 = vadd.f32 %v9591_v29, %v9543_v55 }
0x14b2   : > { %v14011_v22 = vpop.eup %14010  ;;  %v9842_v41 = vadd.f32 %v14009_v33, %v9841_v27  ;;  %v13108_v35 = vmul.f32 -1.442695, %v9592_v3 }
0x14b3   : > { %v14013_v8 = vpop.eup %14012  ;;  %v9656_v34 = vadd.f32 1.0, %v14011_v22 }
0x14b4   : > { %v9846_v60 = vsel %vm9845_vm12, %v14009_v33, %v9842_v41  ;;  %v9854_v17 = vmul.f32 %v14013_v8, %v9655_v54  ;;  %14014 = vpow2.f32 %v13108_v35  ;;  %vm9859_vm1 = vweird.f32 %v14013_v8 }
0x14b5   : > { %v9851_v5 = vsel %vm9848_vm8, %v9850_v24, %v9846_v60  ;;  %14016 = vrcp.f32 %v9656_v34  ;;  %vm9860_vm14 = vmor %vm9858_vm0, %vm9859_vm1  ;;  %v9879_v28 = vand.u32 2147483648, %v9656_v34  ;;  %v9877_v39 = vand.u32 2147483647, %v9656_v34 }
0x14b6   : > { %9910 = vst [vmem:[%s16689_s1 + $0x60] sm:$0xff] %v9851_v5  ;;  %v9855_v26 = vsub.f32 1.0, %v9854_v17  ;;  %vm9873_vm9 = vweird.f32 %v9656_v34 }
0x14b7   : > { %v9880_v0 = vor.u32 1.1754944e-38, %v9879_v28  ;;  %vm9878_vm4 = vcmp.eq.f32.partialorder %v9877_v39, 8.507059e+37 }
0x14b8   : > { %v9856_v50 = vmul.f32 %v14013_v8, %v9855_v26 }
0x14ba   : > { %v14015_v2 = vpop.eup %14014  ;;  %v9857_v30 = vadd.f32 %v14013_v8, %v9856_v50 }
0x14bb   : > { %v14017_v1 = vpop.eup %14016  ;;  %v9657_v63 = vadd.f32 1.0, %v14015_v2 }
0x14bc   : > { %v9861_v40 = vsel %vm9860_vm14, %v14013_v8, %v9857_v30  ;;  %v9869_v15 = vmul.f32 %v14017_v1, %v9656_v34  ;;  %vm9874_vm13 = vweird.f32 %v14017_v1 }
0x14bd   : > { %v9866_v62 = vsel %vm9863_vm6, %v9865_v18, %v9861_v40  ;;  %14018 = vrcp.f32 %v9657_v63  ;;  %vm9875_vm7 = vmor %vm9873_vm9, %vm9874_vm13  ;;  %v9894_v49 = vand.u32 2147483648, %v9657_v63  ;;  %v9892_v31 = vand.u32 2147483647, %v9657_v63 }
0x14be   : > { %9911 = vst [vmem:[%s16689_s1 + $0x68] sm:$0xff] %v9866_v62  ;;  %v9870_v52 = vsub.f32 1.0, %v9869_v15  ;;  %vm9888_vm11 = vweird.f32 %v9657_v63 }
0x14bf   : > { %v9895_v38 = vor.u32 1.1754944e-38, %v9894_v49  ;;  %vm9893_vm2 = vcmp.eq.f32.partialorder %v9892_v31, 8.507059e+37 }
0x14c0   : > { %v9871_v25 = vmul.f32 %v14017_v1, %v9870_v52 }
0x14c2   : > { %v9872_v37 = vadd.f32 %v14017_v1, %v9871_v25 }
0x14c3   : > { %v14019_v10 = vpop.eup %14018 }
0x14c4   : > { %v9876_v32 = vsel %vm9875_vm7, %v14017_v1, %v9872_v37  ;;  %v9884_v47 = vmul.f32 %v14019_v10, %v9657_v63  ;;  %vm9889_vm10 = vweird.f32 %v14019_v10 }
0x14c5   : > { %v9881_v13 = vsel %vm9878_vm4, %v9880_v0, %v9876_v32  ;;  %vm9890_vm3 = vmor %vm9888_vm11, %vm9889_vm10 }
0x14c6   : > { %9912 = vst [vmem:[%s16689_s1 + $0x70] sm:$0xff] %v9881_v13  ;;  %v9885_v4 = vsub.f32 1.0, %v9884_v47 }
0x14c8   : > { %v9886_v51 = vmul.f32 %v14019_v10, %v9885_v4 }
0x14ca   : > { %v9887_v11 = vadd.f32 %v14019_v10, %v9886_v51 }
0x14cc   : > { %v9891_v56 = vsel %vm9890_vm3, %v14019_v10, %v9887_v11 }
0x14cd   : > { %v9896_v23 = vsel %vm9893_vm2, %v9895_v38, %v9891_v56 }
0x14ce   : > { %9913 = vst [vmem:[%s16689_s1 + $0x78] sm:$0xff] %v9896_v23 }
0x14cf   : > { %14287 = shalt.err (!%p14284_p3)
}
0x14d0   : > { %s14412_s10 = smov 128   ;;  %s14413_s11 = smov 8  }
0x14d1   : > { %13707 = dma.vmem_to_hbm [thread:$0]  (%p14762_p5), %s9928_s5, 2048, %s9930_s6, %s9915_s0, %s14412_s10, %s14412_s10, %s14413_s11  }
0x14d2 PF: > { %s17059_s28 = sld [smem:[#allocation77_spill]] }
0x14d3   : > { %s17060_s1 = sld [smem:[#allocation74_spill]] }
0x14d8   : > { %p13754_p4 = scmp.ge.s32.totalorder %s17059_s28, 2 }
0x14d9   : > { %s9944_s12 = sand.u32 1, %s17060_s1  }
0x14da   : > { %p13735_p7 = pnand %p13754_p4, %p14766_p6  ;;  %s9945_s13 = scalar_lea.sflag [#allocation4], %s9944_s12 }
0x14dc   : > { %p13736_p8 = pneg %p13735_p7 }
0x14de   : > { %14325 = dma.done.wait (%p13736_p8), %s9945_s13, 2048  }
0x14df   : > { %14327 = vsyncadd (%p13736_p8), %s9945_s13, 4294965248  ;;  %s17062_s7 = sld [smem:[#allocation78_spill]] }
0x14e0   : > { %s17063_s28 = sld [smem:[#allocation75_spill]] }
0x14e1   : > { %s17064_s1 = sld [smem:[#allocation76_spill]] }
0x14e2   : > { %s17065_s9 = sld [smem:[#allocation79_spill]] }
0x14e5   : > { %p136_p11 = scmp.ge.s32.totalorder %s17062_s7, 4  }
0x14e7   :  { %138 = sbr.rel (!%p136_p11) target bundleno = 128 (0x80), region = 436 }
0x14e8   : > { %17066 = sst [smem:[#allocation74_spill]] %s17065_s9 }
0x14ec   :  { %9951 = vsyncpa [#allocation3], 1 }
0x14ed   :  { %9953 = vsyncpa [#allocation3 + $0x1], 1 }
0x14ee   :  { %9954 = vsyncpa [#allocation6], 1 }
0x14ef   :  { %9955 = vsyncpa [#allocation9], 1 }
0x14f0   :  { %9956 = vsyncpa [#allocation12], 1 }
0x14f1   :  { %9957 = vsyncpa [#allocation15], 1 }
0x14f2   :  { %9958 = vsyncpa [#allocation4], 1 }
0x14f3   :  { %9960 = vsyncpa [#allocation4 + $0x1], 1 }

</bundles_post_ra>
